<compile_context>
chip_gen: v5e
topology: v5e:2x2
jax: 0.10.0
libtpu: 0.0.40
codegen_flags: <defaults>
</compile_context>

<pallas_src>
import jax
import jax.numpy as jnp
from jax.experimental import pallas as pl
from jax.experimental.pallas import tpu as pltpu


def _fused_trans_block_kernel(x_ref, w1_ref, w2_ref, s1_ref, b1_ref,
                              s2_ref, b2_ref, mask_ref, o_ref,
                              xf_scr, y1_scr):
    # x_ref   : (1, H, W, C) f32 input block (also used as the residual)
    # w*_ref  : (9, C, C) bf16 conv taps, tap index = 3*dh + dw
    # s*/b*   : (1, C) f32 folded BN scale / bias
    # mask_ref: (Hp*Wp, 1) f32 interior mask in flattened padded coordinates
    # o_ref   : (1, H, W, C) f32 output block
    # xf_scr  : ((H+6)*(W+2), C) f32 flat zero-padded input (+2-row margins)
    # y1_scr  : ((H+6)*(W+2), C) f32 flat stage-1 activation (+ margins)
    _, H, W, C = o_ref.shape
    Hp, Wp = H + 2, W + 2
    L = Hp * Wp            # flattened zero-padded image length
    M = 2 * Wp             # margin (>= Wp+1) so every tap window is in bounds

    x = x_ref[0]           # (H, W, C); stays resident; reused as residual

    # ---- build the zero halo in VMEM (no wrapper-side jnp.pad) -------------
    xf_scr[...] = jnp.zeros(xf_scr.shape, jnp.float32)
    for h in range(H):     # image row h -> padded row h+1, padded col 1
        xf_scr[pl.ds(M + (h + 1) * Wp + 1, W), :] = x[h]

    mask = mask_ref[...]   # (L, 1): 1.0 on interior pixels, 0.0 on the halo

    def conv3x3(src_ref, w_ref):
        # 3x3 conv as 9 shifted (L, C) x (C, C) MXU matmuls, f32 accumulation.
        acc = jnp.zeros((L, C), jnp.float32)
        for dh in range(3):
            for dw in range(3):
                off = (dh - 1) * Wp + (dw - 1)
                a = src_ref[pl.ds(M + off, L), :].astype(jnp.bfloat16)
                acc = acc + jnp.dot(a, w_ref[3 * dh + dw],
                                    preferred_element_type=jnp.float32)
        return acc

    # ---- stage 1: conv1 + bn1 + relu (exact zero halo kept for stage 2) ----
    acc1 = conv3x3(xf_scr, w1_ref)
    y1 = jnp.maximum(acc1 * s1_ref[0] + b1_ref[0], 0.0) * mask

    y1_scr[...] = jnp.zeros(y1_scr.shape, jnp.float32)
    y1_scr[pl.ds(M, L), :] = y1

    # ---- stage 2: conv2 + bn2 + residual + relu -----------------------------
    acc2 = conv3x3(y1_scr, w2_ref)
    y2 = acc2 * s2_ref[0] + b2_ref[0]              # (L, C), padded coordinates
    for h in range(H):                             # extract interior rows
        base = (h + 1) * Wp + 1
        row = y2[base:base + W, :] + x[h]
        o_ref[0, h] = jnp.maximum(row, 0.0).astype(o_ref.dtype)


def trans_basic_block_forward(x_nchw, params):
    """TransBasicBlock forward (stride=1, upsample=None). Input/output NCHW."""
    x = jnp.transpose(x_nchw, (0, 2, 3, 1)).astype(jnp.float32)   # NCHW -> NHWC
    N, H, W, C = x.shape
    Hp, Wp = H + 2, W + 2
    L = Hp * Wp
    eps = 1e-5

    # Fold BN1 / BN2 into per-channel scale & bias (inference BN).
    s1 = params["bn1_gamma"] / jnp.sqrt(params["bn1_var"] + eps)
    b1 = params["bn1_beta"] - params["bn1_mean"] * s1
    s2 = params["bn2_gamma"] / jnp.sqrt(params["bn2_var"] + eps)
    b2 = params["bn2_beta"] - params["bn2_mean"] * s2

    # bf16 MXU operands (f32 accumulation happens in-kernel).
    w1 = params["w1"].reshape(9, C, C).astype(jnp.bfloat16)
    w2 = params["w2"].reshape(9, C, C).astype(jnp.bfloat16)

    # Interior mask in flattened padded coordinates (tiny, computed once).
    r = jnp.arange(L, dtype=jnp.int32) // Wp
    c = jnp.arange(L, dtype=jnp.int32) % Wp
    mask = (((r >= 1) & (r <= H) & (c >= 1) & (c <= W))
            .astype(jnp.float32).reshape(L, 1))

    x_spec = pl.BlockSpec((1, H, W, C), lambda b: (b, 0, 0, 0))
    w_spec = pl.BlockSpec((9, C, C), lambda b: (0, 0, 0))
    sb_spec = pl.BlockSpec((1, C), lambda b: (0, 0))
    mask_spec = pl.BlockSpec((L, 1), lambda b: (0, 0))
    out_spec = pl.BlockSpec((1, H, W, C), lambda b: (b, 0, 0, 0))

    flops = 2 * (2 * N * H * W * 9 * C * C)          # two 3x3 convs
    bytes_accessed = (2 * N * H * W * C * 4          # x read + out write
                      + 2 * 9 * C * C * 2            # bf16 weights
                      + 4 * C * 4 + L * 4)           # BN affines + mask

    out = pl.pallas_call(
        _fused_trans_block_kernel,
        out_shape=jax.ShapeDtypeStruct((N, H, W, C), jnp.float32),
        grid_spec=pltpu.PrefetchScalarGridSpec(
            num_scalar_prefetch=0,
            grid=(N,),
            in_specs=[x_spec, w_spec, w_spec, sb_spec, sb_spec,
                      sb_spec, sb_spec, mask_spec],
            out_specs=out_spec,
            scratch_shapes=[
                pltpu.VMEM(((H + 6) * Wp, C), jnp.float32),
                pltpu.VMEM(((H + 6) * Wp, C), jnp.float32),
            ],
        ),
        compiler_params=pltpu.CompilerParams(
            dimension_semantics=("parallel",),
            vmem_limit_bytes=32 * 1024 * 1024,
        ),
        cost_estimate=pl.CostEstimate(
            flops=flops, transcendentals=0, bytes_accessed=bytes_accessed),
    )(x, w1, w2, s1.reshape(1, C), b1.reshape(1, C),
      s2.reshape(1, C), b2.reshape(1, C), mask)

    return jnp.transpose(out, (0, 3, 1, 2))          # NHWC -> NCHW


def _reference_forward(x_nchw, params):
    """Pure-JAX f32 reference for correctness checking."""
    x = jnp.transpose(x_nchw, (0, 2, 3, 1))
    eps = 1e-5
    s1 = params["bn1_gamma"] / jnp.sqrt(params["bn1_var"] + eps)
    b1 = params["bn1_beta"] - params["bn1_mean"] * s1
    s2 = params["bn2_gamma"] / jnp.sqrt(params["bn2_var"] + eps)
    b2 = params["bn2_beta"] - params["bn2_mean"] * s2

    def conv(a, w):
        return jax.lax.conv_general_dilated(
            a, w, window_strides=(1, 1), padding=((1, 1), (1, 1)),
            dimension_numbers=("NHWC", "HWIO", "NHWC"),
            precision=jax.lax.Precision.HIGHEST)

    y = jnp.maximum(conv(x, params["w1"]) * s1 + b1, 0.0)
    y = conv(y, params["w2"]) * s2 + b2 + x
    return jnp.transpose(jnp.maximum(y, 0.0), (0, 3, 1, 2))


def make_params(key, channels):
    # Conv weights stored as (kh, kw, cin, cout); PyTorch's (cout, cin, kh, kw)
    # would be transposed the same way when importing real weights.
    k1, k2, k3, k4, k5, k6 = jax.random.split(key, 6)
    C = channels
    return {
        "w1": 0.1 * jax.random.normal(k1, (3, 3, C, C), jnp.float32),
        "w2": 0.1 * jax.random.normal(k2, (3, 3, C, C), jnp.float32),
        "bn1_gamma": 1.0 + 0.1 * jax.random.normal(k3, (C,), jnp.float32),
        "bn1_beta": 0.1 * jax.random.normal(k4, (C,), jnp.float32),
        "bn1_mean": jnp.zeros((C,), jnp.float32),
        "bn1_var": jnp.ones((C,), jnp.float32),
        "bn2_gamma": 1.0 + 0.1 * jax.random.normal(k5, (C,), jnp.float32),
        "bn2_beta": 0.1 * jax.random.normal(k6, (C,), jnp.float32),
        "bn2_mean": jnp.zeros((C,), jnp.float32),
        "bn2_var": jnp.ones((C,), jnp.float32),
    }


if __name__ == "__main__":
    # TODO(synk): ConvTranspose2d branch (upsample is not None and stride != 1)
    # is not implemented; only the default stride=1 / identity-residual path is.
    # TODO(synk): at realistic RedNet sizes (C>=128, H,W>=56) add row-band +
    # Cout tiling (with a 2-row halo); one image per grid step suffices here.
    key = jax.random.PRNGKey(0)
    kx, kp = jax.random.split(key)
    N, C, H, W = 2, 4, 16, 16
    x = jax.random.normal(kx, (N, C, H, W), jnp.float32)   # NCHW, like PyTorch
    params = make_params(kp, C)

    out = jax.jit(trans_basic_block_forward)(x, params)
    out = jax.block_until_ready(out)
    assert out.shape == (N, C, H, W)
    assert bool(jnp.all(out >= 0.0))                        # final ReLU

    # Numerical check vs. pure-JAX reference (tolerance covers bf16 operands).
    ref = _reference_forward(x, params)
    max_err = float(jnp.max(jnp.abs(out - ref)))
    assert max_err < 1e-1, f"mismatch vs reference: max_err={max_err}"
    print("KERNEL_OK")
</pallas_src>

<mosaic_0001>
module attributes {stable_mosaic.version = 11 : i64} {
  func.func @_fused_trans_block_kernel(%arg0: i32, %arg1: memref<1x16x16x4xf32, #tpu.memory_space<vmem>>, %arg2: memref<9x4x4xbf16, #tpu.memory_space<vmem>>, %arg3: memref<9x4x4xbf16, #tpu.memory_space<vmem>>, %arg4: memref<1x4xf32, #tpu.memory_space<vmem>>, %arg5: memref<1x4xf32, #tpu.memory_space<vmem>>, %arg6: memref<1x4xf32, #tpu.memory_space<vmem>>, %arg7: memref<1x4xf32, #tpu.memory_space<vmem>>, %arg8: memref<324x1xf32, #tpu.memory_space<vmem>>, %arg9: memref<1x16x16x4xf32, #tpu.memory_space<vmem>>, %arg10: memref<396x4xf32, #tpu.memory_space<vmem>>, %arg11: memref<396x4xf32, #tpu.memory_space<vmem>>) attributes {dimension_semantics = [#tpu.dimension_semantics<parallel>], iteration_bounds = array<i64: 2>, scalar_prefetch = 0 : i64, scratch_operands = 2 : i64, tpu.core_type = #tpu.core_type<tc>, window_params = [{transform_indices = @transform_0, window_bounds = array<i64: 1, 16, 16, 4>}, {pipeline_mode = #tpu.pipeline_mode<synchronous>, transform_indices = @transform_1, window_bounds = array<i64: 9, 4, 4>}, {pipeline_mode = #tpu.pipeline_mode<synchronous>, transform_indices = @transform_2, window_bounds = array<i64: 9, 4, 4>}, {pipeline_mode = #tpu.pipeline_mode<synchronous>, transform_indices = @transform_3, window_bounds = array<i64: 1, 4>}, {pipeline_mode = #tpu.pipeline_mode<synchronous>, transform_indices = @transform_4, window_bounds = array<i64: 1, 4>}, {pipeline_mode = #tpu.pipeline_mode<synchronous>, transform_indices = @transform_5, window_bounds = array<i64: 1, 4>}, {pipeline_mode = #tpu.pipeline_mode<synchronous>, transform_indices = @transform_6, window_bounds = array<i64: 1, 4>}, {pipeline_mode = #tpu.pipeline_mode<synchronous>, transform_indices = @transform_7, window_bounds = array<i64: 324, 1>}, {transform_indices = @transform_8, window_bounds = array<i64: 1, 16, 16, 4>}]} {
    %c0 = arith.constant 0 : index
    %c0_0 = arith.constant 0 : index
    %c0_1 = arith.constant 0 : index
    %c0_2 = arith.constant 0 : index
    %0 = vector.load %arg1[%c0, %c0_0, %c0_1, %c0_2] : memref<1x16x16x4xf32, #tpu.memory_space<vmem>>, vector<1x16x16x4xf32>
    %1 = vector.shape_cast %0 : vector<1x16x16x4xf32> to vector<16x16x4xf32>
    %cst = arith.constant 0.000000e+00 : f32
    %2 = vector.broadcast %cst : f32 to vector<396x4xf32>
    %c0_3 = arith.constant 0 : index
    %c0_4 = arith.constant 0 : index
    %3 = vector.load %arg10[%c0_3, %c0_4] : memref<396x4xf32, #tpu.memory_space<vmem>>, vector<396x4xf32>
    tpu.vector_store %arg10[%c0_3, %c0_4], %2 {strides = array<i32>} : memref<396x4xf32, #tpu.memory_space<vmem>>, vector<396x4xf32>,
    %4 = vector.extract_strided_slice %1 {offsets = [0, 0, 0], sizes = [1, 16, 4], strides = [1, 1, 1]} : vector<16x16x4xf32> to vector<1x16x4xf32>
    %5 = vector.shape_cast %4 : vector<1x16x4xf32> to vector<16x4xf32>
    %c55 = arith.constant 55 : index
    %c0_5 = arith.constant 0 : index
    %6 = vector.load %arg10[%c55, %c0_5] : memref<396x4xf32, #tpu.memory_space<vmem>>, vector<16x4xf32>
    tpu.vector_store %arg10[%c55, %c0_5], %5 {strides = array<i32>} : memref<396x4xf32, #tpu.memory_space<vmem>>, vector<16x4xf32>,
    %7 = vector.extract_strided_slice %1 {offsets = [1, 0, 0], sizes = [1, 16, 4], strides = [1, 1, 1]} : vector<16x16x4xf32> to vector<1x16x4xf32>
    %8 = vector.shape_cast %7 : vector<1x16x4xf32> to vector<16x4xf32>
    %c73 = arith.constant 73 : index
    %c0_6 = arith.constant 0 : index
    %9 = vector.load %arg10[%c73, %c0_6] : memref<396x4xf32, #tpu.memory_space<vmem>>, vector<16x4xf32>
    tpu.vector_store %arg10[%c73, %c0_6], %8 {strides = array<i32>} : memref<396x4xf32, #tpu.memory_space<vmem>>, vector<16x4xf32>,
    %10 = vector.extract_strided_slice %1 {offsets = [2, 0, 0], sizes = [1, 16, 4], strides = [1, 1, 1]} : vector<16x16x4xf32> to vector<1x16x4xf32>
    %11 = vector.shape_cast %10 : vector<1x16x4xf32> to vector<16x4xf32>
    %c91 = arith.constant 91 : index
    %c0_7 = arith.constant 0 : index
    %12 = vector.load %arg10[%c91, %c0_7] : memref<396x4xf32, #tpu.memory_space<vmem>>, vector<16x4xf32>
    tpu.vector_store %arg10[%c91, %c0_7], %11 {strides = array<i32>} : memref<396x4xf32, #tpu.memory_space<vmem>>, vector<16x4xf32>,
    %13 = vector.extract_strided_slice %1 {offsets = [3, 0, 0], sizes = [1, 16, 4], strides = [1, 1, 1]} : vector<16x16x4xf32> to vector<1x16x4xf32>
    %14 = vector.shape_cast %13 : vector<1x16x4xf32> to vector<16x4xf32>
    %c109 = arith.constant 109 : index
    %c0_8 = arith.constant 0 : index
    %15 = vector.load %arg10[%c109, %c0_8] : memref<396x4xf32, #tpu.memory_space<vmem>>, vector<16x4xf32>
    tpu.vector_store %arg10[%c109, %c0_8], %14 {strides = array<i32>} : memref<396x4xf32, #tpu.memory_space<vmem>>, vector<16x4xf32>,
    %16 = vector.extract_strided_slice %1 {offsets = [4, 0, 0], sizes = [1, 16, 4], strides = [1, 1, 1]} : vector<16x16x4xf32> to vector<1x16x4xf32>
    %17 = vector.shape_cast %16 : vector<1x16x4xf32> to vector<16x4xf32>
    %c127 = arith.constant 127 : index
    %c0_9 = arith.constant 0 : index
    %18 = vector.load %arg10[%c127, %c0_9] : memref<396x4xf32, #tpu.memory_space<vmem>>, vector<16x4xf32>
    tpu.vector_store %arg10[%c127, %c0_9], %17 {strides = array<i32>} : memref<396x4xf32, #tpu.memory_space<vmem>>, vector<16x4xf32>,
    %19 = vector.extract_strided_slice %1 {offsets = [5, 0, 0], sizes = [1, 16, 4], strides = [1, 1, 1]} : vector<16x16x4xf32> to vector<1x16x4xf32>
    %20 = vector.shape_cast %19 : vector<1x16x4xf32> to vector<16x4xf32>
    %c145 = arith.constant 145 : index
    %c0_10 = arith.constant 0 : index
    %21 = vector.load %arg10[%c145, %c0_10] : memref<396x4xf32, #tpu.memory_space<vmem>>, vector<16x4xf32>
    tpu.vector_store %arg10[%c145, %c0_10], %20 {strides = array<i32>} : memref<396x4xf32, #tpu.memory_space<vmem>>, vector<16x4xf32>,
    %22 = vector.extract_strided_slice %1 {offsets = [6, 0, 0], sizes = [1, 16, 4], strides = [1, 1, 1]} : vector<16x16x4xf32> to vector<1x16x4xf32>
    %23 = vector.shape_cast %22 : vector<1x16x4xf32> to vector<16x4xf32>
    %c163 = arith.constant 163 : index
    %c0_11 = arith.constant 0 : index
    %24 = vector.load %arg10[%c163, %c0_11] : memref<396x4xf32, #tpu.memory_space<vmem>>, vector<16x4xf32>
    tpu.vector_store %arg10[%c163, %c0_11], %23 {strides = array<i32>} : memref<396x4xf32, #tpu.memory_space<vmem>>, vector<16x4xf32>,
    %25 = vector.extract_strided_slice %1 {offsets = [7, 0, 0], sizes = [1, 16, 4], strides = [1, 1, 1]} : vector<16x16x4xf32> to vector<1x16x4xf32>
    %26 = vector.shape_cast %25 : vector<1x16x4xf32> to vector<16x4xf32>
    %c181 = arith.constant 181 : index
    %c0_12 = arith.constant 0 : index
    %27 = vector.load %arg10[%c181, %c0_12] : memref<396x4xf32, #tpu.memory_space<vmem>>, vector<16x4xf32>
    tpu.vector_store %arg10[%c181, %c0_12], %26 {strides = array<i32>} : memref<396x4xf32, #tpu.memory_space<vmem>>, vector<16x4xf32>,
    %28 = vector.extract_strided_slice %1 {offsets = [8, 0, 0], sizes = [1, 16, 4], strides = [1, 1, 1]} : vector<16x16x4xf32> to vector<1x16x4xf32>
    %29 = vector.shape_cast %28 : vector<1x16x4xf32> to vector<16x4xf32>
    %c199 = arith.constant 199 : index
    %c0_13 = arith.constant 0 : index
    %30 = vector.load %arg10[%c199, %c0_13] : memref<396x4xf32, #tpu.memory_space<vmem>>, vector<16x4xf32>
    tpu.vector_store %arg10[%c199, %c0_13], %29 {strides = array<i32>} : memref<396x4xf32, #tpu.memory_space<vmem>>, vector<16x4xf32>,
    %31 = vector.extract_strided_slice %1 {offsets = [9, 0, 0], sizes = [1, 16, 4], strides = [1, 1, 1]} : vector<16x16x4xf32> to vector<1x16x4xf32>
    %32 = vector.shape_cast %31 : vector<1x16x4xf32> to vector<16x4xf32>
    %c217 = arith.constant 217 : index
    %c0_14 = arith.constant 0 : index
    %33 = vector.load %arg10[%c217, %c0_14] : memref<396x4xf32, #tpu.memory_space<vmem>>, vector<16x4xf32>
    tpu.vector_store %arg10[%c217, %c0_14], %32 {strides = array<i32>} : memref<396x4xf32, #tpu.memory_space<vmem>>, vector<16x4xf32>,
    %34 = vector.extract_strided_slice %1 {offsets = [10, 0, 0], sizes = [1, 16, 4], strides = [1, 1, 1]} : vector<16x16x4xf32> to vector<1x16x4xf32>
    %35 = vector.shape_cast %34 : vector<1x16x4xf32> to vector<16x4xf32>
    %c235 = arith.constant 235 : index
    %c0_15 = arith.constant 0 : index
    %36 = vector.load %arg10[%c235, %c0_15] : memref<396x4xf32, #tpu.memory_space<vmem>>, vector<16x4xf32>
    tpu.vector_store %arg10[%c235, %c0_15], %35 {strides = array<i32>} : memref<396x4xf32, #tpu.memory_space<vmem>>, vector<16x4xf32>,
    %37 = vector.extract_strided_slice %1 {offsets = [11, 0, 0], sizes = [1, 16, 4], strides = [1, 1, 1]} : vector<16x16x4xf32> to vector<1x16x4xf32>
    %38 = vector.shape_cast %37 : vector<1x16x4xf32> to vector<16x4xf32>
    %c253 = arith.constant 253 : index
    %c0_16 = arith.constant 0 : index
    %39 = vector.load %arg10[%c253, %c0_16] : memref<396x4xf32, #tpu.memory_space<vmem>>, vector<16x4xf32>
    tpu.vector_store %arg10[%c253, %c0_16], %38 {strides = array<i32>} : memref<396x4xf32, #tpu.memory_space<vmem>>, vector<16x4xf32>,
    %40 = vector.extract_strided_slice %1 {offsets = [12, 0, 0], sizes = [1, 16, 4], strides = [1, 1, 1]} : vector<16x16x4xf32> to vector<1x16x4xf32>
    %41 = vector.shape_cast %40 : vector<1x16x4xf32> to vector<16x4xf32>
    %c271 = arith.constant 271 : index
    %c0_17 = arith.constant 0 : index
    %42 = vector.load %arg10[%c271, %c0_17] : memref<396x4xf32, #tpu.memory_space<vmem>>, vector<16x4xf32>
    tpu.vector_store %arg10[%c271, %c0_17], %41 {strides = array<i32>} : memref<396x4xf32, #tpu.memory_space<vmem>>, vector<16x4xf32>,
    %43 = vector.extract_strided_slice %1 {offsets = [13, 0, 0], sizes = [1, 16, 4], strides = [1, 1, 1]} : vector<16x16x4xf32> to vector<1x16x4xf32>
    %44 = vector.shape_cast %43 : vector<1x16x4xf32> to vector<16x4xf32>
    %c289 = arith.constant 289 : index
    %c0_18 = arith.constant 0 : index
    %45 = vector.load %arg10[%c289, %c0_18] : memref<396x4xf32, #tpu.memory_space<vmem>>, vector<16x4xf32>
    tpu.vector_store %arg10[%c289, %c0_18], %44 {strides = array<i32>} : memref<396x4xf32, #tpu.memory_space<vmem>>, vector<16x4xf32>,
    %46 = vector.extract_strided_slice %1 {offsets = [14, 0, 0], sizes = [1, 16, 4], strides = [1, 1, 1]} : vector<16x16x4xf32> to vector<1x16x4xf32>
    %47 = vector.shape_cast %46 : vector<1x16x4xf32> to vector<16x4xf32>
    %c307 = arith.constant 307 : index
    %c0_19 = arith.constant 0 : index
    %48 = vector.load %arg10[%c307, %c0_19] : memref<396x4xf32, #tpu.memory_space<vmem>>, vector<16x4xf32>
    tpu.vector_store %arg10[%c307, %c0_19], %47 {strides = array<i32>} : memref<396x4xf32, #tpu.memory_space<vmem>>, vector<16x4xf32>,
    %49 = vector.extract_strided_slice %1 {offsets = [15, 0, 0], sizes = [1, 16, 4], strides = [1, 1, 1]} : vector<16x16x4xf32> to vector<1x16x4xf32>
    %50 = vector.shape_cast %49 : vector<1x16x4xf32> to vector<16x4xf32>
    %c325 = arith.constant 325 : index
    %c0_20 = arith.constant 0 : index
    %51 = vector.load %arg10[%c325, %c0_20] : memref<396x4xf32, #tpu.memory_space<vmem>>, vector<16x4xf32>
    tpu.vector_store %arg10[%c325, %c0_20], %50 {strides = array<i32>} : memref<396x4xf32, #tpu.memory_space<vmem>>, vector<16x4xf32>,
    %c0_21 = arith.constant 0 : index
    %c0_22 = arith.constant 0 : index
    %52 = vector.load %arg8[%c0_21, %c0_22] : memref<324x1xf32, #tpu.memory_space<vmem>>, vector<324x1xf32>
    %cst_23 = arith.constant 0.000000e+00 : f32
    %53 = vector.broadcast %cst_23 : f32 to vector<324x4xf32>
    %c17 = arith.constant 17 : index
    %c0_24 = arith.constant 0 : index
    %54 = vector.load %arg10[%c17, %c0_24] : memref<396x4xf32, #tpu.memory_space<vmem>>, vector<324x4xf32>
    %55 = arith.truncf %54 : vector<324x4xf32> to vector<324x4xbf16>
    %c0_25 = arith.constant 0 : index
    %c0_26 = arith.constant 0 : index
    %c0_27 = arith.constant 0 : index
    %56 = vector.load %arg2[%c0_25, %c0_26, %c0_27] : memref<9x4x4xbf16, #tpu.memory_space<vmem>>, vector<1x4x4xbf16>
    %57 = vector.shape_cast %56 : vector<1x4x4xbf16> to vector<4x4xbf16>
    %cst_28 = arith.constant dense<0.000000e+00> : vector<324x4xf32>
    %58 = tpu.matmul %55, %57, %cst_28 {dimension_numbers = #tpu.dot_dimension_numbers<[1], [0], [0], [1], [0, 0, 1, 1], [], []>} : vector<324x4xbf16>, vector<4x4xbf16>, vector<324x4xf32> -> vector<324x4xf32>
    %59 = arith.addf %53, %58 : vector<324x4xf32>
    %c18 = arith.constant 18 : index
    %c0_29 = arith.constant 0 : index
    %60 = vector.load %arg10[%c18, %c0_29] : memref<396x4xf32, #tpu.memory_space<vmem>>, vector<324x4xf32>
    %61 = arith.truncf %60 : vector<324x4xf32> to vector<324x4xbf16>
    %c1 = arith.constant 1 : index
    %c0_30 = arith.constant 0 : index
    %c0_31 = arith.constant 0 : index
    %62 = vector.load %arg2[%c1, %c0_30, %c0_31] : memref<9x4x4xbf16, #tpu.memory_space<vmem>>, vector<1x4x4xbf16>
    %63 = vector.shape_cast %62 : vector<1x4x4xbf16> to vector<4x4xbf16>
    %cst_32 = arith.constant dense<0.000000e+00> : vector<324x4xf32>
    %64 = tpu.matmul %61, %63, %cst_32 {dimension_numbers = #tpu.dot_dimension_numbers<[1], [0], [0], [1], [0, 0, 1, 1], [], []>} : vector<324x4xbf16>, vector<4x4xbf16>, vector<324x4xf32> -> vector<324x4xf32>
    %65 = arith.addf %59, %64 : vector<324x4xf32>
    %c19 = arith.constant 19 : index
    %c0_33 = arith.constant 0 : index
    %66 = vector.load %arg10[%c19, %c0_33] : memref<396x4xf32, #tpu.memory_space<vmem>>, vector<324x4xf32>
    %67 = arith.truncf %66 : vector<324x4xf32> to vector<324x4xbf16>
    %c2 = arith.constant 2 : index
    %c0_34 = arith.constant 0 : index
    %c0_35 = arith.constant 0 : index
    %68 = vector.load %arg2[%c2, %c0_34, %c0_35] : memref<9x4x4xbf16, #tpu.memory_space<vmem>>, vector<1x4x4xbf16>
    %69 = vector.shape_cast %68 : vector<1x4x4xbf16> to vector<4x4xbf16>
    %cst_36 = arith.constant dense<0.000000e+00> : vector<324x4xf32>
    %70 = tpu.matmul %67, %69, %cst_36 {dimension_numbers = #tpu.dot_dimension_numbers<[1], [0], [0], [1], [0, 0, 1, 1], [], []>} : vector<324x4xbf16>, vector<4x4xbf16>, vector<324x4xf32> -> vector<324x4xf32>
    %71 = arith.addf %65, %70 : vector<324x4xf32>
    %c35 = arith.constant 35 : index
    %c0_37 = arith.constant 0 : index
    %72 = vector.load %arg10[%c35, %c0_37] : memref<396x4xf32, #tpu.memory_space<vmem>>, vector<324x4xf32>
    %73 = arith.truncf %72 : vector<324x4xf32> to vector<324x4xbf16>
    %c3 = arith.constant 3 : index
    %c0_38 = arith.constant 0 : index
    %c0_39 = arith.constant 0 : index
    %74 = vector.load %arg2[%c3, %c0_38, %c0_39] : memref<9x4x4xbf16, #tpu.memory_space<vmem>>, vector<1x4x4xbf16>
    %75 = vector.shape_cast %74 : vector<1x4x4xbf16> to vector<4x4xbf16>
    %cst_40 = arith.constant dense<0.000000e+00> : vector<324x4xf32>
    %76 = tpu.matmul %73, %75, %cst_40 {dimension_numbers = #tpu.dot_dimension_numbers<[1], [0], [0], [1], [0, 0, 1, 1], [], []>} : vector<324x4xbf16>, vector<4x4xbf16>, vector<324x4xf32> -> vector<324x4xf32>
    %77 = arith.addf %71, %76 : vector<324x4xf32>
    %c36 = arith.constant 36 : index
    %c0_41 = arith.constant 0 : index
    %78 = vector.load %arg10[%c36, %c0_41] : memref<396x4xf32, #tpu.memory_space<vmem>>, vector<324x4xf32>
    %79 = arith.truncf %78 : vector<324x4xf32> to vector<324x4xbf16>
    %c4 = arith.constant 4 : index
    %c0_42 = arith.constant 0 : index
    %c0_43 = arith.constant 0 : index
    %80 = vector.load %arg2[%c4, %c0_42, %c0_43] : memref<9x4x4xbf16, #tpu.memory_space<vmem>>, vector<1x4x4xbf16>
    %81 = vector.shape_cast %80 : vector<1x4x4xbf16> to vector<4x4xbf16>
    %cst_44 = arith.constant dense<0.000000e+00> : vector<324x4xf32>
    %82 = tpu.matmul %79, %81, %cst_44 {dimension_numbers = #tpu.dot_dimension_numbers<[1], [0], [0], [1], [0, 0, 1, 1], [], []>} : vector<324x4xbf16>, vector<4x4xbf16>, vector<324x4xf32> -> vector<324x4xf32>
    %83 = arith.addf %77, %82 : vector<324x4xf32>
    %c37 = arith.constant 37 : index
    %c0_45 = arith.constant 0 : index
    %84 = vector.load %arg10[%c37, %c0_45] : memref<396x4xf32, #tpu.memory_space<vmem>>, vector<324x4xf32>
    %85 = arith.truncf %84 : vector<324x4xf32> to vector<324x4xbf16>
    %c5 = arith.constant 5 : index
    %c0_46 = arith.constant 0 : index
    %c0_47 = arith.constant 0 : index
    %86 = vector.load %arg2[%c5, %c0_46, %c0_47] : memref<9x4x4xbf16, #tpu.memory_space<vmem>>, vector<1x4x4xbf16>
    %87 = vector.shape_cast %86 : vector<1x4x4xbf16> to vector<4x4xbf16>
    %cst_48 = arith.constant dense<0.000000e+00> : vector<324x4xf32>
    %88 = tpu.matmul %85, %87, %cst_48 {dimension_numbers = #tpu.dot_dimension_numbers<[1], [0], [0], [1], [0, 0, 1, 1], [], []>} : vector<324x4xbf16>, vector<4x4xbf16>, vector<324x4xf32> -> vector<324x4xf32>
    %89 = arith.addf %83, %88 : vector<324x4xf32>
    %c53 = arith.constant 53 : index
    %c0_49 = arith.constant 0 : index
    %90 = vector.load %arg10[%c53, %c0_49] : memref<396x4xf32, #tpu.memory_space<vmem>>, vector<324x4xf32>
    %91 = arith.truncf %90 : vector<324x4xf32> to vector<324x4xbf16>
    %c6 = arith.constant 6 : index
    %c0_50 = arith.constant 0 : index
    %c0_51 = arith.constant 0 : index
    %92 = vector.load %arg2[%c6, %c0_50, %c0_51] : memref<9x4x4xbf16, #tpu.memory_space<vmem>>, vector<1x4x4xbf16>
    %93 = vector.shape_cast %92 : vector<1x4x4xbf16> to vector<4x4xbf16>
    %cst_52 = arith.constant dense<0.000000e+00> : vector<324x4xf32>
    %94 = tpu.matmul %91, %93, %cst_52 {dimension_numbers = #tpu.dot_dimension_numbers<[1], [0], [0], [1], [0, 0, 1, 1], [], []>} : vector<324x4xbf16>, vector<4x4xbf16>, vector<324x4xf32> -> vector<324x4xf32>
    %95 = arith.addf %89, %94 : vector<324x4xf32>
    %c54 = arith.constant 54 : index
    %c0_53 = arith.constant 0 : index
    %96 = vector.load %arg10[%c54, %c0_53] : memref<396x4xf32, #tpu.memory_space<vmem>>, vector<324x4xf32>
    %97 = arith.truncf %96 : vector<324x4xf32> to vector<324x4xbf16>
    %c7 = arith.constant 7 : index
    %c0_54 = arith.constant 0 : index
    %c0_55 = arith.constant 0 : index
    %98 = vector.load %arg2[%c7, %c0_54, %c0_55] : memref<9x4x4xbf16, #tpu.memory_space<vmem>>, vector<1x4x4xbf16>
    %99 = vector.shape_cast %98 : vector<1x4x4xbf16> to vector<4x4xbf16>
    %cst_56 = arith.constant dense<0.000000e+00> : vector<324x4xf32>
    %100 = tpu.matmul %97, %99, %cst_56 {dimension_numbers = #tpu.dot_dimension_numbers<[1], [0], [0], [1], [0, 0, 1, 1], [], []>} : vector<324x4xbf16>, vector<4x4xbf16>, vector<324x4xf32> -> vector<324x4xf32>
    %101 = arith.addf %95, %100 : vector<324x4xf32>
    %c55_57 = arith.constant 55 : index
    %c0_58 = arith.constant 0 : index
    %102 = vector.load %arg10[%c55_57, %c0_58] : memref<396x4xf32, #tpu.memory_space<vmem>>, vector<324x4xf32>
    %103 = arith.truncf %102 : vector<324x4xf32> to vector<324x4xbf16>
    %c8 = arith.constant 8 : index
    %c0_59 = arith.constant 0 : index
    %c0_60 = arith.constant 0 : index
    %104 = vector.load %arg2[%c8, %c0_59, %c0_60] : memref<9x4x4xbf16, #tpu.memory_space<vmem>>, vector<1x4x4xbf16>
    %105 = vector.shape_cast %104 : vector<1x4x4xbf16> to vector<4x4xbf16>
    %cst_61 = arith.constant dense<0.000000e+00> : vector<324x4xf32>
    %106 = tpu.matmul %103, %105, %cst_61 {dimension_numbers = #tpu.dot_dimension_numbers<[1], [0], [0], [1], [0, 0, 1, 1], [], []>} : vector<324x4xbf16>, vector<4x4xbf16>, vector<324x4xf32> -> vector<324x4xf32>
    %107 = arith.addf %101, %106 : vector<324x4xf32>
    %c0_62 = arith.constant 0 : index
    %c0_63 = arith.constant 0 : index
    %108 = vector.load %arg4[%c0_62, %c0_63] : memref<1x4xf32, #tpu.memory_space<vmem>>, vector<1x4xf32>
    %109 = vector.shape_cast %108 : vector<1x4xf32> to vector<4xf32>
    %110 = vector.shape_cast %109 : vector<4xf32> to vector<1x4xf32>
    %111 = vector.broadcast %110 : vector<1x4xf32> to vector<324x4xf32>
    %112 = arith.mulf %107, %111 : vector<324x4xf32>
    %c0_64 = arith.constant 0 : index
    %c0_65 = arith.constant 0 : index
    %113 = vector.load %arg5[%c0_64, %c0_65] : memref<1x4xf32, #tpu.memory_space<vmem>>, vector<1x4xf32>
    %114 = vector.shape_cast %113 : vector<1x4xf32> to vector<4xf32>
    %115 = vector.shape_cast %114 : vector<4xf32> to vector<1x4xf32>
    %116 = vector.broadcast %115 : vector<1x4xf32> to vector<324x4xf32>
    %117 = arith.addf %112, %116 : vector<324x4xf32>
    %cst_66 = arith.constant 0.000000e+00 : f32
    %118 = vector.broadcast %cst_66 : f32 to vector<324x4xf32>
    %119 = arith.maximumf %117, %118 : vector<324x4xf32>
    %120 = vector.broadcast %52 : vector<324x1xf32> to vector<324x4xf32>
    %121 = arith.mulf %119, %120 : vector<324x4xf32>
    %cst_67 = arith.constant 0.000000e+00 : f32
    %122 = vector.broadcast %cst_67 : f32 to vector<396x4xf32>
    %c0_68 = arith.constant 0 : index
    %c0_69 = arith.constant 0 : index
    %123 = vector.load %arg11[%c0_68, %c0_69] : memref<396x4xf32, #tpu.memory_space<vmem>>, vector<396x4xf32>
    tpu.vector_store %arg11[%c0_68, %c0_69], %122 {strides = array<i32>} : memref<396x4xf32, #tpu.memory_space<vmem>>, vector<396x4xf32>,
    %c36_70 = arith.constant 36 : index
    %c0_71 = arith.constant 0 : index
    %124 = vector.load %arg11[%c36_70, %c0_71] : memref<396x4xf32, #tpu.memory_space<vmem>>, vector<324x4xf32>
    tpu.vector_store %arg11[%c36_70, %c0_71], %121 {strides = array<i32>} : memref<396x4xf32, #tpu.memory_space<vmem>>, vector<324x4xf32>,
    %cst_72 = arith.constant 0.000000e+00 : f32
    %125 = vector.broadcast %cst_72 : f32 to vector<324x4xf32>
    %c17_73 = arith.constant 17 : index
    %c0_74 = arith.constant 0 : index
    %126 = vector.load %arg11[%c17_73, %c0_74] : memref<396x4xf32, #tpu.memory_space<vmem>>, vector<324x4xf32>
    %127 = arith.truncf %126 : vector<324x4xf32> to vector<324x4xbf16>
    %c0_75 = arith.constant 0 : index
    %c0_76 = arith.constant 0 : index
    %c0_77 = arith.constant 0 : index
    %128 = vector.load %arg3[%c0_75, %c0_76, %c0_77] : memref<9x4x4xbf16, #tpu.memory_space<vmem>>, vector<1x4x4xbf16>
    %129 = vector.shape_cast %128 : vector<1x4x4xbf16> to vector<4x4xbf16>
    %cst_78 = arith.constant dense<0.000000e+00> : vector<324x4xf32>
    %130 = tpu.matmul %127, %129, %cst_78 {dimension_numbers = #tpu.dot_dimension_numbers<[1], [0], [0], [1], [0, 0, 1, 1], [], []>} : vector<324x4xbf16>, vector<4x4xbf16>, vector<324x4xf32> -> vector<324x4xf32>
    %131 = arith.addf %125, %130 : vector<324x4xf32>
    %c18_79 = arith.constant 18 : index
    %c0_80 = arith.constant 0 : index
    %132 = vector.load %arg11[%c18_79, %c0_80] : memref<396x4xf32, #tpu.memory_space<vmem>>, vector<324x4xf32>
    %133 = arith.truncf %132 : vector<324x4xf32> to vector<324x4xbf16>
    %c1_81 = arith.constant 1 : index
    %c0_82 = arith.constant 0 : index
    %c0_83 = arith.constant 0 : index
    %134 = vector.load %arg3[%c1_81, %c0_82, %c0_83] : memref<9x4x4xbf16, #tpu.memory_space<vmem>>, vector<1x4x4xbf16>
    %135 = vector.shape_cast %134 : vector<1x4x4xbf16> to vector<4x4xbf16>
    %cst_84 = arith.constant dense<0.000000e+00> : vector<324x4xf32>
    %136 = tpu.matmul %133, %135, %cst_84 {dimension_numbers = #tpu.dot_dimension_numbers<[1], [0], [0], [1], [0, 0, 1, 1], [], []>} : vector<324x4xbf16>, vector<4x4xbf16>, vector<324x4xf32> -> vector<324x4xf32>
    %137 = arith.addf %131, %136 : vector<324x4xf32>
    %c19_85 = arith.constant 19 : index
    %c0_86 = arith.constant 0 : index
    %138 = vector.load %arg11[%c19_85, %c0_86] : memref<396x4xf32, #tpu.memory_space<vmem>>, vector<324x4xf32>
    %139 = arith.truncf %138 : vector<324x4xf32> to vector<324x4xbf16>
    %c2_87 = arith.constant 2 : index
    %c0_88 = arith.constant 0 : index
    %c0_89 = arith.constant 0 : index
    %140 = vector.load %arg3[%c2_87, %c0_88, %c0_89] : memref<9x4x4xbf16, #tpu.memory_space<vmem>>, vector<1x4x4xbf16>
    %141 = vector.shape_cast %140 : vector<1x4x4xbf16> to vector<4x4xbf16>
    %cst_90 = arith.constant dense<0.000000e+00> : vector<324x4xf32>
    %142 = tpu.matmul %139, %141, %cst_90 {dimension_numbers = #tpu.dot_dimension_numbers<[1], [0], [0], [1], [0, 0, 1, 1], [], []>} : vector<324x4xbf16>, vector<4x4xbf16>, vector<324x4xf32> -> vector<324x4xf32>
    %143 = arith.addf %137, %142 : vector<324x4xf32>
    %c35_91 = arith.constant 35 : index
    %c0_92 = arith.constant 0 : index
    %144 = vector.load %arg11[%c35_91, %c0_92] : memref<396x4xf32, #tpu.memory_space<vmem>>, vector<324x4xf32>
    %145 = arith.truncf %144 : vector<324x4xf32> to vector<324x4xbf16>
    %c3_93 = arith.constant 3 : index
    %c0_94 = arith.constant 0 : index
    %c0_95 = arith.constant 0 : index
    %146 = vector.load %arg3[%c3_93, %c0_94, %c0_95] : memref<9x4x4xbf16, #tpu.memory_space<vmem>>, vector<1x4x4xbf16>
    %147 = vector.shape_cast %146 : vector<1x4x4xbf16> to vector<4x4xbf16>
    %cst_96 = arith.constant dense<0.000000e+00> : vector<324x4xf32>
    %148 = tpu.matmul %145, %147, %cst_96 {dimension_numbers = #tpu.dot_dimension_numbers<[1], [0], [0], [1], [0, 0, 1, 1], [], []>} : vector<324x4xbf16>, vector<4x4xbf16>, vector<324x4xf32> -> vector<324x4xf32>
    %149 = arith.addf %143, %148 : vector<324x4xf32>
    %c36_97 = arith.constant 36 : index
    %c0_98 = arith.constant 0 : index
    %150 = vector.load %arg11[%c36_97, %c0_98] : memref<396x4xf32, #tpu.memory_space<vmem>>, vector<324x4xf32>
    %151 = arith.truncf %150 : vector<324x4xf32> to vector<324x4xbf16>
    %c4_99 = arith.constant 4 : index
    %c0_100 = arith.constant 0 : index
    %c0_101 = arith.constant 0 : index
    %152 = vector.load %arg3[%c4_99, %c0_100, %c0_101] : memref<9x4x4xbf16, #tpu.memory_space<vmem>>, vector<1x4x4xbf16>
    %153 = vector.shape_cast %152 : vector<1x4x4xbf16> to vector<4x4xbf16>
    %cst_102 = arith.constant dense<0.000000e+00> : vector<324x4xf32>
    %154 = tpu.matmul %151, %153, %cst_102 {dimension_numbers = #tpu.dot_dimension_numbers<[1], [0], [0], [1], [0, 0, 1, 1], [], []>} : vector<324x4xbf16>, vector<4x4xbf16>, vector<324x4xf32> -> vector<324x4xf32>
    %155 = arith.addf %149, %154 : vector<324x4xf32>
    %c37_103 = arith.constant 37 : index
    %c0_104 = arith.constant 0 : index
    %156 = vector.load %arg11[%c37_103, %c0_104] : memref<396x4xf32, #tpu.memory_space<vmem>>, vector<324x4xf32>
    %157 = arith.truncf %156 : vector<324x4xf32> to vector<324x4xbf16>
    %c5_105 = arith.constant 5 : index
    %c0_106 = arith.constant 0 : index
    %c0_107 = arith.constant 0 : index
    %158 = vector.load %arg3[%c5_105, %c0_106, %c0_107] : memref<9x4x4xbf16, #tpu.memory_space<vmem>>, vector<1x4x4xbf16>
    %159 = vector.shape_cast %158 : vector<1x4x4xbf16> to vector<4x4xbf16>
    %cst_108 = arith.constant dense<0.000000e+00> : vector<324x4xf32>
    %160 = tpu.matmul %157, %159, %cst_108 {dimension_numbers = #tpu.dot_dimension_numbers<[1], [0], [0], [1], [0, 0, 1, 1], [], []>} : vector<324x4xbf16>, vector<4x4xbf16>, vector<324x4xf32> -> vector<324x4xf32>
    %161 = arith.addf %155, %160 : vector<324x4xf32>
    %c53_109 = arith.constant 53 : index
    %c0_110 = arith.constant 0 : index
    %162 = vector.load %arg11[%c53_109, %c0_110] : memref<396x4xf32, #tpu.memory_space<vmem>>, vector<324x4xf32>
    %163 = arith.truncf %162 : vector<324x4xf32> to vector<324x4xbf16>
    %c6_111 = arith.constant 6 : index
    %c0_112 = arith.constant 0 : index
    %c0_113 = arith.constant 0 : index
    %164 = vector.load %arg3[%c6_111, %c0_112, %c0_113] : memref<9x4x4xbf16, #tpu.memory_space<vmem>>, vector<1x4x4xbf16>
    %165 = vector.shape_cast %164 : vector<1x4x4xbf16> to vector<4x4xbf16>
    %cst_114 = arith.constant dense<0.000000e+00> : vector<324x4xf32>
    %166 = tpu.matmul %163, %165, %cst_114 {dimension_numbers = #tpu.dot_dimension_numbers<[1], [0], [0], [1], [0, 0, 1, 1], [], []>} : vector<324x4xbf16>, vector<4x4xbf16>, vector<324x4xf32> -> vector<324x4xf32>
    %167 = arith.addf %161, %166 : vector<324x4xf32>
    %c54_115 = arith.constant 54 : index
    %c0_116 = arith.constant 0 : index
    %168 = vector.load %arg11[%c54_115, %c0_116] : memref<396x4xf32, #tpu.memory_space<vmem>>, vector<324x4xf32>
    %169 = arith.truncf %168 : vector<324x4xf32> to vector<324x4xbf16>
    %c7_117 = arith.constant 7 : index
    %c0_118 = arith.constant 0 : index
    %c0_119 = arith.constant 0 : index
    %170 = vector.load %arg3[%c7_117, %c0_118, %c0_119] : memref<9x4x4xbf16, #tpu.memory_space<vmem>>, vector<1x4x4xbf16>
    %171 = vector.shape_cast %170 : vector<1x4x4xbf16> to vector<4x4xbf16>
    %cst_120 = arith.constant dense<0.000000e+00> : vector<324x4xf32>
    %172 = tpu.matmul %169, %171, %cst_120 {dimension_numbers = #tpu.dot_dimension_numbers<[1], [0], [0], [1], [0, 0, 1, 1], [], []>} : vector<324x4xbf16>, vector<4x4xbf16>, vector<324x4xf32> -> vector<324x4xf32>
    %173 = arith.addf %167, %172 : vector<324x4xf32>
    %c55_121 = arith.constant 55 : index
    %c0_122 = arith.constant 0 : index
    %174 = vector.load %arg11[%c55_121, %c0_122] : memref<396x4xf32, #tpu.memory_space<vmem>>, vector<324x4xf32>
    %175 = arith.truncf %174 : vector<324x4xf32> to vector<324x4xbf16>
    %c8_123 = arith.constant 8 : index
    %c0_124 = arith.constant 0 : index
    %c0_125 = arith.constant 0 : index
    %176 = vector.load %arg3[%c8_123, %c0_124, %c0_125] : memref<9x4x4xbf16, #tpu.memory_space<vmem>>, vector<1x4x4xbf16>
    %177 = vector.shape_cast %176 : vector<1x4x4xbf16> to vector<4x4xbf16>
    %cst_126 = arith.constant dense<0.000000e+00> : vector<324x4xf32>
    %178 = tpu.matmul %175, %177, %cst_126 {dimension_numbers = #tpu.dot_dimension_numbers<[1], [0], [0], [1], [0, 0, 1, 1], [], []>} : vector<324x4xbf16>, vector<4x4xbf16>, vector<324x4xf32> -> vector<324x4xf32>
    %179 = arith.addf %173, %178 : vector<324x4xf32>
    %c0_127 = arith.constant 0 : index
    %c0_128 = arith.constant 0 : index
    %180 = vector.load %arg6[%c0_127, %c0_128] : memref<1x4xf32, #tpu.memory_space<vmem>>, vector<1x4xf32>
    %181 = vector.shape_cast %180 : vector<1x4xf32> to vector<4xf32>
    %182 = vector.shape_cast %181 : vector<4xf32> to vector<1x4xf32>
    %183 = vector.broadcast %182 : vector<1x4xf32> to vector<324x4xf32>
    %184 = arith.mulf %179, %183 : vector<324x4xf32>
    %c0_129 = arith.constant 0 : index
    %c0_130 = arith.constant 0 : index
    %185 = vector.load %arg7[%c0_129, %c0_130] : memref<1x4xf32, #tpu.memory_space<vmem>>, vector<1x4xf32>
    %186 = vector.shape_cast %185 : vector<1x4xf32> to vector<4xf32>
    %187 = vector.shape_cast %186 : vector<4xf32> to vector<1x4xf32>
    %188 = vector.broadcast %187 : vector<1x4xf32> to vector<324x4xf32>
    %189 = arith.addf %184, %188 : vector<324x4xf32>
    %190 = vector.extract_strided_slice %189 {offsets = [19, 0], sizes = [16, 4], strides = [1, 1]} : vector<324x4xf32> to vector<16x4xf32>
    %191 = vector.extract_strided_slice %1 {offsets = [0, 0, 0], sizes = [1, 16, 4], strides = [1, 1, 1]} : vector<16x16x4xf32> to vector<1x16x4xf32>
    %192 = vector.shape_cast %191 : vector<1x16x4xf32> to vector<16x4xf32>
    %193 = arith.addf %190, %192 : vector<16x4xf32>
    %cst_131 = arith.constant 0.000000e+00 : f32
    %194 = vector.broadcast %cst_131 : f32 to vector<16x4xf32>
    %195 = arith.maximumf %193, %194 : vector<16x4xf32>
    %c0_132 = arith.constant 0 : index
    %c0_133 = arith.constant 0 : index
    %c0_134 = arith.constant 0 : index
    %c0_135 = arith.constant 0 : index
    %196 = vector.load %arg9[%c0_132, %c0_133, %c0_134, %c0_135] : memref<1x16x16x4xf32, #tpu.memory_space<vmem>>, vector<1x1x16x4xf32>
    %197 = vector.shape_cast %196 : vector<1x1x16x4xf32> to vector<16x4xf32>
    %198 = vector.shape_cast %195 : vector<16x4xf32> to vector<1x1x16x4xf32>
    tpu.vector_store %arg9[%c0_132, %c0_133, %c0_134, %c0_135], %198 {strides = array<i32>} : memref<1x16x16x4xf32, #tpu.memory_space<vmem>>, vector<1x1x16x4xf32>,
    %199 = vector.extract_strided_slice %189 {offsets = [37, 0], sizes = [16, 4], strides = [1, 1]} : vector<324x4xf32> to vector<16x4xf32>
    %200 = vector.extract_strided_slice %1 {offsets = [1, 0, 0], sizes = [1, 16, 4], strides = [1, 1, 1]} : vector<16x16x4xf32> to vector<1x16x4xf32>
    %201 = vector.shape_cast %200 : vector<1x16x4xf32> to vector<16x4xf32>
    %202 = arith.addf %199, %201 : vector<16x4xf32>
    %cst_136 = arith.constant 0.000000e+00 : f32
    %203 = vector.broadcast %cst_136 : f32 to vector<16x4xf32>
    %204 = arith.maximumf %202, %203 : vector<16x4xf32>
    %c0_137 = arith.constant 0 : index
    %c1_138 = arith.constant 1 : index
    %c0_139 = arith.constant 0 : index
    %c0_140 = arith.constant 0 : index
    %205 = vector.load %arg9[%c0_137, %c1_138, %c0_139, %c0_140] : memref<1x16x16x4xf32, #tpu.memory_space<vmem>>, vector<1x1x16x4xf32>
    %206 = vector.shape_cast %205 : vector<1x1x16x4xf32> to vector<16x4xf32>
    %207 = vector.shape_cast %204 : vector<16x4xf32> to vector<1x1x16x4xf32>
    tpu.vector_store %arg9[%c0_137, %c1_138, %c0_139, %c0_140], %207 {strides = array<i32>} : memref<1x16x16x4xf32, #tpu.memory_space<vmem>>, vector<1x1x16x4xf32>,
    %208 = vector.extract_strided_slice %189 {offsets = [55, 0], sizes = [16, 4], strides = [1, 1]} : vector<324x4xf32> to vector<16x4xf32>
    %209 = vector.extract_strided_slice %1 {offsets = [2, 0, 0], sizes = [1, 16, 4], strides = [1, 1, 1]} : vector<16x16x4xf32> to vector<1x16x4xf32>
    %210 = vector.shape_cast %209 : vector<1x16x4xf32> to vector<16x4xf32>
    %211 = arith.addf %208, %210 : vector<16x4xf32>
    %cst_141 = arith.constant 0.000000e+00 : f32
    %212 = vector.broadcast %cst_141 : f32 to vector<16x4xf32>
    %213 = arith.maximumf %211, %212 : vector<16x4xf32>
    %c0_142 = arith.constant 0 : index
    %c2_143 = arith.constant 2 : index
    %c0_144 = arith.constant 0 : index
    %c0_145 = arith.constant 0 : index
    %214 = vector.load %arg9[%c0_142, %c2_143, %c0_144, %c0_145] : memref<1x16x16x4xf32, #tpu.memory_space<vmem>>, vector<1x1x16x4xf32>
    %215 = vector.shape_cast %214 : vector<1x1x16x4xf32> to vector<16x4xf32>
    %216 = vector.shape_cast %213 : vector<16x4xf32> to vector<1x1x16x4xf32>
    tpu.vector_store %arg9[%c0_142, %c2_143, %c0_144, %c0_145], %216 {strides = array<i32>} : memref<1x16x16x4xf32, #tpu.memory_space<vmem>>, vector<1x1x16x4xf32>,
    %217 = vector.extract_strided_slice %189 {offsets = [73, 0], sizes = [16, 4], strides = [1, 1]} : vector<324x4xf32> to vector<16x4xf32>
    %218 = vector.extract_strided_slice %1 {offsets = [3, 0, 0], sizes = [1, 16, 4], strides = [1, 1, 1]} : vector<16x16x4xf32> to vector<1x16x4xf32>
    %219 = vector.shape_cast %218 : vector<1x16x4xf32> to vector<16x4xf32>
    %220 = arith.addf %217, %219 : vector<16x4xf32>
    %cst_146 = arith.constant 0.000000e+00 : f32
    %221 = vector.broadcast %cst_146 : f32 to vector<16x4xf32>
    %222 = arith.maximumf %220, %221 : vector<16x4xf32>
    %c0_147 = arith.constant 0 : index
    %c3_148 = arith.constant 3 : index
    %c0_149 = arith.constant 0 : index
    %c0_150 = arith.constant 0 : index
    %223 = vector.load %arg9[%c0_147, %c3_148, %c0_149, %c0_150] : memref<1x16x16x4xf32, #tpu.memory_space<vmem>>, vector<1x1x16x4xf32>
    %224 = vector.shape_cast %223 : vector<1x1x16x4xf32> to vector<16x4xf32>
    %225 = vector.shape_cast %222 : vector<16x4xf32> to vector<1x1x16x4xf32>
    tpu.vector_store %arg9[%c0_147, %c3_148, %c0_149, %c0_150], %225 {strides = array<i32>} : memref<1x16x16x4xf32, #tpu.memory_space<vmem>>, vector<1x1x16x4xf32>,
    %226 = vector.extract_strided_slice %189 {offsets = [91, 0], sizes = [16, 4], strides = [1, 1]} : vector<324x4xf32> to vector<16x4xf32>
    %227 = vector.extract_strided_slice %1 {offsets = [4, 0, 0], sizes = [1, 16, 4], strides = [1, 1, 1]} : vector<16x16x4xf32> to vector<1x16x4xf32>
    %228 = vector.shape_cast %227 : vector<1x16x4xf32> to vector<16x4xf32>
    %229 = arith.addf %226, %228 : vector<16x4xf32>
    %cst_151 = arith.constant 0.000000e+00 : f32
    %230 = vector.broadcast %cst_151 : f32 to vector<16x4xf32>
    %231 = arith.maximumf %229, %230 : vector<16x4xf32>
    %c0_152 = arith.constant 0 : index
    %c4_153 = arith.constant 4 : index
    %c0_154 = arith.constant 0 : index
    %c0_155 = arith.constant 0 : index
    %232 = vector.load %arg9[%c0_152, %c4_153, %c0_154, %c0_155] : memref<1x16x16x4xf32, #tpu.memory_space<vmem>>, vector<1x1x16x4xf32>
    %233 = vector.shape_cast %232 : vector<1x1x16x4xf32> to vector<16x4xf32>
    %234 = vector.shape_cast %231 : vector<16x4xf32> to vector<1x1x16x4xf32>
    tpu.vector_store %arg9[%c0_152, %c4_153, %c0_154, %c0_155], %234 {strides = array<i32>} : memref<1x16x16x4xf32, #tpu.memory_space<vmem>>, vector<1x1x16x4xf32>,
    %235 = vector.extract_strided_slice %189 {offsets = [109, 0], sizes = [16, 4], strides = [1, 1]} : vector<324x4xf32> to vector<16x4xf32>
    %236 = vector.extract_strided_slice %1 {offsets = [5, 0, 0], sizes = [1, 16, 4], strides = [1, 1, 1]} : vector<16x16x4xf32> to vector<1x16x4xf32>
    %237 = vector.shape_cast %236 : vector<1x16x4xf32> to vector<16x4xf32>
    %238 = arith.addf %235, %237 : vector<16x4xf32>
    %cst_156 = arith.constant 0.000000e+00 : f32
    %239 = vector.broadcast %cst_156 : f32 to vector<16x4xf32>
    %240 = arith.maximumf %238, %239 : vector<16x4xf32>
    %c0_157 = arith.constant 0 : index
    %c5_158 = arith.constant 5 : index
    %c0_159 = arith.constant 0 : index
    %c0_160 = arith.constant 0 : index
    %241 = vector.load %arg9[%c0_157, %c5_158, %c0_159, %c0_160] : memref<1x16x16x4xf32, #tpu.memory_space<vmem>>, vector<1x1x16x4xf32>
    %242 = vector.shape_cast %241 : vector<1x1x16x4xf32> to vector<16x4xf32>
    %243 = vector.shape_cast %240 : vector<16x4xf32> to vector<1x1x16x4xf32>
    tpu.vector_store %arg9[%c0_157, %c5_158, %c0_159, %c0_160], %243 {strides = array<i32>} : memref<1x16x16x4xf32, #tpu.memory_space<vmem>>, vector<1x1x16x4xf32>,
    %244 = vector.extract_strided_slice %189 {offsets = [127, 0], sizes = [16, 4], strides = [1, 1]} : vector<324x4xf32> to vector<16x4xf32>
    %245 = vector.extract_strided_slice %1 {offsets = [6, 0, 0], sizes = [1, 16, 4], strides = [1, 1, 1]} : vector<16x16x4xf32> to vector<1x16x4xf32>
    %246 = vector.shape_cast %245 : vector<1x16x4xf32> to vector<16x4xf32>
    %247 = arith.addf %244, %246 : vector<16x4xf32>
    %cst_161 = arith.constant 0.000000e+00 : f32
    %248 = vector.broadcast %cst_161 : f32 to vector<16x4xf32>
    %249 = arith.maximumf %247, %248 : vector<16x4xf32>
    %c0_162 = arith.constant 0 : index
    %c6_163 = arith.constant 6 : index
    %c0_164 = arith.constant 0 : index
    %c0_165 = arith.constant 0 : index
    %250 = vector.load %arg9[%c0_162, %c6_163, %c0_164, %c0_165] : memref<1x16x16x4xf32, #tpu.memory_space<vmem>>, vector<1x1x16x4xf32>
    %251 = vector.shape_cast %250 : vector<1x1x16x4xf32> to vector<16x4xf32>
    %252 = vector.shape_cast %249 : vector<16x4xf32> to vector<1x1x16x4xf32>
    tpu.vector_store %arg9[%c0_162, %c6_163, %c0_164, %c0_165], %252 {strides = array<i32>} : memref<1x16x16x4xf32, #tpu.memory_space<vmem>>, vector<1x1x16x4xf32>,
    %253 = vector.extract_strided_slice %189 {offsets = [145, 0], sizes = [16, 4], strides = [1, 1]} : vector<324x4xf32> to vector<16x4xf32>
    %254 = vector.extract_strided_slice %1 {offsets = [7, 0, 0], sizes = [1, 16, 4], strides = [1, 1, 1]} : vector<16x16x4xf32> to vector<1x16x4xf32>
    %255 = vector.shape_cast %254 : vector<1x16x4xf32> to vector<16x4xf32>
    %256 = arith.addf %253, %255 : vector<16x4xf32>
    %cst_166 = arith.constant 0.000000e+00 : f32
    %257 = vector.broadcast %cst_166 : f32 to vector<16x4xf32>
    %258 = arith.maximumf %256, %257 : vector<16x4xf32>
    %c0_167 = arith.constant 0 : index
    %c7_168 = arith.constant 7 : index
    %c0_169 = arith.constant 0 : index
    %c0_170 = arith.constant 0 : index
    %259 = vector.load %arg9[%c0_167, %c7_168, %c0_169, %c0_170] : memref<1x16x16x4xf32, #tpu.memory_space<vmem>>, vector<1x1x16x4xf32>
    %260 = vector.shape_cast %259 : vector<1x1x16x4xf32> to vector<16x4xf32>
    %261 = vector.shape_cast %258 : vector<16x4xf32> to vector<1x1x16x4xf32>
    tpu.vector_store %arg9[%c0_167, %c7_168, %c0_169, %c0_170], %261 {strides = array<i32>} : memref<1x16x16x4xf32, #tpu.memory_space<vmem>>, vector<1x1x16x4xf32>,
    %262 = vector.extract_strided_slice %189 {offsets = [163, 0], sizes = [16, 4], strides = [1, 1]} : vector<324x4xf32> to vector<16x4xf32>
    %263 = vector.extract_strided_slice %1 {offsets = [8, 0, 0], sizes = [1, 16, 4], strides = [1, 1, 1]} : vector<16x16x4xf32> to vector<1x16x4xf32>
    %264 = vector.shape_cast %263 : vector<1x16x4xf32> to vector<16x4xf32>
    %265 = arith.addf %262, %264 : vector<16x4xf32>
    %cst_171 = arith.constant 0.000000e+00 : f32
    %266 = vector.broadcast %cst_171 : f32 to vector<16x4xf32>
    %267 = arith.maximumf %265, %266 : vector<16x4xf32>
    %c0_172 = arith.constant 0 : index
    %c8_173 = arith.constant 8 : index
    %c0_174 = arith.constant 0 : index
    %c0_175 = arith.constant 0 : index
    %268 = vector.load %arg9[%c0_172, %c8_173, %c0_174, %c0_175] : memref<1x16x16x4xf32, #tpu.memory_space<vmem>>, vector<1x1x16x4xf32>
    %269 = vector.shape_cast %268 : vector<1x1x16x4xf32> to vector<16x4xf32>
    %270 = vector.shape_cast %267 : vector<16x4xf32> to vector<1x1x16x4xf32>
    tpu.vector_store %arg9[%c0_172, %c8_173, %c0_174, %c0_175], %270 {strides = array<i32>} : memref<1x16x16x4xf32, #tpu.memory_space<vmem>>, vector<1x1x16x4xf32>,
    %271 = vector.extract_strided_slice %189 {offsets = [181, 0], sizes = [16, 4], strides = [1, 1]} : vector<324x4xf32> to vector<16x4xf32>
    %272 = vector.extract_strided_slice %1 {offsets = [9, 0, 0], sizes = [1, 16, 4], strides = [1, 1, 1]} : vector<16x16x4xf32> to vector<1x16x4xf32>
    %273 = vector.shape_cast %272 : vector<1x16x4xf32> to vector<16x4xf32>
    %274 = arith.addf %271, %273 : vector<16x4xf32>
    %cst_176 = arith.constant 0.000000e+00 : f32
    %275 = vector.broadcast %cst_176 : f32 to vector<16x4xf32>
    %276 = arith.maximumf %274, %275 : vector<16x4xf32>
    %c0_177 = arith.constant 0 : index
    %c9 = arith.constant 9 : index
    %c0_178 = arith.constant 0 : index
    %c0_179 = arith.constant 0 : index
    %277 = vector.load %arg9[%c0_177, %c9, %c0_178, %c0_179] : memref<1x16x16x4xf32, #tpu.memory_space<vmem>>, vector<1x1x16x4xf32>
    %278 = vector.shape_cast %277 : vector<1x1x16x4xf32> to vector<16x4xf32>
    %279 = vector.shape_cast %276 : vector<16x4xf32> to vector<1x1x16x4xf32>
    tpu.vector_store %arg9[%c0_177, %c9, %c0_178, %c0_179], %279 {strides = array<i32>} : memref<1x16x16x4xf32, #tpu.memory_space<vmem>>, vector<1x1x16x4xf32>,
    %280 = vector.extract_strided_slice %189 {offsets = [199, 0], sizes = [16, 4], strides = [1, 1]} : vector<324x4xf32> to vector<16x4xf32>
    %281 = vector.extract_strided_slice %1 {offsets = [10, 0, 0], sizes = [1, 16, 4], strides = [1, 1, 1]} : vector<16x16x4xf32> to vector<1x16x4xf32>
    %282 = vector.shape_cast %281 : vector<1x16x4xf32> to vector<16x4xf32>
    %283 = arith.addf %280, %282 : vector<16x4xf32>
    %cst_180 = arith.constant 0.000000e+00 : f32
    %284 = vector.broadcast %cst_180 : f32 to vector<16x4xf32>
    %285 = arith.maximumf %283, %284 : vector<16x4xf32>
    %c0_181 = arith.constant 0 : index
    %c10 = arith.constant 10 : index
    %c0_182 = arith.constant 0 : index
    %c0_183 = arith.constant 0 : index
    %286 = vector.load %arg9[%c0_181, %c10, %c0_182, %c0_183] : memref<1x16x16x4xf32, #tpu.memory_space<vmem>>, vector<1x1x16x4xf32>
    %287 = vector.shape_cast %286 : vector<1x1x16x4xf32> to vector<16x4xf32>
    %288 = vector.shape_cast %285 : vector<16x4xf32> to vector<1x1x16x4xf32>
    tpu.vector_store %arg9[%c0_181, %c10, %c0_182, %c0_183], %288 {strides = array<i32>} : memref<1x16x16x4xf32, #tpu.memory_space<vmem>>, vector<1x1x16x4xf32>,
    %289 = vector.extract_strided_slice %189 {offsets = [217, 0], sizes = [16, 4], strides = [1, 1]} : vector<324x4xf32> to vector<16x4xf32>
    %290 = vector.extract_strided_slice %1 {offsets = [11, 0, 0], sizes = [1, 16, 4], strides = [1, 1, 1]} : vector<16x16x4xf32> to vector<1x16x4xf32>
    %291 = vector.shape_cast %290 : vector<1x16x4xf32> to vector<16x4xf32>
    %292 = arith.addf %289, %291 : vector<16x4xf32>
    %cst_184 = arith.constant 0.000000e+00 : f32
    %293 = vector.broadcast %cst_184 : f32 to vector<16x4xf32>
    %294 = arith.maximumf %292, %293 : vector<16x4xf32>
    %c0_185 = arith.constant 0 : index
    %c11 = arith.constant 11 : index
    %c0_186 = arith.constant 0 : index
    %c0_187 = arith.constant 0 : index
    %295 = vector.load %arg9[%c0_185, %c11, %c0_186, %c0_187] : memref<1x16x16x4xf32, #tpu.memory_space<vmem>>, vector<1x1x16x4xf32>
    %296 = vector.shape_cast %295 : vector<1x1x16x4xf32> to vector<16x4xf32>
    %297 = vector.shape_cast %294 : vector<16x4xf32> to vector<1x1x16x4xf32>
    tpu.vector_store %arg9[%c0_185, %c11, %c0_186, %c0_187], %297 {strides = array<i32>} : memref<1x16x16x4xf32, #tpu.memory_space<vmem>>, vector<1x1x16x4xf32>,
    %298 = vector.extract_strided_slice %189 {offsets = [235, 0], sizes = [16, 4], strides = [1, 1]} : vector<324x4xf32> to vector<16x4xf32>
    %299 = vector.extract_strided_slice %1 {offsets = [12, 0, 0], sizes = [1, 16, 4], strides = [1, 1, 1]} : vector<16x16x4xf32> to vector<1x16x4xf32>
    %300 = vector.shape_cast %299 : vector<1x16x4xf32> to vector<16x4xf32>
    %301 = arith.addf %298, %300 : vector<16x4xf32>
    %cst_188 = arith.constant 0.000000e+00 : f32
    %302 = vector.broadcast %cst_188 : f32 to vector<16x4xf32>
    %303 = arith.maximumf %301, %302 : vector<16x4xf32>
    %c0_189 = arith.constant 0 : index
    %c12 = arith.constant 12 : index
    %c0_190 = arith.constant 0 : index
    %c0_191 = arith.constant 0 : index
    %304 = vector.load %arg9[%c0_189, %c12, %c0_190, %c0_191] : memref<1x16x16x4xf32, #tpu.memory_space<vmem>>, vector<1x1x16x4xf32>
    %305 = vector.shape_cast %304 : vector<1x1x16x4xf32> to vector<16x4xf32>
    %306 = vector.shape_cast %303 : vector<16x4xf32> to vector<1x1x16x4xf32>
    tpu.vector_store %arg9[%c0_189, %c12, %c0_190, %c0_191], %306 {strides = array<i32>} : memref<1x16x16x4xf32, #tpu.memory_space<vmem>>, vector<1x1x16x4xf32>,
    %307 = vector.extract_strided_slice %189 {offsets = [253, 0], sizes = [16, 4], strides = [1, 1]} : vector<324x4xf32> to vector<16x4xf32>
    %308 = vector.extract_strided_slice %1 {offsets = [13, 0, 0], sizes = [1, 16, 4], strides = [1, 1, 1]} : vector<16x16x4xf32> to vector<1x16x4xf32>
    %309 = vector.shape_cast %308 : vector<1x16x4xf32> to vector<16x4xf32>
    %310 = arith.addf %307, %309 : vector<16x4xf32>
    %cst_192 = arith.constant 0.000000e+00 : f32
    %311 = vector.broadcast %cst_192 : f32 to vector<16x4xf32>
    %312 = arith.maximumf %310, %311 : vector<16x4xf32>
    %c0_193 = arith.constant 0 : index
    %c13 = arith.constant 13 : index
    %c0_194 = arith.constant 0 : index
    %c0_195 = arith.constant 0 : index
    %313 = vector.load %arg9[%c0_193, %c13, %c0_194, %c0_195] : memref<1x16x16x4xf32, #tpu.memory_space<vmem>>, vector<1x1x16x4xf32>
    %314 = vector.shape_cast %313 : vector<1x1x16x4xf32> to vector<16x4xf32>
    %315 = vector.shape_cast %312 : vector<16x4xf32> to vector<1x1x16x4xf32>
    tpu.vector_store %arg9[%c0_193, %c13, %c0_194, %c0_195], %315 {strides = array<i32>} : memref<1x16x16x4xf32, #tpu.memory_space<vmem>>, vector<1x1x16x4xf32>,
    %316 = vector.extract_strided_slice %189 {offsets = [271, 0], sizes = [16, 4], strides = [1, 1]} : vector<324x4xf32> to vector<16x4xf32>
    %317 = vector.extract_strided_slice %1 {offsets = [14, 0, 0], sizes = [1, 16, 4], strides = [1, 1, 1]} : vector<16x16x4xf32> to vector<1x16x4xf32>
    %318 = vector.shape_cast %317 : vector<1x16x4xf32> to vector<16x4xf32>
    %319 = arith.addf %316, %318 : vector<16x4xf32>
    %cst_196 = arith.constant 0.000000e+00 : f32
    %320 = vector.broadcast %cst_196 : f32 to vector<16x4xf32>
    %321 = arith.maximumf %319, %320 : vector<16x4xf32>
    %c0_197 = arith.constant 0 : index
    %c14 = arith.constant 14 : index
    %c0_198 = arith.constant 0 : index
    %c0_199 = arith.constant 0 : index
    %322 = vector.load %arg9[%c0_197, %c14, %c0_198, %c0_199] : memref<1x16x16x4xf32, #tpu.memory_space<vmem>>, vector<1x1x16x4xf32>
    %323 = vector.shape_cast %322 : vector<1x1x16x4xf32> to vector<16x4xf32>
    %324 = vector.shape_cast %321 : vector<16x4xf32> to vector<1x1x16x4xf32>
    tpu.vector_store %arg9[%c0_197, %c14, %c0_198, %c0_199], %324 {strides = array<i32>} : memref<1x16x16x4xf32, #tpu.memory_space<vmem>>, vector<1x1x16x4xf32>,
    %325 = vector.extract_strided_slice %189 {offsets = [289, 0], sizes = [16, 4], strides = [1, 1]} : vector<324x4xf32> to vector<16x4xf32>
    %326 = vector.extract_strided_slice %1 {offsets = [15, 0, 0], sizes = [1, 16, 4], strides = [1, 1, 1]} : vector<16x16x4xf32> to vector<1x16x4xf32>
    %327 = vector.shape_cast %326 : vector<1x16x4xf32> to vector<16x4xf32>
    %328 = arith.addf %325, %327 : vector<16x4xf32>
    %cst_200 = arith.constant 0.000000e+00 : f32
    %329 = vector.broadcast %cst_200 : f32 to vector<16x4xf32>
    %330 = arith.maximumf %328, %329 : vector<16x4xf32>
    %c0_201 = arith.constant 0 : index
    %c15 = arith.constant 15 : index
    %c0_202 = arith.constant 0 : index
    %c0_203 = arith.constant 0 : index
    %331 = vector.load %arg9[%c0_201, %c15, %c0_202, %c0_203] : memref<1x16x16x4xf32, #tpu.memory_space<vmem>>, vector<1x1x16x4xf32>
    %332 = vector.shape_cast %331 : vector<1x1x16x4xf32> to vector<16x4xf32>
    %333 = vector.shape_cast %330 : vector<16x4xf32> to vector<1x1x16x4xf32>
    tpu.vector_store %arg9[%c0_201, %c15, %c0_202, %c0_203], %333 {strides = array<i32>} : memref<1x16x16x4xf32, #tpu.memory_space<vmem>>, vector<1x1x16x4xf32>,
    return
  }
  func.func @transform_0(%arg0: i32) -> (i32, i32, i32, i32) {
    %c0_i32 = arith.constant 0 : i32
    %c0_i32_0 = arith.constant 0 : i32
    %c0_i32_1 = arith.constant 0 : i32
    %c0_i32_2 = arith.constant 0 : i32
    return %arg0, %c0_i32, %c0_i32_0, %c0_i32_1 : i32, i32, i32, i32
  }
  func.func @transform_1(%arg0: i32) -> (i32, i32, i32) {
    %c0_i32 = arith.constant 0 : i32
    %c0_i32_0 = arith.constant 0 : i32
    %c0_i32_1 = arith.constant 0 : i32
    %c0_i32_2 = arith.constant 0 : i32
    return %c0_i32, %c0_i32_0, %c0_i32_1 : i32, i32, i32
  }
  func.func @transform_2(%arg0: i32) -> (i32, i32, i32) {
    %c0_i32 = arith.constant 0 : i32
    %c0_i32_0 = arith.constant 0 : i32
    %c0_i32_1 = arith.constant 0 : i32
    %c0_i32_2 = arith.constant 0 : i32
    return %c0_i32, %c0_i32_0, %c0_i32_1 : i32, i32, i32
  }
  func.func @transform_3(%arg0: i32) -> (i32, i32) {
    %c0_i32 = arith.constant 0 : i32
    %c0_i32_0 = arith.constant 0 : i32
    %c0_i32_1 = arith.constant 0 : i32
    return %c0_i32, %c0_i32_0 : i32, i32
  }
  func.func @transform_4(%arg0: i32) -> (i32, i32) {
    %c0_i32 = arith.constant 0 : i32
    %c0_i32_0 = arith.constant 0 : i32
    %c0_i32_1 = arith.constant 0 : i32
    return %c0_i32, %c0_i32_0 : i32, i32
  }
  func.func @transform_5(%arg0: i32) -> (i32, i32) {
    %c0_i32 = arith.constant 0 : i32
    %c0_i32_0 = arith.constant 0 : i32
    %c0_i32_1 = arith.constant 0 : i32
    return %c0_i32, %c0_i32_0 : i32, i32
  }
  func.func @transform_6(%arg0: i32) -> (i32, i32) {
    %c0_i32 = arith.constant 0 : i32
    %c0_i32_0 = arith.constant 0 : i32
    %c0_i32_1 = arith.constant 0 : i32
    return %c0_i32, %c0_i32_0 : i32, i32
  }
  func.func @transform_7(%arg0: i32) -> (i32, i32) {
    %c0_i32 = arith.constant 0 : i32
    %c0_i32_0 = arith.constant 0 : i32
    %c0_i32_1 = arith.constant 0 : i32
    return %c0_i32, %c0_i32_0 : i32, i32
  }
  func.func @transform_8(%arg0: i32) -> (i32, i32, i32, i32) {
    %c0_i32 = arith.constant 0 : i32
    %c0_i32_0 = arith.constant 0 : i32
    %c0_i32_1 = arith.constant 0 : i32
    %c0_i32_2 = arith.constant 0 : i32
    return %arg0, %c0_i32, %c0_i32_0, %c0_i32_1 : i32, i32, i32, i32
  }
}

</mosaic_0001>

<bundles_post_ra>
// kernel: trans_basic_block_forward.1
= control target key start
LH: loop header
LB: loop body
LE: loop exit
PB: predicated region body
PF: predicated region fallthrough
CT: control target
= control target key end

     0   :  { %s6781_s27 = smov 0   ;;  %s8874_s0 = inlined_call_operand.vmem [shape: f32[2,16,16,4], index: 0, kind: input, shape index: {}]   ;;  %s8875_s1 = inlined_call_operand.vmem [shape: bf16[9,4,4], index: 1, kind: input, shape index: {}]   ;;  %s8876_s2 = inlined_call_operand.vmem [shape: bf16[9,4,4], index: 2, kind: input, shape index: {}]   ;;  %s8877_s3 = inlined_call_operand.vmem [shape: f32[1,4], index: 3, kind: input, shape index: {}]   ;;  %s8878_s4 = inlined_call_operand.vmem [shape: f32[1,4], index: 4, kind: input, shape index: {}]   ;;  %s8879_s5 = inlined_call_operand.vmem [shape: f32[1,4], index: 5, kind: input, shape index: {}]   ;;  %s8880_s6 = inlined_call_operand.vmem [shape: f32[1,4], index: 6, kind: input, shape index: {}]   ;;  %s8881_s7 = inlined_call_operand.vmem [shape: f32[324,1], index: 7, kind: input, shape index: {}]   ;;  %s8882_s8 = inlined_call_operand.vmem [shape: f32[2,16,16,4], index: 8, kind: output, shape index: {}]  }
   0x1 LB: > { %s6251_s28 = sadd.s32 4294967295, %s6732_s27   ;;  %p6255_p0 = scmp.ge.s32.totalorder %s6732_s27, 1  ;;  %s6732_s27 = sphi %s6781_s27, %s18_s27  }
   0x2   : > { %p262_p1 = scmp.lt.s32.totalorder %s6732_s27, 3 }
   0x4   : > { %p263_p2 = pnand %p6255_p0, %p262_p1 }
   0x6   : > { %266 = sbr.rel (%p263_p2) target bundleno = 1892 (0x764), region = 52 }
   0xb   : > { %v6260_v0 = vld [vmem:[%s8875_s1 + $0x2] sm:$0x3]  ;;  %vm654_vm0 = vcmask 1041408   ;;  %v526_v1 = vld [vmem:[%s8875_s1] sm:$0x3]  ;;  %vm339_vm1 = vcmask 31744  }
   0xc   : > { %v656_v2 = vsel %vm654_vm0, %v6260_v0, 0  ;;  %v835_v3 = vsel %vm654_vm0, %v526_v1, 0  ;;  %v6734_v4 = vmov 0.0   ;;  %v6347_v11 = vld [vmem:[%s8875_s1 + $0x8] sm:$0x3]  ;;  %p296_p3 = scmp.lt.s32.totalorder %s6251_s28, 1 }
   0xd   : > { %665 = vmatpush.bf16.msra.mxu0 %v656_v2  ;;  %844 = vmatpush.bf16.msra.mxu1 %v835_v3  ;;  %342 = vst.msk [vmem:[#allocation2 + $0x10] sm:$0xff] %vm339_vm1, %v6734_v4  ;;  %v1646_v12 = vsel %vm654_vm0, %v6347_v11, 0  ;;  %v6303_v13 = vld [vmem:[%s8875_s1 + $0x4] sm:$0x3]  ;;  %v6325_v14 = vld [vmem:[%s8875_s1 + $0x6] sm:$0x3] }
   0xe   : > { %343 = vst.msk [vmem:[#allocation2 + $0x18] sm:$0xff] %vm339_vm1, %v6734_v4  ;;  %6703 = vmatpush.bf16.msra.mxu2 %v656_v2  ;;  %6704 = vmatpush.bf16.msra.mxu3 %v835_v3  ;;  %v1078_v16 = vsel %vm654_vm0, %v6303_v13, 0  ;;  %v1362_v17 = vsel %vm654_vm0, %v6325_v14, 0  ;;  %s9012_s28 = smov (!%p296_p3, %s6251_s28), 1  ;;  %vm389_vm2 = vcmask 27648   ;;  %vm5912_vm3 = vcmask 31747  }
   0xf   : > { %344 = vst.msk [vmem:[#allocation2 + $0x20] sm:$0xff] %vm339_vm1, %v6734_v4  ;;  %s6701_s17 = sshll.u32 %s9012_s28, 8  ;;  %vm5899_vm4 = vcmask 1042432   ;;  %vm5915_vm5 = vcmask 26624   ;;  %vm5933_vm6 = vcmask 31749   ;;  %vm5919_vm7 = vcmask 1044480  }
  0x10   : > { %345 = vst.msk [vmem:[#allocation2 + $0x28] sm:$0xff] %vm339_vm1, %v6734_v4  ;;  %s7001_s20 = scalar_lea.vmem %s8874_s0, %s6701_s17  ;;  %s8546_s9 = scalar_lea.vmem %s8882_s8, %s6701_s17  ;;  %vm5936_vm8 = vcmask 28672   ;;  %vm5954_vm9 = vcmask 31751   ;;  %vm5940_vm10 = vcmask 1046528   ;;  %vm5957_vm11 = vcmask 30720  }
  0x11   : > { %346 = vst.msk [vmem:[#allocation2 + $0x30] sm:$0xff] %vm339_vm1, %v6734_v4  ;;  %1655 = vmatpush.bf16.msrb.mxu0 %v1646_v12  ;;  %v7010_v23 = vld [vmem:[%s7001_s20 + $0x78] sm:$0xff]  ;;  %v7015_v24 = vld [vmem:[%s7001_s20 + $0x80] sm:$0xff]  ;;  %v7018_v25 = vld [vmem:[%s7001_s20 + $0x88] sm:$0xff]  ;;  %vm5975_vm12 = vcmask 31745   ;;  %vm5961_vm13 = vcmask 1040384  }
  0x12   : > { %347 = vst.msk [vmem:[#allocation2 + $0x38] sm:$0xff] %vm339_vm1, %v6734_v4  ;;  %1087 = vmatpush.bf16.msrb.mxu2 %v1078_v16  ;;  %1371 = vmatpush.bf16.msrb.mxu3 %v1362_v17  ;;  %v7023_v26 = vld [vmem:[%s7001_s20 + $0x90] sm:$0xff]  ;;  %v7028_v27 = vld [vmem:[%s7001_s20 + $0x98] sm:$0xff]  ;;  %v7033_v28 = vld [vmem:[%s7001_s20] sm:$0xff]  ;;  %vm5978_vm14 = vcmask 24576  }
  0x13   : > { %348 = vst.msk [vmem:[#allocation2 + $0x40] sm:$0xff] %vm339_vm1, %v6734_v4  ;;  %v7038_v29 = vld [vmem:[%s7001_s20 + $0x8] sm:$0xff]  ;;  %v7043_v30 = vld [vmem:[%s7001_s20 + $0xa0] sm:$0xff]  ;;  %v7054_v39 = vld [vmem:[%s7001_s20 + $0x10] sm:$0xff] }
  0x14   : > { %349 = vst.msk [vmem:[#allocation2 + $0x48] sm:$0xff] %vm339_vm1, %v6734_v4  ;;  %v7057_v42 = vld [vmem:[%s7001_s20 + $0x18] sm:$0xff]  ;;  %v7064_v45 = vld [vmem:[%s7001_s20 + $0xa8] sm:$0xff]  ;;  %v7067_v46 = vld [vmem:[%s7001_s20 + $0xb0] sm:$0xff] }
  0x15   : > { %v527_v5 = vld [vmem:[#allocation2 + $0x12] sm:$0xff]  ;;  %350 = vst.msk [vmem:[#allocation2 + $0x50] sm:$0xff] %vm339_vm1, %v6734_v4  ;;  %v7076_v57 = vld [vmem:[%s7001_s20 + $0x20] sm:$0xff]  ;;  %v7105_v12 = vld [vmem:[%s7001_s20 + $0xc8] sm:$0xff] }
  0x16   : > { %v464_v6 = vld [vmem:[#allocation2 + $0x11] sm:$0xff]  ;;  %v528_v7 = vld [vmem:[#allocation2 + $0x1a] sm:$0xff]  ;;  %351 = vst.msk [vmem:[#allocation2 + $0x58] sm:$0xff] %vm339_vm1, %v6734_v4 }
  0x17   : > { %v465_v8 = vld [vmem:[#allocation2 + $0x19] sm:$0xff]  ;;  %v568_v9 = vpack.c.bf16 %v528_v7, %v527_v5  ;;  %352 = vst.msk [vmem:[#allocation2 + $0x60] sm:$0xff] %vm339_vm1, %v6734_v4  ;;  %v529_v15 = vld [vmem:[#allocation2 + $0x22] sm:$0xff]  ;;  %v7108_v13 = vld [vmem:[%s7001_s20 + $0xd0] sm:$0xff] }
  0x18   : > { %v505_v10 = vpack.c.bf16 %v465_v8, %v464_v6  ;;  %353 = vst.msk [vmem:[#allocation2 + $0x68] sm:$0xff] %vm339_vm1, %v6734_v4  ;;  %v530_v18 = vld [vmem:[#allocation2 + $0x2a] sm:$0xff]  ;;  %v466_v19 = vld [vmem:[#allocation2 + $0x21] sm:$0xff]  ;;  %v7083_v60 = vld [vmem:[%s7001_s20 + $0xb8] sm:$0xff] }
  0x19   : > { %6261 = vmatmul.msk.bf16.vlgmr.msra.gmra.mxu0 %vm339_vm1, %v568_v9  ;;  %354 = vst.msk [vmem:[#allocation2 + $0x70] sm:$0xff] %vm339_vm1, %v6734_v4  ;;  %v467_v20 = vld [vmem:[#allocation2 + $0x29] sm:$0xff]  ;;  %v569_v21 = vpack.c.bf16 %v530_v18, %v529_v15  ;;  %v7086_v61 = vld [vmem:[%s7001_s20 + $0xc0] sm:$0xff] }
  0x1a   : > { %6282 = vmatmul.msk.bf16.vlgmr.msra.gmra.mxu1 %vm339_vm1, %v505_v10  ;;  %355 = vst.msk [vmem:[#allocation2 + $0x78] sm:$0xff] %vm339_vm1, %v6734_v4  ;;  %v506_v22 = vpack.c.bf16 %v467_v20, %v466_v19  ;;  %v7095_v8 = vld [vmem:[%s7001_s20 + $0x28] sm:$0xff]  ;;  %v7098_v9 = vld [vmem:[%s7001_s20 + $0x30] sm:$0xff] }
  0x1b   : > { %356 = vst.msk [vmem:[#allocation2 + $0x80] sm:$0xff] %vm339_vm1, %v6734_v4 }
  0x1c   : > { %357 = vst.msk [vmem:[#allocation2 + $0x88] sm:$0xff] %vm339_vm1, %v6734_v4 }
  0x1d   : > { %358 = vst.msk [vmem:[#allocation2 + $0x90] sm:$0xff] %vm339_vm1, %v6734_v4 }
  0x1e   : > { %359 = vst.msk [vmem:[#allocation2 + $0x98] sm:$0xff] %vm339_vm1, %v6734_v4 }
  0x1f   : > { %360 = vst.msk [vmem:[#allocation2 + $0xa0] sm:$0xff] %vm339_vm1, %v6734_v4 }
  0x20   : > { %361 = vst.msk [vmem:[#allocation2 + $0xa8] sm:$0xff] %vm339_vm1, %v6734_v4 }
  0x21   : > { %362 = vst.msk [vmem:[#allocation2 + $0xb0] sm:$0xff] %vm339_vm1, %v6734_v4 }
  0x22   : > { %363 = vst.msk [vmem:[#allocation2 + $0xb8] sm:$0xff] %vm339_vm1, %v6734_v4 }
  0x23   : > { %364 = vst.msk [vmem:[#allocation2 + $0xc0] sm:$0xff] %vm339_vm1, %v6734_v4 }
  0x24   : > { %365 = vst.msk [vmem:[#allocation2 + $0xc8] sm:$0xff] %vm339_vm1, %v6734_v4 }
  0x25   : > { %366 = vst.msk [vmem:[#allocation2 + $0xd0] sm:$0xff] %vm339_vm1, %v6734_v4 }
  0x26   : > { %367 = vst.msk [vmem:[#allocation2 + $0xd8] sm:$0xff] %vm339_vm1, %v6734_v4 }
  0x27   : > { %368 = vst.msk [vmem:[#allocation2 + $0xe0] sm:$0xff] %vm339_vm1, %v6734_v4 }
  0x28   : > { %369 = vst.msk [vmem:[#allocation2 + $0xe8] sm:$0xff] %vm339_vm1, %v6734_v4 }
  0x29   : > { %370 = vst.msk [vmem:[#allocation2 + $0xf0] sm:$0xff] %vm339_vm1, %v6734_v4  ;;  %6262 = vmatmul.msk.bf16.gmra.mxu0 %vm339_vm1, %v569_v21 }
  0x2a   : > { %371 = vst.msk [vmem:[#allocation2 + $0xf8] sm:$0xff] %vm339_vm1, %v6734_v4  ;;  %6283 = vmatmul.msk.bf16.gmra.mxu1 %vm339_vm1, %v506_v22 }
  0x2b   : > { %372 = vst.msk [vmem:[#allocation2 + $0x100] sm:$0xff] %vm339_vm1, %v6734_v4 }
  0x2c   : > { %373 = vst.msk [vmem:[#allocation2 + $0x108] sm:$0xff] %vm339_vm1, %v6734_v4 }
  0x2d   : > { %374 = vst.msk [vmem:[#allocation2 + $0x110] sm:$0xff] %vm339_vm1, %v6734_v4 }
  0x2e   : > { %375 = vst.msk [vmem:[#allocation2 + $0x118] sm:$0xff] %vm339_vm1, %v6734_v4 }
  0x2f   : > { %376 = vst.msk [vmem:[#allocation2 + $0x120] sm:$0xff] %vm339_vm1, %v6734_v4 }
  0x30   : > { %377 = vst.msk [vmem:[#allocation2 + $0x128] sm:$0xff] %vm339_vm1, %v6734_v4 }
  0x31   : > { %378 = vst.msk [vmem:[#allocation2 + $0x130] sm:$0xff] %vm339_vm1, %v6734_v4 }
  0x32   : > { %379 = vst.msk [vmem:[#allocation2 + $0x138] sm:$0xff] %vm339_vm1, %v6734_v4 }
  0x33   : > { %380 = vst.msk [vmem:[#allocation2 + $0x140] sm:$0xff] %vm339_vm1, %v6734_v4 }
  0x34   : > { %381 = vst.msk [vmem:[#allocation2 + $0x148] sm:$0xff] %vm339_vm1, %v6734_v4 }
  0x35   : > { %382 = vst.msk [vmem:[#allocation2 + $0x150] sm:$0xff] %vm339_vm1, %v6734_v4 }
  0x36   : > { %383 = vst.msk [vmem:[#allocation2 + $0x158] sm:$0xff] %vm339_vm1, %v6734_v4 }
  0x37   : > { %384 = vst.msk [vmem:[#allocation2 + $0x160] sm:$0xff] %vm339_vm1, %v6734_v4 }
  0x38   : > { %385 = vst.msk [vmem:[#allocation2 + $0x168] sm:$0xff] %vm339_vm1, %v6734_v4 }
  0x39   : > { %386 = vst.msk [vmem:[#allocation2 + $0x170] sm:$0xff] %vm339_vm1, %v6734_v4 }
  0x3a   : > { %387 = vst.msk [vmem:[#allocation2 + $0x178] sm:$0xff] %vm339_vm1, %v6734_v4 }
  0x3b   : > { %3317 = vst.msk [vmem:[#allocation3 + $0x10] sm:$0xff] %vm339_vm1, %v6734_v4 }
  0x3c   : > { %3318 = vst.msk [vmem:[#allocation3 + $0x18] sm:$0xff] %vm339_vm1, %v6734_v4 }
  0x3d   : > { %3319 = vst.msk [vmem:[#allocation3 + $0x20] sm:$0xff] %vm339_vm1, %v6734_v4 }
  0x3e   : > { %3320 = vst.msk [vmem:[#allocation3 + $0x28] sm:$0xff] %vm339_vm1, %v6734_v4 }
  0x3f   : > { %3321 = vst.msk [vmem:[#allocation3 + $0x30] sm:$0xff] %vm339_vm1, %v6734_v4 }
  0x40   : > { %3322 = vst.msk [vmem:[#allocation3 + $0x38] sm:$0xff] %vm339_vm1, %v6734_v4 }
  0x41   : > { %3323 = vst.msk [vmem:[#allocation3 + $0x40] sm:$0xff] %vm339_vm1, %v6734_v4 }
  0x42   : > { %3324 = vst.msk [vmem:[#allocation3 + $0x48] sm:$0xff] %vm339_vm1, %v6734_v4 }
  0x43   : > { %3325 = vst.msk [vmem:[#allocation3 + $0x50] sm:$0xff] %vm339_vm1, %v6734_v4 }
  0x44   : > { %3326 = vst.msk [vmem:[#allocation3 + $0x58] sm:$0xff] %vm339_vm1, %v6734_v4 }
  0x45   : > { %3327 = vst.msk [vmem:[#allocation3 + $0x60] sm:$0xff] %vm339_vm1, %v6734_v4 }
  0x46   : > { %3328 = vst.msk [vmem:[#allocation3 + $0x68] sm:$0xff] %vm339_vm1, %v6734_v4 }
  0x47   : > { %3329 = vst.msk [vmem:[#allocation3 + $0x70] sm:$0xff] %vm339_vm1, %v6734_v4 }
  0x48   : > { %3330 = vst.msk [vmem:[#allocation3 + $0x78] sm:$0xff] %vm339_vm1, %v6734_v4 }
  0x49   : > { %3331 = vst.msk [vmem:[#allocation3 + $0x80] sm:$0xff] %vm339_vm1, %v6734_v4 }
  0x4a   : > { %3332 = vst.msk [vmem:[#allocation3 + $0x88] sm:$0xff] %vm339_vm1, %v6734_v4 }
  0x4b   : > { %3333 = vst.msk [vmem:[#allocation3 + $0x90] sm:$0xff] %vm339_vm1, %v6734_v4 }
  0x4c   : > { %3334 = vst.msk [vmem:[#allocation3 + $0x98] sm:$0xff] %vm339_vm1, %v6734_v4 }
  0x4d   : > { %3335 = vst.msk [vmem:[#allocation3 + $0xa0] sm:$0xff] %vm339_vm1, %v6734_v4 }
  0x4e   : > { %3336 = vst.msk [vmem:[#allocation3 + $0xa8] sm:$0xff] %vm339_vm1, %v6734_v4 }
  0x4f   : > { %3337 = vst.msk [vmem:[#allocation3 + $0xb0] sm:$0xff] %vm339_vm1, %v6734_v4 }
  0x50   : > { %3338 = vst.msk [vmem:[#allocation3 + $0xb8] sm:$0xff] %vm339_vm1, %v6734_v4 }
  0x51   : > { %3339 = vst.msk [vmem:[#allocation3 + $0xc0] sm:$0xff] %vm339_vm1, %v6734_v4 }
  0x52   : > { %3340 = vst.msk [vmem:[#allocation3 + $0xc8] sm:$0xff] %vm339_vm1, %v6734_v4 }
  0x53   : > { %3341 = vst.msk [vmem:[#allocation3 + $0xd0] sm:$0xff] %vm339_vm1, %v6734_v4 }
  0x54   : > { %3342 = vst.msk [vmem:[#allocation3 + $0xd8] sm:$0xff] %vm339_vm1, %v6734_v4 }
  0x55   : > { %3343 = vst.msk [vmem:[#allocation3 + $0xe0] sm:$0xff] %vm339_vm1, %v6734_v4 }
  0x56   : > { %3344 = vst.msk [vmem:[#allocation3 + $0xe8] sm:$0xff] %vm339_vm1, %v6734_v4 }
  0x57   : > { %3345 = vst.msk [vmem:[#allocation3 + $0xf0] sm:$0xff] %vm339_vm1, %v6734_v4 }
  0x58   : > { %3346 = vst.msk [vmem:[#allocation3 + $0xf8] sm:$0xff] %vm339_vm1, %v6734_v4 }
  0x59   : > { %3347 = vst.msk [vmem:[#allocation3 + $0x100] sm:$0xff] %vm339_vm1, %v6734_v4 }
  0x5a   : > { %3348 = vst.msk [vmem:[#allocation3 + $0x108] sm:$0xff] %vm339_vm1, %v6734_v4 }
  0x5b   : > { %3349 = vst.msk [vmem:[#allocation3 + $0x110] sm:$0xff] %vm339_vm1, %v6734_v4 }
  0x5c   : > { %3350 = vst.msk [vmem:[#allocation3 + $0x118] sm:$0xff] %vm339_vm1, %v6734_v4 }
  0x5d   : > { %3351 = vst.msk [vmem:[#allocation3 + $0x120] sm:$0xff] %vm339_vm1, %v6734_v4 }
  0x5e   : > { %3352 = vst.msk [vmem:[#allocation3 + $0x128] sm:$0xff] %vm339_vm1, %v6734_v4 }
  0x5f   : > { %3353 = vst.msk [vmem:[#allocation3 + $0x130] sm:$0xff] %vm339_vm1, %v6734_v4 }
  0x60   : > { %3354 = vst.msk [vmem:[#allocation3 + $0x138] sm:$0xff] %vm339_vm1, %v6734_v4 }
  0x61   : > { %3355 = vst.msk [vmem:[#allocation3 + $0x140] sm:$0xff] %vm339_vm1, %v6734_v4 }
  0x62   : > { %3356 = vst.msk [vmem:[#allocation3 + $0x148] sm:$0xff] %vm339_vm1, %v6734_v4 }
  0x63   : > { %3357 = vst.msk [vmem:[#allocation3 + $0x150] sm:$0xff] %vm339_vm1, %v6734_v4 }
  0x64   : > { %3358 = vst.msk [vmem:[#allocation3 + $0x158] sm:$0xff] %vm339_vm1, %v6734_v4 }
  0x65   : > { %3359 = vst.msk [vmem:[#allocation3 + $0x160] sm:$0xff] %vm339_vm1, %v6734_v4 }
  0x66   : > { %3360 = vst.msk [vmem:[#allocation3 + $0x168] sm:$0xff] %vm339_vm1, %v6734_v4 }
  0x67   : > { %3361 = vst.msk [vmem:[#allocation3 + $0x170] sm:$0xff] %vm339_vm1, %v6734_v4 }
  0x68   : > { %8915 = vst [vmem:[#allocation4_spill] sm:$0xff] %v7010_v23 }
  0x69   : > { %3362 = vst.msk [vmem:[#allocation3 + $0x178] sm:$0xff] %vm339_vm1, %v6734_v4 }
  0x6a   : > { %8916 = vst [vmem:[#allocation5_spill] sm:$0xff] %v7015_v24 }
  0x6b   : > { %8917 = vst [vmem:[#allocation6_spill] sm:$0xff] %v7018_v25 }
  0x6c   : > { %406 = vst.msk [vmem:[#allocation2 + $0xbd] sm:$0xff] %vm339_vm1, %v7010_v23 }
  0x6d   : > { %8918 = vst [vmem:[#allocation7_spill] sm:$0xff] %v7023_v26 }
  0x6e   : > { %407 = vst.msk [vmem:[#allocation2 + $0xc7] sm:$0xff] %vm339_vm1, %v7015_v24 }
  0x6f   : > { %8919 = vst [vmem:[#allocation8_spill] sm:$0xff] %v7028_v27 }
  0x70   : > { %408 = vst.msk [vmem:[#allocation2 + $0xcf] sm:$0xff] %vm339_vm1, %v7018_v25 }
  0x71   : > { %8920 = vst [vmem:[#allocation9_spill] sm:$0xff] %v7033_v28 }
  0x72   : > { %409 = vst.msk [vmem:[#allocation2 + $0xd9] sm:$0xff] %vm339_vm1, %v7023_v26 }
  0x73   : > { %8921 = vst [vmem:[#allocation10_spill] sm:$0xff] %v7038_v29 }
  0x74   : > { %410 = vst.msk [vmem:[#allocation2 + $0xe1] sm:$0xff] %vm339_vm1, %v7028_v27 }
  0x75   : > { %8922 = vst [vmem:[#allocation11_spill] sm:$0xff] %v7043_v30  ;;  %v549_v31 = vld [vmem:[#allocation2 + $0xc2] sm:$0xff] }
  0x76   : > { %391 = vst.msk [vmem:[#allocation2 + $0x37] sm:$0xff] %vm339_vm1, %v7033_v28  ;;  %v486_v32 = vld [vmem:[#allocation2 + $0xc1] sm:$0xff] }
  0x77   : > { %392 = vst.msk [vmem:[#allocation2 + $0x3f] sm:$0xff] %vm339_vm1, %v7038_v29  ;;  %v550_v33 = vld [vmem:[#allocation2 + $0xca] sm:$0xff] }
  0x78   : > { %411 = vst.msk [vmem:[#allocation2 + $0xeb] sm:$0xff] %vm339_vm1, %v7043_v30  ;;  %v487_v34 = vld [vmem:[#allocation2 + $0xc9] sm:$0xff]  ;;  %v579_v35 = vpack.c.bf16 %v550_v33, %v549_v31  ;;  %v488_v47 = vld [vmem:[#allocation2 + $0xd1] sm:$0xff]  ;;  %v7122_v33 = vld [vmem:[%s7001_s20 + $0x40] sm:$0xff] }
  0x79   : > { %v516_v36 = vpack.c.bf16 %v487_v34, %v486_v32  ;;  %8923 = vst [vmem:[#allocation12_spill] sm:$0xff] %v7054_v39  ;;  %v551_v48 = vld [vmem:[#allocation2 + $0xd2] sm:$0xff] }
  0x7a   : > { %6272 = vmatmul.msk.bf16.vlgmr.msra.gmra.mxu2 %vm339_vm1, %v579_v35  ;;  %8924 = vst [vmem:[#allocation13_spill] sm:$0xff] %v7057_v42  ;;  %v489_v50 = vld [vmem:[#allocation2 + $0xd9] sm:$0xff] }
  0x7b   : > { %6293 = vmatmul.msk.bf16.vlgmr.msra.gmra.mxu3 %vm339_vm1, %v516_v36  ;;  %393 = vst.msk [vmem:[#allocation2 + $0x49] sm:$0xff] %vm339_vm1, %v7054_v39  ;;  %v552_v49 = vld [vmem:[#allocation2 + $0xda] sm:$0xff]  ;;  %v517_v52 = vpack.c.bf16 %v489_v50, %v488_v47  ;;  %v553_v62 = vld [vmem:[#allocation2 + $0xe2] sm:$0xff] }
  0x7c   : > { %394 = vst.msk [vmem:[#allocation2 + $0x51] sm:$0xff] %vm339_vm1, %v7057_v42  ;;  %v580_v51 = vpack.c.bf16 %v552_v49, %v551_v48  ;;  %v490_v0 = vld [vmem:[#allocation2 + $0xe1] sm:$0xff]  ;;  %v7119_v32 = vld [vmem:[%s7001_s20 + $0x38] sm:$0xff] }
  0x7d   : > { %v531_v37 = vld [vmem:[#allocation2 + $0x32] sm:$0xff]  ;;  %8925 = vst [vmem:[#allocation14_spill] sm:$0xff] %v7064_v45 }
  0x7e   : > { %v468_v38 = vld [vmem:[#allocation2 + $0x31] sm:$0xff]  ;;  %v532_v40 = vld [vmem:[#allocation2 + $0x3a] sm:$0xff]  ;;  %8926 = vst [vmem:[#allocation15_spill] sm:$0xff] %v7067_v46 }
  0x7f   : > { %v469_v41 = vld [vmem:[#allocation2 + $0x39] sm:$0xff]  ;;  %v570_v43 = vpack.c.bf16 %v532_v40, %v531_v37  ;;  %412 = vst.msk [vmem:[#allocation2 + $0xf3] sm:$0xff] %vm339_vm1, %v7064_v45  ;;  %v470_v53 = vld [vmem:[#allocation2 + $0x41] sm:$0xff]  ;;  %v554_v63 = vld [vmem:[#allocation2 + $0xea] sm:$0xff] }
  0x80   : > { %v507_v44 = vpack.c.bf16 %v469_v41, %v468_v38  ;;  %413 = vst.msk [vmem:[#allocation2 + $0xfd] sm:$0xff] %vm339_vm1, %v7067_v46  ;;  %v491_v1 = vld [vmem:[#allocation2 + $0xe9] sm:$0xff]  ;;  %v581_v2 = vpack.c.bf16 %v554_v63, %v553_v62  ;;  %v7129_v36 = vld [vmem:[%s7001_s20 + $0xd8] sm:$0xff] }
  0x81   : > { %6263 = vmatmul.msk.bf16.gmra.mxu0 %vm339_vm1, %v570_v43  ;;  %8927 = vst [vmem:[#allocation16_spill] sm:$0xff] %v7076_v57  ;;  %v518_v3 = vpack.c.bf16 %v491_v1, %v490_v0 }
  0x82   : > { %6284 = vmatmul.msk.bf16.gmra.mxu1 %vm339_vm1, %v507_v44  ;;  %v533_v54 = vld [vmem:[#allocation2 + $0x42] sm:$0xff]  ;;  %395 = vst.msk [vmem:[#allocation2 + $0x5b] sm:$0xff] %vm339_vm1, %v7076_v57 }
  0x83   : > { %v534_v55 = vld [vmem:[#allocation2 + $0x4a] sm:$0xff]  ;;  %8928 = vst [vmem:[#allocation17_spill] sm:$0xff] %v7083_v60  ;;  %v535_v4 = vld [vmem:[#allocation2 + $0x52] sm:$0xff] }
  0x84   : > { %v471_v56 = vld [vmem:[#allocation2 + $0x49] sm:$0xff]  ;;  %v571_v58 = vpack.c.bf16 %v534_v55, %v533_v54  ;;  %8929 = vst [vmem:[#allocation18_spill] sm:$0xff] %v7086_v61  ;;  %v472_v6 = vld [vmem:[#allocation2 + $0x51] sm:$0xff]  ;;  %v7148_v55 = vld [vmem:[%s7001_s20 + $0xe0] sm:$0xff] }
  0x85   : > { %v508_v59 = vpack.c.bf16 %v471_v56, %v470_v53  ;;  %414 = vst.msk [vmem:[#allocation2 + $0x105] sm:$0xff] %vm339_vm1, %v7083_v60  ;;  %v7151_v56 = vld [vmem:[%s7001_s20 + $0xe8] sm:$0xff] }
  0x86   : > { %415 = vst.msk [vmem:[#allocation2 + $0x10f] sm:$0xff] %vm339_vm1, %v7086_v61  ;;  %v555_v14 = vld [vmem:[#allocation2 + $0xf2] sm:$0xff] }
  0x87   : > { %8930 = vst [vmem:[#allocation19_spill] sm:$0xff] %v7095_v8  ;;  %v556_v15 = vld [vmem:[#allocation2 + $0xfa] sm:$0xff]  ;;  %v492_v16 = vld [vmem:[#allocation2 + $0xf1] sm:$0xff] }
  0x88   : > { %8931 = vst [vmem:[#allocation20_spill] sm:$0xff] %v7098_v9  ;;  %v493_v17 = vld [vmem:[#allocation2 + $0xf9] sm:$0xff]  ;;  %v582_v18 = vpack.c.bf16 %v556_v15, %v555_v14  ;;  %v7169_v15 = vld [vmem:[%s7001_s20 + $0xf0] sm:$0xff] }
  0x89   : > { %v536_v5 = vld [vmem:[#allocation2 + $0x5a] sm:$0xff]  ;;  %396 = vst.msk [vmem:[#allocation2 + $0x63] sm:$0xff] %vm339_vm1, %v7095_v8  ;;  %v519_v19 = vpack.c.bf16 %v493_v17, %v492_v16 }
  0x8a   : > { %6273 = vmatmul.msk.bf16.gmra.mxu2 %vm339_vm1, %v580_v51  ;;  %v473_v7 = vld [vmem:[#allocation2 + $0x59] sm:$0xff]  ;;  %v572_v10 = vpack.c.bf16 %v536_v5, %v535_v4  ;;  %8932 = vst [vmem:[#allocation21_spill] sm:$0xff] %v7105_v12  ;;  %v7138_v51 = vld [vmem:[%s7001_s20 + $0x48] sm:$0xff] }
  0x8b   : > { %6294 = vmatmul.msk.bf16.gmra.mxu3 %vm339_vm1, %v517_v52  ;;  %v509_v11 = vpack.c.bf16 %v473_v7, %v472_v6  ;;  %8933 = vst [vmem:[#allocation22_spill] sm:$0xff] %v7108_v13  ;;  %v7141_v52 = vld [vmem:[%s7001_s20 + $0x50] sm:$0xff]  ;;  %v7162_v6 = vld [vmem:[%s7001_s20 + $0x58] sm:$0xff] }
  0x8c   : > { %397 = vst.msk [vmem:[#allocation2 + $0x6d] sm:$0xff] %vm339_vm1, %v7098_v9  ;;  %v557_v37 = vld [vmem:[#allocation2 + $0x102] sm:$0xff]  ;;  %v7172_v16 = vld [vmem:[%s7001_s20 + $0xf8] sm:$0xff] }
  0x8d   : > { %416 = vst.msk [vmem:[#allocation2 + $0x117] sm:$0xff] %vm339_vm1, %v7105_v12  ;;  %v558_v38 = vld [vmem:[#allocation2 + $0x10a] sm:$0xff]  ;;  %v494_v40 = vld [vmem:[#allocation2 + $0x101] sm:$0xff] }
  0x8e   : > { %417 = vst.msk [vmem:[#allocation2 + $0x121] sm:$0xff] %vm339_vm1, %v7108_v13  ;;  %v495_v41 = vld [vmem:[#allocation2 + $0x109] sm:$0xff]  ;;  %v583_v43 = vpack.c.bf16 %v558_v38, %v557_v37 }
  0x8f   : > { %8934 = vst [vmem:[#allocation23_spill] sm:$0xff] %v7119_v32  ;;  %v520_v44 = vpack.c.bf16 %v495_v41, %v494_v40 }
  0x90   : > { %v537_v20 = vld [vmem:[#allocation2 + $0x62] sm:$0xff]  ;;  %8935 = vst [vmem:[#allocation24_spill] sm:$0xff] %v7122_v33 }
  0x91   : > { %6264 = vmatmul.msk.bf16.gmra.mxu0 %vm339_vm1, %v571_v58  ;;  %v474_v22 = vld [vmem:[#allocation2 + $0x61] sm:$0xff]  ;;  %398 = vst.msk [vmem:[#allocation2 + $0x75] sm:$0xff] %vm339_vm1, %v7119_v32 }
  0x92   : > { %6285 = vmatmul.msk.bf16.gmra.mxu1 %vm339_vm1, %v508_v59  ;;  %8936 = vst [vmem:[#allocation25_spill] sm:$0xff] %v7129_v36  ;;  %v1810_v60 = vld [vmem:[#allocation2 + $0x65] sm:$0xff] }
  0x93   : > { %v538_v21 = vld [vmem:[#allocation2 + $0x6a] sm:$0xff]  ;;  %399 = vst.msk [vmem:[#allocation2 + $0x7f] sm:$0xff] %vm339_vm1, %v7122_v33 }
  0x94   : > { %v475_v31 = vld [vmem:[#allocation2 + $0x69] sm:$0xff]  ;;  %v573_v34 = vpack.c.bf16 %v538_v21, %v537_v20  ;;  %418 = vst.msk [vmem:[#allocation2 + $0x129] sm:$0xff] %vm339_vm1, %v7129_v36  ;;  %v559_v58 = vld [vmem:[#allocation2 + $0x112] sm:$0xff] }
  0x95   : > { %v510_v35 = vpack.c.bf16 %v475_v31, %v474_v22  ;;  %8937 = vst [vmem:[#allocation26_spill] sm:$0xff] %v7138_v51  ;;  %v560_v59 = vld [vmem:[#allocation2 + $0x11a] sm:$0xff]  ;;  %v496_v62 = vld [vmem:[#allocation2 + $0x111] sm:$0xff] }
  0x96   : > { %8938 = vst [vmem:[#allocation27_spill] sm:$0xff] %v7141_v52  ;;  %v497_v63 = vld [vmem:[#allocation2 + $0x119] sm:$0xff]  ;;  %v584_v0 = vpack.c.bf16 %v560_v59, %v559_v58  ;;  %v498_v20 = vld [vmem:[#allocation2 + $0x121] sm:$0xff] }
  0x97   : > { %400 = vst.msk [vmem:[#allocation2 + $0x87] sm:$0xff] %vm339_vm1, %v7138_v51  ;;  %v521_v1 = vpack.c.bf16 %v497_v63, %v496_v62  ;;  %v846_v14 = vpop.f32.mrf.mxu1  ;;  %v1808_v36 = vld [vmem:[#allocation2 + $0x55] sm:$0xff] }
  0x98   : > { %v539_v47 = vld [vmem:[#allocation2 + $0x72] sm:$0xff]  ;;  %8939 = vst [vmem:[#allocation28_spill] sm:$0xff] %v7148_v55 }
  0x99   : > { %v476_v49 = vld [vmem:[#allocation2 + $0x71] sm:$0xff]  ;;  %8940 = vst [vmem:[#allocation29_spill] sm:$0xff] %v7151_v56 }
  0x9a   : > { %6274 = vmatmul.msk.bf16.gmra.mxu2 %vm339_vm1, %v581_v2  ;;  %v540_v48 = vld [vmem:[#allocation2 + $0x7a] sm:$0xff]  ;;  %401 = vst.msk [vmem:[#allocation2 + $0x91] sm:$0xff] %vm339_vm1, %v7141_v52 }
  0x9b   : > { %6295 = vmatmul.msk.bf16.gmra.mxu3 %vm339_vm1, %v518_v3  ;;  %v477_v50 = vld [vmem:[#allocation2 + $0x79] sm:$0xff]  ;;  %v574_v53 = vpack.c.bf16 %v540_v48, %v539_v47  ;;  %419 = vst.msk [vmem:[#allocation2 + $0x133] sm:$0xff] %vm339_vm1, %v7148_v55  ;;  %v499_v21 = vld [vmem:[#allocation2 + $0x129] sm:$0xff] }
  0x9c   : > { %v511_v54 = vpack.c.bf16 %v477_v50, %v476_v49  ;;  %420 = vst.msk [vmem:[#allocation2 + $0x13b] sm:$0xff] %vm339_vm1, %v7151_v56  ;;  %v6369_v49 = vld [vmem:[%s8875_s1 + $0xa] sm:$0x3]  ;;  %v1812_v27 = vld [vmem:[#allocation2 + $0x75] sm:$0xff] }
  0x9d   : > { %8941 = vst [vmem:[#allocation30_spill] sm:$0xff] %v7162_v6 }
  0x9e   : > { %v541_v2 = vld [vmem:[#allocation2 + $0x82] sm:$0xff]  ;;  %402 = vst.msk [vmem:[#allocation2 + $0x99] sm:$0xff] %vm339_vm1, %v7162_v6 }
  0x9f   : > { %v478_v4 = vld [vmem:[#allocation2 + $0x81] sm:$0xff]  ;;  %v479_v5 = vld [vmem:[#allocation2 + $0x89] sm:$0xff]  ;;  %8942 = vst [vmem:[#allocation31_spill] sm:$0xff] %v7169_v15  ;;  %v7184_v31 = vpop.f32.mrf.mxu1 }
  0xa0   : > { %8943 = vst [vmem:[#allocation32_spill] sm:$0xff] %v7172_v16  ;;  %v1814_v23 = vld [vmem:[#allocation2 + $0x85] sm:$0xff] }
  0xa1   : > { %6265 = vmatmul.msk.bf16.gmra.mxu0 %vm339_vm1, %v572_v10  ;;  %v542_v3 = vld [vmem:[#allocation2 + $0x8a] sm:$0xff]  ;;  %v512_v10 = vpack.c.bf16 %v479_v5, %v478_v4  ;;  %421 = vst.msk [vmem:[#allocation2 + $0x145] sm:$0xff] %vm339_vm1, %v7169_v15 }
  0xa2   : > { %6286 = vmatmul.msk.bf16.gmra.mxu1 %vm339_vm1, %v509_v11  ;;  %v575_v7 = vpack.c.bf16 %v542_v3, %v541_v2  ;;  %v667_v11 = vpop.f32.mrf.mxu0  ;;  %422 = vst.msk [vmem:[#allocation2 + $0x14d] sm:$0xff] %vm339_vm1, %v7172_v16  ;;  %v480_v37 = vld [vmem:[#allocation2 + $0x91] sm:$0xff] }
  0xa3   : > { %v7174_v17 = vadd.f32 %v846_v14, %v667_v11  ;;  %v563_v59 = vld [vmem:[#allocation2 + $0x132] sm:$0xff]  ;;  %v564_v62 = vld [vmem:[#allocation2 + $0x13a] sm:$0xff] }
  0xa4   : > { %v500_v63 = vld [vmem:[#allocation2 + $0x131] sm:$0xff] }
  0xa5   : > { %v543_v38 = vld [vmem:[#allocation2 + $0x92] sm:$0xff]  ;;  %v544_v40 = vld [vmem:[#allocation2 + $0x9a] sm:$0xff] }
  0xa6   : > { %v481_v41 = vld [vmem:[#allocation2 + $0x99] sm:$0xff]  ;;  %v576_v47 = vpack.c.bf16 %v544_v40, %v543_v38 }
  0xa7   : > { %v513_v48 = vpack.c.bf16 %v481_v41, %v480_v37  ;;  %v1816_v6 = vld [vmem:[#allocation2 + $0x95] sm:$0xff] }
  0xaa   : > { %6275 = vmatmul.msk.bf16.gmra.mxu2 %vm339_vm1, %v582_v18  ;;  %v561_v18 = vld [vmem:[#allocation2 + $0x122] sm:$0xff]  ;;  %v7182_v22 = vpop.f32.mrf.mxu0 }
  0xab   : > { %6296 = vmatmul.msk.bf16.gmra.mxu3 %vm339_vm1, %v519_v19  ;;  %v562_v19 = vld [vmem:[#allocation2 + $0x12a] sm:$0xff] }
  0xb1   : > { %6266 = vmatmul.msk.bf16.gmra.mxu0 %vm339_vm1, %v573_v34  ;;  %v585_v34 = vpack.c.bf16 %v562_v19, %v561_v18 }
  0xb2   : > { %6287 = vmatmul.msk.bf16.gmra.mxu1 %vm339_vm1, %v510_v35  ;;  %v522_v35 = vpack.c.bf16 %v499_v21, %v498_v20  ;;  %v672_v50 = vpop.f32.mrf.mxu0  ;;  %v565_v20 = vld [vmem:[#allocation2 + $0x142] sm:$0xff]  ;;  %v566_v21 = vld [vmem:[#allocation2 + $0x14a] sm:$0xff] }
  0xb3   : > { %v587_v37 = vpack.c.bf16 %v566_v21, %v565_v20 }
  0xba   : > { %6276 = vmatmul.msk.bf16.gmra.mxu2 %vm339_vm1, %v583_v43  ;;  %v7187_v43 = vld [vmem:[%s7001_s20 + $0x60] sm:$0xff]  ;;  %v7215_v18 = vpop.f32.mrf.mxu0 }
  0xbb   : > { %6297 = vmatmul.msk.bf16.gmra.mxu3 %vm339_vm1, %v520_v44  ;;  %8944 = vst [vmem:[#allocation33_spill] sm:$0xff] %v7187_v43  ;;  %v7190_v44 = vld [vmem:[%s7001_s20 + $0x68] sm:$0xff] }
  0xbc   : > { %8945 = vst [vmem:[#allocation34_spill] sm:$0xff] %v7190_v44 }
  0xbd   : > { %403 = vst.msk [vmem:[#allocation2 + $0xa3] sm:$0xff] %vm339_vm1, %v7187_v43 }
  0xbe   : > { %404 = vst.msk [vmem:[#allocation2 + $0xab] sm:$0xff] %vm339_vm1, %v7190_v44 }
  0xc1   : > { %6267 = vmatmul.msk.bf16.gmra.mxu0 %vm339_vm1, %v574_v53  ;;  %v851_v53 = vpop.f32.mrf.mxu1 }
  0xc2   : > { %6288 = vmatmul.msk.bf16.gmra.mxu1 %vm339_vm1, %v511_v54  ;;  %v1930_v54 = vsel %vm654_vm0, %v6369_v49, 0  ;;  %v7204_v58 = vadd.f32 %v851_v53, %v672_v50  ;;  %v6391_v53 = vld [vmem:[%s8875_s1 + $0xc] sm:$0x3] }
  0xc3   : > { %1939 = vmatpush.bf16.msrb.mxu1 %v1930_v54  ;;  %v6413_v54 = vld [vmem:[%s8875_s1 + $0xe] sm:$0x3] }
  0xc4   : > { %v545_v3 = vld [vmem:[#allocation2 + $0xa2] sm:$0xff] }
  0xc5   : > { %v546_v4 = vld [vmem:[#allocation2 + $0xaa] sm:$0xff]  ;;  %v482_v5 = vld [vmem:[#allocation2 + $0xa1] sm:$0xff] }
  0xc6   : > { %v577_v11 = vpack.c.bf16 %v546_v4, %v545_v3  ;;  %v1818_v32 = vld [vmem:[#allocation2 + $0xa5] sm:$0xff] }
  0xc9   : > { %v7217_v19 = vpop.f32.mrf.mxu1 }
  0xca   : > { %6277 = vmatmul.msk.bf16.gmra.mxu2 %vm339_vm1, %v584_v0  ;;  %v501_v0 = vld [vmem:[#allocation2 + $0x139] sm:$0xff] }
  0xcb   : > { %6298 = vmatmul.msk.bf16.gmra.mxu3 %vm339_vm1, %v521_v1  ;;  %v586_v1 = vpack.c.bf16 %v564_v62, %v563_v59  ;;  %v523_v2 = vpack.c.bf16 %v501_v0, %v500_v63  ;;  %v2214_v63 = vsel %vm654_vm0, %v6391_v53, 0  ;;  %v2498_v0 = vsel %vm654_vm0, %v6413_v54, 0 }
  0xcc   : > { %2223 = vmatpush.bf16.msra.mxu2 %v2214_v63  ;;  %2507 = vmatpush.bf16.msra.mxu3 %v2498_v0 }
  0xd1   : > { %6268 = vmatmul.msk.bf16.gmra.mxu0 %vm339_vm1, %v575_v7  ;;  %v483_v7 = vld [vmem:[#allocation2 + $0xa9] sm:$0xff] }
  0xd2   : > { %6289 = vmatmul.msk.bf16.gmra.mxu1 %vm339_vm1, %v512_v10  ;;  %v7207_v10 = vld [vmem:[%s7001_s20 + $0x70] sm:$0xff]  ;;  %v514_v14 = vpack.c.bf16 %v483_v7, %v482_v5 }
  0xd3   : > { %8946 = vst [vmem:[#allocation35_spill] sm:$0xff] %v7207_v10  ;;  %v6435_v5 = vld [vmem:[%s8875_s1 + $0x10] sm:$0x3] }
  0xd4   : > { %405 = vst.msk [vmem:[#allocation2 + $0xb5] sm:$0xff] %vm339_vm1, %v7207_v10  ;;  %v2782_v7 = vsel %vm654_vm0, %v6435_v5, 0  ;;  %v950_v5 = vld [vmem:[#allocation2 + $0x13] sm:$0xff] }
  0xd5   : > { %2791 = vmatpush.bf16.msra.mxu0 %v2782_v7  ;;  %v951_v7 = vld [vmem:[#allocation2 + $0x1b] sm:$0xff] }
  0xda   : > { %6278 = vmatmul.msk.bf16.gmra.mxu2 %vm339_vm1, %v585_v34  ;;  %v502_v34 = vld [vmem:[#allocation2 + $0x141] sm:$0xff] }
  0xdb   : > { %6299 = vmatmul.msk.bf16.gmra.mxu3 %vm339_vm1, %v522_v35  ;;  %v503_v35 = vld [vmem:[#allocation2 + $0x149] sm:$0xff]  ;;  %v547_v40 = vld [vmem:[#allocation2 + $0xb2] sm:$0xff]  ;;  %v548_v41 = vld [vmem:[#allocation2 + $0xba] sm:$0xff] }
  0xdc   : > { %v524_v38 = vpack.c.bf16 %v503_v35, %v502_v34  ;;  %v578_v49 = vpack.c.bf16 %v548_v41, %v547_v40  ;;  %v1820_v57 = vld [vmem:[#allocation2 + $0xb5] sm:$0xff] }
  0xe1   : > { %6269 = vmatmul.msk.bf16.gmra.mxu0 %vm339_vm1, %v576_v47  ;;  %v484_v47 = vld [vmem:[#allocation2 + $0xb1] sm:$0xff] }
  0xe2   : > { %6290 = vmatmul.msk.bf16.gmra.mxu1 %vm339_vm1, %v513_v48  ;;  %v485_v48 = vld [vmem:[#allocation2 + $0xb9] sm:$0xff] }
  0xe3   : > { %v515_v50 = vpack.c.bf16 %v485_v48, %v484_v47  ;;  %v1518_v47 = vld [vmem:[#allocation2 + $0x24] sm:$0xff]  ;;  %v1519_v48 = vld [vmem:[#allocation2 + $0x2c] sm:$0xff] }
  0xe4   : > { %v1559_v53 = vpack.c.bf16 %v1519_v48, %v1518_v47  ;;  %v991_v47 = vpack.c.bf16 %v951_v7, %v950_v5  ;;  %v1236_v5 = vld [vmem:[#allocation2 + $0x33] sm:$0xff]  ;;  %v1237_v7 = vld [vmem:[#allocation2 + $0x3b] sm:$0xff] }
  0xea   : > { %6279 = vmatmul.msk.bf16.gmra.mxu2 %vm339_vm1, %v586_v1 }
  0xeb   : > { %6300 = vmatmul.msk.bf16.gmra.mxu3 %vm339_vm1, %v523_v2 }
  0xf1   : > { %6270 = vmatmul.msk.bf16.gmra.mxu0 %vm339_vm1, %v577_v11  ;;  %v567_v11 = vld [vmem:[#allocation2 + $0x152] sm:$0xf] }
  0xf2   : > { %6291 = vmatmul.msk.bf16.gmra.mxu1 %vm339_vm1, %v514_v14  ;;  %v504_v14 = vld [vmem:[#allocation2 + $0x151] sm:$0xf]  ;;  %v588_v40 = vpack.c.bf16 %v567_v11, %v567_v11  ;;  %v1234_v11 = vld [vmem:[#allocation2 + $0x23] sm:$0xff] }
  0xf3   : > { %v525_v41 = vpack.c.bf16 %v504_v14, %v504_v14  ;;  %v1235_v14 = vld [vmem:[#allocation2 + $0x2b] sm:$0xff] }
  0xf4   : > { %v1275_v48 = vpack.c.bf16 %v1235_v14, %v1234_v11 }
  0xfa   : > { %6280 = vmatmul.msk.bf16.gmra.mxu2 %vm339_vm1, %v587_v37 }
  0xfb   : > { %6301 = vmatmul.msk.bf16.gmra.mxu3 %vm339_vm1, %v524_v38 }
  0xfd   : > { %v722_v2 = vpop.f32.mrf.mxu2 }
  0xfe   : > { %v677_v59 = vpop.f32.mrf.mxu0  ;;  %v901_v3 = vpop.f32.mrf.mxu3 }
  0xff   : > { %v856_v62 = vpop.f32.mrf.mxu1  ;;  %v7231_v4 = vadd.f32 %v901_v3, %v722_v2 }
 0x100   : > { %v7229_v1 = vadd.f32 %v856_v62, %v677_v59 }
 0x101   : > { %6271 = vmatmul.msk.bf16.gmra.mxu0 %vm339_vm1, %v578_v49  ;;  %v1802_v49 = vld [vmem:[#allocation2 + $0x25] sm:$0xff] }
 0x102   : > { %6292 = vmatmul.msk.bf16.gmra.mxu1 %vm339_vm1, %v515_v50  ;;  %v1803_v50 = vld [vmem:[#allocation2 + $0x2d] sm:$0xff] }
 0x103   : > { %v1843_v54 = vpack.c.bf16 %v1803_v50, %v1802_v49  ;;  %v1520_v49 = vld [vmem:[#allocation2 + $0x34] sm:$0xff]  ;;  %v1521_v50 = vld [vmem:[#allocation2 + $0x3c] sm:$0xff] }
 0x105   : > { %v724_v35 = vpop.f32.mrf.mxu2 }
 0x106   : > { %v679_v20 = vpop.f32.mrf.mxu0  ;;  %v903_v37 = vpop.f32.mrf.mxu3 }
 0x107   : > { %v858_v21 = vpop.f32.mrf.mxu1  ;;  %v7241_v38 = vadd.f32 %v903_v37, %v724_v35 }
 0x108   : > { %v7239_v34 = vadd.f32 %v858_v21, %v679_v20 }
 0x10a   : > { %6281 = vmatmul.msk.bf16.gmra.mxu2 %vm339_vm1, %v588_v40 }
 0x10b   : > { %6302 = vmatmul.msk.bf16.gmra.mxu3 %vm339_vm1, %v525_v41 }
 0x10d   : > { %v727_v0 = vpop.f32.mrf.mxu2 }
 0x10e   : > { %v682_v59 = vpop.f32.mrf.mxu0  ;;  %v906_v2 = vpop.f32.mrf.mxu3 }
 0x10f   : > { %v861_v62 = vpop.f32.mrf.mxu1  ;;  %v7247_v3 = vadd.f32 %v906_v2, %v727_v0 }
 0x110   : > { %v7245_v63 = vadd.f32 %v861_v62, %v682_v59  ;;  %v1804_v59 = vld [vmem:[#allocation2 + $0x35] sm:$0xff] }
 0x111   : > { %6348 = vmatmul.msk.bf16.vlgmr.msrb.gmra.mxu0 %vm339_vm1, %v1559_v53  ;;  %v1805_v53 = vld [vmem:[#allocation2 + $0x3d] sm:$0xff] }
 0x112   : > { %6370 = vmatmul.msk.bf16.vlgmr.msrb.gmra.mxu1 %vm339_vm1, %v1843_v54  ;;  %v1560_v54 = vpack.c.bf16 %v1521_v50, %v1520_v49  ;;  %v1844_v62 = vpack.c.bf16 %v1805_v53, %v1804_v59  ;;  %v1276_v59 = vpack.c.bf16 %v1237_v7, %v1236_v5  ;;  %v1522_v53 = vld [vmem:[#allocation2 + $0x44] sm:$0xff] }
 0x113   : > { %v1238_v5 = vld [vmem:[#allocation2 + $0x43] sm:$0xff]  ;;  %v1239_v7 = vld [vmem:[#allocation2 + $0x4b] sm:$0xff] }
 0x115   : > { %v729_v37 = vpop.f32.mrf.mxu2 }
 0x116   : > { %v684_v20 = vpop.f32.mrf.mxu0  ;;  %v908_v40 = vpop.f32.mrf.mxu3 }
 0x117   : > { %v863_v21 = vpop.f32.mrf.mxu1  ;;  %v7253_v41 = vadd.f32 %v908_v40, %v729_v37 }
 0x118   : > { %v7251_v35 = vadd.f32 %v863_v21, %v684_v20 }
 0x11a   : > { %6304 = vmatmul.msk.bf16.vlgmr.msrb.gmra.mxu2 %vm339_vm1, %v991_v47 }
 0x11b   : > { %6326 = vmatmul.msk.bf16.vlgmr.msrb.gmra.mxu3 %vm339_vm1, %v1275_v48 }
 0x11d   : > { %v732_v21 = vpop.f32.mrf.mxu2 }
 0x11e   : > { %v687_v0 = vpop.f32.mrf.mxu0  ;;  %v911_v16 = vpop.f32.mrf.mxu3 }
 0x11f   : > { %v866_v2 = vpop.f32.mrf.mxu1  ;;  %v7259_v37 = vadd.f32 %v911_v16, %v732_v21  ;;  %v1807_v16 = vld [vmem:[#allocation2 + $0x4d] sm:$0xff] }
 0x120   : > { %v7257_v20 = vadd.f32 %v866_v2, %v687_v0  ;;  %v1523_v0 = vld [vmem:[#allocation2 + $0x4c] sm:$0xff] }
 0x121   : > { %6349 = vmatmul.msk.bf16.gmra.mxu0 %vm339_vm1, %v1560_v54  ;;  %v1806_v2 = vld [vmem:[#allocation2 + $0x45] sm:$0xff]  ;;  %v1561_v54 = vpack.c.bf16 %v1523_v0, %v1522_v53 }
 0x122   : > { %6371 = vmatmul.msk.bf16.gmra.mxu1 %vm339_vm1, %v1844_v62  ;;  %v1845_v62 = vpack.c.bf16 %v1807_v16, %v1806_v2  ;;  %v1524_v16 = vld [vmem:[#allocation2 + $0x54] sm:$0xff] }
 0x125   : > { %v734_v47 = vpop.f32.mrf.mxu2 }
 0x126   : > { %v689_v11 = vpop.f32.mrf.mxu0  ;;  %v913_v49 = vpop.f32.mrf.mxu3 }
 0x127   : > { %v868_v14 = vpop.f32.mrf.mxu1  ;;  %v7265_v50 = vadd.f32 %v913_v49, %v734_v47 }
 0x128   : > { %v7263_v40 = vadd.f32 %v868_v14, %v689_v11 }
 0x12a   : > { %6305 = vmatmul.msk.bf16.gmra.mxu2 %vm339_vm1, %v1275_v48 }
 0x12b   : > { %6327 = vmatmul.msk.bf16.gmra.mxu3 %vm339_vm1, %v1276_v59 }
 0x12d   : > { %v737_v11 = vpop.f32.mrf.mxu2 }
 0x12e   : > { %v692_v21 = vpop.f32.mrf.mxu0  ;;  %v916_v14 = vpop.f32.mrf.mxu3 }
 0x12f   : > { %v871_v15 = vpop.f32.mrf.mxu1  ;;  %v7271_v55 = vadd.f32 %v916_v14, %v737_v11  ;;  %v1809_v11 = vld [vmem:[#allocation2 + $0x5d] sm:$0xff] }
 0x130   : > { %v7269_v56 = vadd.f32 %v871_v15, %v692_v21  ;;  %v1277_v15 = vpack.c.bf16 %v1239_v7, %v1238_v5  ;;  %v1525_v21 = vld [vmem:[#allocation2 + $0x5c] sm:$0xff]  ;;  %v1240_v5 = vld [vmem:[#allocation2 + $0x53] sm:$0xff] }
 0x131   : > { %6350 = vmatmul.msk.bf16.gmra.mxu0 %vm339_vm1, %v1561_v54  ;;  %v1562_v54 = vpack.c.bf16 %v1525_v21, %v1524_v16  ;;  %v1241_v7 = vld [vmem:[#allocation2 + $0x5b] sm:$0xff] }
 0x132   : > { %6372 = vmatmul.msk.bf16.gmra.mxu1 %vm339_vm1, %v1845_v62  ;;  %v1846_v62 = vpack.c.bf16 %v1809_v11, %v1808_v36  ;;  %v1526_v11 = vld [vmem:[#allocation2 + $0x64] sm:$0xff] }
 0x135   : > { %v739_v53 = vpop.f32.mrf.mxu2 }
 0x136   : > { %v694_v47 = vpop.f32.mrf.mxu0  ;;  %v918_v0 = vpop.f32.mrf.mxu3 }
 0x137   : > { %v873_v48 = vpop.f32.mrf.mxu1  ;;  %v7277_v2 = vadd.f32 %v918_v0, %v739_v53 }
 0x138   : > { %v7275_v49 = vadd.f32 %v873_v48, %v694_v47 }
 0x13a   : > { %6306 = vmatmul.msk.bf16.gmra.mxu2 %vm339_vm1, %v1276_v59 }
 0x13b   : > { %6328 = vmatmul.msk.bf16.gmra.mxu3 %vm339_vm1, %v1277_v15 }
 0x13d   : > { %v742_v47 = vpop.f32.mrf.mxu2 }
 0x13e   : > { %v697_v14 = vpop.f32.mrf.mxu0  ;;  %v921_v48 = vpop.f32.mrf.mxu3 }
 0x13f   : > { %v876_v13 = vpop.f32.mrf.mxu1  ;;  %v7283_v61 = vadd.f32 %v921_v48, %v742_v47  ;;  %v1811_v47 = vld [vmem:[#allocation2 + $0x6d] sm:$0xff] }
 0x140   : > { %v7281_v12 = vadd.f32 %v876_v13, %v697_v14  ;;  %v1278_v13 = vpack.c.bf16 %v1241_v7, %v1240_v5  ;;  %v1527_v14 = vld [vmem:[#allocation2 + $0x6c] sm:$0xff]  ;;  %v1242_v5 = vld [vmem:[#allocation2 + $0x63] sm:$0xff] }
 0x141   : > { %6351 = vmatmul.msk.bf16.gmra.mxu0 %vm339_vm1, %v1562_v54  ;;  %v1563_v54 = vpack.c.bf16 %v1527_v14, %v1526_v11  ;;  %v1243_v7 = vld [vmem:[#allocation2 + $0x6b] sm:$0xff] }
 0x142   : > { %6373 = vmatmul.msk.bf16.gmra.mxu1 %vm339_vm1, %v1846_v62  ;;  %v1847_v62 = vpack.c.bf16 %v1811_v47, %v1810_v60  ;;  %v1528_v47 = vld [vmem:[#allocation2 + $0x74] sm:$0xff] }
 0x145   : > { %v744_v16 = vpop.f32.mrf.mxu2 }
 0x146   : > { %v699_v53 = vpop.f32.mrf.mxu0  ;;  %v923_v36 = vpop.f32.mrf.mxu3 }
 0x147   : > { %v878_v59 = vpop.f32.mrf.mxu1  ;;  %v7289_v21 = vadd.f32 %v923_v36, %v744_v16 }
 0x148   : > { %v7287_v0 = vadd.f32 %v878_v59, %v699_v53 }
 0x14a   : > { %6307 = vmatmul.msk.bf16.gmra.mxu2 %vm339_vm1, %v1277_v15 }
 0x14b   : > { %6329 = vmatmul.msk.bf16.gmra.mxu3 %vm339_vm1, %v1278_v13 }
 0x14d   : > { %v747_v53 = vpop.f32.mrf.mxu2 }
 0x14e   : > { %v702_v48 = vpop.f32.mrf.mxu0  ;;  %v926_v59 = vpop.f32.mrf.mxu3 }
 0x14f   : > { %v881_v46 = vpop.f32.mrf.mxu1  ;;  %v7295_v30 = vadd.f32 %v926_v59, %v747_v53  ;;  %v1813_v53 = vld [vmem:[#allocation2 + $0x7d] sm:$0xff] }
 0x150   : > { %v7293_v45 = vadd.f32 %v881_v46, %v702_v48  ;;  %v1279_v46 = vpack.c.bf16 %v1243_v7, %v1242_v5  ;;  %v1529_v48 = vld [vmem:[#allocation2 + $0x7c] sm:$0xff]  ;;  %v1244_v5 = vld [vmem:[#allocation2 + $0x73] sm:$0xff] }
 0x151   : > { %6352 = vmatmul.msk.bf16.gmra.mxu0 %vm339_vm1, %v1563_v54  ;;  %v1564_v54 = vpack.c.bf16 %v1529_v48, %v1528_v47  ;;  %v1245_v7 = vld [vmem:[#allocation2 + $0x7b] sm:$0xff] }
 0x152   : > { %6374 = vmatmul.msk.bf16.gmra.mxu1 %vm339_vm1, %v1847_v62  ;;  %v1848_v62 = vpack.c.bf16 %v1813_v53, %v1812_v27  ;;  %v1530_v53 = vld [vmem:[#allocation2 + $0x84] sm:$0xff] }
 0x155   : > { %v749_v11 = vpop.f32.mrf.mxu2 }
 0x156   : > { %v704_v16 = vpop.f32.mrf.mxu0  ;;  %v928_v60 = vpop.f32.mrf.mxu3 }
 0x157   : > { %v883_v15 = vpop.f32.mrf.mxu1  ;;  %v7301_v14 = vadd.f32 %v928_v60, %v749_v11 }
 0x158   : > { %v7299_v36 = vadd.f32 %v883_v15, %v704_v16 }
 0x15a   : > { %6308 = vmatmul.msk.bf16.gmra.mxu2 %vm339_vm1, %v1278_v13 }
 0x15b   : > { %6330 = vmatmul.msk.bf16.gmra.mxu3 %vm339_vm1, %v1279_v46 }
 0x15d   : > { %v752_v16 = vpop.f32.mrf.mxu2 }
 0x15e   : > { %v707_v59 = vpop.f32.mrf.mxu0  ;;  %v931_v15 = vpop.f32.mrf.mxu3 }
 0x15f   : > { %v886_v26 = vpop.f32.mrf.mxu1  ;;  %v7307_v24 = vadd.f32 %v931_v15, %v752_v16  ;;  %v1815_v16 = vld [vmem:[#allocation2 + $0x8d] sm:$0xff] }
 0x160   : > { %v7305_v25 = vadd.f32 %v886_v26, %v707_v59  ;;  %v1280_v26 = vpack.c.bf16 %v1245_v7, %v1244_v5  ;;  %v1531_v59 = vld [vmem:[#allocation2 + $0x8c] sm:$0xff]  ;;  %v1246_v5 = vld [vmem:[#allocation2 + $0x83] sm:$0xff] }
 0x161   : > { %6353 = vmatmul.msk.bf16.gmra.mxu0 %vm339_vm1, %v1564_v54  ;;  %v1565_v54 = vpack.c.bf16 %v1531_v59, %v1530_v53  ;;  %v1247_v7 = vld [vmem:[#allocation2 + $0x8b] sm:$0xff] }
 0x162   : > { %6375 = vmatmul.msk.bf16.gmra.mxu1 %vm339_vm1, %v1848_v62  ;;  %v1849_v62 = vpack.c.bf16 %v1815_v16, %v1814_v23  ;;  %v1532_v16 = vld [vmem:[#allocation2 + $0x94] sm:$0xff] }
 0x165   : > { %v754_v47 = vpop.f32.mrf.mxu2 }
 0x166   : > { %v709_v11 = vpop.f32.mrf.mxu0  ;;  %v933_v27 = vpop.f32.mrf.mxu3 }
 0x167   : > { %v888_v13 = vpop.f32.mrf.mxu1  ;;  %v7313_v48 = vadd.f32 %v933_v27, %v754_v47 }
 0x168   : > { %v7311_v60 = vadd.f32 %v888_v13, %v709_v11 }
 0x16a   : > { %6309 = vmatmul.msk.bf16.gmra.mxu2 %vm339_vm1, %v1279_v46 }
 0x16b   : > { %6331 = vmatmul.msk.bf16.gmra.mxu3 %vm339_vm1, %v1280_v26 }
 0x16d   : > { %v757_v11 = vpop.f32.mrf.mxu2 }
 0x16e   : > { %v712_v15 = vpop.f32.mrf.mxu0  ;;  %v936_v13 = vpop.f32.mrf.mxu3 }
 0x16f   : > { %v891_v10 = vpop.f32.mrf.mxu1  ;;  %v7319_v43 = vadd.f32 %v936_v13, %v757_v11  ;;  %v1817_v11 = vld [vmem:[#allocation2 + $0x9d] sm:$0xff] }
 0x170   : > { %v7317_v44 = vadd.f32 %v891_v10, %v712_v15  ;;  %v1281_v10 = vpack.c.bf16 %v1247_v7, %v1246_v5  ;;  %v1533_v15 = vld [vmem:[#allocation2 + $0x9c] sm:$0xff]  ;;  %v1248_v5 = vld [vmem:[#allocation2 + $0x93] sm:$0xff] }
 0x171   : > { %6354 = vmatmul.msk.bf16.gmra.mxu0 %vm339_vm1, %v1565_v54  ;;  %v1566_v54 = vpack.c.bf16 %v1533_v15, %v1532_v16  ;;  %v1249_v7 = vld [vmem:[#allocation2 + $0x9b] sm:$0xff] }
 0x172   : > { %6376 = vmatmul.msk.bf16.gmra.mxu1 %vm339_vm1, %v1849_v62  ;;  %v1850_v62 = vpack.c.bf16 %v1817_v11, %v1816_v6  ;;  %v1534_v11 = vld [vmem:[#allocation2 + $0xa4] sm:$0xff] }
 0x175   : > { %v759_v53 = vpop.f32.mrf.mxu2 }
 0x176   : > { %v714_v47 = vpop.f32.mrf.mxu0  ;;  %v938_v23 = vpop.f32.mrf.mxu3 }
 0x177   : > { %v893_v46 = vpop.f32.mrf.mxu1  ;;  %v7325_v59 = vadd.f32 %v938_v23, %v759_v53 }
 0x178   : > { %v7323_v27 = vadd.f32 %v893_v46, %v714_v47 }
 0x179   : > { %8947 = vst [vmem:[#allocation36_spill] sm:$0xff] %v7325_v59  ;;  %v1823_v59 = vld [vmem:[#allocation2 + $0xcd] sm:$0xff] }
 0x17a   : > { %6310 = vmatmul.msk.bf16.gmra.mxu2 %vm339_vm1, %v1280_v26 }
 0x17b   : > { %6332 = vmatmul.msk.bf16.gmra.mxu3 %vm339_vm1, %v1281_v10 }
 0x17d   : > { %v762_v47 = vpop.f32.mrf.mxu2 }
 0x17e   : > { %v717_v13 = vpop.f32.mrf.mxu0  ;;  %v941_v46 = vpop.f32.mrf.mxu3 }
 0x17f   : > { %v896_v52 = vpop.f32.mrf.mxu1  ;;  %v7331_v33 = vadd.f32 %v941_v46, %v762_v47  ;;  %v1819_v47 = vld [vmem:[#allocation2 + $0xad] sm:$0xff] }
 0x180   : > { %v7329_v51 = vadd.f32 %v896_v52, %v717_v13  ;;  %v1282_v52 = vpack.c.bf16 %v1249_v7, %v1248_v5  ;;  %v1535_v13 = vld [vmem:[#allocation2 + $0xac] sm:$0xff]  ;;  %v6457_v5 = vld [vmem:[%s8876_s2 + $0x2] sm:$0x3] }
 0x181   : > { %8948 = vst [vmem:[#allocation37_spill] sm:$0xff] %v7331_v33  ;;  %6355 = vmatmul.msk.bf16.gmra.mxu0 %vm339_vm1, %v1566_v54  ;;  %v1567_v54 = vpack.c.bf16 %v1535_v13, %v1534_v11  ;;  %v1250_v7 = vld [vmem:[#allocation2 + $0xa3] sm:$0xff] }
 0x182   : > { %6377 = vmatmul.msk.bf16.gmra.mxu1 %vm339_vm1, %v1850_v62  ;;  %v1851_v62 = vpack.c.bf16 %v1819_v47, %v1818_v32 }
 0x185   : > { %v764_v16 = vpop.f32.mrf.mxu2 }
 0x186   : > { %v719_v53 = vpop.f32.mrf.mxu0  ;;  %v943_v6 = vpop.f32.mrf.mxu3 }
 0x187   : > { %v898_v26 = vpop.f32.mrf.mxu1  ;;  %v7337_v15 = vadd.f32 %v943_v6, %v764_v16  ;;  %v1251_v16 = vld [vmem:[#allocation2 + $0xab] sm:$0xff] }
 0x188   : > { %v7335_v23 = vadd.f32 %v898_v26, %v719_v53  ;;  %v1283_v47 = vpack.c.bf16 %v1251_v16, %v1250_v7 }
 0x189   : > { %8949 = vst [vmem:[#allocation38_spill] sm:$0xff] %v7337_v15 }
 0x18a   : > { %6311 = vmatmul.msk.bf16.gmra.mxu2 %vm339_vm1, %v1281_v10  ;;  %v3597_v10 = vsel %vm654_vm0, %v6457_v5, 0 }
 0x18b   : > { %6333 = vmatmul.msk.bf16.gmra.mxu3 %vm339_vm1, %v1282_v52  ;;  %3606 = vmatpush.bf16.msra.mxu1 %v3597_v10 }
 0x18d   : > { %v767_v8 = vpop.f32.mrf.mxu2 }
 0x18e   : > { %v1657_v46 = vpop.f32.mrf.mxu0  ;;  %v946_v53 = vpop.f32.mrf.mxu3 }
 0x18f   : > { %v1941_v9 = vpop.f32.mrf.mxu1  ;;  %v7341_v26 = vadd.f32 %v946_v53, %v767_v8  ;;  %v1536_v8 = vld [vmem:[#allocation2 + $0xb4] sm:$0xff]  ;;  %v1537_v53 = vld [vmem:[#allocation2 + $0xbc] sm:$0xff] }
 0x191   : > { %8950 = vst [vmem:[#allocation39_spill] sm:$0xff] %v7341_v26  ;;  %6356 = vmatmul.msk.bf16.gmra.mxu0 %vm339_vm1, %v1567_v54  ;;  %v1821_v54 = vld [vmem:[#allocation2 + $0xbd] sm:$0xff] }
 0x192   : > { %6378 = vmatmul.msk.bf16.gmra.mxu1 %vm339_vm1, %v1851_v62  ;;  %v1568_v62 = vpack.c.bf16 %v1537_v53, %v1536_v8  ;;  %v1852_v42 = vpack.c.bf16 %v1821_v54, %v1820_v57  ;;  %v849_v8 = vadd.f32 %v7184_v31, %v7182_v22 }
 0x195   : > { %v769_v11 = vpop.f32.mrf.mxu2 }
 0x196   : > { %v1659_v32 = vpop.f32.mrf.mxu0  ;;  %v948_v13 = vpop.f32.mrf.mxu3  ;;  %v1252_v11 = vld [vmem:[#allocation2 + $0xb3] sm:$0xff] }
 0x197   : > { %v1943_v6 = vpop.f32.mrf.mxu1  ;;  %v1253_v13 = vld [vmem:[#allocation2 + $0xbb] sm:$0xff] }
 0x198   : > { %v1284_v33 = vpack.c.bf16 %v1253_v13, %v1252_v11  ;;  %v1254_v13 = vld [vmem:[#allocation2 + $0xc3] sm:$0xff] }
 0x19a   : > { %6312 = vmatmul.msk.bf16.gmra.mxu2 %vm339_vm1, %v1282_v52 }
 0x19b   : > { %6334 = vmatmul.msk.bf16.gmra.mxu3 %vm339_vm1, %v1283_v47 }
 0x19d   : > { %v1089_v10 = vpop.f32.mrf.mxu2 }
 0x19e   : > { %v1662_v39 = vpop.f32.mrf.mxu0  ;;  %v1373_v29 = vpop.f32.mrf.mxu3  ;;  %v1193_v28 = vadd.f32 %v1089_v10, %v7174_v17  ;;  %v1538_v17 = vld [vmem:[#allocation2 + $0xc4] sm:$0xff]  ;;  %v1539_v10 = vld [vmem:[#allocation2 + $0xcc] sm:$0xff] }
 0x19f   : > { %v1946_v5 = vpop.f32.mrf.mxu1 }
 0x1a0   : > { %v1477_v7 = vadd.f32 %v1373_v29, %v1193_v28  ;;  %v1569_v29 = vpack.c.bf16 %v1539_v10, %v1538_v17 }
 0x1a1   : > { %6357 = vmatmul.msk.bf16.gmra.mxu0 %vm339_vm1, %v1568_v62  ;;  %v1822_v62 = vld [vmem:[#allocation2 + $0xc5] sm:$0xff] }
 0x1a2   : > { %6379 = vmatmul.msk.bf16.gmra.mxu1 %vm339_vm1, %v1852_v42  ;;  %v1761_v16 = vadd.f32 %v1657_v46, %v1477_v7  ;;  %v1853_v46 = vpack.c.bf16 %v1823_v59, %v1822_v62  ;;  %v854_v59 = vadd.f32 %v7217_v19, %v7215_v18 }
 0x1a4   : > { %v7356_v57 = vadd.f32 %v1941_v9, %v1761_v16 }
 0x1a5   : > { %v1091_v53 = vpop.f32.mrf.mxu2 }
 0x1a6   : > { %v1664_v26 = vpop.f32.mrf.mxu0  ;;  %v1375_v54 = vpop.f32.mrf.mxu3  ;;  %v1194_v15 = vadd.f32 %v1091_v53, %v849_v8 }
 0x1a7   : > { %v1948_v52 = vpop.f32.mrf.mxu1 }
 0x1a8   : > { %v1478_v42 = vadd.f32 %v1375_v54, %v1194_v15 }
 0x1aa   : > { %v1762_v28 = vadd.f32 %v1659_v32, %v1478_v42  ;;  %6313 = vmatmul.msk.bf16.gmra.mxu2 %vm339_vm1, %v1283_v47  ;;  %v1255_v47 = vld [vmem:[#allocation2 + $0xcb] sm:$0xff]  ;;  %v1541_v42 = vld [vmem:[#allocation2 + $0xdc] sm:$0xff] }
 0x1ab   : > { %6335 = vmatmul.msk.bf16.gmra.mxu3 %vm339_vm1, %v1284_v33  ;;  %v1285_v62 = vpack.c.bf16 %v1255_v47, %v1254_v13  ;;  %v1256_v47 = vld [vmem:[#allocation2 + $0xd3] sm:$0xff] }
 0x1ac   : > { %v7360_v9 = vadd.f32 %v1943_v6, %v1762_v28  ;;  %v1824_v28 = vld [vmem:[#allocation2 + $0xd5] sm:$0xff] }
 0x1ad   : > { %v1094_v31 = vpop.f32.mrf.mxu2 }
 0x1ae   : > { %v1667_v7 = vpop.f32.mrf.mxu0  ;;  %v1378_v16 = vpop.f32.mrf.mxu3  ;;  %v1195_v11 = vadd.f32 %v1094_v31, %v7204_v58  ;;  %v1540_v58 = vld [vmem:[#allocation2 + $0xd4] sm:$0xff] }
 0x1af   : > { %v1951_v22 = vpop.f32.mrf.mxu1 }
 0x1b0   : > { %v1479_v15 = vadd.f32 %v1378_v16, %v1195_v11 }
 0x1b1   : > { %6358 = vmatmul.msk.bf16.gmra.mxu0 %vm339_vm1, %v1569_v29  ;;  %v1825_v29 = vld [vmem:[#allocation2 + $0xdd] sm:$0xff] }
 0x1b2   : > { %6380 = vmatmul.msk.bf16.gmra.mxu1 %vm339_vm1, %v1853_v46  ;;  %v1763_v32 = vadd.f32 %v1662_v39, %v1479_v15  ;;  %v1570_v39 = vpack.c.bf16 %v1541_v42, %v1540_v58  ;;  %v1854_v16 = vpack.c.bf16 %v1825_v29, %v1824_v28  ;;  %v1542_v28 = vld [vmem:[#allocation2 + $0xe4] sm:$0xff]  ;;  %v1543_v29 = vld [vmem:[#allocation2 + $0xec] sm:$0xff] }
 0x1b4   : > { %v7367_v54 = vadd.f32 %v1946_v5, %v1763_v32 }
 0x1b5   : > { %v1096_v6 = vpop.f32.mrf.mxu2 }
 0x1b6   : > { %v1669_v8 = vpop.f32.mrf.mxu0  ;;  %v1380_v17 = vpop.f32.mrf.mxu3  ;;  %v1196_v10 = vadd.f32 %v1096_v6, %v854_v59 }
 0x1b7   : > { %v1953_v53 = vpop.f32.mrf.mxu1 }
 0x1b8   : > { %v1480_v46 = vadd.f32 %v1380_v17, %v1196_v10 }
 0x1ba   : > { %v1764_v31 = vadd.f32 %v1664_v26, %v1480_v46  ;;  %6314 = vmatmul.msk.bf16.gmra.mxu2 %vm339_vm1, %v1284_v33  ;;  %v1257_v33 = vld [vmem:[#allocation2 + $0xdb] sm:$0xff]  ;;  %v1827_v46 = vld [vmem:[#allocation2 + $0xed] sm:$0xff] }
 0x1bb   : > { %6336 = vmatmul.msk.bf16.gmra.mxu3 %vm339_vm1, %v1285_v62  ;;  %v1286_v42 = vpack.c.bf16 %v1257_v33, %v1256_v47  ;;  %v1258_v47 = vld [vmem:[#allocation2 + $0xe3] sm:$0xff] }
 0x1bc   : > { %v7371_v19 = vadd.f32 %v1948_v52, %v1764_v31 }
 0x1bd   : > { %v1099_v5 = vpop.f32.mrf.mxu2 }
 0x1be   : > { %v1672_v11 = vpop.f32.mrf.mxu0  ;;  %v1383_v15 = vpop.f32.mrf.mxu3  ;;  %v1197_v32 = vadd.f32 %v1099_v5, %v7229_v1  ;;  %v1826_v1 = vld [vmem:[#allocation2 + $0xe5] sm:$0xff] }
 0x1bf   : > { %v1956_v18 = vpop.f32.mrf.mxu1 }
 0x1c0   : > { %v1481_v13 = vadd.f32 %v1383_v15, %v1197_v32 }
 0x1c1   : > { %6359 = vmatmul.msk.bf16.gmra.mxu0 %vm339_vm1, %v1570_v39 }
 0x1c2   : > { %6381 = vmatmul.msk.bf16.gmra.mxu1 %vm339_vm1, %v1854_v16  ;;  %v1765_v26 = vadd.f32 %v1667_v7, %v1481_v13  ;;  %v1571_v7 = vpack.c.bf16 %v1543_v29, %v1542_v28  ;;  %v1855_v16 = vpack.c.bf16 %v1827_v46, %v1826_v1  ;;  %v1544_v1 = vld [vmem:[#allocation2 + $0xf4] sm:$0xff]  ;;  %v1545_v46 = vld [vmem:[#allocation2 + $0xfc] sm:$0xff] }
 0x1c4   : > { %v7376_v17 = vadd.f32 %v1951_v22, %v1765_v26 }
 0x1c5   : > { %v1101_v10 = vpop.f32.mrf.mxu2 }
 0x1c6   : > { %v1674_v59 = vpop.f32.mrf.mxu0  ;;  %v1385_v58 = vpop.f32.mrf.mxu3  ;;  %v1198_v52 = vadd.f32 %v1101_v10, %v7239_v34 }
 0x1c7   : > { %v1958_v6 = vpop.f32.mrf.mxu1 }
 0x1c8   : > { %v1482_v31 = vadd.f32 %v1385_v58, %v1198_v52 }
 0x1ca   : > { %v1766_v39 = vadd.f32 %v1669_v8, %v1482_v31  ;;  %6315 = vmatmul.msk.bf16.gmra.mxu2 %vm339_vm1, %v1285_v62  ;;  %v1259_v62 = vld [vmem:[#allocation2 + $0xeb] sm:$0xff]  ;;  %v1829_v31 = vld [vmem:[#allocation2 + $0xfd] sm:$0xff] }
 0x1cb   : > { %6337 = vmatmul.msk.bf16.gmra.mxu3 %vm339_vm1, %v1286_v42  ;;  %v1287_v29 = vpack.c.bf16 %v1259_v62, %v1258_v47  ;;  %v1260_v47 = vld [vmem:[#allocation2 + $0xf3] sm:$0xff] }
 0x1cc   : > { %v7381_v15 = vadd.f32 %v1953_v53, %v1766_v39 }
 0x1cd   : > { %v1104_v32 = vpop.f32.mrf.mxu2 }
 0x1ce   : > { %v1677_v5 = vpop.f32.mrf.mxu0  ;;  %v1388_v13 = vpop.f32.mrf.mxu3  ;;  %v1199_v34 = vadd.f32 %v1104_v32, %v7245_v63  ;;  %v1828_v63 = vld [vmem:[#allocation2 + $0xf5] sm:$0xff] }
 0x1cf   : > { %v1961_v22 = vpop.f32.mrf.mxu1 }
 0x1d0   : > { %v1483_v26 = vadd.f32 %v1388_v13, %v1199_v34 }
 0x1d1   : > { %6360 = vmatmul.msk.bf16.gmra.mxu0 %vm339_vm1, %v1571_v7 }
 0x1d2   : > { %6382 = vmatmul.msk.bf16.gmra.mxu1 %vm339_vm1, %v1855_v16  ;;  %v1767_v8 = vadd.f32 %v1672_v11, %v1483_v26  ;;  %v1572_v11 = vpack.c.bf16 %v1545_v46, %v1544_v1  ;;  %v1856_v16 = vpack.c.bf16 %v1829_v31, %v1828_v63  ;;  %v1546_v63 = vld [vmem:[#allocation2 + $0x104] sm:$0xff]  ;;  %v1547_v31 = vld [vmem:[#allocation2 + $0x10c] sm:$0xff] }
 0x1d4   : > { %v7386_v58 = vadd.f32 %v1956_v18, %v1767_v8 }
 0x1d5   : > { %v1106_v52 = vpop.f32.mrf.mxu2 }
 0x1d6   : > { %v1679_v33 = vpop.f32.mrf.mxu0  ;;  %v1390_v28 = vpop.f32.mrf.mxu3  ;;  %v1200_v53 = vadd.f32 %v1106_v52, %v7251_v35 }
 0x1d7   : > { %v1963_v10 = vpop.f32.mrf.mxu1 }
 0x1d8   : > { %v1484_v39 = vadd.f32 %v1390_v28, %v1200_v53 }
 0x1da   : > { %v1768_v7 = vadd.f32 %v1674_v59, %v1484_v39  ;;  %6316 = vmatmul.msk.bf16.gmra.mxu2 %vm339_vm1, %v1286_v42  ;;  %v1261_v42 = vld [vmem:[#allocation2 + $0xfb] sm:$0xff]  ;;  %v1831_v39 = vld [vmem:[#allocation2 + $0x10d] sm:$0xff] }
 0x1db   : > { %6338 = vmatmul.msk.bf16.gmra.mxu3 %vm339_vm1, %v1287_v29  ;;  %v1288_v46 = vpack.c.bf16 %v1261_v42, %v1260_v47  ;;  %v1262_v47 = vld [vmem:[#allocation2 + $0x103] sm:$0xff] }
 0x1dc   : > { %v7391_v13 = vadd.f32 %v1958_v6, %v1768_v7 }
 0x1dd   : > { %v1109_v34 = vpop.f32.mrf.mxu2 }
 0x1de   : > { %v1682_v32 = vpop.f32.mrf.mxu0  ;;  %v1393_v26 = vpop.f32.mrf.mxu3  ;;  %v1201_v35 = vadd.f32 %v1109_v34, %v7257_v20  ;;  %v1830_v20 = vld [vmem:[#allocation2 + $0x105] sm:$0xff] }
 0x1df   : > { %v1966_v18 = vpop.f32.mrf.mxu1 }
 0x1e0   : > { %v1485_v8 = vadd.f32 %v1393_v26, %v1201_v35 }
 0x1e1   : > { %6361 = vmatmul.msk.bf16.gmra.mxu0 %vm339_vm1, %v1572_v11 }
 0x1e2   : > { %6383 = vmatmul.msk.bf16.gmra.mxu1 %vm339_vm1, %v1856_v16  ;;  %v1769_v59 = vadd.f32 %v1677_v5, %v1485_v8  ;;  %v1573_v5 = vpack.c.bf16 %v1547_v31, %v1546_v63  ;;  %v1857_v16 = vpack.c.bf16 %v1831_v39, %v1830_v20  ;;  %v1548_v20 = vld [vmem:[#allocation2 + $0x114] sm:$0xff]  ;;  %v1549_v39 = vld [vmem:[#allocation2 + $0x11c] sm:$0xff] }
 0x1e4   : > { %v7396_v28 = vadd.f32 %v1961_v22, %v1769_v59 }
 0x1e5   : > { %v1111_v53 = vpop.f32.mrf.mxu2 }
 0x1e6   : > { %v1684_v62 = vpop.f32.mrf.mxu0  ;;  %v1395_v1 = vpop.f32.mrf.mxu3  ;;  %v1202_v6 = vadd.f32 %v1111_v53, %v7263_v40 }
 0x1e7   : > { %v1968_v52 = vpop.f32.mrf.mxu1 }
 0x1e8   : > { %v1486_v7 = vadd.f32 %v1395_v1, %v1202_v6 }
 0x1ea   : > { %v1770_v11 = vadd.f32 %v1679_v33, %v1486_v7  ;;  %6317 = vmatmul.msk.bf16.gmra.mxu2 %vm339_vm1, %v1287_v29  ;;  %v1263_v29 = vld [vmem:[#allocation2 + $0x10b] sm:$0xff]  ;;  %v1833_v7 = vld [vmem:[#allocation2 + $0x11d] sm:$0xff] }
 0x1eb   : > { %6339 = vmatmul.msk.bf16.gmra.mxu3 %vm339_vm1, %v1288_v46  ;;  %v1289_v31 = vpack.c.bf16 %v1263_v29, %v1262_v47  ;;  %v1264_v47 = vld [vmem:[#allocation2 + $0x113] sm:$0xff]  ;;  %v1265_v29 = vld [vmem:[#allocation2 + $0x11b] sm:$0xff] }
 0x1ec   : > { %v7401_v26 = vadd.f32 %v1963_v10, %v1770_v11 }
 0x1ed   : > { %v1114_v35 = vpop.f32.mrf.mxu2 }
 0x1ee   : > { %v1687_v34 = vpop.f32.mrf.mxu0  ;;  %v1398_v8 = vpop.f32.mrf.mxu3  ;;  %v1203_v40 = vadd.f32 %v1114_v35, %v7269_v56  ;;  %v1832_v56 = vld [vmem:[#allocation2 + $0x115] sm:$0xff] }
 0x1ef   : > { %v1971_v22 = vpop.f32.mrf.mxu1 }
 0x1f0   : > { %v1487_v59 = vadd.f32 %v1398_v8, %v1203_v40 }
 0x1f1   : > { %6362 = vmatmul.msk.bf16.gmra.mxu0 %vm339_vm1, %v1573_v5 }
 0x1f2   : > { %6384 = vmatmul.msk.bf16.gmra.mxu1 %vm339_vm1, %v1857_v16  ;;  %v1771_v33 = vadd.f32 %v1682_v32, %v1487_v59  ;;  %v1574_v32 = vpack.c.bf16 %v1549_v39, %v1548_v20  ;;  %v1858_v16 = vpack.c.bf16 %v1833_v7, %v1832_v56  ;;  %v1290_v56 = vpack.c.bf16 %v1265_v29, %v1264_v47  ;;  %v1550_v7 = vld [vmem:[#allocation2 + $0x124] sm:$0xff] }
 0x1f3   : > { %v1266_v29 = vld [vmem:[#allocation2 + $0x123] sm:$0xff] }
 0x1f4   : > { %v7406_v1 = vadd.f32 %v1966_v18, %v1771_v33 }
 0x1f5   : > { %v1116_v6 = vpop.f32.mrf.mxu2 }
 0x1f6   : > { %v1689_v42 = vpop.f32.mrf.mxu0  ;;  %v1400_v63 = vpop.f32.mrf.mxu3  ;;  %v1204_v10 = vadd.f32 %v1116_v6, %v7275_v49 }
 0x1f7   : > { %v1973_v53 = vpop.f32.mrf.mxu1 }
 0x1f8   : > { %v1488_v11 = vadd.f32 %v1400_v63, %v1204_v10 }
 0x1fa   : > { %v1772_v5 = vadd.f32 %v1684_v62, %v1488_v11  ;;  %6318 = vmatmul.msk.bf16.gmra.mxu2 %vm339_vm1, %v1288_v46  ;;  %v423_v62 = vld [vmem:[%s8881_s7] sm:$0xff]  ;;  %v6735_v46 = vmov 0   ;;  %v424_v11 = vld [vmem:[%s8881_s7 + $0x8] sm:$0xff] }
 0x1fb   : > { %6340 = vmatmul.msk.bf16.gmra.mxu3 %vm339_vm1, %v1289_v31  ;;  %6715 = vset.pattern.permute.xlu0 %v6735_v46 }
 0x1fc   : > { %v7411_v8 = vadd.f32 %v1968_v52, %v1772_v5  ;;  %6716 = vset.pattern.permute.xlu1 %v6735_v46  ;;  %3071 = vperm.xlu0 %6715, %v423_v62   ;;  %v1551_v5 = vld [vmem:[#allocation2 + $0x12c] sm:$0xff] }
 0x1fd   : > { %v1119_v40 = vpop.f32.mrf.mxu2  ;;  %6717 = vset.pattern.permute.xlu2 %v6735_v46 }
 0x1fe   : > { %v1692_v35 = vpop.f32.mrf.mxu0  ;;  %v1403_v59 = vpop.f32.mrf.mxu3  ;;  %v1205_v49 = vadd.f32 %v1119_v40, %v7281_v12 }
 0x1ff   : > { %v1976_v18 = vpop.f32.mrf.mxu1 }
 0x200   : > { %v1489_v33 = vadd.f32 %v1403_v59, %v1205_v49 }
 0x201   : > { %6363 = vmatmul.msk.bf16.gmra.mxu0 %vm339_vm1, %v1574_v32  ;;  %v1834_v32 = vld [vmem:[#allocation2 + $0x125] sm:$0xff] }
 0x202   : > { %6385 = vmatmul.msk.bf16.gmra.mxu1 %vm339_vm1, %v1858_v16  ;;  %v1773_v52 = vadd.f32 %v1687_v34, %v1489_v33  ;;  %v1835_v16 = vld [vmem:[#allocation2 + $0x12d] sm:$0xff] }
 0x203   : > { %v1859_v59 = vpack.c.bf16 %v1835_v16, %v1834_v32  ;;  %v1552_v16 = vld [vmem:[#allocation2 + $0x134] sm:$0xff] }
 0x204   : > { %v7419_v12 = vadd.f32 %v1971_v22, %v1773_v52  ;;  %3076 = vperm.xlu0 %6715, %v424_v11   ;;  %v1575_v22 = vpack.c.bf16 %v1551_v5, %v1550_v7 }
 0x205   : > { %v1121_v10 = vpop.f32.mrf.mxu2 }
 0x206   : > { %v1694_v6 = vpop.f32.mrf.mxu0  ;;  %v1405_v20 = vpop.f32.mrf.mxu3  ;;  %v1206_v39 = vadd.f32 %v1121_v10, %v7287_v0  ;;  %v1267_v10 = vld [vmem:[#allocation2 + $0x12b] sm:$0xff] }
 0x207   : > { %v1978_v63 = vpop.f32.mrf.mxu1  ;;  %v1291_v32 = vpack.c.bf16 %v1267_v10, %v1266_v29 }
 0x208   : > { %v1490_v34 = vadd.f32 %v1405_v20, %v1206_v39 }
 0x20a   : > { %v1774_v40 = vadd.f32 %v1689_v42, %v1490_v34  ;;  %6319 = vmatmul.msk.bf16.gmra.mxu2 %vm339_vm1, %v1289_v31  ;;  %v425_v42 = vld [vmem:[%s8881_s7 + $0x10] sm:$0xff]  ;;  %v426_v34 = vld [vmem:[%s8881_s7 + $0x18] sm:$0xff] }
 0x20b   : > { %6341 = vmatmul.msk.bf16.gmra.mxu3 %vm339_vm1, %v1290_v56  ;;  %v429_v31 = vld [vmem:[%s8881_s7 + $0x30] sm:$0xff]  ;;  %3081 = vperm.xlu1 %6716, %v425_v42  }
 0x20c   : > { %v7427_v62 = vadd.f32 %v1973_v53, %v1774_v40  ;;  %3101 = vperm.xlu0 %6715, %v429_v31   ;;  %v1553_v40 = vld [vmem:[#allocation2 + $0x13c] sm:$0xff] }
 0x20d   : > { %v1124_v46 = vpop.f32.mrf.mxu2 }
 0x20e   : > { %v1697_v49 = vpop.f32.mrf.mxu0  ;;  %v1408_v33 = vpop.f32.mrf.mxu3  ;;  %v1207_v52 = vadd.f32 %v1124_v46, %v7293_v45 }
 0x20f   : > { %v1981_v0 = vpop.f32.mrf.mxu1 }
 0x210   : > { %v1491_v47 = vadd.f32 %v1408_v33, %v1207_v52 }
 0x211   : > { %6364 = vmatmul.msk.bf16.gmra.mxu0 %vm339_vm1, %v1575_v22  ;;  %v1836_v22 = vld [vmem:[#allocation2 + $0x135] sm:$0xff] }
 0x212   : > { %6386 = vmatmul.msk.bf16.gmra.mxu1 %vm339_vm1, %v1859_v59  ;;  %v1775_v53 = vadd.f32 %v1692_v35, %v1491_v47  ;;  %v432_v35 = vld [vmem:[%s8881_s7 + $0x48] sm:$0xff]  ;;  %v1837_v59 = vld [vmem:[#allocation2 + $0x13d] sm:$0xff] }
 0x213   : > { %3086 = vperm.xlu1 %6716, %v426_v34   ;;  %v1860_v33 = vpack.c.bf16 %v1837_v59, %v1836_v22  ;;  %v1554_v59 = vld [vmem:[#allocation2 + $0x144] sm:$0xff] }
 0x214   : > { %v7438_v39 = vadd.f32 %v1976_v18, %v1775_v53  ;;  %3116 = vperm.xlu0 %6715, %v432_v35  }
 0x215   : > { %v1126_v7 = vpop.f32.mrf.mxu2 }
 0x216   : > { %v1699_v20 = vpop.f32.mrf.mxu0  ;;  %v1410_v11 = vpop.f32.mrf.mxu3  ;;  %v1208_v5 = vadd.f32 %v1126_v7, %v7299_v36  ;;  %v1576_v36 = vpack.c.bf16 %v1553_v40, %v1552_v16  ;;  %v1268_v7 = vld [vmem:[#allocation2 + $0x133] sm:$0xff] }
 0x217   : > { %v1983_v45 = vpop.f32.mrf.mxu1 }
 0x218   : > { %v1492_v18 = vadd.f32 %v1410_v11, %v1208_v5  ;;  %v1269_v11 = vld [vmem:[#allocation2 + $0x13b] sm:$0xff] }
 0x219   : > { %v1292_v22 = vpack.c.bf16 %v1269_v11, %v1268_v7 }
 0x21a   : > { %v1776_v46 = vadd.f32 %v1694_v6, %v1492_v18  ;;  %6320 = vmatmul.msk.bf16.gmra.mxu2 %vm339_vm1, %v1290_v56  ;;  %v430_v6 = vld [vmem:[%s8881_s7 + $0x38] sm:$0xff]  ;;  %v435_v56 = vld [vmem:[%s8881_s7 + $0x60] sm:$0xff]  ;;  %v433_v18 = vld [vmem:[%s8881_s7 + $0x50] sm:$0xff] }
 0x21b   : > { %6342 = vmatmul.msk.bf16.gmra.mxu3 %vm339_vm1, %v1291_v32  ;;  %3106 = vperm.xlu1 %6716, %v430_v6  }
 0x21c   : > { %v7449_v31 = vadd.f32 %v1978_v63, %v1776_v46  ;;  %3131 = vperm.xlu0 %6715, %v435_v56   ;;  %v1555_v46 = vld [vmem:[#allocation2 + $0x14c] sm:$0xff] }
 0x21d   : > { %v1129_v47 = vpop.f32.mrf.mxu2 }
 0x21e   : > { %v1702_v52 = vpop.f32.mrf.mxu0  ;;  %v1413_v53 = vpop.f32.mrf.mxu3  ;;  %v1209_v29 = vadd.f32 %v1129_v47, %v7305_v25 }
 0x21f   : > { %v1986_v42 = vpop.f32.mrf.mxu1 }
 0x220   : > { %v1493_v10 = vadd.f32 %v1413_v53, %v1209_v29 }
 0x221   : > { %6365 = vmatmul.msk.bf16.gmra.mxu0 %vm339_vm1, %v1576_v36  ;;  %v1838_v36 = vld [vmem:[#allocation2 + $0x145] sm:$0xff] }
 0x222   : > { %6387 = vmatmul.msk.bf16.gmra.mxu1 %vm339_vm1, %v1860_v33  ;;  %v1777_v63 = vadd.f32 %v1697_v49, %v1493_v10  ;;  %v438_v49 = vld [vmem:[%s8881_s7 + $0x78] sm:$0xff]  ;;  %v1839_v33 = vld [vmem:[#allocation2 + $0x14d] sm:$0xff] }
 0x223   : > { %3121 = vperm.xlu1 %6716, %v433_v18   ;;  %v1861_v53 = vpack.c.bf16 %v1839_v33, %v1838_v36  ;;  %v1556_v33 = vld [vmem:[#allocation2 + $0x154] sm:$0xff] }
 0x224   : > { %v7462_v16 = vadd.f32 %v1981_v0, %v1777_v63  ;;  %3146 = vperm.xlu0 %6715, %v438_v49  }
 0x225   : > { %v1131_v34 = vpop.f32.mrf.mxu2 }
 0x226   : > { %v1704_v5 = vpop.f32.mrf.mxu0  ;;  %v1415_v35 = vpop.f32.mrf.mxu3  ;;  %v1210_v40 = vadd.f32 %v1131_v34, %v7311_v60  ;;  %v1577_v60 = vpack.c.bf16 %v1555_v46, %v1554_v59  ;;  %v1270_v34 = vld [vmem:[#allocation2 + $0x143] sm:$0xff] }
 0x227   : > { %v7460_v25 = vpop.f32.mrf.mxu1 }
 0x228   : > { %v1494_v0 = vadd.f32 %v1415_v35, %v1210_v40  ;;  %v1271_v35 = vld [vmem:[#allocation2 + $0x14b] sm:$0xff] }
 0x229   : > { %v1293_v36 = vpack.c.bf16 %v1271_v35, %v1270_v34  ;;  %v447_v34 = vld [vmem:[%s8881_s7 + $0xc0] sm:$0xff] }
 0x22a   : > { %v1778_v47 = vadd.f32 %v1699_v20, %v1494_v0  ;;  %6321 = vmatmul.msk.bf16.gmra.mxu2 %vm339_vm1, %v1291_v32  ;;  %v436_v20 = vld [vmem:[%s8881_s7 + $0x68] sm:$0xff]  ;;  %v441_v32 = vld [vmem:[%s8881_s7 + $0x90] sm:$0xff]  ;;  %v439_v0 = vld [vmem:[%s8881_s7 + $0x80] sm:$0xff] }
 0x22b   : > { %6343 = vmatmul.msk.bf16.gmra.mxu3 %vm339_vm1, %v1292_v22  ;;  %3136 = vperm.xlu1 %6716, %v436_v20  }
 0x22c   : > { %v7473_v56 = vadd.f32 %v1983_v45, %v1778_v47  ;;  %3161 = vperm.xlu0 %6715, %v441_v32   ;;  %v1557_v47 = vld [vmem:[#allocation2 + $0x15c] sm:$0xff] }
 0x22d   : > { %v1134_v10 = vpop.f32.mrf.mxu2 }
 0x22e   : > { %v1707_v29 = vpop.f32.mrf.mxu0  ;;  %v1418_v63 = vpop.f32.mrf.mxu3  ;;  %v1211_v7 = vadd.f32 %v1134_v10, %v7317_v44 }
 0x22f   : > { %v1991_v6 = vpop.f32.mrf.mxu1 }
 0x230   : > { %v1495_v11 = vadd.f32 %v1418_v63, %v1211_v7 }
 0x231   : > { %6366 = vmatmul.msk.bf16.gmra.mxu0 %vm339_vm1, %v1577_v60  ;;  %v1840_v60 = vld [vmem:[#allocation2 + $0x155] sm:$0xff] }
 0x232   : > { %6388 = vmatmul.msk.bf16.gmra.mxu1 %vm339_vm1, %v1861_v53  ;;  %v1779_v45 = vadd.f32 %v1702_v52, %v1495_v11  ;;  %v444_v52 = vld [vmem:[%s8881_s7 + $0xa8] sm:$0xff]  ;;  %v1841_v53 = vld [vmem:[#allocation2 + $0x15d] sm:$0xff] }
 0x233   : > { %3151 = vperm.xlu1 %6716, %v439_v0   ;;  %v1862_v63 = vpack.c.bf16 %v1841_v53, %v1840_v60 }
 0x234   : > { %v7486_v59 = vadd.f32 %v1986_v42, %v1779_v45  ;;  %3176 = vperm.xlu0 %6715, %v444_v52  }
 0x235   : > { %v1136_v18 = vpop.f32.mrf.mxu2 }
 0x236   : > { %v1709_v40 = vpop.f32.mrf.mxu0  ;;  %v1420_v49 = vpop.f32.mrf.mxu3  ;;  %v1212_v46 = vadd.f32 %v1136_v18, %v7323_v27  ;;  %v1578_v27 = vpack.c.bf16 %v1557_v47, %v1556_v33  ;;  %v1272_v18 = vld [vmem:[#allocation2 + $0x153] sm:$0xff] }
 0x237   : > { %v7484_v44 = vpop.f32.mrf.mxu1 }
 0x238   : > { %v1496_v42 = vadd.f32 %v1420_v49, %v1212_v46  ;;  %v1273_v49 = vld [vmem:[#allocation2 + $0x15b] sm:$0xff] }
 0x239   : > { %v1294_v53 = vpack.c.bf16 %v1273_v49, %v1272_v18  ;;  %v453_v18 = vld [vmem:[%s8881_s7 + $0xf0] sm:$0xff] }
 0x23a   : > { %v7495_v10 = vadd.f32 %v1704_v5, %v1496_v42  ;;  %6322 = vmatmul.msk.bf16.gmra.mxu2 %vm339_vm1, %v1292_v22  ;;  %v427_v5 = vld [vmem:[%s8881_s7 + $0x20] sm:$0xff]  ;;  %v442_v22 = vld [vmem:[%s8881_s7 + $0x98] sm:$0xff]  ;;  %v428_v42 = vld [vmem:[%s8881_s7 + $0x28] sm:$0xff] }
 0x23b   : > { %6344 = vmatmul.msk.bf16.gmra.mxu3 %vm339_vm1, %v1293_v36  ;;  %3091 = vperm.xlu2 %6717, %v427_v5  }
 0x23c   : > { %3166 = vperm.xlu1 %6716, %v442_v22   ;;  %3191 = vperm.xlu0 %6715, %v447_v34  }
 0x23d   : > { %v1139_v32 = vpop.f32.mrf.mxu2 }
 0x23e   : > { %v1712_v7 = vpop.f32.mrf.mxu0  ;;  %v1423_v11 = vpop.f32.mrf.mxu3  ;;  %v1213_v45 = vadd.f32 %v1139_v32, %v7329_v51 }
 0x23f   : > { %v1996_v20 = vpop.f32.mrf.mxu1 }
 0x240   : > { %v1497_v35 = vadd.f32 %v1423_v11, %v1213_v45 }
 0x241   : > { %6367 = vmatmul.msk.bf16.gmra.mxu0 %vm339_vm1, %v1578_v27  ;;  %v450_v27 = vld [vmem:[%s8881_s7 + $0xd8] sm:$0xff] }
 0x242   : > { %6389 = vmatmul.msk.bf16.gmra.mxu1 %vm339_vm1, %v1862_v63  ;;  %v1781_v51 = vadd.f32 %v1707_v29, %v1497_v35  ;;  %v445_v29 = vld [vmem:[%s8881_s7 + $0xb0] sm:$0xff]  ;;  %v1558_v63 = vld [vmem:[#allocation2 + $0x164] sm:$0xf] }
 0x243   : > { %3096 = vperm.xlu2 %6717, %v428_v42   ;;  %v1579_v11 = vpack.c.bf16 %v1558_v63, %v1558_v63 }
 0x244   : > { %v7513_v0 = vadd.f32 %v1991_v6, %v1781_v51  ;;  %v1842_v6 = vld [vmem:[#allocation2 + $0x165] sm:$0xf]  ;;  %3181 = vperm.xlu1 %6716, %v445_v29   ;;  %3206 = vperm.xlu0 %6715, %v450_v27  }
 0x245   : > { %v1141_v52 = vpop.f32.mrf.mxu2  ;;  %v1863_v45 = vpack.c.bf16 %v1842_v6, %v1842_v6 }
 0x246   : > { %v1714_v46 = vpop.f32.mrf.mxu0  ;;  %v1425_v47 = vpop.f32.mrf.mxu3  ;;  %v1214_v60 = vadd.f32 %v1141_v52, %v7335_v23  ;;  %v990_v52 = vld [vmem:[#allocation2 + $0x153] sm:$0xf] }
 0x247   : > { %v7511_v33 = vpop.f32.mrf.mxu1  ;;  %v1011_v6 = vpack.c.bf16 %v990_v52, %v990_v52  ;;  %v437_v52 = vld [vmem:[%s8881_s7 + $0x70] sm:$0xff] }
 0x248   : > { %v1498_v32 = vadd.f32 %v1425_v47, %v1214_v60  ;;  %v1274_v47 = vld [vmem:[#allocation2 + $0x163] sm:$0xf] }
 0x24a   : > { %v7525_v23 = vadd.f32 %v1709_v40, %v1498_v32  ;;  %6323 = vmatmul.msk.bf16.gmra.mxu2 %vm339_vm1, %v1293_v36  ;;  %v431_v40 = vld [vmem:[%s8881_s7 + $0x40] sm:$0xff]  ;;  %v448_v36 = vld [vmem:[%s8881_s7 + $0xc8] sm:$0xff]  ;;  %v1295_v32 = vpack.c.bf16 %v1274_v47, %v1274_v47 }
 0x24b   : > { %6345 = vmatmul.msk.bf16.gmra.mxu3 %vm339_vm1, %v1294_v53  ;;  %3111 = vperm.xlu2 %6717, %v431_v40   ;;  %v459_v47 = vld [vmem:[%s8881_s7 + $0x120] sm:$0xff] }
 0x24c   : > { %3196 = vperm.xlu1 %6716, %v448_v36   ;;  %3221 = vperm.xlu0 %6715, %v453_v18  }
 0x24d   : > { %v1144_v34 = vpop.f32.mrf.mxu2 }
 0x24e   : > { %v1717_v5 = vpop.f32.mrf.mxu0  ;;  %v1428_v35 = vpop.f32.mrf.mxu3  ;;  %v1215_v51 = vadd.f32 %v1144_v34, %v7231_v4  ;;  %v2655_v34 = vld [vmem:[#allocation2 + $0x3f] sm:$0xff] }
 0x24f   : > { %v2001_v22 = vpop.f32.mrf.mxu1 }
 0x250   : > { %v1499_v49 = vadd.f32 %v1428_v35, %v1215_v51 }
 0x251   : > { %6368 = vmatmul.msk.bf16.gmra.mxu0 %vm339_vm1, %v1579_v11  ;;  %v434_v11 = vld [vmem:[%s8881_s7 + $0x58] sm:$0xff] }
 0x252   : > { %6390 = vmatmul.msk.bf16.gmra.mxu1 %vm339_vm1, %v1863_v45  ;;  %v1783_v4 = vadd.f32 %v1712_v7, %v1499_v49  ;;  %v451_v7 = vld [vmem:[%s8881_s7 + $0xe0] sm:$0xff]  ;;  %v456_v45 = vld [vmem:[%s8881_s7 + $0x108] sm:$0xff] }
 0x253   : > { %3126 = vperm.xlu2 %6717, %v434_v11  }
 0x254   : > { %v7543_v42 = vadd.f32 %v1996_v20, %v1783_v4  ;;  %v2654_v20 = vld [vmem:[#allocation2 + $0x37] sm:$0xff]  ;;  %3211 = vperm.xlu1 %6716, %v451_v7   ;;  %3236 = vperm.xlu0 %6715, %v456_v45  }
 0x255   : > { %v1146_v29 = vpop.f32.mrf.mxu2  ;;  %v2695_v51 = vpack.c.bf16 %v2655_v34, %v2654_v20 }
 0x256   : > { %v1719_v60 = vpop.f32.mrf.mxu0  ;;  %v1430_v27 = vpop.f32.mrf.mxu3  ;;  %v1216_v63 = vadd.f32 %v1146_v29, %v7241_v38 }
 0x257   : > { %v7541_v53 = vpop.f32.mrf.mxu1 }
 0x258   : > { %v1500_v35 = vadd.f32 %v1430_v27, %v1216_v63  ;;  %v2087_v63 = vld [vmem:[#allocation2 + $0x3d] sm:$0xff] }
 0x25a   : > { %v7555_v38 = vadd.f32 %v1714_v46, %v1500_v35  ;;  %6324 = vmatmul.msk.bf16.gmra.mxu2 %vm339_vm1, %v1011_v6  ;;  %v454_v46 = vld [vmem:[%s8881_s7 + $0xf8] sm:$0xff] }
 0x25b   : > { %6346 = vmatmul.msk.bf16.gmra.mxu3 %vm339_vm1, %v1295_v32  ;;  %3141 = vperm.xlu2 %6717, %v437_v52   ;;  %v2370_v6 = vld [vmem:[#allocation2 + $0x36] sm:$0xff]  ;;  %v2371_v32 = vld [vmem:[#allocation2 + $0x3e] sm:$0xff] }
 0x25c   : > { %3226 = vperm.xlu1 %6716, %v454_v46   ;;  %3251 = vperm.xlu0 %6715, %v459_v47   ;;  %v2657_v52 = vld [vmem:[#allocation2 + $0x4f] sm:$0xff] }
 0x25d   : > { %v1149_v18 = vpop.f32.mrf.mxu2 }
 0x25e   : > { %v1722_v40 = vpop.f32.mrf.mxu0  ;;  %v1433_v49 = vpop.f32.mrf.mxu3  ;;  %v1217_v4 = vadd.f32 %v1149_v18, %v7247_v3  ;;  %v2086_v3 = vld [vmem:[#allocation2 + $0x35] sm:$0xff]  ;;  %v2411_v18 = vpack.c.bf16 %v2371_v32, %v2370_v6  ;;  %v443_v32 = vld [vmem:[%s8881_s7 + $0xa0] sm:$0xff] }
 0x25f   : > { %v2006_v36 = vpop.f32.mrf.mxu1 }
 0x260   : > { %v1501_v29 = vadd.f32 %v1433_v49, %v1217_v4  ;;  %v440_v49 = vld [vmem:[%s8881_s7 + $0x88] sm:$0xff]  ;;  %v462_v4 = vld [vmem:[%s8881_s7 + $0x138] sm:$0xff] }
 0x261   : > { %6436 = vmatmul.msk.bf16.vlgmr.msra.gmra.mxu0 %vm339_vm1, %v2695_v51  ;;  %v2127_v51 = vpack.c.bf16 %v2087_v63, %v2086_v3 }
 0x262   : > { %v1785_v27 = vadd.f32 %v1717_v5, %v1501_v29  ;;  %v457_v5 = vld [vmem:[%s8881_s7 + $0x110] sm:$0xff] }
 0x263   : > { %3156 = vperm.xlu2 %6717, %v440_v49   ;;  %v2373_v49 = vld [vmem:[#allocation2 + $0x4e] sm:$0xff] }
 0x264   : > { %v7572_v45 = vadd.f32 %v2001_v22, %v1785_v27  ;;  %v2656_v22 = vld [vmem:[#allocation2 + $0x47] sm:$0xff]  ;;  %3241 = vperm.xlu1 %6716, %v457_v5   ;;  %3266 = vperm.xlu0 %6715, %v462_v4  }
 0x265   : > { %v1151_v20 = vpop.f32.mrf.mxu2  ;;  %v2696_v47 = vpack.c.bf16 %v2657_v52, %v2656_v22 }
 0x266   : > { %v1724_v11 = vpop.f32.mrf.mxu0  ;;  %v1435_v34 = vpop.f32.mrf.mxu3  ;;  %v1218_v35 = vadd.f32 %v1151_v20, %v7253_v41 }
 0x267   : > { %v7570_v7 = vpop.f32.mrf.mxu1 }
 0x268   : > { %v1502_v46 = vadd.f32 %v1435_v34, %v1218_v35  ;;  %v2088_v35 = vld [vmem:[#allocation2 + $0x45] sm:$0xff] }
 0x26a   : > { %v7584_v41 = vadd.f32 %v1719_v60, %v1502_v46  ;;  %6392 = vmatmul.msk.bf16.vlgmr.msra.gmra.mxu2 %vm339_vm1, %v2127_v51  ;;  %v460_v60 = vld [vmem:[%s8881_s7 + $0x128] sm:$0xff] }
 0x26b   : > { %6414 = vmatmul.msk.bf16.vlgmr.msra.gmra.mxu3 %vm339_vm1, %v2411_v18  ;;  %3171 = vperm.xlu2 %6717, %v443_v32   ;;  %v2089_v51 = vld [vmem:[#allocation2 + $0x4d] sm:$0xff]  ;;  %v2659_v32 = vld [vmem:[#allocation2 + $0x5f] sm:$0xff] }
 0x26c   : > { %3256 = vperm.xlu1 %6716, %v460_v60   ;;  %v2372_v18 = vld [vmem:[#allocation2 + $0x46] sm:$0xff] }
 0x26d   : > { %v1154_v3 = vpop.f32.mrf.mxu2 }
 0x26e   : > { %v1727_v29 = vpop.f32.mrf.mxu0  ;;  %v1438_v63 = vpop.f32.mrf.mxu3  ;;  %v1219_v6 = vadd.f32 %v1154_v3, %v7259_v37  ;;  %v2412_v3 = vpack.c.bf16 %v2373_v49, %v2372_v18  ;;  %v449_v49 = vld [vmem:[%s8881_s7 + $0xd0] sm:$0xff] }
 0x26f   : > { %v2011_v27 = vpop.f32.mrf.mxu1 }
 0x270   : > { %v1503_v20 = vadd.f32 %v1438_v63, %v1219_v6  ;;  %v446_v63 = vld [vmem:[%s8881_s7 + $0xb8] sm:$0xff] }
 0x271   : > { %6437 = vmatmul.msk.bf16.gmra.mxu0 %vm339_vm1, %v2696_v47  ;;  %v2128_v47 = vpack.c.bf16 %v2089_v51, %v2088_v35  ;;  %v2658_v6 = vld [vmem:[#allocation2 + $0x57] sm:$0xff] }
 0x272   : > { %v1787_v34 = vadd.f32 %v1722_v40, %v1503_v20  ;;  %v463_v40 = vld [vmem:[%s8881_s7 + $0x140] sm:$0xf] }
 0x273   : > { %3186 = vperm.xlu2 %6717, %v446_v63  }
 0x274   : > { %v7598_v4 = vadd.f32 %v2006_v36, %v1787_v34  ;;  %3271 = vperm.xlu1 %6716, %v463_v40  }
 0x275   : > { %v1156_v22 = vpop.f32.mrf.mxu2 }
 0x276   : > { %v1729_v5 = vpop.f32.mrf.mxu0  ;;  %v1440_v52 = vpop.f32.mrf.mxu3  ;;  %v1220_v46 = vadd.f32 %v1156_v22, %v7265_v50  ;;  %v2697_v50 = vpack.c.bf16 %v2659_v32, %v2658_v6 }
 0x277   : > { %v7596_v37 = vpop.f32.mrf.mxu1 }
 0x278   : > { %v1504_v36 = vadd.f32 %v1440_v52, %v1220_v46  ;;  %v2090_v52 = vld [vmem:[#allocation2 + $0x55] sm:$0xff]  ;;  %v2091_v46 = vld [vmem:[#allocation2 + $0x5d] sm:$0xff] }
 0x27a   : > { %v7607_v60 = vadd.f32 %v1724_v11, %v1504_v36  ;;  %6393 = vmatmul.msk.bf16.gmra.mxu2 %vm339_vm1, %v2128_v47  ;;  %v2374_v47 = vld [vmem:[#allocation2 + $0x56] sm:$0xff] }
 0x27b   : > { %6415 = vmatmul.msk.bf16.gmra.mxu3 %vm339_vm1, %v2412_v3  ;;  %3201 = vperm.xlu2 %6717, %v449_v49   ;;  %v2375_v3 = vld [vmem:[#allocation2 + $0x5e] sm:$0xff] }
 0x27d   : > { %v1159_v35 = vpop.f32.mrf.mxu2 }
 0x27e   : > { %v1732_v20 = vpop.f32.mrf.mxu0  ;;  %v1443_v51 = vpop.f32.mrf.mxu3  ;;  %v1221_v18 = vadd.f32 %v1159_v35, %v7271_v55  ;;  %v2413_v35 = vpack.c.bf16 %v2375_v3, %v2374_v47  ;;  %v455_v47 = vld [vmem:[%s8881_s7 + $0x100] sm:$0xff] }
 0x27f   : > { %v2016_v34 = vpop.f32.mrf.mxu1 }
 0x280   : > { %v1505_v11 = vadd.f32 %v1443_v51, %v1221_v18  ;;  %v452_v51 = vld [vmem:[%s8881_s7 + $0xe8] sm:$0xff] }
 0x281   : > { %6438 = vmatmul.msk.bf16.gmra.mxu0 %vm339_vm1, %v2697_v50  ;;  %v2129_v50 = vpack.c.bf16 %v2091_v46, %v2090_v52  ;;  %v2661_v18 = vld [vmem:[#allocation2 + $0x6f] sm:$0xff] }
 0x282   : > { %v1789_v22 = vadd.f32 %v1727_v29, %v1505_v11  ;;  %v2660_v29 = vld [vmem:[#allocation2 + $0x67] sm:$0xff] }
 0x283   : > { %3216 = vperm.xlu2 %6717, %v452_v51  }
 0x284   : > { %v7618_v6 = vadd.f32 %v2011_v27, %v1789_v22  ;;  %v2698_v27 = vpack.c.bf16 %v2661_v18, %v2660_v29 }
 0x285   : > { %v1161_v32 = vpop.f32.mrf.mxu2 }
 0x286   : > { %v1734_v63 = vpop.f32.mrf.mxu0  ;;  %v1445_v55 = vpop.f32.mrf.mxu3  ;;  %v1222_v36 = vadd.f32 %v1161_v32, %v7277_v2  ;;  %v2092_v32 = vld [vmem:[#allocation2 + $0x65] sm:$0xff] }
 0x287   : > { %v7616_v40 = vpop.f32.mrf.mxu1 }
 0x288   : > { %8951 = vst [vmem:[#allocation40_spill] sm:$0xff] %v7616_v40  ;;  %v1506_v49 = vadd.f32 %v1445_v55, %v1222_v36  ;;  %v2093_v55 = vld [vmem:[#allocation2 + $0x6d] sm:$0xff] }
 0x289   : > { %v2376_v36 = vld [vmem:[#allocation2 + $0x66] sm:$0xff] }
 0x28a   : > { %v7624_v11 = vadd.f32 %v1729_v5, %v1506_v49  ;;  %6394 = vmatmul.msk.bf16.gmra.mxu2 %vm339_vm1, %v2129_v50  ;;  %v2377_v50 = vld [vmem:[#allocation2 + $0x6e] sm:$0xff] }
 0x28b   : > { %6416 = vmatmul.msk.bf16.gmra.mxu3 %vm339_vm1, %v2413_v35  ;;  %3231 = vperm.xlu2 %6717, %v455_v47  }
 0x28d   : > { %v1164_v2 = vpop.f32.mrf.mxu2 }
 0x28e   : > { %v1737_v22 = vpop.f32.mrf.mxu0  ;;  %v1448_v52 = vpop.f32.mrf.mxu3  ;;  %v1223_v46 = vadd.f32 %v1164_v2, %v7283_v61  ;;  %v2414_v2 = vpack.c.bf16 %v2377_v50, %v2376_v36  ;;  %v461_v36 = vld [vmem:[%s8881_s7 + $0x130] sm:$0xff] }
 0x28f   : > { %v2021_v40 = vpop.f32.mrf.mxu1 }
 0x290   : > { %v1507_v5 = vadd.f32 %v1448_v52, %v1223_v46  ;;  %v458_v52 = vld [vmem:[%s8881_s7 + $0x118] sm:$0xff] }
 0x291   : > { %6439 = vmatmul.msk.bf16.gmra.mxu0 %vm339_vm1, %v2698_v27  ;;  %v2130_v27 = vpack.c.bf16 %v2093_v55, %v2092_v32  ;;  %v2663_v46 = vld [vmem:[#allocation2 + $0x7f] sm:$0xff] }
 0x292   : > { %v1791_v3 = vadd.f32 %v1732_v20, %v1507_v5  ;;  %v2662_v20 = vld [vmem:[#allocation2 + $0x77] sm:$0xff] }
 0x293   : > { %3246 = vperm.xlu2 %6717, %v458_v52  }
 0x294   : > { %v7635_v29 = vadd.f32 %v2016_v34, %v1791_v3  ;;  %v2699_v34 = vpack.c.bf16 %v2663_v46, %v2662_v20 }
 0x295   : > { %v1166_v18 = vpop.f32.mrf.mxu2 }
 0x296   : > { %v1739_v35 = vpop.f32.mrf.mxu0  ;;  %8953 = vst [vmem:[#allocation42_spill] sm:$0xff] %v7635_v29  ;;  %v1450_v61 = vpop.f32.mrf.mxu3  ;;  %v1224_v49 = vadd.f32 %v1166_v18, %v7289_v21  ;;  %v2094_v18 = vld [vmem:[#allocation2 + $0x75] sm:$0xff] }
 0x297   : > { %v7633_v51 = vpop.f32.mrf.mxu1  ;;  %v2665_v29 = vld [vmem:[#allocation2 + $0x8f] sm:$0xff] }
 0x298   : > { %8952 = vst [vmem:[#allocation41_spill] sm:$0xff] %v7633_v51  ;;  %v1508_v47 = vadd.f32 %v1450_v61, %v1224_v49  ;;  %v2095_v61 = vld [vmem:[#allocation2 + $0x7d] sm:$0xff] }
 0x299   : > { %v2378_v49 = vld [vmem:[#allocation2 + $0x76] sm:$0xff] }
 0x29a   : > { %v7641_v5 = vadd.f32 %v1734_v63, %v1508_v47  ;;  %6395 = vmatmul.msk.bf16.gmra.mxu2 %vm339_vm1, %v2130_v27  ;;  %v2379_v27 = vld [vmem:[#allocation2 + $0x7e] sm:$0xff] }
 0x29b   : > { %6417 = vmatmul.msk.bf16.gmra.mxu3 %vm339_vm1, %v2414_v2  ;;  %3261 = vperm.xlu2 %6717, %v461_v36  }
 0x29c   : > { %8954 = vst [vmem:[#allocation43_spill] sm:$0xff] %v7641_v5  ;;  %v2664_v5 = vld [vmem:[#allocation2 + $0x87] sm:$0xff] }
 0x29d   : > { %v1169_v21 = vpop.f32.mrf.mxu2 }
 0x29e   : > { %v1742_v3 = vpop.f32.mrf.mxu0  ;;  %v1453_v32 = vpop.f32.mrf.mxu3  ;;  %v1225_v55 = vadd.f32 %v1169_v21, %v7295_v30  ;;  %v2415_v21 = vpack.c.bf16 %v2379_v27, %v2378_v49  ;;  %v2097_v49 = vld [vmem:[#allocation2 + $0x8d] sm:$0xff] }
 0x29f   : > { %v2026_v51 = vpop.f32.mrf.mxu1  ;;  %v2380_v27 = vld [vmem:[#allocation2 + $0x86] sm:$0xff] }
 0x2a0   : > { %v1509_v63 = vadd.f32 %v1453_v32, %v1225_v55 }
 0x2a1   : > { %6440 = vmatmul.msk.bf16.gmra.mxu0 %vm339_vm1, %v2699_v34  ;;  %v2131_v34 = vpack.c.bf16 %v2095_v61, %v2094_v18  ;;  %v2096_v61 = vld [vmem:[#allocation2 + $0x85] sm:$0xff] }
 0x2a2   : > { %v1793_v50 = vadd.f32 %v1737_v22, %v1509_v63  ;;  %v2700_v22 = vpack.c.bf16 %v2665_v29, %v2664_v5 }
 0x2a4   : > { %v7652_v20 = vadd.f32 %v2021_v40, %v1793_v50 }
 0x2a5   : > { %v1171_v46 = vpop.f32.mrf.mxu2 }
 0x2a6   : > { %v1744_v2 = vpop.f32.mrf.mxu0  ;;  %v1455_v30 = vpop.f32.mrf.mxu3  ;;  %v1226_v47 = vadd.f32 %v1171_v46, %v7301_v14 }
 0x2a7   : > { %v7650_v52 = vpop.f32.mrf.mxu1 }
 0x2a8   : > { %8955 = vst [vmem:[#allocation44_spill] sm:$0xff] %v7650_v52  ;;  %v1510_v36 = vadd.f32 %v1455_v30, %v1226_v47 }
 0x2aa   : > { %v7655_v32 = vadd.f32 %v1739_v35, %v1510_v36  ;;  %6396 = vmatmul.msk.bf16.gmra.mxu2 %vm339_vm1, %v2131_v34  ;;  %v2381_v35 = vld [vmem:[#allocation2 + $0x8e] sm:$0xff] }
 0x2ab   : > { %6418 = vmatmul.msk.bf16.gmra.mxu3 %vm339_vm1, %v2415_v21  ;;  %v2132_v21 = vpack.c.bf16 %v2097_v49, %v2096_v61  ;;  %v2416_v36 = vpack.c.bf16 %v2381_v35, %v2380_v27  ;;  %v2098_v49 = vld [vmem:[#allocation2 + $0x95] sm:$0xff]  ;;  %v2099_v27 = vld [vmem:[#allocation2 + $0x9d] sm:$0xff] }
 0x2ac   : > { %v2382_v35 = vld [vmem:[#allocation2 + $0x96] sm:$0xff] }
 0x2ad   : > { %v1174_v40 = vpop.f32.mrf.mxu2 }
 0x2ae   : > { %v1747_v55 = vpop.f32.mrf.mxu0  ;;  %v1458_v50 = vpop.f32.mrf.mxu3  ;;  %v1227_v52 = vadd.f32 %v1174_v40, %v7307_v24  ;;  %v2666_v24 = vld [vmem:[#allocation2 + $0x97] sm:$0xff]  ;;  %v2667_v40 = vld [vmem:[#allocation2 + $0x9f] sm:$0xff] }
 0x2af   : > { %v2031_v63 = vpop.f32.mrf.mxu1 }
 0x2b0   : > { %v1511_v14 = vadd.f32 %v1458_v50, %v1227_v52 }
 0x2b1   : > { %6441 = vmatmul.msk.bf16.gmra.mxu0 %vm339_vm1, %v2700_v22 }
 0x2b2   : > { %v1795_v18 = vadd.f32 %v1742_v3, %v1511_v14  ;;  %v2701_v3 = vpack.c.bf16 %v2667_v40, %v2666_v24  ;;  %v8961_v24 = vld [vmem:[#allocation36_spill] sm:$0xff] }
 0x2b4   : > { %v7663_v47 = vadd.f32 %v2026_v51, %v1795_v18 }
 0x2b5   : > { %v1176_v29 = vpop.f32.mrf.mxu2 }
 0x2b6   : > { %v1749_v46 = vpop.f32.mrf.mxu0  ;;  %8957 = vst [vmem:[#allocation46_spill] sm:$0xff] %v7663_v47  ;;  %v1460_v5 = vpop.f32.mrf.mxu3  ;;  %v1228_v34 = vadd.f32 %v1176_v29, %v7313_v48 }
 0x2b7   : > { %v7661_v30 = vpop.f32.mrf.mxu1 }
 0x2b8   : > { %8956 = vst [vmem:[#allocation45_spill] sm:$0xff] %v7661_v30  ;;  %v1512_v22 = vadd.f32 %v1460_v5, %v1228_v34 }
 0x2ba   : > { %v7666_v52 = vadd.f32 %v1744_v2, %v1512_v22  ;;  %6397 = vmatmul.msk.bf16.gmra.mxu2 %vm339_vm1, %v2132_v21  ;;  %v2383_v2 = vld [vmem:[#allocation2 + $0x9e] sm:$0xff]  ;;  %v2133_v22 = vpack.c.bf16 %v2099_v27, %v2098_v49 }
 0x2bb   : > { %6419 = vmatmul.msk.bf16.gmra.mxu3 %vm339_vm1, %v2416_v36 }
 0x2bc   : > { %8958 = vst [vmem:[#allocation47_spill] sm:$0xff] %v7666_v52  ;;  %v2417_v52 = vpack.c.bf16 %v2383_v2, %v2382_v35  ;;  %v2100_v35 = vld [vmem:[#allocation2 + $0xa5] sm:$0xff]  ;;  %v2101_v2 = vld [vmem:[#allocation2 + $0xad] sm:$0xff] }
 0x2bd   : > { %v1179_v51 = vpop.f32.mrf.mxu2 }
 0x2be   : > { %v1752_v50 = vpop.f32.mrf.mxu0  ;;  %v1463_v18 = vpop.f32.mrf.mxu3  ;;  %v1229_v30 = vadd.f32 %v1179_v51, %v7319_v43  ;;  %v2668_v43 = vld [vmem:[#allocation2 + $0xa7] sm:$0xff]  ;;  %v2669_v51 = vld [vmem:[#allocation2 + $0xaf] sm:$0xff] }
 0x2bf   : > { %v2036_v14 = vpop.f32.mrf.mxu1 }
 0x2c0   : > { %v1513_v48 = vadd.f32 %v1463_v18, %v1229_v30 }
 0x2c1   : > { %6442 = vmatmul.msk.bf16.gmra.mxu0 %vm339_vm1, %v2701_v3 }
 0x2c2   : > { %v1797_v61 = vadd.f32 %v1747_v55, %v1513_v48  ;;  %v2702_v55 = vpack.c.bf16 %v2669_v51, %v2668_v43 }
 0x2c4   : > { %v7674_v34 = vadd.f32 %v2031_v63, %v1797_v61 }
 0x2c5   : > { %v1181_v21 = vpop.f32.mrf.mxu2 }
 0x2c6   : > { %v1754_v29 = vpop.f32.mrf.mxu0  ;;  %8960 = vst [vmem:[#allocation49_spill] sm:$0xff] %v7674_v34  ;;  %v1465_v36 = vpop.f32.mrf.mxu3  ;;  %v1230_v40 = vadd.f32 %v1181_v21, %v8961_v24  ;;  %v2384_v21 = vld [vmem:[#allocation2 + $0xa6] sm:$0xff] }
 0x2c7   : > { %v7672_v5 = vpop.f32.mrf.mxu1  ;;  %v3469_v24 = vld [vmem:[#allocation3 + $0x12] sm:$0xff] }
 0x2c8   : > { %8959 = vst [vmem:[#allocation48_spill] sm:$0xff] %v7672_v5  ;;  %v1514_v3 = vadd.f32 %v1465_v36, %v1230_v40  ;;  %v8963_v5 = vld [vmem:[#allocation37_spill] sm:$0xff] }
 0x2c9   : > { %v3470_v40 = vld [vmem:[#allocation3 + $0x1a] sm:$0xff] }
 0x2ca   : > { %v7677_v30 = vadd.f32 %v1749_v46, %v1514_v3  ;;  %6398 = vmatmul.msk.bf16.gmra.mxu2 %vm339_vm1, %v2133_v22  ;;  %v2385_v46 = vld [vmem:[#allocation2 + $0xae] sm:$0xff]  ;;  %v3510_v43 = vpack.c.bf16 %v3470_v40, %v3469_v24 }
 0x2cb   : > { %6420 = vmatmul.msk.bf16.gmra.mxu3 %vm339_vm1, %v2417_v52  ;;  %v2102_v40 = vld [vmem:[#allocation2 + $0xb5] sm:$0xff] }
 0x2cc   : > { %8962 = vst [vmem:[#allocation36_spill] sm:$0xff] %v7677_v30  ;;  %v8964_v30 = vld [vmem:[#allocation38_spill] sm:$0xff]  ;;  %6458 = vmatmul.msk.bf16.vlgmr.msra.gmra.mxu1 %vm339_vm1, %v3510_v43 }
 0x2cd   : > { %v1184_v63 = vpop.f32.mrf.mxu2  ;;  %v2386_v43 = vld [vmem:[#allocation2 + $0xb6] sm:$0xff] }
 0x2ce   : > { %v1757_v18 = vpop.f32.mrf.mxu0  ;;  %v1468_v61 = vpop.f32.mrf.mxu3  ;;  %v1231_v34 = vadd.f32 %v1184_v63, %v8963_v5  ;;  %v2134_v5 = vpack.c.bf16 %v2101_v2, %v2100_v35  ;;  %v2418_v63 = vpack.c.bf16 %v2385_v46, %v2384_v21  ;;  %v8965_v21 = vld [vmem:[#allocation39_spill] sm:$0xff] }
 0x2cf   : > { %v2041_v48 = vpop.f32.mrf.mxu1 }
 0x2d0   : > { %v1515_v49 = vadd.f32 %v1468_v61, %v1231_v34  ;;  %v2671_v34 = vld [vmem:[#allocation2 + $0xbf] sm:$0xff] }
 0x2d1   : > { %6443 = vmatmul.msk.bf16.gmra.mxu0 %vm339_vm1, %v2702_v55 }
 0x2d2   : > { %v1799_v27 = vadd.f32 %v1752_v50, %v1515_v49  ;;  %v2670_v50 = vld [vmem:[#allocation2 + $0xb7] sm:$0xff] }
 0x2d4   : > { %v7683_v52 = vadd.f32 %v2036_v14, %v1799_v27  ;;  %v2703_v14 = vpack.c.bf16 %v2671_v34, %v2670_v50  ;;  %v3468_v27 = vld [vmem:[%s8876_s2] sm:$0x3]  ;;  %v6544_v50 = vld [vmem:[%s8876_s2 + $0x8] sm:$0x3] }
 0x2d5   : > { %v1186_v51 = vpop.f32.mrf.mxu2 }
 0x2d6   : > { %v1759_v36 = vpop.f32.mrf.mxu0  ;;  %v1470_v3 = vpop.f32.mrf.mxu3  ;;  %v1232_v47 = vadd.f32 %v1186_v51, %v8964_v30  ;;  %v6500_v30 = vld [vmem:[%s8876_s2 + $0x4] sm:$0x3] }
 0x2d7   : > { %v2043_v22 = vpop.f32.mrf.mxu1  ;;  %v2387_v51 = vld [vmem:[#allocation2 + $0xbe] sm:$0xff] }
 0x2d8   : > { %v1516_v55 = vadd.f32 %v1470_v3, %v1232_v47  ;;  %v3772_v47 = vsel %vm654_vm0, %v3468_v27, 0  ;;  %v2103_v22 = vld [vmem:[#allocation2 + $0xbd] sm:$0xff] }
 0x2d9   : > { %3781 = vmatpush.bf16.msrb.mxu2 %v3772_v47  ;;  %v2135_v27 = vpack.c.bf16 %v2103_v22, %v2102_v40  ;;  %v7723_v22 = vld [vmem:[%s8878_s4] ss:$0 sm:$0xff] }
 0x2da   : > { %v7687_v61 = vadd.f32 %v1754_v29, %v1516_v55  ;;  %6399 = vmatmul.msk.bf16.gmra.mxu2 %vm339_vm1, %v2134_v5  ;;  %v4011_v29 = vsel %vm654_vm0, %v6500_v30, 0  ;;  %v2419_v30 = vpack.c.bf16 %v2387_v51, %v2386_v43  ;;  %v2104_v43 = vld [vmem:[#allocation2 + $0xc5] sm:$0xff]  ;;  %v2105_v51 = vld [vmem:[#allocation2 + $0xcd] sm:$0xff] }
 0x2db   : > { %6421 = vmatmul.msk.bf16.gmra.mxu3 %vm339_vm1, %v2418_v63  ;;  %v6522_v63 = vld [vmem:[%s8876_s2 + $0x6] sm:$0x3] }
 0x2dc   : > { %4020 = vmatpush.bf16.msrb.mxu3 %v4011_v29 }
 0x2dd   : > { %v1189_v35 = vpop.f32.mrf.mxu2 }
 0x2de   : > { %v2793_v49 = vpop.f32.mrf.mxu0  ;;  %v1473_v2 = vpop.f32.mrf.mxu3  ;;  %v1233_v46 = vadd.f32 %v1189_v35, %v8965_v21  ;;  %v2673_v35 = vld [vmem:[#allocation2 + $0xcf] sm:$0xff] }
 0x2e0   : > { %v1517_v36 = vadd.f32 %v1473_v2, %v1233_v46 }
 0x2e1   : > { %6444 = vmatmul.msk.bf16.gmra.mxu0 %vm339_vm1, %v2703_v14  ;;  %v4287_v14 = vsel %vm654_vm0, %v6522_v63, 0  ;;  %v2388_v63 = vld [vmem:[#allocation2 + $0xc6] sm:$0xff] }
 0x2e2   : > { %v1801_v24 = vadd.f32 %v1757_v18, %v1517_v36  ;;  %v4563_v18 = vsel %vm654_vm0, %v6544_v50, 0  ;;  %4296 = vmatpush.bf16.msrb.mxu0 %v4287_v14  ;;  %v2389_v50 = vld [vmem:[#allocation2 + $0xce] sm:$0xff] }
 0x2e3   : > { %4572 = vmatpush.bf16.msrb.mxu1 %v4563_v18 }
 0x2e4   : > { %v7701_v5 = vadd.f32 %v2041_v48, %v1801_v24  ;;  %v2672_v48 = vld [vmem:[#allocation2 + $0xc7] sm:$0xff]  ;;  %v7718_v24 = vld [vmem:[%s8877_s3] ss:$0 sm:$0xff] }
 0x2e5   : > { %v1191_v34 = vpop.f32.mrf.mxu2  ;;  %v2704_v2 = vpack.c.bf16 %v2673_v35, %v2672_v48  ;;  %v3072_v48 = vpop.permute.xlu0 %3071  ;;  %v2674_v35 = vld [vmem:[#allocation2 + $0xd7] sm:$0xff] }
 0x2e6   : > { %v2795_v3 = vpop.f32.mrf.mxu0  ;;  %8966 = vst [vmem:[#allocation37_spill] sm:$0xff] %v7701_v5  ;;  %v1475_v55 = vpop.f32.mrf.mxu3 }
 0x2ea   : > { %6400 = vmatmul.msk.bf16.gmra.mxu2 %vm339_vm1, %v2135_v27 }
 0x2eb   : > { %6422 = vmatmul.msk.bf16.gmra.mxu3 %vm339_vm1, %v2419_v30  ;;  %v2136_v30 = vpack.c.bf16 %v2105_v51, %v2104_v43 }
 0x2ed   : > { %v2225_v29 = vpop.f32.mrf.mxu2 }
 0x2ee   : > { %v2798_v47 = vpop.f32.mrf.mxu0  ;;  %v2509_v21 = vpop.f32.mrf.mxu3  ;;  %v2329_v46 = vadd.f32 %v2225_v29, %v7356_v57 }
 0x2f0   : > { %v2613_v36 = vadd.f32 %v2509_v21, %v2329_v46 }
 0x2f1   : > { %6445 = vmatmul.msk.bf16.gmra.mxu0 %vm339_vm1, %v2704_v2  ;;  %v2675_v2 = vld [vmem:[#allocation2 + $0xdf] sm:$0xff] }
 0x2f2   : > { %v2897_v40 = vadd.f32 %v2793_v49, %v2613_v36  ;;  %v2420_v49 = vpack.c.bf16 %v2389_v50, %v2388_v63 }
 0x2f4   : > { %v2942_v57 = vmul.f32 %v7718_v24, %v2897_v40  ;;  %v2705_v40 = vpack.c.bf16 %v2675_v2, %v2674_v35 }
 0x2f5   : > { %v2227_v55 = vpop.f32.mrf.mxu2 }
 0x2f6   : > { %v2800_v34 = vpop.f32.mrf.mxu0  ;;  %v2511_v14 = vpop.f32.mrf.mxu3  ;;  %v2987_v18 = vadd.f32 %v7723_v22, %v2942_v57  ;;  %v2330_v27 = vadd.f32 %v2227_v55, %v7360_v9 }
 0x2f7   : > { %v3077_v55 = vpop.permute.xlu0 %3076 }
 0x2f8   : > { %v3028_v29 = vmax.f32 %v2987_v18, 0.0  ;;  %v2614_v21 = vadd.f32 %v2511_v14, %v2330_v27  ;;  %v2106_v27 = vld [vmem:[#allocation2 + $0xd5] sm:$0xff] }
 0x2fa   : > { %v3274_v46 = vmul.f32 %v3072_v48, %v3028_v29  ;;  %v2898_v36 = vadd.f32 %v2795_v3, %v2614_v21  ;;  %6401 = vmatmul.msk.bf16.gmra.mxu2 %vm339_vm1, %v2136_v30  ;;  %v2107_v30 = vld [vmem:[#allocation2 + $0xdd] sm:$0xff] }
 0x2fb   : > { %6423 = vmatmul.msk.bf16.gmra.mxu3 %vm339_vm1, %v2420_v49  ;;  %v2390_v49 = vld [vmem:[#allocation2 + $0xd6] sm:$0xff]  ;;  %v2391_v48 = vld [vmem:[#allocation2 + $0xde] sm:$0xff] }
 0x2fc   : > { %3365 = vst.msk [vmem:[#allocation3 + $0x24] sm:$0xff] %vm339_vm1, %v3274_v46  ;;  %v2943_v57 = vmul.f32 %v7718_v24, %v2898_v36  ;;  %v2137_v36 = vpack.c.bf16 %v2107_v30, %v2106_v27 }
 0x2fd   : > { %v2230_v9 = vpop.f32.mrf.mxu2 }
 0x2fe   : > { %v2803_v5 = vpop.f32.mrf.mxu0  ;;  %v2514_v43 = vpop.f32.mrf.mxu3  ;;  %v2988_v51 = vadd.f32 %v7723_v22, %v2943_v57  ;;  %v2331_v63 = vadd.f32 %v2230_v9, %v7367_v54  ;;  %v2676_v9 = vld [vmem:[#allocation2 + $0xe7] sm:$0xff] }
 0x2ff   : > { %v3082_v57 = vpop.permute.xlu1 %3081 }
 0x300   : > { %v3029_v50 = vmax.f32 %v2988_v51, 0.0  ;;  %v2615_v3 = vadd.f32 %v2514_v43, %v2331_v63 }
 0x301   : > { %6446 = vmatmul.msk.bf16.gmra.mxu0 %vm339_vm1, %v2705_v40  ;;  %v2421_v40 = vpack.c.bf16 %v2391_v48, %v2390_v49 }
 0x302   : > { %v3275_v14 = vmul.f32 %v3077_v55, %v3029_v50  ;;  %v2899_v18 = vadd.f32 %v2798_v47, %v2615_v3  ;;  %v2677_v47 = vld [vmem:[#allocation2 + $0xef] sm:$0xff] }
 0x303   : > { %v2706_v3 = vpack.c.bf16 %v2677_v47, %v2676_v9  ;;  %v3471_v55 = vld [vmem:[#allocation3 + $0x22] sm:$0xff] }
 0x304   : > { %3366 = vst.msk [vmem:[#allocation3 + $0x2c] sm:$0xff] %vm339_vm1, %v3275_v14  ;;  %v2944_v2 = vmul.f32 %v7718_v24, %v2899_v18  ;;  %v2393_v9 = vld [vmem:[#allocation2 + $0xee] sm:$0xff] }
 0x305   : > { %v2232_v29 = vpop.f32.mrf.mxu2 }
 0x306   : > { %v2805_v35 = vpop.f32.mrf.mxu0  ;;  %v2516_v21 = vpop.f32.mrf.mxu3  ;;  %v2989_v54 = vadd.f32 %v7723_v22, %v2944_v2  ;;  %v2332_v46 = vadd.f32 %v2232_v29, %v7371_v19 }
 0x308   : > { %v3030_v43 = vmax.f32 %v2989_v54, 0.0  ;;  %v2616_v51 = vadd.f32 %v2516_v21, %v2332_v46  ;;  %v3087_v21 = vpop.permute.xlu1 %3086 }
 0x30a   : > { %v3276_v63 = vmul.f32 %v3082_v57, %v3030_v43  ;;  %v2900_v50 = vadd.f32 %v2800_v34, %v2616_v51  ;;  %6402 = vmatmul.msk.bf16.gmra.mxu2 %vm339_vm1, %v2137_v36  ;;  %v2108_v36 = vld [vmem:[#allocation2 + $0xe5] sm:$0xff] }
 0x30b   : > { %6424 = vmatmul.msk.bf16.gmra.mxu3 %vm339_vm1, %v2421_v40  ;;  %v3472_v14 = vld [vmem:[#allocation3 + $0x2a] sm:$0xff]  ;;  %v2109_v40 = vld [vmem:[#allocation2 + $0xed] sm:$0xff] }
 0x30c   : > { %3367 = vst.msk [vmem:[#allocation3 + $0x34] sm:$0xff] %vm339_vm1, %v3276_v63  ;;  %v2945_v19 = vmul.f32 %v7718_v24, %v2900_v50  ;;  %v3511_v27 = vpack.c.bf16 %v3472_v14, %v3471_v55  ;;  %v2392_v57 = vld [vmem:[#allocation2 + $0xe6] sm:$0xff]  ;;  %v3092_v14 = vpop.permute.xlu2 %3091 }
 0x30d   : > { %v2235_v30 = vpop.f32.mrf.mxu2  ;;  %v2422_v55 = vpack.c.bf16 %v2393_v9, %v2392_v57 }
 0x30e   : > { %v2808_v18 = vpop.f32.mrf.mxu0  ;;  %v2519_v49 = vpop.f32.mrf.mxu3  ;;  %v2990_v48 = vadd.f32 %v7723_v22, %v2945_v19  ;;  %v2333_v2 = vadd.f32 %v2235_v30, %v7376_v17  ;;  %6459 = vmatmul.msk.bf16.gmra.mxu1 %vm339_vm1, %v3511_v27  ;;  %v2678_v19 = vld [vmem:[#allocation2 + $0xf7] sm:$0xff] }
 0x310   : > { %v3031_v34 = vmax.f32 %v2990_v48, 0.0  ;;  %v2617_v29 = vadd.f32 %v2519_v49, %v2333_v2 }
 0x311   : > { %6447 = vmatmul.msk.bf16.gmra.mxu0 %vm339_vm1, %v2706_v3  ;;  %v2138_v3 = vpack.c.bf16 %v2109_v40, %v2108_v36 }
 0x312   : > { %v3277_v54 = vmul.f32 %v3087_v21, %v3031_v34  ;;  %v2901_v46 = vadd.f32 %v2803_v5, %v2617_v29  ;;  %v2679_v5 = vld [vmem:[#allocation2 + $0xff] sm:$0xff] }
 0x313   : > { %v2707_v2 = vpack.c.bf16 %v2679_v5, %v2678_v19  ;;  %v3473_v34 = vld [vmem:[#allocation3 + $0x32] sm:$0xff] }
 0x314   : > { %3368 = vst.msk [vmem:[#allocation3 + $0x3c] sm:$0xff] %vm339_vm1, %v3277_v54  ;;  %v2946_v43 = vmul.f32 %v7718_v24, %v2901_v46 }
 0x315   : > { %v2237_v51 = vpop.f32.mrf.mxu2 }
 0x316   : > { %v2810_v47 = vpop.f32.mrf.mxu0  ;;  %v2521_v17 = vpop.f32.mrf.mxu3  ;;  %v2991_v63 = vadd.f32 %v7723_v22, %v2946_v43  ;;  %v2334_v50 = vadd.f32 %v2237_v51, %v7381_v15 }
 0x317   : > { %v3097_v43 = vpop.permute.xlu2 %3096 }
 0x318   : > { %v3032_v27 = vmax.f32 %v2991_v63, 0.0  ;;  %v2618_v30 = vadd.f32 %v2521_v17, %v2334_v50  ;;  %v2110_v63 = vld [vmem:[#allocation2 + $0xf5] sm:$0xff]  ;;  %v2111_v50 = vld [vmem:[#allocation2 + $0xfd] sm:$0xff] }
 0x31a   : > { %v3278_v49 = vmul.f32 %v3092_v14, %v3032_v27  ;;  %v2902_v48 = vadd.f32 %v2805_v35, %v2618_v30  ;;  %6403 = vmatmul.msk.bf16.gmra.mxu2 %vm339_vm1, %v2138_v3  ;;  %v2394_v3 = vld [vmem:[#allocation2 + $0xf6] sm:$0xff] }
 0x31b   : > { %6425 = vmatmul.msk.bf16.gmra.mxu3 %vm339_vm1, %v2422_v55  ;;  %v3474_v29 = vld [vmem:[#allocation3 + $0x3a] sm:$0xff]  ;;  %v2395_v55 = vld [vmem:[#allocation2 + $0xfe] sm:$0xff] }
 0x31c   : > { %3369 = vst.msk [vmem:[#allocation3 + $0x44] sm:$0xff] %vm339_vm1, %v3278_v49  ;;  %v2947_v15 = vmul.f32 %v7718_v24, %v2902_v48  ;;  %v3512_v54 = vpack.c.bf16 %v3474_v29, %v3473_v34  ;;  %v2139_v49 = vpack.c.bf16 %v2111_v50, %v2110_v63  ;;  %v2423_v48 = vpack.c.bf16 %v2395_v55, %v2394_v3  ;;  %v2681_v34 = vld [vmem:[#allocation2 + $0x10f] sm:$0xff]  ;;  %v3107_v3 = vpop.permute.xlu1 %3106 }
 0x31d   : > { %v2240_v46 = vpop.f32.mrf.mxu2 }
 0x31e   : > { %v2813_v21 = vpop.f32.mrf.mxu0  ;;  %v2524_v36 = vpop.f32.mrf.mxu3  ;;  %v2992_v40 = vadd.f32 %v7723_v22, %v2947_v15  ;;  %v2335_v57 = vadd.f32 %v2240_v46, %v7386_v58  ;;  %6460 = vmatmul.msk.bf16.gmra.mxu1 %vm339_vm1, %v3512_v54 }
 0x31f   : > { %v3102_v15 = vpop.permute.xlu0 %3101 }
 0x320   : > { %v3033_v35 = vmax.f32 %v2992_v40, 0.0  ;;  %v2619_v9 = vadd.f32 %v2524_v36, %v2335_v57 }
 0x321   : > { %6448 = vmatmul.msk.bf16.gmra.mxu0 %vm339_vm1, %v2707_v2  ;;  %v2680_v2 = vld [vmem:[#allocation2 + $0x107] sm:$0xff] }
 0x322   : > { %v3279_v51 = vmul.f32 %v3097_v43, %v3033_v35  ;;  %v2903_v17 = vadd.f32 %v2808_v18, %v2619_v9  ;;  %v2708_v36 = vpack.c.bf16 %v2681_v34, %v2680_v2 }
 0x323   : > { %v3475_v40 = vld [vmem:[#allocation3 + $0x42] sm:$0xff] }
 0x324   : > { %3370 = vst.msk [vmem:[#allocation3 + $0x4c] sm:$0xff] %vm339_vm1, %v3279_v51  ;;  %v2948_v19 = vmul.f32 %v7718_v24, %v2903_v17 }
 0x325   : > { %v2242_v5 = vpop.f32.mrf.mxu2 }
 0x326   : > { %v2815_v14 = vpop.f32.mrf.mxu0  ;;  %v2526_v58 = vpop.f32.mrf.mxu3  ;;  %v2993_v27 = vadd.f32 %v7723_v22, %v2948_v19  ;;  %v2336_v30 = vadd.f32 %v2242_v5, %v7391_v13  ;;  %v2112_v5 = vld [vmem:[#allocation2 + $0x105] sm:$0xff] }
 0x328   : > { %v3034_v18 = vmax.f32 %v2993_v27, 0.0  ;;  %v2620_v29 = vadd.f32 %v2526_v58, %v2336_v30  ;;  %v2113_v58 = vld [vmem:[#allocation2 + $0x10d] sm:$0xff] }
 0x329   : > { %v2396_v27 = vld [vmem:[#allocation2 + $0x106] sm:$0xff]  ;;  %v2397_v30 = vld [vmem:[#allocation2 + $0x10e] sm:$0xff] }
 0x32a   : > { %v3280_v54 = vmul.f32 %v3102_v15, %v3034_v18  ;;  %v2904_v46 = vadd.f32 %v2810_v47, %v2620_v29  ;;  %6404 = vmatmul.msk.bf16.gmra.mxu2 %vm339_vm1, %v2139_v49  ;;  %v2140_v29 = vpack.c.bf16 %v2113_v58, %v2112_v5  ;;  %v2424_v15 = vpack.c.bf16 %v2397_v30, %v2396_v27  ;;  %v3117_v5 = vpop.permute.xlu0 %3116  ;;  %v2114_v30 = vld [vmem:[#allocation2 + $0x115] sm:$0xff] }
 0x32b   : > { %6426 = vmatmul.msk.bf16.gmra.mxu3 %vm339_vm1, %v2423_v48  ;;  %v3476_v57 = vld [vmem:[#allocation3 + $0x4a] sm:$0xff] }
 0x32c   : > { %3371 = vst.msk [vmem:[#allocation3 + $0x54] sm:$0xff] %vm339_vm1, %v3280_v54  ;;  %v2949_v13 = vmul.f32 %v7718_v24, %v2904_v46  ;;  %v3513_v9 = vpack.c.bf16 %v3476_v57, %v3475_v40  ;;  %v2682_v54 = vld [vmem:[#allocation2 + $0x117] sm:$0xff]  ;;  %v2683_v46 = vld [vmem:[#allocation2 + $0x11f] sm:$0xff]  ;;  %v3112_v40 = vpop.permute.xlu2 %3111 }
 0x32d   : > { %v2245_v43 = vpop.f32.mrf.mxu2 }
 0x32e   : > { %v2818_v35 = vpop.f32.mrf.mxu0  ;;  %v2529_v51 = vpop.f32.mrf.mxu3  ;;  %v2994_v17 = vadd.f32 %v7723_v22, %v2949_v13  ;;  %v2337_v63 = vadd.f32 %v2245_v43, %v7396_v28  ;;  %6461 = vmatmul.msk.bf16.gmra.mxu1 %vm339_vm1, %v3513_v9  ;;  %v2709_v9 = vpack.c.bf16 %v2683_v46, %v2682_v54 }
 0x330   : > { %v3035_v47 = vmax.f32 %v2994_v17, 0.0  ;;  %v2621_v50 = vadd.f32 %v2529_v51, %v2337_v63 }
 0x331   : > { %6449 = vmatmul.msk.bf16.gmra.mxu0 %vm339_vm1, %v2708_v36 }
 0x332   : > { %v3281_v55 = vmul.f32 %v3107_v3, %v3035_v47  ;;  %v2905_v19 = vadd.f32 %v2813_v21, %v2621_v50 }
 0x333   : > { %v3477_v43 = vld [vmem:[#allocation3 + $0x52] sm:$0xff] }
 0x334   : > { %3372 = vst.msk [vmem:[#allocation3 + $0x5c] sm:$0xff] %vm339_vm1, %v3281_v55  ;;  %v2950_v48 = vmul.f32 %v7718_v24, %v2905_v19 }
 0x335   : > { %v2247_v2 = vpop.f32.mrf.mxu2 }
 0x336   : > { %v2820_v49 = vpop.f32.mrf.mxu0  ;;  %v2531_v28 = vpop.f32.mrf.mxu3  ;;  %v2995_v34 = vadd.f32 %v7723_v22, %v2950_v48  ;;  %v2338_v18 = vadd.f32 %v2247_v2, %v7401_v26  ;;  %v2115_v48 = vld [vmem:[#allocation2 + $0x11d] sm:$0xff] }
 0x337   : > { %v2398_v2 = vld [vmem:[#allocation2 + $0x116] sm:$0xff]  ;;  %v2141_v46 = vpack.c.bf16 %v2115_v48, %v2114_v30  ;;  %v2116_v48 = vld [vmem:[#allocation2 + $0x125] sm:$0xff] }
 0x338   : > { %v3036_v21 = vmax.f32 %v2995_v34, 0.0  ;;  %v2622_v36 = vadd.f32 %v2531_v28, %v2338_v18  ;;  %v2399_v28 = vld [vmem:[#allocation2 + $0x11e] sm:$0xff] }
 0x33a   : > { %v3282_v57 = vmul.f32 %v3112_v40, %v3036_v21  ;;  %v2906_v13 = vadd.f32 %v2815_v14, %v2622_v36  ;;  %6405 = vmatmul.msk.bf16.gmra.mxu2 %vm339_vm1, %v2140_v29  ;;  %v2425_v21 = vpack.c.bf16 %v2399_v28, %v2398_v2  ;;  %v2684_v36 = vld [vmem:[#allocation2 + $0x127] sm:$0xff]  ;;  %v2685_v40 = vld [vmem:[#allocation2 + $0x12f] sm:$0xff] }
 0x33b   : > { %6427 = vmatmul.msk.bf16.gmra.mxu3 %vm339_vm1, %v2424_v15  ;;  %v3478_v51 = vld [vmem:[#allocation3 + $0x5a] sm:$0xff] }
 0x33c   : > { %3373 = vst.msk [vmem:[#allocation3 + $0x64] sm:$0xff] %vm339_vm1, %v3282_v57  ;;  %v2951_v26 = vmul.f32 %v7718_v24, %v2906_v13  ;;  %v3514_v63 = vpack.c.bf16 %v3478_v51, %v3477_v43  ;;  %v3122_v13 = vpop.permute.xlu1 %3121  ;;  %v2710_v51 = vpack.c.bf16 %v2685_v40, %v2684_v36  ;;  %v2117_v2 = vld [vmem:[#allocation2 + $0x12d] sm:$0xff] }
 0x33d   : > { %v2250_v47 = vpop.f32.mrf.mxu2  ;;  %v2400_v28 = vld [vmem:[#allocation2 + $0x126] sm:$0xff]  ;;  %v2142_v36 = vpack.c.bf16 %v2117_v2, %v2116_v48  ;;  %v2118_v2 = vld [vmem:[#allocation2 + $0x135] sm:$0xff] }
 0x33e   : > { %v2823_v17 = vpop.f32.mrf.mxu0  ;;  %v2534_v50 = vpop.f32.mrf.mxu3  ;;  %v2996_v3 = vadd.f32 %v7723_v22, %v2951_v26  ;;  %v2339_v55 = vadd.f32 %v2250_v47, %v7406_v1  ;;  %6462 = vmatmul.msk.bf16.gmra.mxu1 %vm339_vm1, %v3514_v63 }
 0x340   : > { %v3037_v14 = vmax.f32 %v2996_v3, 0.0  ;;  %v2623_v19 = vadd.f32 %v2534_v50, %v2339_v55 }
 0x341   : > { %6450 = vmatmul.msk.bf16.gmra.mxu0 %vm339_vm1, %v2709_v9 }
 0x342   : > { %v3283_v58 = vmul.f32 %v3117_v5, %v3037_v14  ;;  %v2907_v27 = vadd.f32 %v2818_v35, %v2623_v19 }
 0x343   : > { %v3479_v26 = vld [vmem:[#allocation3 + $0x62] sm:$0xff] }
 0x344   : > { %3374 = vst.msk [vmem:[#allocation3 + $0x6c] sm:$0xff] %vm339_vm1, %v3283_v58  ;;  %v2952_v18 = vmul.f32 %v7718_v24, %v2907_v27  ;;  %v3127_v58 = vpop.permute.xlu2 %3126 }
 0x345   : > { %v2252_v29 = vpop.f32.mrf.mxu2 }
 0x346   : > { %v2825_v34 = vpop.f32.mrf.mxu0  ;;  %v2536_v1 = vpop.f32.mrf.mxu3  ;;  %v2997_v15 = vadd.f32 %v7723_v22, %v2952_v18  ;;  %v2340_v54 = vadd.f32 %v2252_v29, %v7411_v8  ;;  %v2401_v18 = vld [vmem:[#allocation2 + $0x12e] sm:$0xff] }
 0x347   : > { %v2426_v40 = vpack.c.bf16 %v2401_v18, %v2400_v28  ;;  %v2119_v28 = vld [vmem:[#allocation2 + $0x13d] sm:$0xff] }
 0x348   : > { %v3038_v35 = vmax.f32 %v2997_v15, 0.0  ;;  %v2624_v57 = vadd.f32 %v2536_v1, %v2340_v54  ;;  %v2402_v18 = vld [vmem:[#allocation2 + $0x136] sm:$0xff] }
 0x349   : > { %v3608_v1 = vpop.f32.mrf.mxu1 }
 0x34a   : > { %v3284_v9 = vmul.f32 %v3122_v13, %v3038_v35  ;;  %v2908_v43 = vadd.f32 %v2820_v49, %v2624_v57  ;;  %6406 = vmatmul.msk.bf16.gmra.mxu2 %vm339_vm1, %v2141_v46  ;;  %v2686_v35 = vld [vmem:[#allocation2 + $0x137] sm:$0xff] }
 0x34b   : > { %6428 = vmatmul.msk.bf16.gmra.mxu3 %vm339_vm1, %v2425_v21  ;;  %v3480_v63 = vld [vmem:[#allocation3 + $0x6a] sm:$0xff] }
 0x34c   : > { %3375 = vst.msk [vmem:[#allocation3 + $0x74] sm:$0xff] %vm339_vm1, %v3284_v9  ;;  %v2953_v8 = vmul.f32 %v7718_v24, %v2908_v43  ;;  %v3515_v50 = vpack.c.bf16 %v3480_v63, %v3479_v26  ;;  %v3132_v9 = vpop.permute.xlu0 %3131  ;;  %v2403_v1 = vld [vmem:[#allocation2 + $0x13e] sm:$0xff] }
 0x34d   : > { %v2255_v3 = vpop.f32.mrf.mxu2 }
 0x34e   : > { %v2828_v47 = vpop.f32.mrf.mxu0  ;;  %v2539_v55 = vpop.f32.mrf.mxu3  ;;  %v2998_v14 = vadd.f32 %v7723_v22, %v2953_v8  ;;  %v2341_v19 = vadd.f32 %v2255_v3, %v7419_v12  ;;  %6463 = vmatmul.msk.bf16.gmra.mxu1 %vm339_vm1, %v3515_v50 }
 0x350   : > { %v3039_v49 = vmax.f32 %v2998_v14, 0.0  ;;  %v2625_v5 = vadd.f32 %v2539_v55, %v2341_v19 }
 0x351   : > { %6451 = vmatmul.msk.bf16.gmra.mxu0 %vm339_vm1, %v2710_v51  ;;  %v3609_v3 = vpop.f32.mrf.mxu1 }
 0x352   : > { %v3285_v27 = vmul.f32 %v3127_v58, %v3039_v49  ;;  %v2909_v30 = vadd.f32 %v2823_v17, %v2625_v5  ;;  %v2687_v17 = vld [vmem:[#allocation2 + $0x13f] sm:$0xff] }
 0x353   : > { %v2711_v26 = vpack.c.bf16 %v2687_v17, %v2686_v35  ;;  %v3481_v63 = vld [vmem:[#allocation3 + $0x72] sm:$0xff]  ;;  %v2689_v17 = vld [vmem:[#allocation2 + $0x14f] sm:$0xff] }
 0x354   : > { %3376 = vst.msk [vmem:[#allocation3 + $0x7c] sm:$0xff] %vm339_vm1, %v3285_v27  ;;  %v2954_v15 = vmul.f32 %v7718_v24, %v2909_v30  ;;  %v3137_v27 = vpop.permute.xlu1 %3136  ;;  %v2688_v35 = vld [vmem:[#allocation2 + $0x147] sm:$0xff] }
 0x355   : > { %v2257_v12 = vpop.f32.mrf.mxu2 }
 0x356   : > { %v2830_v29 = vpop.f32.mrf.mxu0  ;;  %v2541_v54 = vpop.f32.mrf.mxu3  ;;  %v2999_v46 = vadd.f32 %v7723_v22, %v2954_v15  ;;  %v2342_v21 = vadd.f32 %v2257_v12, %v7427_v62 }
 0x358   : > { %v3040_v57 = vmax.f32 %v2999_v46, 0.0  ;;  %v2626_v13 = vadd.f32 %v2541_v54, %v2342_v21 }
 0x35a   : > { %v3286_v43 = vmul.f32 %v3132_v9, %v3040_v57  ;;  %v2910_v51 = vadd.f32 %v2825_v34, %v2626_v13  ;;  %6407 = vmatmul.msk.bf16.gmra.mxu2 %vm339_vm1, %v2142_v36  ;;  %v2143_v36 = vpack.c.bf16 %v2119_v28, %v2118_v2  ;;  %v3142_v13 = vpop.permute.xlu2 %3141  ;;  %v2405_v2 = vld [vmem:[#allocation2 + $0x14e] sm:$0xff] }
 0x35b   : > { %6429 = vmatmul.msk.bf16.gmra.mxu3 %vm339_vm1, %v2426_v40  ;;  %v3482_v8 = vld [vmem:[#allocation3 + $0x7a] sm:$0xff]  ;;  %v2427_v40 = vpack.c.bf16 %v2403_v1, %v2402_v18 }
 0x35c   : > { %3377 = vst.msk [vmem:[#allocation3 + $0x84] sm:$0xff] %vm339_vm1, %v3286_v43  ;;  %v2955_v62 = vmul.f32 %v7718_v24, %v2910_v51  ;;  %v3516_v55 = vpack.c.bf16 %v3482_v8, %v3481_v63  ;;  %v2712_v51 = vpack.c.bf16 %v2689_v17, %v2688_v35  ;;  %v3152_v35 = vpop.permute.xlu1 %3151 }
 0x35d   : > { %v2260_v14 = vpop.f32.mrf.mxu2 }
 0x35e   : > { %v2833_v50 = vpop.f32.mrf.mxu0  ;;  %v2544_v19 = vpop.f32.mrf.mxu3  ;;  %v3000_v49 = vadd.f32 %v7723_v22, %v2955_v62  ;;  %v2343_v34 = vadd.f32 %v2260_v14, %v7438_v39  ;;  %6464 = vmatmul.msk.bf16.gmra.mxu1 %vm339_vm1, %v3516_v55 }
 0x360   : > { %v3041_v5 = vmax.f32 %v3000_v49, 0.0  ;;  %v2627_v58 = vadd.f32 %v2544_v19, %v2343_v34  ;;  %v3147_v34 = vpop.permute.xlu0 %3146 }
 0x361   : > { %6452 = vmatmul.msk.bf16.gmra.mxu0 %vm339_vm1, %v2711_v26 }
 0x362   : > { %v3287_v30 = vmul.f32 %v3137_v27, %v3041_v5  ;;  %v2911_v48 = vadd.f32 %v2828_v47, %v2627_v58  ;;  %v2120_v27 = vld [vmem:[#allocation2 + $0x145] sm:$0xff] }
 0x363   : > { %v3483_v26 = vld [vmem:[#allocation3 + $0x82] sm:$0xff] }
 0x364   : > { %3378 = vst.msk [vmem:[#allocation3 + $0x8c] sm:$0xff] %vm339_vm1, %v3287_v30  ;;  %v2956_v12 = vmul.f32 %v7718_v24, %v2911_v48  ;;  %v2121_v30 = vld [vmem:[#allocation2 + $0x14d] sm:$0xff] }
 0x365   : > { %v2262_v54 = vpop.f32.mrf.mxu2  ;;  %v2404_v48 = vld [vmem:[#allocation2 + $0x146] sm:$0xff] }
 0x366   : > { %v2835_v15 = vpop.f32.mrf.mxu0  ;;  %v2546_v39 = vpop.f32.mrf.mxu3  ;;  %v3001_v46 = vadd.f32 %v7723_v22, %v2956_v12  ;;  %v2344_v21 = vadd.f32 %v2262_v54, %v7449_v31 }
 0x368   : > { %v3042_v47 = vmax.f32 %v3001_v46, 0.0  ;;  %v2628_v57 = vadd.f32 %v2546_v39, %v2344_v21  ;;  %v2144_v39 = vpack.c.bf16 %v2121_v30, %v2120_v27  ;;  %v2428_v46 = vpack.c.bf16 %v2405_v2, %v2404_v48  ;;  %v2690_v21 = vld [vmem:[#allocation2 + $0x157] sm:$0xff] }
 0x369   : > { %v2064_v27 = vadd.f32 %v7460_v25, %v7495_v10 }
 0x36a   : > { %v3288_v9 = vmul.f32 %v3142_v13, %v3042_v47  ;;  %v2912_v43 = vadd.f32 %v2830_v29, %v2628_v57  ;;  %6408 = vmatmul.msk.bf16.gmra.mxu2 %vm339_vm1, %v2143_v36  ;;  %v2691_v36 = vld [vmem:[#allocation2 + $0x15f] sm:$0xff] }
 0x36b   : > { %6430 = vmatmul.msk.bf16.gmra.mxu3 %vm339_vm1, %v2427_v40  ;;  %v3484_v63 = vld [vmem:[#allocation3 + $0x8a] sm:$0xff]  ;;  %v2713_v57 = vpack.c.bf16 %v2691_v36, %v2690_v21 }
 0x36c   : > { %3379 = vst.msk [vmem:[#allocation3 + $0x94] sm:$0xff] %vm339_vm1, %v3288_v9  ;;  %v2957_v31 = vmul.f32 %v7718_v24, %v2912_v43  ;;  %v3517_v3 = vpack.c.bf16 %v3484_v63, %v3483_v26 }
 0x36d   : > { %v2265_v62 = vpop.f32.mrf.mxu2 }
 0x36e   : > { %v2838_v8 = vpop.f32.mrf.mxu0  ;;  %v2549_v55 = vpop.f32.mrf.mxu3  ;;  %v3002_v14 = vadd.f32 %v7723_v22, %v2957_v31  ;;  %v2345_v19 = vadd.f32 %v2265_v62, %v7462_v16  ;;  %6465 = vmatmul.msk.bf16.gmra.mxu1 %vm339_vm1, %v3517_v3 }
 0x370   : > { %v3043_v29 = vmax.f32 %v3002_v14, 0.0  ;;  %v2629_v49 = vadd.f32 %v2549_v55, %v2345_v19  ;;  %v3157_v55 = vpop.permute.xlu2 %3156 }
 0x371   : > { %6453 = vmatmul.msk.bf16.gmra.mxu0 %vm339_vm1, %v2712_v51 }
 0x372   : > { %v3289_v5 = vmul.f32 %v3147_v34, %v3043_v29  ;;  %v2913_v58 = vadd.f32 %v2833_v50, %v2629_v49  ;;  %v2122_v29 = vld [vmem:[#allocation2 + $0x155] sm:$0xff]  ;;  %v2123_v49 = vld [vmem:[#allocation2 + $0x15d] sm:$0xff] }
 0x373   : > { %v3485_v13 = vld [vmem:[#allocation3 + $0x92] sm:$0xff]  ;;  %v2406_v34 = vld [vmem:[#allocation2 + $0x156] sm:$0xff] }
 0x374   : > { %3380 = vst.msk [vmem:[#allocation3 + $0x9c] sm:$0xff] %vm339_vm1, %v3289_v5  ;;  %v2958_v18 = vmul.f32 %v7718_v24, %v2913_v58  ;;  %v2407_v5 = vld [vmem:[#allocation2 + $0x15e] sm:$0xff] }
 0x375   : > { %v2267_v1 = vpop.f32.mrf.mxu2 }
 0x376   : > { %v2840_v28 = vpop.f32.mrf.mxu0  ;;  %v2551_v16 = vpop.f32.mrf.mxu3  ;;  %v3003_v12 = vadd.f32 %v7723_v22, %v2958_v18  ;;  %v2346_v54 = vadd.f32 %v2267_v1, %v7473_v56  ;;  %v2145_v1 = vpack.c.bf16 %v2123_v49, %v2122_v29  ;;  %v2066_v29 = vadd.f32 %v7484_v44, %v7525_v23 }
 0x378   : > { %v3044_v50 = vmax.f32 %v3003_v12, 0.0  ;;  %v2630_v40 = vadd.f32 %v2551_v16, %v2346_v54  ;;  %v2429_v16 = vpack.c.bf16 %v2407_v5, %v2406_v34  ;;  %v2693_v12 = vld [vmem:[#allocation2 + $0x16f] sm:$0xff] }
 0x37a   : > { %v3290_v17 = vmul.f32 %v3152_v35, %v3044_v50  ;;  %v2914_v47 = vadd.f32 %v2835_v15, %v2630_v40  ;;  %6409 = vmatmul.msk.bf16.gmra.mxu2 %vm339_vm1, %v2144_v39 }
 0x37b   : > { %6431 = vmatmul.msk.bf16.gmra.mxu3 %vm339_vm1, %v2428_v46  ;;  %v3486_v9 = vld [vmem:[#allocation3 + $0x9a] sm:$0xff]  ;;  %v3162_v46 = vpop.permute.xlu0 %3161 }
 0x37c   : > { %3381 = vst.msk [vmem:[#allocation3 + $0xa4] sm:$0xff] %vm339_vm1, %v3290_v17  ;;  %v2959_v56 = vmul.f32 %v7718_v24, %v2914_v47  ;;  %v3518_v51 = vpack.c.bf16 %v3486_v9, %v3485_v13 }
 0x37d   : > { %v2270_v26 = vpop.f32.mrf.mxu2 }
 0x37e   : > { %v2843_v43 = vpop.f32.mrf.mxu0  ;;  %v2554_v63 = vpop.f32.mrf.mxu3  ;;  %v3004_v31 = vadd.f32 %v7723_v22, %v2959_v56  ;;  %v2347_v3 = vadd.f32 %v2270_v26, %v7486_v59  ;;  %6466 = vmatmul.msk.bf16.gmra.mxu1 %vm339_vm1, %v3518_v51 }
 0x37f   : > { %v3167_v26 = vpop.permute.xlu1 %3166 }
 0x380   : > { %v3045_v15 = vmax.f32 %v3004_v31, 0.0  ;;  %v2631_v62 = vadd.f32 %v2554_v63, %v2347_v3  ;;  %v2124_v3 = vld [vmem:[#allocation2 + $0x165] sm:$0xff] }
 0x381   : > { %6454 = vmatmul.msk.bf16.gmra.mxu0 %vm339_vm1, %v2713_v57 }
 0x382   : > { %v3291_v14 = vmul.f32 %v3157_v55, %v3045_v15  ;;  %v2915_v19 = vadd.f32 %v2838_v8, %v2631_v62  ;;  %v2692_v8 = vld [vmem:[#allocation2 + $0x167] sm:$0xff] }
 0x383   : > { %v2714_v25 = vpack.c.bf16 %v2693_v12, %v2692_v8  ;;  %v3487_v50 = vld [vmem:[#allocation3 + $0xa2] sm:$0xff]  ;;  %v2408_v55 = vld [vmem:[#allocation2 + $0x166] sm:$0xff] }
 0x384   : > { %3382 = vst.msk [vmem:[#allocation3 + $0xac] sm:$0xff] %vm339_vm1, %v3291_v14  ;;  %v2960_v59 = vmul.f32 %v7718_v24, %v2915_v19  ;;  %v2125_v62 = vld [vmem:[#allocation2 + $0x16d] sm:$0xff] }
 0x385   : > { %v2272_v30 = vpop.f32.mrf.mxu2  ;;  %v2409_v14 = vld [vmem:[#allocation2 + $0x16e] sm:$0xff] }
 0x386   : > { %v2845_v58 = vpop.f32.mrf.mxu0  ;;  %v2556_v48 = vpop.f32.mrf.mxu3  ;;  %v3005_v2 = vadd.f32 %v7723_v22, %v2960_v59  ;;  %v2348_v18 = vadd.f32 %v2272_v30, %v2064_v27  ;;  %v2430_v59 = vpack.c.bf16 %v2409_v14, %v2408_v55  ;;  %v2694_v30 = vld [vmem:[#allocation2 + $0x177] sm:$0xf] }
 0x387   : > { %v2715_v44 = vpack.c.bf16 %v2694_v30, %v2694_v30 }
 0x388   : > { %v3046_v54 = vmax.f32 %v3005_v2, 0.0  ;;  %v2632_v39 = vadd.f32 %v2556_v48, %v2348_v18  ;;  %v3172_v18 = vpop.permute.xlu2 %3171 }
 0x38a   : > { %v3292_v21 = vmul.f32 %v3162_v46, %v3046_v54  ;;  %v2916_v36 = vadd.f32 %v2840_v28, %v2632_v39  ;;  %6410 = vmatmul.msk.bf16.gmra.mxu2 %vm339_vm1, %v2145_v1 }
 0x38b   : > { %6432 = vmatmul.msk.bf16.gmra.mxu3 %vm339_vm1, %v2429_v16  ;;  %v7838_v10 = vpop.f32.mrf.mxu1  ;;  %v3488_v40 = vld [vmem:[#allocation3 + $0xaa] sm:$0xff] }
 0x38c   : > { %3383 = vst.msk [vmem:[#allocation3 + $0xb4] sm:$0xff] %vm339_vm1, %v3292_v21  ;;  %v2961_v17 = vmul.f32 %v7718_v24, %v2916_v36  ;;  %v3519_v47 = vpack.c.bf16 %v3488_v40, %v3487_v50 }
 0x38d   : > { %v2275_v57 = vpop.f32.mrf.mxu2 }
 0x38e   : > { %v2848_v35 = vpop.f32.mrf.mxu0  ;;  %v2559_v13 = vpop.f32.mrf.mxu3  ;;  %v3006_v9 = vadd.f32 %v7723_v22, %v2961_v17  ;;  %v2349_v28 = vadd.f32 %v2275_v57, %v7513_v0  ;;  %6467 = vmatmul.msk.bf16.gmra.mxu1 %vm339_vm1, %v3519_v47 }
 0x38f   : > { %v3177_v17 = vpop.permute.xlu0 %3176 }
 0x390   : > { %v3047_v56 = vmax.f32 %v3006_v9, 0.0  ;;  %v2633_v51 = vadd.f32 %v2559_v13, %v2349_v28  ;;  %v2126_v9 = vld [vmem:[#allocation2 + $0x175] sm:$0xf] }
 0x391   : > { %6455 = vmatmul.msk.bf16.gmra.mxu0 %vm339_vm1, %v2714_v25  ;;  %v2410_v28 = vld [vmem:[#allocation2 + $0x176] sm:$0xf] }
 0x392   : > { %v3293_v63 = vmul.f32 %v3167_v26, %v3047_v56  ;;  %v2917_v31 = vadd.f32 %v2843_v43, %v2633_v51  ;;  %v2146_v43 = vpack.c.bf16 %v2125_v62, %v2124_v3  ;;  %v2068_v51 = vadd.f32 %v7511_v33, %v7555_v38 }
 0x393   : > { %v7846_v15 = vpop.f32.mrf.mxu1  ;;  %v3489_v8 = vld [vmem:[#allocation3 + $0xb2] sm:$0xff]  ;;  %v2147_v62 = vpack.c.bf16 %v2126_v9, %v2126_v9  ;;  %v2431_v55 = vpack.c.bf16 %v2410_v28, %v2410_v28 }
 0x394   : > { %3384 = vst.msk [vmem:[#allocation3 + $0xbc] sm:$0xff] %vm339_vm1, %v3293_v63  ;;  %v2962_v0 = vmul.f32 %v7718_v24, %v2917_v31 }
 0x395   : > { %v2277_v49 = vpop.f32.mrf.mxu2 }
 0x396   : > { %v2850_v19 = vpop.f32.mrf.mxu0  ;;  %v2561_v34 = vpop.f32.mrf.mxu3  ;;  %v3007_v5 = vadd.f32 %v7723_v22, %v2962_v0  ;;  %v2350_v27 = vadd.f32 %v2277_v49, %v2066_v29  ;;  %v4160_v0 = vld [vmem:[#allocation3 + $0x2b] sm:$0xff] }
 0x397   : > { %v3182_v29 = vpop.permute.xlu1 %3181 }
 0x398   : > { %v3048_v48 = vmax.f32 %v3007_v5, 0.0  ;;  %v2634_v2 = vadd.f32 %v2561_v34, %v2350_v27 }
 0x39a   : > { %v3294_v1 = vmul.f32 %v3172_v18, %v3048_v48  ;;  %v2918_v16 = vadd.f32 %v2845_v58, %v2634_v2  ;;  %6411 = vmatmul.msk.bf16.gmra.mxu2 %vm339_vm1, %v2146_v43  ;;  %v4159_v43 = vld [vmem:[#allocation3 + $0x23] sm:$0xff] }
 0x39b   : > { %6433 = vmatmul.msk.bf16.gmra.mxu3 %vm339_vm1, %v2430_v59  ;;  %v7855_v23 = vpop.f32.mrf.mxu1  ;;  %v3490_v12 = vld [vmem:[#allocation3 + $0xba] sm:$0xff]  ;;  %v7876_v48 = vpack.c.bf16 %v4160_v0, %v4159_v43 }
 0x39c   : > { %3385 = vst.msk [vmem:[#allocation3 + $0xc4] sm:$0xff] %vm339_vm1, %v3294_v1  ;;  %v2963_v39 = vmul.f32 %v7718_v24, %v2918_v16  ;;  %v3520_v46 = vpack.c.bf16 %v3490_v12, %v3489_v8  ;;  %v3187_v8 = vpop.permute.xlu2 %3186 }
 0x39d   : > { %v2280_v21 = vpop.f32.mrf.mxu2 }
 0x39e   : > { %v2853_v54 = vpop.f32.mrf.mxu0  ;;  %v2564_v36 = vpop.f32.mrf.mxu3  ;;  %v3008_v25 = vadd.f32 %v7723_v22, %v2963_v39  ;;  %v2351_v58 = vadd.f32 %v2280_v21, %v7543_v42  ;;  %6468 = vmatmul.msk.bf16.gmra.mxu1 %vm339_vm1, %v3520_v46  ;;  %v3406_v46 = vld [vmem:[#allocation3 + $0x11] sm:$0xff] }
 0x3a0   : > { %v3049_v50 = vmax.f32 %v3008_v25, 0.0  ;;  %v2635_v40 = vadd.f32 %v2564_v36, %v2351_v58  ;;  %v3407_v36 = vld [vmem:[#allocation3 + $0x19] sm:$0xff] }
 0x3a1   : > { %6456 = vmatmul.msk.bf16.gmra.mxu0 %vm339_vm1, %v2715_v44  ;;  %v3883_v25 = vld [vmem:[#allocation3 + $0x13] sm:$0xff]  ;;  %v3884_v58 = vld [vmem:[#allocation3 + $0x1b] sm:$0xff] }
 0x3a2   : > { %v3295_v47 = vmul.f32 %v3177_v17, %v3049_v50  ;;  %v2919_v57 = vadd.f32 %v2848_v35, %v2635_v40  ;;  %v3924_v28 = vpack.c.bf16 %v3884_v58, %v3883_v25 }
 0x3a3   : > { %v7863_v13 = vpop.f32.mrf.mxu1  ;;  %v3491_v38 = vld [vmem:[#allocation3 + $0xc2] sm:$0xff] }
 0x3a4   : > { %3386 = vst.msk [vmem:[#allocation3 + $0xcc] sm:$0xff] %vm339_vm1, %v3295_v47  ;;  %v2964_v42 = vmul.f32 %v7718_v24, %v2919_v57  ;;  %v3202_v58 = vpop.permute.xlu2 %3201 }
 0x3a5   : > { %v2282_v26 = vpop.f32.mrf.mxu2 }
 0x3a6   : > { %v2855_v56 = vpop.f32.mrf.mxu0  ;;  %v2566_v63 = vpop.f32.mrf.mxu3  ;;  %v3009_v31 = vadd.f32 %v7723_v22, %v2964_v42  ;;  %v2352_v3 = vadd.f32 %v2282_v26, %v2068_v51 }
 0x3a7   : > { %v3192_v26 = vpop.permute.xlu0 %3191 }
 0x3a8   : > { %v3050_v35 = vmax.f32 %v3009_v31, 0.0  ;;  %v2636_v14 = vadd.f32 %v2566_v63, %v2352_v3  ;;  %v4162_v63 = vld [vmem:[#allocation3 + $0x3b] sm:$0xff] }
 0x3aa   : > { %v3296_v49 = vmul.f32 %v3182_v29, %v3050_v35  ;;  %v2920_v34 = vadd.f32 %v2850_v19, %v2636_v14  ;;  %6412 = vmatmul.msk.bf16.gmra.mxu2 %vm339_vm1, %v2147_v62 }
 0x3ab   : > { %6434 = vmatmul.msk.bf16.gmra.mxu3 %vm339_vm1, %v2431_v55  ;;  %v7872_v33 = vpop.f32.mrf.mxu1  ;;  %v3492_v5 = vld [vmem:[#allocation3 + $0xca] sm:$0xff]  ;;  %v4161_v55 = vld [vmem:[#allocation3 + $0x33] sm:$0xff] }
 0x3ac   : > { %3387 = vst.msk [vmem:[#allocation3 + $0xd4] sm:$0xff] %vm339_vm1, %v3296_v49  ;;  %v2965_v59 = vmul.f32 %v7718_v24, %v2920_v34  ;;  %v3521_v30 = vpack.c.bf16 %v3492_v5, %v3491_v38  ;;  %v7901_v14 = vpack.c.bf16 %v4162_v63, %v4161_v55  ;;  %v7906_v49 = vld [vmem:[%s8878_s4] ss:$0 sm:$0xff] }
 0x3ad   : > { %v2285_v2 = vpop.f32.mrf.mxu2 }
 0x3ae   : > { %v2858_v27 = vpop.f32.mrf.mxu0  ;;  %v2569_v18 = vpop.f32.mrf.mxu3  ;;  %v3010_v19 = vadd.f32 %v7723_v22, %v2965_v59  ;;  %v2353_v1 = vadd.f32 %v2285_v2, %v7572_v45  ;;  %6469 = vmatmul.msk.bf16.gmra.mxu1 %vm339_vm1, %v3521_v30  ;;  %v2070_v45 = vadd.f32 %v7541_v53, %v7584_v41 }
 0x3af   : > { %v3197_v59 = vpop.permute.xlu1 %3196 }
 0x3b0   : > { %v3051_v16 = vmax.f32 %v3010_v19, 0.0  ;;  %v2637_v44 = vadd.f32 %v2569_v18, %v2353_v1  ;;  %v2072_v1 = vadd.f32 %v7570_v7, %v7607_v60 }
 0x3b1   : > { %6523 = vmatmul.msk.bf16.vlgmr.msrb.gmra.mxu0 %vm339_vm1, %v7876_v48 }
 0x3b2   : > { %v3297_v12 = vmul.f32 %v3187_v8, %v3051_v16  ;;  %v2921_v39 = vadd.f32 %v2853_v54, %v2637_v44  ;;  %v3447_v54 = vpack.c.bf16 %v3407_v36, %v3406_v46  ;;  %v3409_v8 = vld [vmem:[#allocation3 + $0x29] sm:$0xff]  ;;  %v3408_v46 = vld [vmem:[#allocation3 + $0x21] sm:$0xff] }
 0x3b3   : > { %v7883_v21 = vpop.f32.mrf.mxu1  ;;  %v3493_v41 = vld [vmem:[#allocation3 + $0xd2] sm:$0xff] }
 0x3b4   : > { %3388 = vst.msk [vmem:[#allocation3 + $0xdc] sm:$0xff] %vm339_vm1, %v3297_v12  ;;  %v2966_v40 = vmul.f32 %v7718_v24, %v2921_v39 }
 0x3b5   : > { %v2287_v17 = vpop.f32.mrf.mxu2 }
 0x3b6   : > { %v2860_v50 = vpop.f32.mrf.mxu0  ;;  %v2571_v47 = vpop.f32.mrf.mxu3  ;;  %v3011_v57 = vadd.f32 %v7723_v22, %v2966_v40  ;;  %v2354_v9 = vadd.f32 %v2287_v17, %v2070_v45  ;;  %v7898_v22 = vld [vmem:[%s8877_s3] ss:$0 sm:$0xff] }
 0x3b7   : > { %v4164_v45 = vld [vmem:[#allocation3 + $0x4b] sm:$0xff] }
 0x3b8   : > { %v3052_v51 = vmax.f32 %v3011_v57, 0.0  ;;  %v2638_v42 = vadd.f32 %v2571_v47, %v2354_v9  ;;  %v4163_v9 = vld [vmem:[#allocation3 + $0x43] sm:$0xff] }
 0x3ba   : > { %v3298_v31 = vmul.f32 %v3192_v26, %v3052_v51  ;;  %v2922_v3 = vadd.f32 %v2855_v56, %v2638_v42  ;;  %6479 = vmatmul.msk.bf16.vlgmr.msrb.gmra.mxu2 %vm339_vm1, %v3447_v54  ;;  %v7927_v51 = vpack.c.bf16 %v4164_v45, %v4163_v9 }
 0x3bb   : > { %6501 = vmatmul.msk.bf16.vlgmr.msrb.gmra.mxu3 %vm339_vm1, %v3924_v28  ;;  %v7892_v53 = vpop.f32.mrf.mxu1  ;;  %v3494_v24 = vld [vmem:[#allocation3 + $0xda] sm:$0xff] }
 0x3bc   : > { %3389 = vst.msk [vmem:[#allocation3 + $0xe4] sm:$0xff] %vm339_vm1, %v3298_v31  ;;  %v2967_v35 = vmul.f32 %v7898_v22, %v2922_v3  ;;  %v3522_v56 = vpack.c.bf16 %v3494_v24, %v3493_v41  ;;  %v3207_v3 = vpop.permute.xlu0 %3206 }
 0x3bd   : > { %v2290_v29 = vpop.f32.mrf.mxu2 }
 0x3be   : > { %v2863_v62 = vpop.f32.mrf.mxu0  ;;  %v2574_v0 = vpop.f32.mrf.mxu3  ;;  %v3012_v34 = vadd.f32 %v7906_v49, %v2967_v35  ;;  %v2355_v38 = vadd.f32 %v2290_v29, %v7598_v4  ;;  %6470 = vmatmul.msk.bf16.gmra.mxu1 %vm339_vm1, %v3522_v56  ;;  %v2074_v56 = vadd.f32 %v7596_v37, %v7624_v11 }
 0x3c0   : > { %v3053_v5 = vmax.f32 %v3012_v34, 0.0  ;;  %v2639_v43 = vadd.f32 %v2574_v0, %v2355_v38  ;;  %v3411_v34 = vld [vmem:[#allocation3 + $0x39] sm:$0xff] }
 0x3c1   : > { %6524 = vmatmul.msk.bf16.gmra.mxu0 %vm339_vm1, %v7901_v14 }
 0x3c2   : > { %v3299_v30 = vmul.f32 %v3197_v59, %v3053_v5  ;;  %v2923_v2 = vadd.f32 %v2858_v27, %v2639_v43  ;;  %v3448_v27 = vpack.c.bf16 %v3409_v8, %v3408_v46  ;;  %v3410_v43 = vld [vmem:[#allocation3 + $0x31] sm:$0xff] }
 0x3c3   : > { %v7913_v18 = vpop.f32.mrf.mxu1  ;;  %v3495_v60 = vld [vmem:[#allocation3 + $0xe2] sm:$0xff] }
 0x3c4   : > { %3390 = vst.msk [vmem:[#allocation3 + $0xec] sm:$0xff] %vm339_vm1, %v3299_v30  ;;  %v2968_v4 = vmul.f32 %v7898_v22, %v2923_v2  ;;  %v3212_v2 = vpop.permute.xlu1 %3211 }
 0x3c5   : > { %v2292_v16 = vpop.f32.mrf.mxu2 }
 0x3c6   : > { %v2865_v19 = vpop.f32.mrf.mxu0  ;;  %v2576_v44 = vpop.f32.mrf.mxu3  ;;  %v3013_v12 = vadd.f32 %v7906_v49, %v2968_v4  ;;  %v2356_v39 = vadd.f32 %v2292_v16, %v2072_v1  ;;  %v4166_v1 = vld [vmem:[#allocation3 + $0x5b] sm:$0xff] }
 0x3c8   : > { %v3054_v36 = vmax.f32 %v3013_v12, 0.0  ;;  %v2640_v25 = vadd.f32 %v2576_v44, %v2356_v39  ;;  %v4165_v12 = vld [vmem:[#allocation3 + $0x53] sm:$0xff] }
 0x3ca   : > { %v3300_v40 = vmul.f32 %v3202_v58, %v3054_v36  ;;  %v2924_v17 = vadd.f32 %v2860_v50, %v2640_v25  ;;  %6480 = vmatmul.msk.bf16.gmra.mxu2 %vm339_vm1, %v3448_v27  ;;  %v7948_v36 = vpack.c.bf16 %v4166_v1, %v4165_v12  ;;  %v8967_v58 = vld [vmem:[#allocation42_spill] sm:$0xff] }
 0x3cb   : > { %6502 = vmatmul.msk.bf16.gmra.mxu3 %vm339_vm1, %v7876_v48  ;;  %v7923_v7 = vpop.f32.mrf.mxu1  ;;  %v3496_v47 = vld [vmem:[#allocation3 + $0xea] sm:$0xff] }
 0x3cc   : > { %3391 = vst.msk [vmem:[#allocation3 + $0xf4] sm:$0xff] %vm339_vm1, %v3300_v40  ;;  %v2969_v54 = vmul.f32 %v7898_v22, %v2924_v17  ;;  %v3523_v28 = vpack.c.bf16 %v3496_v47, %v3495_v60  ;;  %v3217_v17 = vpop.permute.xlu2 %3216 }
 0x3cd   : > { %v2295_v42 = vpop.f32.mrf.mxu2 }
 0x3ce   : > { %v2868_v57 = vpop.f32.mrf.mxu0  ;;  %v2579_v50 = vpop.f32.mrf.mxu3  ;;  %v3014_v26 = vadd.f32 %v7906_v49, %v2969_v54  ;;  %v2357_v63 = vadd.f32 %v2295_v42, %v7618_v6  ;;  %6471 = vmatmul.msk.bf16.gmra.mxu1 %vm339_vm1, %v3523_v28  ;;  %v8968_v28 = vld [vmem:[#allocation43_spill] sm:$0xff]  ;;  %v8969_v42 = vld [vmem:[#allocation40_spill] sm:$0xff] }
 0x3d0   : > { %v3055_v48 = vmax.f32 %v3014_v26, 0.0  ;;  %v2641_v31 = vadd.f32 %v2579_v50, %v2357_v63  ;;  %v2076_v50 = vadd.f32 %v8969_v42, %v8968_v28  ;;  %v3414_v28 = vld [vmem:[#allocation3 + $0x51] sm:$0xff] }
 0x3d1   : > { %6525 = vmatmul.msk.bf16.gmra.mxu0 %vm339_vm1, %v7927_v51 }
 0x3d2   : > { %v3301_v41 = vmul.f32 %v3207_v3, %v3055_v48  ;;  %v2925_v24 = vadd.f32 %v2863_v62, %v2641_v31  ;;  %v3449_v62 = vpack.c.bf16 %v3411_v34, %v3410_v43  ;;  %v3413_v31 = vld [vmem:[#allocation3 + $0x49] sm:$0xff] }
 0x3d3   : > { %v7934_v55 = vpop.f32.mrf.mxu1  ;;  %v3497_v11 = vld [vmem:[#allocation3 + $0xf2] sm:$0xff] }
 0x3d4   : > { %3392 = vst.msk [vmem:[#allocation3 + $0xfc] sm:$0xff] %vm339_vm1, %v3301_v41  ;;  %v2970_v6 = vmul.f32 %v7898_v22, %v2925_v24  ;;  %v3412_v24 = vld [vmem:[#allocation3 + $0x41] sm:$0xff] }
 0x3d5   : > { %v2297_v29 = vpop.f32.mrf.mxu2 }
 0x3d6   : > { %v2870_v35 = vpop.f32.mrf.mxu0  ;;  %v2581_v0 = vpop.f32.mrf.mxu3  ;;  %v3015_v38 = vadd.f32 %v7906_v49, %v2970_v6  ;;  %v2358_v5 = vadd.f32 %v2297_v29, %v2074_v56 }
 0x3d7   : > { %v3222_v29 = vpop.permute.xlu0 %3221 }
 0x3d8   : > { %v3056_v59 = vmax.f32 %v3015_v38, 0.0  ;;  %v2642_v30 = vadd.f32 %v2581_v0, %v2358_v5  ;;  %v4168_v0 = vld [vmem:[#allocation3 + $0x6b] sm:$0xff] }
 0x3da   : > { %v3302_v4 = vmul.f32 %v3212_v2, %v3056_v59  ;;  %v2926_v16 = vadd.f32 %v2865_v19, %v2642_v30  ;;  %6481 = vmatmul.msk.bf16.gmra.mxu2 %vm339_vm1, %v3449_v62  ;;  %v4167_v62 = vld [vmem:[#allocation3 + $0x63] sm:$0xff] }
 0x3db   : > { %6503 = vmatmul.msk.bf16.gmra.mxu3 %vm339_vm1, %v7901_v14  ;;  %v7944_v37 = vpop.f32.mrf.mxu1  ;;  %v3498_v44 = vld [vmem:[#allocation3 + $0xfa] sm:$0xff] }
 0x3dc   : > { %3393 = vst.msk [vmem:[#allocation3 + $0x104] sm:$0xff] %vm339_vm1, %v3302_v4  ;;  %v2971_v39 = vmul.f32 %v7898_v22, %v2926_v16  ;;  %v3524_v46 = vpack.c.bf16 %v3498_v44, %v3497_v11  ;;  %v7969_v4 = vpack.c.bf16 %v4168_v0, %v4167_v62 }
 0x3dd   : > { %v2300_v25 = vpop.f32.mrf.mxu2 }
 0x3de   : > { %v2873_v8 = vpop.f32.mrf.mxu0  ;;  %v2584_v19 = vpop.f32.mrf.mxu3  ;;  %v3016_v27 = vadd.f32 %v7906_v49, %v2971_v39  ;;  %v2359_v45 = vadd.f32 %v2300_v25, %v8967_v58  ;;  %6472 = vmatmul.msk.bf16.gmra.mxu1 %vm339_vm1, %v3524_v46  ;;  %v8970_v58 = vld [vmem:[#allocation41_spill] sm:$0xff] }
 0x3df   : > { %v3227_v39 = vpop.permute.xlu1 %3226  ;;  %v3237_v62 = vpop.permute.xlu0 %3236 }
 0x3e0   : > { %v3057_v14 = vmax.f32 %v3016_v27, 0.0  ;;  %v2643_v40 = vadd.f32 %v2584_v19, %v2359_v45  ;;  %v2078_v45 = vadd.f32 %v8970_v58, %v7655_v32 }
 0x3e1   : > { %6526 = vmatmul.msk.bf16.gmra.mxu0 %vm339_vm1, %v7948_v36 }
 0x3e2   : > { %v3303_v60 = vmul.f32 %v3217_v17, %v3057_v14  ;;  %v2927_v47 = vadd.f32 %v2868_v57, %v2643_v40  ;;  %v3450_v57 = vpack.c.bf16 %v3413_v31, %v3412_v24  ;;  %v3415_v17 = vld [vmem:[#allocation3 + $0x59] sm:$0xff] }
 0x3e3   : > { %v7955_v9 = vpop.f32.mrf.mxu1  ;;  %v3499_v43 = vld [vmem:[#allocation3 + $0x102] sm:$0xff] }
 0x3e4   : > { %3394 = vst.msk [vmem:[#allocation3 + $0x10c] sm:$0xff] %vm339_vm1, %v3303_v60  ;;  %v2972_v26 = vmul.f32 %v7898_v22, %v2927_v47 }
 0x3e5   : > { %v2302_v63 = vpop.f32.mrf.mxu2 }
 0x3e6   : > { %v2875_v54 = vpop.f32.mrf.mxu0  ;;  %v2586_v48 = vpop.f32.mrf.mxu3  ;;  %v3017_v3 = vadd.f32 %v7906_v49, %v2972_v26  ;;  %v2360_v41 = vadd.f32 %v2302_v63, %v2076_v50  ;;  %v4170_v63 = vld [vmem:[#allocation3 + $0x7b] sm:$0xff] }
 0x3e7   : > { %v3232_v26 = vpop.permute.xlu2 %3231 }
 0x3e8   : > { %v3058_v56 = vmax.f32 %v3017_v3, 0.0  ;;  %v2644_v6 = vadd.f32 %v2586_v48, %v2360_v41 }
 0x3ea   : > { %v3304_v34 = vmul.f32 %v3222_v29, %v3058_v56  ;;  %v2928_v38 = vadd.f32 %v2870_v35, %v2644_v6  ;;  %6482 = vmatmul.msk.bf16.gmra.mxu2 %vm339_vm1, %v3450_v57  ;;  %v4169_v56 = vld [vmem:[#allocation3 + $0x73] sm:$0xff] }
 0x3eb   : > { %6504 = vmatmul.msk.bf16.gmra.mxu3 %vm339_vm1, %v7927_v51  ;;  %v7965_v5 = vpop.f32.mrf.mxu1  ;;  %v3500_v59 = vld [vmem:[#allocation3 + $0x10a] sm:$0xff]  ;;  %v7990_v29 = vpack.c.bf16 %v4170_v63, %v4169_v56 }
 0x3ec   : > { %3395 = vst.msk [vmem:[#allocation3 + $0x114] sm:$0xff] %vm339_vm1, %v3304_v34  ;;  %v2973_v2 = vmul.f32 %v7898_v22, %v2928_v38  ;;  %v3525_v1 = vpack.c.bf16 %v3500_v59, %v3499_v43  ;;  %v8971_v38 = vld [vmem:[#allocation46_spill] sm:$0xff] }
 0x3ed   : > { %v2305_v16 = vpop.f32.mrf.mxu2  ;;  %v4171_v63 = vld [vmem:[#allocation3 + $0x83] sm:$0xff] }
 0x3ee   : > { %v2878_v30 = vpop.f32.mrf.mxu0  ;;  %v2589_v35 = vpop.f32.mrf.mxu3  ;;  %v3018_v11 = vadd.f32 %v7906_v49, %v2973_v2  ;;  %v2361_v44 = vadd.f32 %v2305_v16, %v7652_v20  ;;  %6473 = vmatmul.msk.bf16.gmra.mxu1 %vm339_vm1, %v3525_v1 }
 0x3f0   : > { %v3059_v51 = vmax.f32 %v3018_v11, 0.0  ;;  %v2645_v12 = vadd.f32 %v2589_v35, %v2361_v44  ;;  %v8972_v11 = vld [vmem:[#allocation47_spill] sm:$0xff]  ;;  %v8973_v44 = vld [vmem:[#allocation44_spill] sm:$0xff] }
 0x3f1   : > { %6527 = vmatmul.msk.bf16.gmra.mxu0 %vm339_vm1, %v7969_v4 }
 0x3f2   : > { %v3305_v46 = vmul.f32 %v3227_v39, %v3059_v51  ;;  %v2929_v25 = vadd.f32 %v2873_v8, %v2645_v12  ;;  %v3451_v8 = vpack.c.bf16 %v3415_v17, %v3414_v28  ;;  %v2080_v51 = vadd.f32 %v8973_v44, %v8972_v11  ;;  %v3242_v17 = vpop.permute.xlu1 %3241 }
 0x3f3   : > { %v7976_v19 = vpop.f32.mrf.mxu1  ;;  %v3501_v3 = vld [vmem:[#allocation3 + $0x112] sm:$0xff] }
 0x3f4   : > { %3396 = vst.msk [vmem:[#allocation3 + $0x11c] sm:$0xff] %vm339_vm1, %v3305_v46  ;;  %v2974_v20 = vmul.f32 %v7898_v22, %v2929_v25  ;;  %v3417_v25 = vld [vmem:[#allocation3 + $0x69] sm:$0xff] }
 0x3f5   : > { %v2307_v14 = vpop.f32.mrf.mxu2 }
 0x3f6   : > { %v2880_v27 = vpop.f32.mrf.mxu0  ;;  %v2591_v40 = vpop.f32.mrf.mxu3  ;;  %v3019_v60 = vadd.f32 %v7906_v49, %v2974_v20  ;;  %v2362_v47 = vadd.f32 %v2307_v14, %v2078_v45  ;;  %v3416_v20 = vld [vmem:[#allocation3 + $0x61] sm:$0xff] }
 0x3f8   : > { %v3060_v42 = vmax.f32 %v3019_v60, 0.0  ;;  %v2646_v50 = vadd.f32 %v2591_v40, %v2362_v47  ;;  %v4172_v60 = vld [vmem:[#allocation3 + $0x8b] sm:$0xff] }
 0x3fa   : > { %v3306_v48 = vmul.f32 %v3232_v26, %v3060_v42  ;;  %v2930_v31 = vadd.f32 %v2875_v54, %v2646_v50  ;;  %6483 = vmatmul.msk.bf16.gmra.mxu2 %vm339_vm1, %v3451_v8 }
 0x3fb   : > { %6505 = vmatmul.msk.bf16.gmra.mxu3 %vm339_vm1, %v7948_v36  ;;  %v7986_v32 = vpop.f32.mrf.mxu1  ;;  %v3502_v41 = vld [vmem:[#allocation3 + $0x11a] sm:$0xff] }
 0x3fc   : > { %3397 = vst.msk [vmem:[#allocation3 + $0x124] sm:$0xff] %vm339_vm1, %v3306_v48  ;;  %v2975_v6 = vmul.f32 %v7898_v22, %v2930_v31  ;;  %v3526_v57 = vpack.c.bf16 %v3502_v41, %v3501_v3  ;;  %v8011_v3 = vpack.c.bf16 %v4172_v60, %v4171_v63 }
 0x3fd   : > { %v2310_v0 = vpop.f32.mrf.mxu2 }
 0x3fe   : > { %v2883_v24 = vpop.f32.mrf.mxu0  ;;  %v2594_v54 = vpop.f32.mrf.mxu3  ;;  %v3020_v34 = vadd.f32 %v7906_v49, %v2975_v6  ;;  %v2363_v43 = vadd.f32 %v2310_v0, %v8971_v38  ;;  %6474 = vmatmul.msk.bf16.gmra.mxu1 %vm339_vm1, %v3526_v57  ;;  %v8974_v6 = vld [vmem:[#allocation49_spill] sm:$0xff] }
 0x400   : > { %v3061_v36 = vmax.f32 %v3020_v34, 0.0  ;;  %v2647_v59 = vadd.f32 %v2594_v54, %v2363_v43  ;;  %v3247_v54 = vpop.permute.xlu2 %3246 }
 0x401   : > { %6528 = vmatmul.msk.bf16.gmra.mxu0 %vm339_vm1, %v7990_v29 }
 0x402   : > { %v3307_v2 = vmul.f32 %v3237_v62, %v3061_v36  ;;  %v2931_v1 = vadd.f32 %v2878_v30, %v2647_v59  ;;  %v3452_v30 = vpack.c.bf16 %v3417_v25, %v3416_v20  ;;  %v8975_v59 = vld [vmem:[#allocation36_spill] sm:$0xff]  ;;  %v8976_v62 = vld [vmem:[#allocation45_spill] sm:$0xff] }
 0x403   : > { %v7997_v16 = vpop.f32.mrf.mxu1  ;;  %v3503_v50 = vld [vmem:[#allocation3 + $0x122] sm:$0xff] }
 0x404   : > { %3398 = vst.msk [vmem:[#allocation3 + $0x12c] sm:$0xff] %vm339_vm1, %v3307_v2  ;;  %v2976_v12 = vmul.f32 %v7898_v22, %v2931_v1  ;;  %v2082_v2 = vadd.f32 %v8976_v62, %v8975_v59  ;;  %v4174_v20 = vld [vmem:[#allocation3 + $0x9b] sm:$0xff]  ;;  %v3421_v62 = vld [vmem:[#allocation3 + $0x89] sm:$0xff] }
 0x405   : > { %v2312_v39 = vpop.f32.mrf.mxu2 }
 0x406   : > { %v2885_v35 = vpop.f32.mrf.mxu0  ;;  %v2596_v46 = vpop.f32.mrf.mxu3  ;;  %v3021_v58 = vadd.f32 %v7906_v49, %v2976_v12  ;;  %v2364_v45 = vadd.f32 %v2312_v39, %v2080_v51  ;;  %v3419_v51 = vld [vmem:[#allocation3 + $0x79] sm:$0xff] }
 0x408   : > { %v3062_v14 = vmax.f32 %v3021_v58, 0.0  ;;  %v2648_v40 = vadd.f32 %v2596_v46, %v2364_v45  ;;  %v3418_v46 = vld [vmem:[#allocation3 + $0x71] sm:$0xff]  ;;  %v3252_v45 = vpop.permute.xlu0 %3251 }
 0x409   : > { %v3453_v58 = vpack.c.bf16 %v3419_v51, %v3418_v46  ;;  %v3420_v51 = vld [vmem:[#allocation3 + $0x81] sm:$0xff] }
 0x40a   : > { %v3308_v47 = vmul.f32 %v3242_v17, %v3062_v14  ;;  %v2932_v28 = vadd.f32 %v2880_v27, %v2648_v40  ;;  %6484 = vmatmul.msk.bf16.gmra.mxu2 %vm339_vm1, %v3452_v30  ;;  %v3454_v46 = vpack.c.bf16 %v3421_v62, %v3420_v51 }
 0x40b   : > { %6506 = vmatmul.msk.bf16.gmra.mxu3 %vm339_vm1, %v7969_v4  ;;  %v8007_v42 = vpop.f32.mrf.mxu1  ;;  %v3504_v8 = vld [vmem:[#allocation3 + $0x12a] sm:$0xff] }
 0x40c   : > { %3399 = vst.msk [vmem:[#allocation3 + $0x134] sm:$0xff] %vm339_vm1, %v3308_v47  ;;  %v2977_v48 = vmul.f32 %v7898_v22, %v2932_v28  ;;  %v3527_v31 = vpack.c.bf16 %v3504_v8, %v3503_v50  ;;  %v4173_v28 = vld [vmem:[#allocation3 + $0x93] sm:$0xff] }
 0x40d   : > { %v2315_v41 = vpop.f32.mrf.mxu2  ;;  %v8036_v63 = vpack.c.bf16 %v4174_v20, %v4173_v28 }
 0x40e   : > { %v2888_v26 = vpop.f32.mrf.mxu0  ;;  %v2599_v27 = vpop.f32.mrf.mxu3  ;;  %v3022_v56 = vadd.f32 %v7906_v49, %v2977_v48  ;;  %v2365_v57 = vadd.f32 %v2315_v41, %v8974_v6  ;;  %6475 = vmatmul.msk.bf16.gmra.mxu1 %vm339_vm1, %v3527_v31 }
 0x410   : > { %v3063_v4 = vmax.f32 %v3022_v56, 0.0  ;;  %v2649_v0 = vadd.f32 %v2599_v27, %v2365_v57  ;;  %v3257_v56 = vpop.permute.xlu1 %3256 }
 0x411   : > { %6529 = vmatmul.msk.bf16.gmra.mxu0 %vm339_vm1, %v8011_v3 }
 0x412   : > { %v3309_v34 = vmul.f32 %v3247_v54, %v3063_v4  ;;  %v2933_v38 = vadd.f32 %v2883_v24, %v2649_v0  ;;  %v8977_v54 = vld [vmem:[#allocation48_spill] sm:$0xff] }
 0x413   : > { %v8018_v43 = vpop.f32.mrf.mxu1  ;;  %v3505_v17 = vld [vmem:[#allocation3 + $0x132] sm:$0xff] }
 0x414   : > { %3400 = vst.msk [vmem:[#allocation3 + $0x13c] sm:$0xff] %vm339_vm1, %v3309_v34  ;;  %v2978_v1 = vmul.f32 %v7898_v22, %v2933_v38  ;;  %v2084_v34 = vadd.f32 %v8977_v54, %v7687_v61 }
 0x415   : > { %v2317_v11 = vpop.f32.mrf.mxu2 }
 0x416   : > { %v8020_v36 = vpop.f32.mrf.mxu0  ;;  %v2601_v44 = vpop.f32.mrf.mxu3  ;;  %v3023_v12 = vadd.f32 %v7906_v49, %v2978_v1  ;;  %v2366_v39 = vadd.f32 %v2317_v11, %v2082_v2  ;;  %v6566_v2 = vld [vmem:[%s8876_s2 + $0xa] sm:$0x3] }
 0x417   : > { %v4839_v61 = vsel %vm654_vm0, %v6566_v2, 0 }
 0x418   : > { %v3064_v24 = vmax.f32 %v3023_v12, 0.0  ;;  %v2650_v25 = vadd.f32 %v2601_v44, %v2366_v39  ;;  %4848 = vmatpush.bf16.msra.mxu2 %v4839_v61  ;;  %v3272_v51 = vpop.permute.xlu1 %3271 }
 0x41a   : > { %v3310_v14 = vmul.f32 %v3252_v45, %v3064_v24  ;;  %v2934_v40 = vadd.f32 %v2885_v35, %v2650_v25  ;;  %6485 = vmatmul.msk.bf16.gmra.mxu2 %vm339_vm1, %v3453_v58  ;;  %v3262_v24 = vpop.permute.xlu2 %3261  ;;  %v4176_v25 = vld [vmem:[#allocation3 + $0xab] sm:$0xff] }
 0x41b   : > { %6507 = vmatmul.msk.bf16.gmra.mxu3 %vm339_vm1, %v7990_v29  ;;  %v8030_v30 = vpop.f32.mrf.mxu1  ;;  %v3506_v60 = vld [vmem:[#allocation3 + $0x13a] sm:$0xff] }
 0x41c   : > { %3401 = vst.msk [vmem:[#allocation3 + $0x144] sm:$0xff] %vm339_vm1, %v3310_v14  ;;  %v2979_v50 = vmul.f32 %v7898_v22, %v2934_v40  ;;  %v3528_v8 = vpack.c.bf16 %v3506_v60, %v3505_v17  ;;  %v4175_v60 = vld [vmem:[#allocation3 + $0xa3] sm:$0xff] }
 0x41d   : > { %v2320_v35 = vpop.f32.mrf.mxu2 }
 0x41e   : > { %v8032_v47 = vpop.f32.mrf.mxu0  ;;  %v2604_v48 = vpop.f32.mrf.mxu3  ;;  %v3024_v31 = vadd.f32 %v7906_v49, %v2979_v50  ;;  %v2367_v29 = vadd.f32 %v2320_v35, %v7683_v52  ;;  %6476 = vmatmul.msk.bf16.gmra.mxu1 %vm339_vm1, %v3528_v8  ;;  %v4208_v8 = vpack.c.bf16 %v4176_v25, %v4175_v60 }
 0x420   : > { %v3065_v41 = vmax.f32 %v3024_v31, 0.0  ;;  %v2651_v27 = vadd.f32 %v2604_v48, %v2367_v29  ;;  %v8978_v31 = vld [vmem:[#allocation37_spill] sm:$0xff] }
 0x421   : > { %6530 = vmatmul.msk.bf16.gmra.mxu0 %vm339_vm1, %v8036_v63 }
 0x422   : > { %v3311_v6 = vmul.f32 %v3257_v56, %v3065_v41  ;;  %v2935_v57 = vadd.f32 %v2888_v26, %v2651_v27  ;;  %v6588_v26 = vld [vmem:[%s8876_s2 + $0xc] sm:$0x3]  ;;  %v6610_v27 = vld [vmem:[%s8876_s2 + $0xe] sm:$0x3]  ;;  %v6632_v56 = vld [vmem:[%s8876_s2 + $0x10] sm:$0x3] }
 0x423   : > { %v8043_v4 = vpop.f32.mrf.mxu1  ;;  %v5115_v44 = vsel %vm654_vm0, %v6588_v26, 0  ;;  %v3507_v14 = vld [vmem:[#allocation3 + $0x142] sm:$0xff]  ;;  %v3423_v26 = vld [vmem:[#allocation3 + $0x99] sm:$0xff] }
 0x424   : > { %3402 = vst.msk [vmem:[#allocation3 + $0x14c] sm:$0xff] %vm339_vm1, %v3311_v6  ;;  %v2980_v52 = vmul.f32 %v7898_v22, %v2935_v57  ;;  %5124 = vmatpush.bf16.msra.mxu3 %v5115_v44  ;;  %v3267_v6 = vpop.permute.xlu0 %3266  ;;  %v5391_v57 = vsel %vm654_vm0, %v6610_v27, 0 }
 0x425   : > { %v2322_v38 = vpop.f32.mrf.mxu2  ;;  %5400 = vmatpush.bf16.msra.mxu0 %v5391_v57 }
 0x426   : > { %v2895_v0 = vpop.f32.mrf.mxu0  ;;  %v2606_v59 = vpop.f32.mrf.mxu3  ;;  %v3025_v1 = vadd.f32 %v7906_v49, %v2980_v52  ;;  %v2368_v11 = vadd.f32 %v2322_v38, %v2084_v34 }
 0x427   : > { %v5667_v0 = vsel %vm654_vm0, %v6632_v56, 0 }
 0x428   : > { %v3066_v12 = vmax.f32 %v3025_v1, 0.0  ;;  %v2652_v39 = vadd.f32 %v2606_v59, %v2368_v11  ;;  %5676 = vmatpush.bf16.msra.mxu1 %v5667_v0  ;;  %v3422_v11 = vld [vmem:[#allocation3 + $0x91] sm:$0xff] }
 0x429   : > { %v3455_v44 = vpack.c.bf16 %v3423_v26, %v3422_v11  ;;  %v3426_v26 = vld [vmem:[#allocation3 + $0xb1] sm:$0xff] }
 0x42a   : > { %v3312_v58 = vmul.f32 %v3262_v24, %v3066_v12  ;;  %v2936_v45 = vadd.f32 %v8020_v36, %v2652_v39  ;;  %6486 = vmatmul.msk.bf16.gmra.mxu2 %vm339_vm1, %v3454_v46  ;;  %v4177_v24 = vld [vmem:[#allocation3 + $0xb3] sm:$0xff] }
 0x42b   : > { %6508 = vmatmul.msk.bf16.gmra.mxu3 %vm339_vm1, %v8011_v3  ;;  %v8062_v20 = vpop.f32.mrf.mxu1  ;;  %v3508_v40 = vld [vmem:[#allocation3 + $0x14a] sm:$0xff] }
 0x42c   : > { %3403 = vst.msk [vmem:[#allocation3 + $0x154] sm:$0xff] %vm339_vm1, %v3312_v58  ;;  %v2981_v28 = vmul.f32 %v7898_v22, %v2936_v45  ;;  %v3529_v50 = vpack.c.bf16 %v3508_v40, %v3507_v14 }
 0x42d   : > { %v2325_v35 = vpop.f32.mrf.mxu2 }
 0x42e   : > { %v4298_v17 = vpop.f32.mrf.mxu0  ;;  %v2609_v48 = vpop.f32.mrf.mxu3  ;;  %v3026_v36 = vadd.f32 %v7906_v49, %v2981_v28  ;;  %v2369_v29 = vadd.f32 %v2325_v35, %v8978_v31  ;;  %6477 = vmatmul.msk.bf16.gmra.mxu1 %vm339_vm1, %v3529_v50  ;;  %v3424_v28 = vld [vmem:[#allocation3 + $0xa1] sm:$0xff]  ;;  %v4436_v35 = vld [vmem:[#allocation3 + $0x2c] sm:$0xff] }
 0x42f   : > { %v4435_v31 = vld [vmem:[#allocation3 + $0x24] sm:$0xff] }
 0x430   : > { %v3067_v3 = vmax.f32 %v3026_v36, 0.0  ;;  %v2653_v41 = vadd.f32 %v2609_v48, %v2369_v29  ;;  %v4180_v48 = vld [vmem:[#allocation3 + $0xcb] sm:$0xff] }
 0x431   : > { %6531 = vmatmul.msk.bf16.gmra.mxu0 %vm339_vm1, %v4208_v8 }
 0x432   : > { %v3313_v54 = vmul.f32 %v3267_v6, %v3067_v3  ;;  %v2937_v34 = vadd.f32 %v8032_v47, %v2653_v41  ;;  %v4178_v47 = vld [vmem:[#allocation3 + $0xbb] sm:$0xff]  ;;  %v4179_v3 = vld [vmem:[#allocation3 + $0xc3] sm:$0xff]  ;;  %v4476_v41 = vpack.c.bf16 %v4436_v35, %v4435_v31 }
 0x433   : > { %v8079_v52 = vpop.f32.mrf.mxu1  ;;  %v3509_v12 = vld [vmem:[#allocation3 + $0x152] sm:$0xf]  ;;  %v4210_v27 = vpack.c.bf16 %v4180_v48, %v4179_v3  ;;  %v3428_v35 = vld [vmem:[#allocation3 + $0xc1] sm:$0xff] }
 0x434   : > { %3404 = vst.msk [vmem:[#allocation3 + $0x15c] sm:$0xff] %vm339_vm1, %v3313_v54  ;;  %v2982_v59 = vmul.f32 %v7898_v22, %v2937_v34  ;;  %v3530_v25 = vpack.c.bf16 %v3509_v12, %v3509_v12  ;;  %v4437_v12 = vld [vmem:[#allocation3 + $0x34] sm:$0xff]  ;;  %v4440_v3 = vld [vmem:[#allocation3 + $0x4c] sm:$0xff] }
 0x435   : > { %v2327_v62 = vpop.f32.mrf.mxu2 }
 0x436   : > { %v4299_v38 = vpop.f32.mrf.mxu0  ;;  %v2611_v2 = vpop.f32.mrf.mxu3  ;;  %v3027_v1 = vadd.f32 %v7906_v49, %v2982_v59  ;;  %v4209_v49 = vpack.c.bf16 %v4178_v47, %v4177_v24  ;;  %v3427_v62 = vld [vmem:[#allocation3 + $0xb9] sm:$0xff] }
 0x437   : > { %v3457_v11 = vpack.c.bf16 %v3427_v62, %v3426_v26 }
 0x438   : > { %v3068_v61 = vmax.f32 %v3027_v1, 0.0 }
 0x43a   : > { %v3314_v39 = vmul.f32 %v3272_v51, %v3068_v61  ;;  %6487 = vmatmul.msk.bf16.gmra.mxu2 %vm339_vm1, %v3455_v44  ;;  %v4438_v61 = vld [vmem:[#allocation3 + $0x3c] sm:$0xff] }
 0x43b   : > { %6509 = vmatmul.msk.bf16.gmra.mxu3 %vm339_vm1, %v8036_v63  ;;  %v8087_v46 = vpop.f32.mrf.mxu1  ;;  %v3425_v63 = vld [vmem:[#allocation3 + $0xa9] sm:$0xff] }
 0x43c   : > { %3405 = vst.msk [vmem:[#allocation3 + $0x164] sm:$0xf] %vm389_vm2, %v3314_v39  ;;  %v3456_v50 = vpack.c.bf16 %v3425_v63, %v3424_v28  ;;  %v4181_v39 = vld [vmem:[#allocation3 + $0xd3] sm:$0xff]  ;;  %v3429_v28 = vld [vmem:[#allocation3 + $0xc9] sm:$0xff] }
 0x43d   : > { %v3783_v58 = vpop.f32.mrf.mxu2  ;;  %v3458_v31 = vpack.c.bf16 %v3429_v28, %v3428_v35 }
 0x43e   : > { %v4301_v22 = vpop.f32.mrf.mxu0  ;;  %v4022_v45 = vpop.f32.mrf.mxu3  ;;  %6478 = vmatmul.msk.bf16.gmra.mxu1 %vm339_vm1, %v3530_v25 }
 0x441   : > { %6532 = vmatmul.msk.bf16.gmra.mxu0 %vm339_vm1, %v4209_v49 }
 0x443   : > { %v8092_v14 = vpop.f32.mrf.mxu1 }
 0x445   : > { %v3784_v17 = vpop.f32.mrf.mxu2 }
 0x446   : > { %v4303_v40 = vpop.f32.mrf.mxu0  ;;  %v4023_v60 = vpop.f32.mrf.mxu3 }
 0x44a   : > { %6488 = vmatmul.msk.bf16.gmra.mxu2 %vm339_vm1, %v3456_v50 }
 0x44b   : > { %6510 = vmatmul.msk.bf16.gmra.mxu3 %vm339_vm1, %v4208_v8  ;;  %v8096_v36 = vpop.f32.mrf.mxu1 }
 0x44d   : > { %v3786_v56 = vpop.f32.mrf.mxu2 }
 0x44e   : > { %v4306_v29 = vpop.f32.mrf.mxu0  ;;  %v4025_v6 = vpop.f32.mrf.mxu3  ;;  %v3787_v57 = vadd.f32 %v3786_v56, %v7838_v10  ;;  %6545 = vmatmul.msk.bf16.vlgmr.msrb.gmra.mxu1 %vm339_vm1, %v4476_v41  ;;  %v4182_v10 = vld [vmem:[#allocation3 + $0xdb] sm:$0xff]  ;;  %v4439_v56 = vld [vmem:[#allocation3 + $0x44] sm:$0xff] }
 0x44f   : > { %v4211_v24 = vpack.c.bf16 %v4182_v10, %v4181_v39 }
 0x450   : > { %v4122_v0 = vadd.f32 %v4025_v6, %v3787_v57  ;;  %v4183_v57 = vld [vmem:[#allocation3 + $0xe3] sm:$0xff] }
 0x451   : > { %6533 = vmatmul.msk.bf16.gmra.mxu0 %vm339_vm1, %v4210_v27 }
 0x452   : > { %v8101_v54 = vadd.f32 %v4301_v22, %v4122_v0  ;;  %v4477_v22 = vpack.c.bf16 %v4438_v61, %v4437_v12  ;;  %v4478_v0 = vpack.c.bf16 %v4440_v3, %v4439_v56  ;;  %v3431_v61 = vld [vmem:[#allocation3 + $0xd9] sm:$0xff]  ;;  %v3430_v12 = vld [vmem:[#allocation3 + $0xd1] sm:$0xff]  ;;  %v3433_v56 = vld [vmem:[#allocation3 + $0xe9] sm:$0xff] }
 0x453   : > { %v8103_v34 = vpop.f32.mrf.mxu1 }
 0x455   : > { %v3788_v38 = vpop.f32.mrf.mxu2 }
 0x456   : > { %v4308_v8 = vpop.f32.mrf.mxu0  ;;  %v4027_v59 = vpop.f32.mrf.mxu3  ;;  %v3789_v2 = vadd.f32 %v3788_v38, %v7846_v15 }
 0x458   : > { %v4123_v1 = vadd.f32 %v4027_v59, %v3789_v2 }
 0x45a   : > { %v8106_v44 = vadd.f32 %v4303_v40, %v4123_v1  ;;  %6489 = vmatmul.msk.bf16.gmra.mxu2 %vm339_vm1, %v3457_v11 }
 0x45b   : > { %6511 = vmatmul.msk.bf16.gmra.mxu3 %vm339_vm1, %v4209_v49  ;;  %v8110_v51 = vpop.f32.mrf.mxu1 }
 0x45d   : > { %v3791_v25 = vpop.f32.mrf.mxu2 }
 0x45e   : > { %v4311_v47 = vpop.f32.mrf.mxu0  ;;  %v4030_v15 = vpop.f32.mrf.mxu3  ;;  %v3792_v58 = vadd.f32 %v3791_v25, %v7855_v23  ;;  %6546 = vmatmul.msk.bf16.gmra.mxu1 %vm339_vm1, %v4477_v22  ;;  %v4184_v23 = vld [vmem:[#allocation3 + $0xeb] sm:$0xff]  ;;  %v3459_v22 = vpack.c.bf16 %v3431_v61, %v3430_v12  ;;  %v4442_v25 = vld [vmem:[#allocation3 + $0x5c] sm:$0xff] }
 0x45f   : > { %v4212_v38 = vpack.c.bf16 %v4184_v23, %v4183_v57  ;;  %v4187_v61 = vld [vmem:[#allocation3 + $0x103] sm:$0xff] }
 0x460   : > { %v4124_v45 = vadd.f32 %v4030_v15, %v3792_v58  ;;  %v4441_v58 = vld [vmem:[#allocation3 + $0x54] sm:$0xff] }
 0x461   : > { %6534 = vmatmul.msk.bf16.gmra.mxu0 %vm339_vm1, %v4211_v24 }
 0x462   : > { %v8115_v40 = vadd.f32 %v4306_v29, %v4124_v45 }
 0x463   : > { %v8117_v17 = vpop.f32.mrf.mxu1 }
 0x465   : > { %v3793_v60 = vpop.f32.mrf.mxu2 }
 0x466   : > { %v4313_v49 = vpop.f32.mrf.mxu0  ;;  %v4032_v63 = vpop.f32.mrf.mxu3  ;;  %v3794_v50 = vadd.f32 %v3793_v60, %v7863_v13  ;;  %v4185_v60 = vld [vmem:[#allocation3 + $0xf3] sm:$0xff] }
 0x468   : > { %v4125_v48 = vadd.f32 %v4032_v63, %v3794_v50  ;;  %v4479_v63 = vpack.c.bf16 %v4442_v25, %v4441_v58 }
 0x46a   : > { %v8120_v41 = vadd.f32 %v4308_v8, %v4125_v48  ;;  %6490 = vmatmul.msk.bf16.gmra.mxu2 %vm339_vm1, %v3458_v31 }
 0x46b   : > { %6512 = vmatmul.msk.bf16.gmra.mxu3 %vm339_vm1, %v4210_v27  ;;  %v8124_v29 = vpop.f32.mrf.mxu1 }
 0x46d   : > { %v3796_v59 = vpop.f32.mrf.mxu2 }
 0x46e   : > { %v4316_v6 = vpop.f32.mrf.mxu0  ;;  %v4035_v13 = vpop.f32.mrf.mxu3  ;;  %v3797_v62 = vadd.f32 %v3796_v59, %v7872_v33  ;;  %6547 = vmatmul.msk.bf16.gmra.mxu1 %vm339_vm1, %v4478_v0  ;;  %v4186_v33 = vld [vmem:[#allocation3 + $0xfb] sm:$0xff] }
 0x46f   : > { %v4213_v28 = vpack.c.bf16 %v4186_v33, %v4185_v60  ;;  %v3432_v0 = vld [vmem:[#allocation3 + $0xe1] sm:$0xff] }
 0x470   : > { %v4126_v8 = vadd.f32 %v4035_v13, %v3797_v62  ;;  %v3460_v13 = vpack.c.bf16 %v3433_v56, %v3432_v0  ;;  %v4444_v62 = vld [vmem:[#allocation3 + $0x6c] sm:$0xff]  ;;  %v4445_v56 = vld [vmem:[#allocation3 + $0x74] sm:$0xff] }
 0x471   : > { %6535 = vmatmul.msk.bf16.gmra.mxu0 %vm339_vm1, %v4212_v38  ;;  %v4189_v0 = vld [vmem:[#allocation3 + $0x113] sm:$0xff] }
 0x472   : > { %v8129_v2 = vadd.f32 %v4311_v47, %v4126_v8 }
 0x473   : > { %v8131_v26 = vpop.f32.mrf.mxu1 }
 0x475   : > { %v3798_v1 = vpop.f32.mrf.mxu2 }
 0x476   : > { %v4318_v27 = vpop.f32.mrf.mxu0  ;;  %v4037_v11 = vpop.f32.mrf.mxu3  ;;  %v3799_v10 = vadd.f32 %v3798_v1, %v7883_v21  ;;  %v4443_v1 = vld [vmem:[#allocation3 + $0x64] sm:$0xff] }
 0x478   : > { %v4127_v39 = vadd.f32 %v4037_v11, %v3799_v10  ;;  %v4480_v10 = vpack.c.bf16 %v4444_v62, %v4443_v1 }
 0x47a   : > { %v8134_v15 = vadd.f32 %v4313_v49, %v4127_v39  ;;  %6491 = vmatmul.msk.bf16.gmra.mxu2 %vm339_vm1, %v3459_v22 }
 0x47b   : > { %6513 = vmatmul.msk.bf16.gmra.mxu3 %vm339_vm1, %v4211_v24  ;;  %v8138_v47 = vpop.f32.mrf.mxu1 }
 0x47d   : > { %v3801_v50 = vpop.f32.mrf.mxu2 }
 0x47e   : > { %v4321_v45 = vpop.f32.mrf.mxu0  ;;  %v4040_v21 = vpop.f32.mrf.mxu3  ;;  %v3802_v35 = vadd.f32 %v3801_v50, %v7892_v53  ;;  %6548 = vmatmul.msk.bf16.gmra.mxu1 %vm339_vm1, %v4479_v63  ;;  %v4188_v53 = vld [vmem:[#allocation3 + $0x10b] sm:$0xff]  ;;  %v3435_v63 = vld [vmem:[#allocation3 + $0xf9] sm:$0xff] }
 0x47f   : > { %v4214_v12 = vpack.c.bf16 %v4188_v53, %v4187_v61 }
 0x480   : > { %v4128_v49 = vadd.f32 %v4040_v21, %v3802_v35  ;;  %v3434_v21 = vld [vmem:[#allocation3 + $0xf1] sm:$0xff] }
 0x481   : > { %6536 = vmatmul.msk.bf16.gmra.mxu0 %vm339_vm1, %v4213_v28 }
 0x482   : > { %v8143_v48 = vadd.f32 %v4316_v6, %v4128_v49  ;;  %v3461_v49 = vpack.c.bf16 %v3435_v63, %v3434_v21  ;;  %v4448_v63 = vld [vmem:[#allocation3 + $0x8c] sm:$0xff]  ;;  %v4447_v21 = vld [vmem:[#allocation3 + $0x84] sm:$0xff] }
 0x483   : > { %v8145_v31 = vpop.f32.mrf.mxu1 }
 0x485   : > { %v3803_v3 = vpop.f32.mrf.mxu2 }
 0x486   : > { %v4323_v24 = vpop.f32.mrf.mxu0  ;;  %v4042_v23 = vpop.f32.mrf.mxu3  ;;  %v3804_v57 = vadd.f32 %v3803_v3, %v7913_v18  ;;  %v4446_v3 = vld [vmem:[#allocation3 + $0x7c] sm:$0xff] }
 0x488   : > { %v4129_v59 = vadd.f32 %v4042_v23, %v3804_v57 }
 0x48a   : > { %v8148_v8 = vadd.f32 %v4318_v27, %v4129_v59  ;;  %6492 = vmatmul.msk.bf16.gmra.mxu2 %vm339_vm1, %v3460_v13  ;;  %v4481_v59 = vpack.c.bf16 %v4446_v3, %v4445_v56  ;;  %v4482_v3 = vpack.c.bf16 %v4448_v63, %v4447_v21 }
 0x48b   : > { %6514 = vmatmul.msk.bf16.gmra.mxu3 %vm339_vm1, %v4212_v38  ;;  %v8152_v6 = vpop.f32.mrf.mxu1 }
 0x48d   : > { %v3806_v39 = vpop.f32.mrf.mxu2 }
 0x48e   : > { %v4326_v11 = vpop.f32.mrf.mxu0  ;;  %v4045_v18 = vpop.f32.mrf.mxu3  ;;  %v3807_v22 = vadd.f32 %v3806_v39, %v7923_v7  ;;  %6549 = vmatmul.msk.bf16.gmra.mxu1 %vm339_vm1, %v4480_v10  ;;  %v4190_v7 = vld [vmem:[#allocation3 + $0x11b] sm:$0xff] }
 0x48f   : > { %v4215_v13 = vpack.c.bf16 %v4190_v7, %v4189_v0 }
 0x490   : > { %v4130_v27 = vadd.f32 %v4045_v18, %v3807_v22  ;;  %v3437_v18 = vld [vmem:[#allocation3 + $0x109] sm:$0xff] }
 0x491   : > { %6537 = vmatmul.msk.bf16.gmra.mxu0 %vm339_vm1, %v4214_v12 }
 0x492   : > { %v8157_v25 = vadd.f32 %v4321_v45, %v4130_v27  ;;  %v3436_v27 = vld [vmem:[#allocation3 + $0x101] sm:$0xff] }
 0x493   : > { %v8159_v33 = vpop.f32.mrf.mxu1 }
 0x495   : > { %v3808_v58 = vpop.f32.mrf.mxu2 }
 0x496   : > { %v4328_v38 = vpop.f32.mrf.mxu0  ;;  %v4047_v60 = vpop.f32.mrf.mxu3  ;;  %v3809_v50 = vadd.f32 %v3808_v58, %v7934_v55 }
 0x498   : > { %v4131_v35 = vadd.f32 %v4047_v60, %v3809_v50  ;;  %v3462_v60 = vpack.c.bf16 %v3437_v18, %v3436_v27  ;;  %v4450_v27 = vld [vmem:[#allocation3 + $0x9c] sm:$0xff] }
 0x49a   : > { %v8162_v23 = vadd.f32 %v4323_v24, %v4131_v35  ;;  %6493 = vmatmul.msk.bf16.gmra.mxu2 %vm339_vm1, %v3461_v49  ;;  %v4191_v49 = vld [vmem:[#allocation3 + $0x123] sm:$0xff] }
 0x49b   : > { %6515 = vmatmul.msk.bf16.gmra.mxu3 %vm339_vm1, %v4213_v28  ;;  %v8166_v45 = vpop.f32.mrf.mxu1 }
 0x49d   : > { %v3811_v62 = vpop.f32.mrf.mxu2 }
 0x49e   : > { %v4331_v57 = vpop.f32.mrf.mxu0  ;;  %v4050_v55 = vpop.f32.mrf.mxu3  ;;  %v3812_v53 = vadd.f32 %v3811_v62, %v7944_v37  ;;  %6550 = vmatmul.msk.bf16.gmra.mxu1 %vm339_vm1, %v4481_v59  ;;  %v4192_v37 = vld [vmem:[#allocation3 + $0x12b] sm:$0xff] }
 0x49f   : > { %v4216_v7 = vpack.c.bf16 %v4192_v37, %v4191_v49  ;;  %v4193_v37 = vld [vmem:[#allocation3 + $0x133] sm:$0xff] }
 0x4a0   : > { %v4132_v24 = vadd.f32 %v4050_v55, %v3812_v53 }
 0x4a1   : > { %6538 = vmatmul.msk.bf16.gmra.mxu0 %vm339_vm1, %v4215_v13 }
 0x4a2   : > { %v8171_v1 = vadd.f32 %v4326_v11, %v4132_v24  ;;  %v3439_v24 = vld [vmem:[#allocation3 + $0x119] sm:$0xff] }
 0x4a3   : > { %v8173_v61 = vpop.f32.mrf.mxu1 }
 0x4a5   : > { %v3813_v10 = vpop.f32.mrf.mxu2 }
 0x4a6   : > { %v4333_v28 = vpop.f32.mrf.mxu0  ;;  %v4052_v39 = vpop.f32.mrf.mxu3  ;;  %v3814_v22 = vadd.f32 %v3813_v10, %v7955_v9 }
 0x4a8   : > { %v4133_v58 = vadd.f32 %v4052_v39, %v3814_v22  ;;  %v3438_v39 = vld [vmem:[#allocation3 + $0x111] sm:$0xff] }
 0x4a9   : > { %v3463_v22 = vpack.c.bf16 %v3439_v24, %v3438_v39  ;;  %v3440_v24 = vld [vmem:[#allocation3 + $0x121] sm:$0xff] }
 0x4aa   : > { %v8176_v50 = vadd.f32 %v4328_v38, %v4133_v58  ;;  %6494 = vmatmul.msk.bf16.gmra.mxu2 %vm339_vm1, %v3462_v60  ;;  %v4194_v58 = vld [vmem:[#allocation3 + $0x13b] sm:$0xff] }
 0x4ab   : > { %6516 = vmatmul.msk.bf16.gmra.mxu3 %vm339_vm1, %v4214_v12  ;;  %v8180_v11 = vpop.f32.mrf.mxu1  ;;  %v4449_v60 = vld [vmem:[#allocation3 + $0x94] sm:$0xff]  ;;  %v4217_v49 = vpack.c.bf16 %v4194_v58, %v4193_v37 }
 0x4ac   : > { %v4483_v21 = vpack.c.bf16 %v4450_v27, %v4449_v60  ;;  %v4451_v27 = vld [vmem:[#allocation3 + $0xa4] sm:$0xff] }
 0x4ad   : > { %v3816_v56 = vpop.f32.mrf.mxu2 }
 0x4ae   : > { %v4336_v35 = vpop.f32.mrf.mxu0  ;;  %v4055_v9 = vpop.f32.mrf.mxu3  ;;  %v3817_v0 = vadd.f32 %v3816_v56, %v7965_v5  ;;  %6551 = vmatmul.msk.bf16.gmra.mxu1 %vm339_vm1, %v4482_v3 }
 0x4b0   : > { %v4134_v38 = vadd.f32 %v4055_v9, %v3817_v0 }
 0x4b1   : > { %6539 = vmatmul.msk.bf16.gmra.mxu0 %vm339_vm1, %v4216_v7 }
 0x4b2   : > { %v8185_v59 = vadd.f32 %v4331_v57, %v4134_v38 }
 0x4b3   : > { %v3703_v62 = vpop.f32.mrf.mxu1 }
 0x4b5   : > { %v3818_v55 = vpop.f32.mrf.mxu2 }
 0x4b6   : > { %v4338_v12 = vpop.f32.mrf.mxu0  ;;  %v4057_v53 = vpop.f32.mrf.mxu3  ;;  %v3819_v10 = vadd.f32 %v3818_v55, %v7976_v19  ;;  %v3441_v55 = vld [vmem:[#allocation3 + $0x129] sm:$0xff] }
 0x4b7   : > { %v3464_v39 = vpack.c.bf16 %v3441_v55, %v3440_v24  ;;  %v3442_v55 = vld [vmem:[#allocation3 + $0x131] sm:$0xff] }
 0x4b8   : > { %v4135_v18 = vadd.f32 %v4057_v53, %v3819_v10 }
 0x4ba   : > { %v8188_v5 = vadd.f32 %v4333_v28, %v4135_v18  ;;  %6495 = vmatmul.msk.bf16.gmra.mxu2 %vm339_vm1, %v3463_v22  ;;  %v4452_v18 = vld [vmem:[#allocation3 + $0xac] sm:$0xff] }
 0x4bb   : > { %6517 = vmatmul.msk.bf16.gmra.mxu3 %vm339_vm1, %v4215_v13  ;;  %v3705_v57 = vpop.f32.mrf.mxu1  ;;  %v4196_v22 = vld [vmem:[#allocation3 + $0x14b] sm:$0xff]  ;;  %v4484_v60 = vpack.c.bf16 %v4452_v18, %v4451_v27  ;;  %v4453_v18 = vld [vmem:[#allocation3 + $0xb4] sm:$0xff] }
 0x4bc   : > { %v4195_v57 = vld [vmem:[#allocation3 + $0x143] sm:$0xff] }
 0x4bd   : > { %v3821_v3 = vpop.f32.mrf.mxu2  ;;  %v4218_v37 = vpack.c.bf16 %v4196_v22, %v4195_v57 }
 0x4be   : > { %v4341_v63 = vpop.f32.mrf.mxu0  ;;  %v4060_v56 = vpop.f32.mrf.mxu3  ;;  %v3822_v19 = vadd.f32 %v3821_v3, %v7986_v32  ;;  %6552 = vmatmul.msk.bf16.gmra.mxu1 %vm339_vm1, %v4483_v21 }
 0x4c0   : > { %v4136_v28 = vadd.f32 %v4060_v56, %v3822_v19 }
 0x4c1   : > { %6540 = vmatmul.msk.bf16.gmra.mxu0 %vm339_vm1, %v4217_v49 }
 0x4c2   : > { %v8195_v9 = vadd.f32 %v4336_v35, %v4136_v28 }
 0x4c3   : > { %v3706_v0 = vpop.f32.mrf.mxu1 }
 0x4c5   : > { %v3823_v13 = vpop.f32.mrf.mxu2 }
 0x4c6   : > { %v4343_v38 = vpop.f32.mrf.mxu0  ;;  %v4062_v62 = vpop.f32.mrf.mxu3  ;;  %v3824_v53 = vadd.f32 %v3823_v13, %v7997_v16  ;;  %v3443_v13 = vld [vmem:[#allocation3 + $0x139] sm:$0xff] }
 0x4c7   : > { %v3465_v24 = vpack.c.bf16 %v3443_v13, %v3442_v55 }
 0x4c8   : > { %v4137_v10 = vadd.f32 %v4062_v62, %v3824_v53 }
 0x4ca   : > { %v8198_v32 = vadd.f32 %v4338_v12, %v4137_v10  ;;  %6496 = vmatmul.msk.bf16.gmra.mxu2 %vm339_vm1, %v3464_v39  ;;  %v4454_v10 = vld [vmem:[#allocation3 + $0xbc] sm:$0xff] }
 0x4cb   : > { %6518 = vmatmul.msk.bf16.gmra.mxu3 %vm339_vm1, %v4216_v7  ;;  %v4574_v35 = vpop.f32.mrf.mxu1  ;;  %v4198_v39 = vld [vmem:[#allocation3 + $0x15b] sm:$0xff]  ;;  %v4485_v57 = vpack.c.bf16 %v4454_v10, %v4453_v18 }
 0x4cc   : > { %v4197_v35 = vld [vmem:[#allocation3 + $0x153] sm:$0xff] }
 0x4cd   : > { %v3826_v21 = vpop.f32.mrf.mxu2 }
 0x4ce   : > { %v4346_v58 = vpop.f32.mrf.mxu0  ;;  %v4065_v3 = vpop.f32.mrf.mxu3  ;;  %v3827_v16 = vadd.f32 %v3826_v21, %v8007_v42  ;;  %6553 = vmatmul.msk.bf16.gmra.mxu1 %vm339_vm1, %v4484_v60 }
 0x4d0   : > { %v4138_v12 = vadd.f32 %v4065_v3, %v3827_v16 }
 0x4d1   : > { %6541 = vmatmul.msk.bf16.gmra.mxu0 %vm339_vm1, %v4218_v37 }
 0x4d2   : > { %v8205_v56 = vadd.f32 %v4341_v63, %v4138_v12 }
 0x4d3   : > { %v4575_v19 = vpop.f32.mrf.mxu1 }
 0x4d5   : > { %v3828_v7 = vpop.f32.mrf.mxu2 }
 0x4d6   : > { %v4348_v28 = vpop.f32.mrf.mxu0  ;;  %v4067_v0 = vpop.f32.mrf.mxu3  ;;  %v3829_v62 = vadd.f32 %v3828_v7, %v8018_v43  ;;  %v4219_v43 = vpack.c.bf16 %v4198_v39, %v4197_v35  ;;  %v4455_v39 = vld [vmem:[#allocation3 + $0xc4] sm:$0xff] }
 0x4d8   : > { %v4139_v53 = vadd.f32 %v4067_v0, %v3829_v62  ;;  %v3445_v0 = vld [vmem:[#allocation3 + $0x149] sm:$0xff]  ;;  %v3444_v62 = vld [vmem:[#allocation3 + $0x141] sm:$0xff] }
 0x4da   : > { %v8208_v42 = vadd.f32 %v4343_v38, %v4139_v53  ;;  %6497 = vmatmul.msk.bf16.gmra.mxu2 %vm339_vm1, %v3465_v24  ;;  %v4456_v53 = vld [vmem:[#allocation3 + $0xcc] sm:$0xff]  ;;  %v4199_v24 = vld [vmem:[#allocation3 + $0x163] sm:$0xf] }
 0x4db   : > { %6519 = vmatmul.msk.bf16.gmra.mxu3 %vm339_vm1, %v4217_v49  ;;  %v4577_v63 = vpop.f32.mrf.mxu1  ;;  %v4486_v18 = vpack.c.bf16 %v4456_v53, %v4455_v39  ;;  %v4220_v35 = vpack.c.bf16 %v4199_v24, %v4199_v24  ;;  %v5263_v24 = vld [vmem:[#allocation3 + $0x36] sm:$0xff] }
 0x4dc   : > { %v8213_v27 = vadd.f32 %v4577_v63, %v8101_v54 }
 0x4dd   : > { %v3831_v60 = vpop.f32.mrf.mxu2 }
 0x4de   : > { %v4351_v22 = vpop.f32.mrf.mxu0  ;;  %v4070_v21 = vpop.f32.mrf.mxu3  ;;  %v3832_v3 = vadd.f32 %v3831_v60, %v8030_v30  ;;  %6554 = vmatmul.msk.bf16.gmra.mxu1 %vm339_vm1, %v4485_v57  ;;  %v3466_v30 = vpack.c.bf16 %v3445_v0, %v3444_v62  ;;  %v4458_v62 = vld [vmem:[#allocation3 + $0xdc] sm:$0xff] }
 0x4e0   : > { %v4140_v38 = vadd.f32 %v4070_v21, %v3832_v3 }
 0x4e1   : > { %6542 = vmatmul.msk.bf16.gmra.mxu0 %vm339_vm1, %v4219_v43 }
 0x4e2   : > { %v8218_v16 = vadd.f32 %v4346_v58, %v4140_v38 }
 0x4e3   : > { %v4579_v49 = vpop.f32.mrf.mxu1 }
 0x4e4   : > { %v8221_v19 = vadd.f32 %v4579_v49, %v8106_v44  ;;  %v3446_v49 = vld [vmem:[#allocation3 + $0x151] sm:$0xf] }
 0x4e5   : > { %v3833_v54 = vpop.f32.mrf.mxu2 }
 0x4e6   : > { %v4353_v12 = vpop.f32.mrf.mxu0  ;;  %v4072_v7 = vpop.f32.mrf.mxu3  ;;  %v3834_v13 = vadd.f32 %v3833_v54, %v8043_v4  ;;  %v3923_v54 = vld [vmem:[#allocation3 + $0x153] sm:$0xf] }
 0x4e8   : > { %v4141_v55 = vadd.f32 %v4072_v7, %v3834_v13  ;;  %v3944_v13 = vpack.c.bf16 %v3923_v54, %v3923_v54 }
 0x4ea   : > { %v8224_v10 = vadd.f32 %v4348_v28, %v4141_v55  ;;  %6498 = vmatmul.msk.bf16.gmra.mxu2 %vm339_vm1, %v3466_v30  ;;  %v5264_v55 = vld [vmem:[#allocation3 + $0x3e] sm:$0xff] }
 0x4eb   : > { %6520 = vmatmul.msk.bf16.gmra.mxu3 %vm339_vm1, %v4218_v37  ;;  %v4582_v58 = vpop.f32.mrf.mxu1 }
 0x4ec   : > { %v8229_v63 = vadd.f32 %v4582_v58, %v8115_v40 }
 0x4ed   : > { %v3836_v4 = vpop.f32.mrf.mxu2 }
 0x4ee   : > { %v4356_v44 = vpop.f32.mrf.mxu0  ;;  %v4075_v57 = vpop.f32.mrf.mxu3  ;;  %v3837_v43 = vadd.f32 %v3836_v4, %v8062_v20  ;;  %6555 = vmatmul.msk.bf16.gmra.mxu1 %vm339_vm1, %v4486_v18  ;;  %v3467_v20 = vpack.c.bf16 %v3446_v49, %v3446_v49  ;;  %v4988_v49 = vld [vmem:[#allocation3 + $0x3d] sm:$0xff] }
 0x4f0   : > { %v4142_v28 = vadd.f32 %v4075_v57, %v3837_v43 }
 0x4f1   : > { %6543 = vmatmul.msk.bf16.gmra.mxu0 %vm339_vm1, %v4220_v35 }
 0x4f2   : > { %v8234_v60 = vadd.f32 %v4351_v22, %v4142_v28 }
 0x4f3   : > { %v4584_v37 = vpop.f32.mrf.mxu1 }
 0x4f4   : > { %v8237_v3 = vadd.f32 %v4584_v37, %v8120_v41  ;;  %v4457_v41 = vld [vmem:[#allocation3 + $0xd4] sm:$0xff] }
 0x4f5   : > { %v3838_v40 = vpop.f32.mrf.mxu2  ;;  %v4487_v39 = vpack.c.bf16 %v4458_v62, %v4457_v41  ;;  %v4460_v62 = vld [vmem:[#allocation3 + $0xec] sm:$0xff] }
 0x4f6   : > { %v4358_v21 = vpop.f32.mrf.mxu0  ;;  %v4077_v38 = vpop.f32.mrf.mxu3  ;;  %v3839_v7 = vadd.f32 %v3838_v40, %v8079_v52  ;;  %v5304_v52 = vpack.c.bf16 %v5264_v55, %v5263_v24  ;;  %v5266_v55 = vld [vmem:[#allocation3 + $0x4e] sm:$0xff]  ;;  %v5265_v24 = vld [vmem:[#allocation3 + $0x46] sm:$0xff] }
 0x4f8   : > { %v4143_v0 = vadd.f32 %v4077_v38, %v3839_v7  ;;  %v4712_v38 = vld [vmem:[#allocation3 + $0x2d] sm:$0xff]  ;;  %v4711_v7 = vld [vmem:[#allocation3 + $0x25] sm:$0xff] }
 0x4fa   : > { %v8240_v30 = vadd.f32 %v4353_v12, %v4143_v0  ;;  %6499 = vmatmul.msk.bf16.gmra.mxu2 %vm339_vm1, %v3467_v20  ;;  %v4752_v20 = vpack.c.bf16 %v4712_v38, %v4711_v7  ;;  %v4989_v7 = vld [vmem:[#allocation3 + $0x45] sm:$0xff] }
 0x4fb   : > { %6521 = vmatmul.msk.bf16.gmra.mxu3 %vm339_vm1, %v3944_v13  ;;  %v4587_v22 = vpop.f32.mrf.mxu1 }
 0x4fc   : > { %v8245_v58 = vadd.f32 %v4587_v22, %v8129_v2  ;;  %v4459_v22 = vld [vmem:[#allocation3 + $0xe4] sm:$0xff] }
 0x4fd   : > { %v3841_v18 = vpop.f32.mrf.mxu2 }
 0x4fe   : > { %v4361_v53 = vpop.f32.mrf.mxu0  ;;  %v4080_v35 = vpop.f32.mrf.mxu3  ;;  %v3842_v4 = vadd.f32 %v3841_v18, %v8087_v46  ;;  %6556 = vmatmul.msk.bf16.gmra.mxu1 %vm339_vm1, %v4487_v39  ;;  %v4987_v46 = vld [vmem:[#allocation3 + $0x35] sm:$0xff] }
 0x4ff   : > { %v5028_v13 = vpack.c.bf16 %v4988_v49, %v4987_v46  ;;  %v4990_v49 = vld [vmem:[#allocation3 + $0x4d] sm:$0xff] }
 0x500   : > { %v4144_v12 = vadd.f32 %v4080_v35, %v3842_v4 }
 0x501   : > { %6611 = vmatmul.msk.bf16.vlgmr.msra.gmra.mxu0 %vm339_vm1, %v5304_v52  ;;  %v5305_v52 = vpack.c.bf16 %v5266_v55, %v5265_v24  ;;  %v4461_v55 = vld [vmem:[#allocation3 + $0xf4] sm:$0xff] }
 0x502   : > { %v8250_v57 = vadd.f32 %v4356_v44, %v4144_v12 }
 0x503   : > { %v4589_v43 = vpop.f32.mrf.mxu1 }
 0x504   : > { %v8253_v37 = vadd.f32 %v4589_v43, %v8134_v15 }
 0x505   : > { %v3843_v2 = vpop.f32.mrf.mxu2 }
 0x506   : > { %v4363_v28 = vpop.f32.mrf.mxu0  ;;  %v4082_v40 = vpop.f32.mrf.mxu3  ;;  %v3844_v54 = vadd.f32 %v3843_v2, %v8092_v14  ;;  %v4488_v14 = vpack.c.bf16 %v4460_v62, %v4459_v22 }
 0x508   : > { %v4145_v0 = vadd.f32 %v4082_v40, %v3844_v54 }
 0x50a   : > { %v8256_v44 = vadd.f32 %v4358_v21, %v4145_v0  ;;  %6567 = vmatmul.msk.bf16.vlgmr.msra.gmra.mxu2 %vm339_vm1, %v4752_v20  ;;  %v4462_v0 = vld [vmem:[#allocation3 + $0xfc] sm:$0xff] }
 0x50b   : > { %6589 = vmatmul.msk.bf16.vlgmr.msra.gmra.mxu3 %vm339_vm1, %v5028_v13  ;;  %v4592_v15 = vpop.f32.mrf.mxu1  ;;  %v5268_v20 = vld [vmem:[#allocation3 + $0x5e] sm:$0xff]  ;;  %v4489_v24 = vpack.c.bf16 %v4462_v0, %v4461_v55 }
 0x50c   : > { %v8261_v39 = vadd.f32 %v4592_v15, %v8143_v48  ;;  %v5267_v15 = vld [vmem:[#allocation3 + $0x56] sm:$0xff] }
 0x50d   : > { %v3846_v18 = vpop.f32.mrf.mxu2 }
 0x50e   : > { %v4366_v41 = vpop.f32.mrf.mxu0  ;;  %v4085_v35 = vpop.f32.mrf.mxu3  ;;  %v3847_v4 = vadd.f32 %v3846_v18, %v8096_v36  ;;  %6557 = vmatmul.msk.bf16.gmra.mxu1 %vm339_vm1, %v4488_v14  ;;  %v5029_v36 = vpack.c.bf16 %v4990_v49, %v4989_v7  ;;  %v4991_v49 = vld [vmem:[#allocation3 + $0x55] sm:$0xff]  ;;  %v4464_v7 = vld [vmem:[#allocation3 + $0x10c] sm:$0xff] }
 0x510   : > { %v4146_v21 = vadd.f32 %v4085_v35, %v3847_v4 }
 0x511   : > { %6612 = vmatmul.msk.bf16.gmra.mxu0 %vm339_vm1, %v5305_v52 }
 0x512   : > { %v8266_v12 = vadd.f32 %v4361_v53, %v4146_v21 }
 0x513   : > { %v4594_v43 = vpop.f32.mrf.mxu1 }
 0x514   : > { %v8269_v40 = vadd.f32 %v4594_v43, %v8148_v8 }
 0x515   : > { %v3848_v48 = vpop.f32.mrf.mxu2 }
 0x516   : > { %v4368_v2 = vpop.f32.mrf.mxu0  ;;  %v4087_v38 = vpop.f32.mrf.mxu3  ;;  %v3849_v54 = vadd.f32 %v3848_v48, %v8103_v34  ;;  %v5306_v34 = vpack.c.bf16 %v5268_v20, %v5267_v15  ;;  %v4992_v48 = vld [vmem:[#allocation3 + $0x5d] sm:$0xff] }
 0x517   : > { %v4463_v20 = vld [vmem:[#allocation3 + $0x104] sm:$0xff] }
 0x518   : > { %v4147_v46 = vadd.f32 %v4087_v38, %v3849_v54  ;;  %v4490_v15 = vpack.c.bf16 %v4464_v7, %v4463_v20 }
 0x51a   : > { %v8272_v62 = vadd.f32 %v4363_v28, %v4147_v46  ;;  %6568 = vmatmul.msk.bf16.gmra.mxu2 %vm339_vm1, %v5028_v13  ;;  %v5270_v46 = vld [vmem:[#allocation3 + $0x6e] sm:$0xff] }
 0x51b   : > { %6590 = vmatmul.msk.bf16.gmra.mxu3 %vm339_vm1, %v5029_v36  ;;  %v4597_v53 = vpop.f32.mrf.mxu1 }
 0x51c   : > { %v8277_v22 = vadd.f32 %v4597_v53, %v8157_v25  ;;  %v5269_v53 = vld [vmem:[#allocation3 + $0x66] sm:$0xff] }
 0x51d   : > { %v3851_v14 = vpop.f32.mrf.mxu2 }
 0x51e   : > { %v4371_v8 = vpop.f32.mrf.mxu0  ;;  %v4090_v52 = vpop.f32.mrf.mxu3  ;;  %v3852_v18 = vadd.f32 %v3851_v14, %v8110_v51  ;;  %6558 = vmatmul.msk.bf16.gmra.mxu1 %vm339_vm1, %v4489_v24  ;;  %v5030_v51 = vpack.c.bf16 %v4992_v48, %v4991_v49  ;;  %v4993_v48 = vld [vmem:[#allocation3 + $0x65] sm:$0xff]  ;;  %v4466_v49 = vld [vmem:[#allocation3 + $0x11c] sm:$0xff] }
 0x520   : > { %v4148_v28 = vadd.f32 %v4090_v52, %v3852_v18 }
 0x521   : > { %6613 = vmatmul.msk.bf16.gmra.mxu0 %vm339_vm1, %v5306_v34 }
 0x522   : > { %v8282_v13 = vadd.f32 %v4366_v41, %v4148_v28 }
 0x523   : > { %v4599_v35 = vpop.f32.mrf.mxu1 }
 0x524   : > { %v8285_v21 = vadd.f32 %v4599_v35, %v8162_v23 }
 0x525   : > { %v3853_v25 = vpop.f32.mrf.mxu2 }
 0x526   : > { %v4373_v4 = vpop.f32.mrf.mxu0  ;;  %v4092_v43 = vpop.f32.mrf.mxu3  ;;  %v3854_v38 = vadd.f32 %v3853_v25, %v8117_v17  ;;  %v5307_v17 = vpack.c.bf16 %v5270_v46, %v5269_v53  ;;  %v4994_v25 = vld [vmem:[#allocation3 + $0x6d] sm:$0xff] }
 0x527   : > { %v4465_v46 = vld [vmem:[#allocation3 + $0x114] sm:$0xff] }
 0x528   : > { %v4149_v54 = vadd.f32 %v4092_v43, %v3854_v38  ;;  %v4491_v53 = vpack.c.bf16 %v4466_v49, %v4465_v46 }
 0x52a   : > { %v8288_v0 = vadd.f32 %v4368_v2, %v4149_v54  ;;  %6569 = vmatmul.msk.bf16.gmra.mxu2 %vm339_vm1, %v5029_v36  ;;  %v5272_v54 = vld [vmem:[#allocation3 + $0x7e] sm:$0xff] }
 0x52b   : > { %6591 = vmatmul.msk.bf16.gmra.mxu3 %vm339_vm1, %v5030_v51  ;;  %v4602_v41 = vpop.f32.mrf.mxu1 }
 0x52c   : > { %v8293_v55 = vadd.f32 %v4602_v41, %v8171_v1  ;;  %v5271_v41 = vld [vmem:[#allocation3 + $0x76] sm:$0xff] }
 0x52d   : > { %v3856_v24 = vpop.f32.mrf.mxu2 }
 0x52e   : > { %v4376_v23 = vpop.f32.mrf.mxu0  ;;  %v4095_v34 = vpop.f32.mrf.mxu3  ;;  %v3857_v14 = vadd.f32 %v3856_v24, %v8124_v29  ;;  %6559 = vmatmul.msk.bf16.gmra.mxu1 %vm339_vm1, %v4490_v15  ;;  %v5031_v29 = vpack.c.bf16 %v4994_v25, %v4993_v48  ;;  %v4995_v25 = vld [vmem:[#allocation3 + $0x75] sm:$0xff]  ;;  %v4468_v48 = vld [vmem:[#allocation3 + $0x12c] sm:$0xff] }
 0x530   : > { %v4150_v2 = vadd.f32 %v4095_v34, %v3857_v14 }
 0x531   : > { %6614 = vmatmul.msk.bf16.gmra.mxu0 %vm339_vm1, %v5307_v17 }
 0x532   : > { %v8298_v36 = vadd.f32 %v4371_v8, %v4150_v2 }
 0x533   : > { %v4604_v52 = vpop.f32.mrf.mxu1 }
 0x534   : > { %v8301_v28 = vadd.f32 %v4604_v52, %v8176_v50 }
 0x535   : > { %v3858_v1 = vpop.f32.mrf.mxu2 }
 0x536   : > { %v4378_v18 = vpop.f32.mrf.mxu0  ;;  %v4097_v35 = vpop.f32.mrf.mxu3  ;;  %v3859_v43 = vadd.f32 %v3858_v1, %v8131_v26  ;;  %v5308_v26 = vpack.c.bf16 %v5272_v54, %v5271_v41  ;;  %v4996_v1 = vld [vmem:[#allocation3 + $0x7d] sm:$0xff] }
 0x537   : > { %v4467_v54 = vld [vmem:[#allocation3 + $0x124] sm:$0xff] }
 0x538   : > { %v4151_v38 = vadd.f32 %v4097_v35, %v3859_v43  ;;  %v4492_v41 = vpack.c.bf16 %v4468_v48, %v4467_v54 }
 0x53a   : > { %v8304_v7 = vadd.f32 %v4373_v4, %v4151_v38  ;;  %6570 = vmatmul.msk.bf16.gmra.mxu2 %vm339_vm1, %v5030_v51  ;;  %v5274_v38 = vld [vmem:[#allocation3 + $0x8e] sm:$0xff] }
 0x53b   : > { %6592 = vmatmul.msk.bf16.gmra.mxu3 %vm339_vm1, %v5031_v29  ;;  %v4607_v8 = vpop.f32.mrf.mxu1 }
 0x53c   : > { %v8309_v20 = vadd.f32 %v4607_v8, %v8185_v59  ;;  %v5273_v8 = vld [vmem:[#allocation3 + $0x86] sm:$0xff] }
 0x53d   : > { %v3861_v15 = vpop.f32.mrf.mxu2 }
 0x53e   : > { %v4381_v50 = vpop.f32.mrf.mxu0  ;;  %v4100_v17 = vpop.f32.mrf.mxu3  ;;  %v3862_v24 = vadd.f32 %v3861_v15, %v8138_v47  ;;  %6560 = vmatmul.msk.bf16.gmra.mxu1 %vm339_vm1, %v4491_v53  ;;  %v5032_v47 = vpack.c.bf16 %v4996_v1, %v4995_v25  ;;  %v4997_v1 = vld [vmem:[#allocation3 + $0x85] sm:$0xff]  ;;  %v4470_v25 = vld [vmem:[#allocation3 + $0x13c] sm:$0xff] }
 0x540   : > { %v4152_v4 = vadd.f32 %v4100_v17, %v3862_v24 }
 0x541   : > { %6615 = vmatmul.msk.bf16.gmra.mxu0 %vm339_vm1, %v5308_v26 }
 0x542   : > { %v8314_v51 = vadd.f32 %v4376_v23, %v4152_v4 }
 0x543   : > { %v4609_v34 = vpop.f32.mrf.mxu1 }
 0x544   : > { %v8317_v2 = vadd.f32 %v4609_v34, %v8188_v5 }
 0x545   : > { %v3863_v59 = vpop.f32.mrf.mxu2 }
 0x546   : > { %v4383_v14 = vpop.f32.mrf.mxu0  ;;  %v4102_v52 = vpop.f32.mrf.mxu3  ;;  %v3864_v35 = vadd.f32 %v3863_v59, %v8145_v31  ;;  %v5309_v31 = vpack.c.bf16 %v5274_v38, %v5273_v8  ;;  %v4998_v59 = vld [vmem:[#allocation3 + $0x8d] sm:$0xff] }
 0x547   : > { %v4469_v38 = vld [vmem:[#allocation3 + $0x134] sm:$0xff] }
 0x548   : > { %v4153_v43 = vadd.f32 %v4102_v52, %v3864_v35  ;;  %v4493_v8 = vpack.c.bf16 %v4470_v25, %v4469_v38 }
 0x54a   : > { %v8320_v49 = vadd.f32 %v4378_v18, %v4153_v43  ;;  %6571 = vmatmul.msk.bf16.gmra.mxu2 %vm339_vm1, %v5031_v29  ;;  %v5276_v43 = vld [vmem:[#allocation3 + $0x9e] sm:$0xff] }
 0x54b   : > { %6593 = vmatmul.msk.bf16.gmra.mxu3 %vm339_vm1, %v5032_v47  ;;  %v4612_v23 = vpop.f32.mrf.mxu1 }
 0x54c   : > { %v8325_v46 = vadd.f32 %v4612_v23, %v8195_v9  ;;  %v5275_v23 = vld [vmem:[#allocation3 + $0x96] sm:$0xff] }
 0x54d   : > { %v3866_v53 = vpop.f32.mrf.mxu2 }
 0x54e   : > { %v4386_v5 = vpop.f32.mrf.mxu0  ;;  %v4105_v26 = vpop.f32.mrf.mxu3  ;;  %v3867_v15 = vadd.f32 %v3866_v53, %v8152_v6  ;;  %6561 = vmatmul.msk.bf16.gmra.mxu1 %vm339_vm1, %v4492_v41  ;;  %v5033_v6 = vpack.c.bf16 %v4998_v59, %v4997_v1  ;;  %v4999_v59 = vld [vmem:[#allocation3 + $0x95] sm:$0xff]  ;;  %v4472_v1 = vld [vmem:[#allocation3 + $0x14c] sm:$0xff] }
 0x550   : > { %v4154_v18 = vadd.f32 %v4105_v26, %v3867_v15 }
 0x551   : > { %6616 = vmatmul.msk.bf16.gmra.mxu0 %vm339_vm1, %v5309_v31 }
 0x552   : > { %v8330_v29 = vadd.f32 %v4381_v50, %v4154_v18 }
 0x553   : > { %v4614_v17 = vpop.f32.mrf.mxu1 }
 0x554   : > { %v8333_v4 = vadd.f32 %v4614_v17, %v8198_v32 }
 0x555   : > { %v3868_v9 = vpop.f32.mrf.mxu2 }
 0x556   : > { %v4388_v24 = vpop.f32.mrf.mxu0  ;;  %v4107_v34 = vpop.f32.mrf.mxu3  ;;  %v3869_v52 = vadd.f32 %v3868_v9, %v8159_v33  ;;  %v5310_v33 = vpack.c.bf16 %v5276_v43, %v5275_v23  ;;  %v5000_v9 = vld [vmem:[#allocation3 + $0x9d] sm:$0xff] }
 0x557   : > { %v4471_v43 = vld [vmem:[#allocation3 + $0x144] sm:$0xff] }
 0x558   : > { %v4155_v35 = vadd.f32 %v4107_v34, %v3869_v52  ;;  %v4494_v23 = vpack.c.bf16 %v4472_v1, %v4471_v43 }
 0x55a   : > { %v8336_v48 = vadd.f32 %v4383_v14, %v4155_v35  ;;  %6572 = vmatmul.msk.bf16.gmra.mxu2 %vm339_vm1, %v5032_v47  ;;  %v5278_v35 = vld [vmem:[#allocation3 + $0xae] sm:$0xff] }
 0x55b   : > { %6594 = vmatmul.msk.bf16.gmra.mxu3 %vm339_vm1, %v5033_v6  ;;  %v4617_v50 = vpop.f32.mrf.mxu1 }
 0x55c   : > { %v8341_v54 = vadd.f32 %v4617_v50, %v8205_v56  ;;  %v5277_v50 = vld [vmem:[#allocation3 + $0xa6] sm:$0xff] }
 0x55d   : > { %v3871_v41 = vpop.f32.mrf.mxu2 }
 0x55e   : > { %v4391_v32 = vpop.f32.mrf.mxu0  ;;  %v4110_v31 = vpop.f32.mrf.mxu3  ;;  %v3872_v53 = vadd.f32 %v3871_v41, %v8166_v45  ;;  %6562 = vmatmul.msk.bf16.gmra.mxu1 %vm339_vm1, %v4493_v8  ;;  %v5034_v45 = vpack.c.bf16 %v5000_v9, %v4999_v59  ;;  %v4474_v9 = vld [vmem:[#allocation3 + $0x15c] sm:$0xff]  ;;  %v4473_v59 = vld [vmem:[#allocation3 + $0x154] sm:$0xff] }
 0x560   : > { %v4156_v14 = vadd.f32 %v4110_v31, %v3872_v53 }
 0x561   : > { %6617 = vmatmul.msk.bf16.gmra.mxu0 %vm339_vm1, %v5310_v33 }
 0x562   : > { %v8346_v47 = vadd.f32 %v4386_v5, %v4156_v14 }
 0x563   : > { %v4619_v26 = vpop.f32.mrf.mxu1 }
 0x564   : > { %v8349_v18 = vadd.f32 %v4619_v26, %v8208_v42 }
 0x565   : > { %v3873_v56 = vpop.f32.mrf.mxu2 }
 0x566   : > { %v4393_v15 = vpop.f32.mrf.mxu0  ;;  %v4112_v17 = vpop.f32.mrf.mxu3  ;;  %v3874_v34 = vadd.f32 %v3873_v56, %v8173_v61  ;;  %v5311_v61 = vpack.c.bf16 %v5278_v35, %v5277_v50  ;;  %v5001_v56 = vld [vmem:[#allocation3 + $0xa5] sm:$0xff] }
 0x567   : > { %v5002_v15 = vld [vmem:[#allocation3 + $0xad] sm:$0xff] }
 0x568   : > { %v4157_v52 = vadd.f32 %v4112_v17, %v3874_v34  ;;  %v5035_v17 = vpack.c.bf16 %v5002_v15, %v5001_v56  ;;  %v5280_v34 = vld [vmem:[#allocation3 + $0xbe] sm:$0xff] }
 0x56a   : > { %v8352_v25 = vadd.f32 %v4388_v24, %v4157_v52  ;;  %6573 = vmatmul.msk.bf16.gmra.mxu2 %vm339_vm1, %v5033_v6  ;;  %v5279_v52 = vld [vmem:[#allocation3 + $0xb6] sm:$0xff] }
 0x56b   : > { %6595 = vmatmul.msk.bf16.gmra.mxu3 %vm339_vm1, %v5034_v45  ;;  %v4622_v5 = vpop.f32.mrf.mxu1  ;;  %v5312_v35 = vpack.c.bf16 %v5280_v34, %v5279_v52  ;;  %v5006_v52 = vld [vmem:[#allocation3 + $0xcd] sm:$0xff] }
 0x56c   : > { %v8357_v38 = vadd.f32 %v4622_v5, %v8218_v16 }
 0x56d   : > { %v3876_v8 = vpop.f32.mrf.mxu2 }
 0x56e   : > { %v4395_v42 = vpop.f32.mrf.mxu0  ;;  %v4115_v33 = vpop.f32.mrf.mxu3  ;;  %v3877_v41 = vadd.f32 %v3876_v8, %v8180_v11  ;;  %6563 = vmatmul.msk.bf16.gmra.mxu1 %vm339_vm1, %v4494_v23  ;;  %v5004_v8 = vld [vmem:[#allocation3 + $0xbd] sm:$0xff] }
 0x570   : > { %v4158_v24 = vadd.f32 %v4115_v33, %v3877_v41  ;;  %v5003_v33 = vld [vmem:[#allocation3 + $0xb5] sm:$0xff] }
 0x571   : > { %6618 = vmatmul.msk.bf16.gmra.mxu0 %vm339_vm1, %v5311_v61  ;;  %v5036_v41 = vpack.c.bf16 %v5004_v8, %v5003_v33 }
 0x572   : > { %v8362_v6 = vadd.f32 %v4391_v32, %v4158_v24  ;;  %v5282_v24 = vld [vmem:[#allocation3 + $0xce] sm:$0xff] }
 0x573   : > { %v4624_v31 = vpop.f32.mrf.mxu1 }
 0x574   : > { %v8365_v14 = vadd.f32 %v4624_v31, %v8224_v10  ;;  %v4495_v10 = vpack.c.bf16 %v4474_v9, %v4473_v59 }
 0x575   : > { %v3878_v16 = vpop.f32.mrf.mxu2 }
 0x576   : > { %v4396_v53 = vpop.f32.mrf.mxu0  ;;  %v4117_v26 = vpop.f32.mrf.mxu3  ;;  %v5281_v16 = vld [vmem:[#allocation3 + $0xc6] sm:$0xff] }
 0x57a   : > { %6574 = vmatmul.msk.bf16.gmra.mxu2 %vm339_vm1, %v5034_v45 }
 0x57b   : > { %6596 = vmatmul.msk.bf16.gmra.mxu3 %vm339_vm1, %v5035_v17  ;;  %v4627_v11 = vpop.f32.mrf.mxu1 }
 0x57c   : > { %v8370_v1 = vadd.f32 %v4627_v11, %v8234_v60  ;;  %v4475_v60 = vld [vmem:[#allocation3 + $0x164] sm:$0xf] }
 0x57d   : > { %v3880_v5 = vpop.f32.mrf.mxu2  ;;  %v4496_v15 = vpack.c.bf16 %v4475_v60, %v4475_v60 }
 0x57e   : > { %v5402_v32 = vpop.f32.mrf.mxu0  ;;  %v4119_v43 = vpop.f32.mrf.mxu3  ;;  %6564 = vmatmul.msk.bf16.gmra.mxu1 %vm339_vm1, %v4495_v10  ;;  %v5005_v10 = vld [vmem:[#allocation3 + $0xc5] sm:$0xff] }
 0x57f   : > { %v5284_v5 = vld [vmem:[#allocation3 + $0xde] sm:$0xff] }
 0x581   : > { %6619 = vmatmul.msk.bf16.gmra.mxu0 %vm339_vm1, %v5312_v35  ;;  %v5037_v35 = vpack.c.bf16 %v5006_v52, %v5005_v10  ;;  %v5542_v52 = vld [vmem:[#allocation3 + $0x4f] sm:$0xff] }
 0x582   : > { %v5286_v10 = vld [vmem:[#allocation3 + $0xee] sm:$0xff] }
 0x583   : > { %v4629_v42 = vpop.f32.mrf.mxu1 }
 0x584   : > { %v8375_v45 = vadd.f32 %v4629_v42, %v8240_v30  ;;  %v5313_v30 = vpack.c.bf16 %v5282_v24, %v5281_v16  ;;  %v5539_v42 = vld [vmem:[#allocation3 + $0x37] sm:$0xff] }
 0x585   : > { %v3881_v23 = vpop.f32.mrf.mxu2 }
 0x586   : > { %v5403_v50 = vpop.f32.mrf.mxu0  ;;  %v4120_v61 = vpop.f32.mrf.mxu3  ;;  %v5283_v23 = vld [vmem:[#allocation3 + $0xd6] sm:$0xff] }
 0x587   : > { %v5314_v8 = vpack.c.bf16 %v5284_v5, %v5283_v23  ;;  %v5541_v5 = vld [vmem:[#allocation3 + $0x47] sm:$0xff] }
 0x588   : > { %v5581_v23 = vpack.c.bf16 %v5542_v52, %v5541_v5 }
 0x58a   : > { %6575 = vmatmul.msk.bf16.gmra.mxu2 %vm339_vm1, %v5035_v17 }
 0x58b   : > { %6597 = vmatmul.msk.bf16.gmra.mxu3 %vm339_vm1, %v5036_v41  ;;  %v4632_v31 = vpop.f32.mrf.mxu1 }
 0x58c   : > { %v8380_v26 = vadd.f32 %v4632_v31, %v8250_v57  ;;  %v5540_v57 = vld [vmem:[#allocation3 + $0x3f] sm:$0xff] }
 0x58d   : > { %v4850_v56 = vpop.f32.mrf.mxu2 }
 0x58e   : > { %v5405_v53 = vpop.f32.mrf.mxu0  ;;  %v5126_v9 = vpop.f32.mrf.mxu3  ;;  %6565 = vmatmul.msk.bf16.gmra.mxu1 %vm339_vm1, %v4496_v15 }
 0x58f   : > { %v5008_v9 = vld [vmem:[#allocation3 + $0xdd] sm:$0xff] }
 0x591   : > { %6620 = vmatmul.msk.bf16.gmra.mxu0 %vm339_vm1, %v5313_v30 }
 0x593   : > { %v4634_v34 = vpop.f32.mrf.mxu1 }
 0x594   : > { %v8385_v17 = vadd.f32 %v4634_v34, %v8256_v44  ;;  %v5580_v44 = vpack.c.bf16 %v5540_v57, %v5539_v42 }
 0x595   : > { %v4851_v59 = vpop.f32.mrf.mxu2 }
 0x596   : > { %v5407_v11 = vpop.f32.mrf.mxu0  ;;  %v5127_v32 = vpop.f32.mrf.mxu3  ;;  %v5007_v59 = vld [vmem:[#allocation3 + $0xd5] sm:$0xff] }
 0x59a   : > { %6576 = vmatmul.msk.bf16.gmra.mxu2 %vm339_vm1, %v5036_v41 }
 0x59b   : > { %6598 = vmatmul.msk.bf16.gmra.mxu3 %vm339_vm1, %v5037_v35  ;;  %v4637_v43 = vpop.f32.mrf.mxu1 }
 0x59c   : > { %v8390_v61 = vadd.f32 %v4637_v43, %v8266_v12  ;;  %v5285_v43 = vld [vmem:[#allocation3 + $0xe6] sm:$0xff] }
 0x59d   : > { %v4853_v33 = vpop.f32.mrf.mxu2 }
 0x59e   : > { %v5410_v50 = vpop.f32.mrf.mxu0  ;;  %v5129_v60 = vpop.f32.mrf.mxu3  ;;  %v4950_v24 = vadd.f32 %v4853_v33, %v8213_v27  ;;  %6633 = vmatmul.msk.bf16.vlgmr.msra.gmra.mxu1 %vm339_vm1, %v5580_v44  ;;  %v5038_v27 = vpack.c.bf16 %v5008_v9, %v5007_v59  ;;  %v5009_v9 = vld [vmem:[#allocation3 + $0xe5] sm:$0xff] }
 0x59f   : > { %v5544_v59 = vld [vmem:[#allocation3 + $0x5f] sm:$0xff] }
 0x5a0   : > { %v5226_v41 = vadd.f32 %v5129_v60, %v4950_v24 }
 0x5a1   : > { %6621 = vmatmul.msk.bf16.gmra.mxu0 %vm339_vm1, %v5314_v8 }
 0x5a2   : > { %v8395_v31 = vadd.f32 %v5405_v53, %v5226_v41 }
 0x5a3   : > { %v4639_v16 = vpop.f32.mrf.mxu1 }
 0x5a4   : > { %v8398_v30 = vadd.f32 %v4639_v16, %v8272_v62 }
 0x5a5   : > { %v4855_v12 = vpop.f32.mrf.mxu2 }
 0x5a6   : > { %v5412_v15 = vpop.f32.mrf.mxu0  ;;  %v5131_v56 = vpop.f32.mrf.mxu3  ;;  %v4951_v34 = vadd.f32 %v4855_v12, %v8221_v19  ;;  %v5315_v19 = vpack.c.bf16 %v5286_v10, %v5285_v43  ;;  %v5010_v12 = vld [vmem:[#allocation3 + $0xed] sm:$0xff]  ;;  %v5543_v10 = vld [vmem:[#allocation3 + $0x57] sm:$0xff] }
 0x5a7   : > { %v5582_v43 = vpack.c.bf16 %v5544_v59, %v5543_v10 }
 0x5a8   : > { %v5227_v32 = vadd.f32 %v5131_v56, %v4951_v34 }
 0x5aa   : > { %v8401_v57 = vadd.f32 %v5407_v11, %v5227_v32  ;;  %6577 = vmatmul.msk.bf16.gmra.mxu2 %vm339_vm1, %v5037_v35  ;;  %v5288_v32 = vld [vmem:[#allocation3 + $0xfe] sm:$0xff] }
 0x5ab   : > { %6599 = vmatmul.msk.bf16.gmra.mxu3 %vm339_vm1, %v5038_v27  ;;  %v4642_v53 = vpop.f32.mrf.mxu1 }
 0x5ac   : > { %v8406_v42 = vadd.f32 %v4642_v53, %v8282_v13  ;;  %v5287_v53 = vld [vmem:[#allocation3 + $0xf6] sm:$0xff] }
 0x5ad   : > { %v4858_v44 = vpop.f32.mrf.mxu2 }
 0x5ae   : > { %v5415_v62 = vpop.f32.mrf.mxu0  ;;  %v5134_v8 = vpop.f32.mrf.mxu3  ;;  %v4952_v33 = vadd.f32 %v4858_v44, %v8229_v63  ;;  %6634 = vmatmul.msk.bf16.gmra.mxu1 %vm339_vm1, %v5581_v23  ;;  %v5039_v63 = vpack.c.bf16 %v5010_v12, %v5009_v9  ;;  %v5011_v12 = vld [vmem:[#allocation3 + $0xf5] sm:$0xff] }
 0x5af   : > { %v5546_v9 = vld [vmem:[#allocation3 + $0x6f] sm:$0xff] }
 0x5b0   : > { %v5228_v11 = vadd.f32 %v5134_v8, %v4952_v33 }
 0x5b1   : > { %6622 = vmatmul.msk.bf16.gmra.mxu0 %vm339_vm1, %v5315_v19 }
 0x5b2   : > { %v8411_v35 = vadd.f32 %v5410_v50, %v5228_v11 }
 0x5b3   : > { %v4644_v60 = vpop.f32.mrf.mxu1 }
 0x5b4   : > { %v8414_v41 = vadd.f32 %v4644_v60, %v8288_v0 }
 0x5b5   : > { %v4860_v13 = vpop.f32.mrf.mxu2 }
 0x5b6   : > { %v5417_v24 = vpop.f32.mrf.mxu0  ;;  %v5136_v16 = vpop.f32.mrf.mxu3  ;;  %v4953_v56 = vadd.f32 %v4860_v13, %v8237_v3  ;;  %v5316_v3 = vpack.c.bf16 %v5288_v32, %v5287_v53  ;;  %v5012_v13 = vld [vmem:[#allocation3 + $0xfd] sm:$0xff]  ;;  %v5545_v32 = vld [vmem:[#allocation3 + $0x67] sm:$0xff] }
 0x5b7   : > { %v5583_v53 = vpack.c.bf16 %v5546_v9, %v5545_v32 }
 0x5b8   : > { %v5229_v34 = vadd.f32 %v5136_v16, %v4953_v56 }
 0x5ba   : > { %v8417_v52 = vadd.f32 %v5412_v15, %v5229_v34  ;;  %6578 = vmatmul.msk.bf16.gmra.mxu2 %vm339_vm1, %v5038_v27  ;;  %v5290_v34 = vld [vmem:[#allocation3 + $0x10e] sm:$0xff] }
 0x5bb   : > { %6600 = vmatmul.msk.bf16.gmra.mxu3 %vm339_vm1, %v5039_v63  ;;  %v4647_v50 = vpop.f32.mrf.mxu1 }
 0x5bc   : > { %v8422_v5 = vadd.f32 %v4647_v50, %v8298_v36  ;;  %v5289_v50 = vld [vmem:[#allocation3 + $0x106] sm:$0xff] }
 0x5bd   : > { %v4863_v23 = vpop.f32.mrf.mxu2 }
 0x5be   : > { %v5420_v0 = vpop.f32.mrf.mxu0  ;;  %v5139_v19 = vpop.f32.mrf.mxu3  ;;  %v4954_v44 = vadd.f32 %v4863_v23, %v8245_v58  ;;  %6635 = vmatmul.msk.bf16.gmra.mxu1 %vm339_vm1, %v5582_v43  ;;  %v5040_v58 = vpack.c.bf16 %v5012_v13, %v5011_v12  ;;  %v5013_v13 = vld [vmem:[#allocation3 + $0x105] sm:$0xff] }
 0x5bf   : > { %v5548_v12 = vld [vmem:[#allocation3 + $0x7f] sm:$0xff] }
 0x5c0   : > { %v5230_v15 = vadd.f32 %v5139_v19, %v4954_v44 }
 0x5c1   : > { %6623 = vmatmul.msk.bf16.gmra.mxu0 %vm339_vm1, %v5316_v3 }
 0x5c2   : > { %v8427_v27 = vadd.f32 %v5415_v62, %v5230_v15 }
 0x5c3   : > { %v4649_v8 = vpop.f32.mrf.mxu1 }
 0x5c4   : > { %v8430_v11 = vadd.f32 %v4649_v8, %v8304_v7 }
 0x5c5   : > { %v4865_v36 = vpop.f32.mrf.mxu2 }
 0x5c6   : > { %v5422_v33 = vpop.f32.mrf.mxu0  ;;  %v5141_v60 = vpop.f32.mrf.mxu3  ;;  %v4955_v16 = vadd.f32 %v4865_v36, %v8253_v37  ;;  %v5317_v37 = vpack.c.bf16 %v5290_v34, %v5289_v50  ;;  %v5014_v36 = vld [vmem:[#allocation3 + $0x10d] sm:$0xff]  ;;  %v5547_v34 = vld [vmem:[#allocation3 + $0x77] sm:$0xff] }
 0x5c7   : > { %v5584_v50 = vpack.c.bf16 %v5548_v12, %v5547_v34 }
 0x5c8   : > { %v5231_v56 = vadd.f32 %v5141_v60, %v4955_v16 }
 0x5ca   : > { %v8433_v59 = vadd.f32 %v5417_v24, %v5231_v56  ;;  %6579 = vmatmul.msk.bf16.gmra.mxu2 %vm339_vm1, %v5039_v63  ;;  %v5292_v56 = vld [vmem:[#allocation3 + $0x11e] sm:$0xff] }
 0x5cb   : > { %6601 = vmatmul.msk.bf16.gmra.mxu3 %vm339_vm1, %v5040_v58  ;;  %v4652_v62 = vpop.f32.mrf.mxu1 }
 0x5cc   : > { %v8438_v10 = vadd.f32 %v4652_v62, %v8314_v51  ;;  %v5291_v62 = vld [vmem:[#allocation3 + $0x116] sm:$0xff] }
 0x5cd   : > { %v4868_v43 = vpop.f32.mrf.mxu2 }
 0x5ce   : > { %v5425_v7 = vpop.f32.mrf.mxu0  ;;  %v5144_v3 = vpop.f32.mrf.mxu3  ;;  %v4956_v23 = vadd.f32 %v4868_v43, %v8261_v39  ;;  %6636 = vmatmul.msk.bf16.gmra.mxu1 %vm339_vm1, %v5583_v53  ;;  %v5041_v39 = vpack.c.bf16 %v5014_v36, %v5013_v13  ;;  %v5015_v36 = vld [vmem:[#allocation3 + $0x115] sm:$0xff] }
 0x5cf   : > { %v5550_v13 = vld [vmem:[#allocation3 + $0x8f] sm:$0xff] }
 0x5d0   : > { %v5232_v24 = vadd.f32 %v5144_v3, %v4956_v23 }
 0x5d1   : > { %6624 = vmatmul.msk.bf16.gmra.mxu0 %vm339_vm1, %v5317_v37 }
 0x5d2   : > { %v8443_v63 = vadd.f32 %v5420_v0, %v5232_v24 }
 0x5d3   : > { %v4654_v19 = vpop.f32.mrf.mxu1 }
 0x5d4   : > { %v8446_v15 = vadd.f32 %v4654_v19, %v8320_v49 }
 0x5d5   : > { %v4870_v51 = vpop.f32.mrf.mxu2 }
 0x5d6   : > { %v5427_v44 = vpop.f32.mrf.mxu0  ;;  %v5146_v8 = vpop.f32.mrf.mxu3  ;;  %v4957_v60 = vadd.f32 %v4870_v51, %v8269_v40  ;;  %v5318_v40 = vpack.c.bf16 %v5292_v56, %v5291_v62  ;;  %v5016_v51 = vld [vmem:[#allocation3 + $0x11d] sm:$0xff]  ;;  %v5549_v56 = vld [vmem:[#allocation3 + $0x87] sm:$0xff] }
 0x5d7   : > { %v5585_v62 = vpack.c.bf16 %v5550_v13, %v5549_v56 }
 0x5d8   : > { %v5233_v16 = vadd.f32 %v5146_v8, %v4957_v60 }
 0x5da   : > { %v8449_v9 = vadd.f32 %v5422_v33, %v5233_v16  ;;  %6580 = vmatmul.msk.bf16.gmra.mxu2 %vm339_vm1, %v5040_v58  ;;  %v5294_v16 = vld [vmem:[#allocation3 + $0x12e] sm:$0xff] }
 0x5db   : > { %6602 = vmatmul.msk.bf16.gmra.mxu3 %vm339_vm1, %v5041_v39  ;;  %v4657_v0 = vpop.f32.mrf.mxu1 }
 0x5dc   : > { %v8454_v32 = vadd.f32 %v4657_v0, %v8330_v29  ;;  %v5293_v0 = vld [vmem:[#allocation3 + $0x126] sm:$0xff] }
 0x5dd   : > { %v4873_v53 = vpop.f32.mrf.mxu2 }
 0x5de   : > { %v5430_v49 = vpop.f32.mrf.mxu0  ;;  %v5149_v37 = vpop.f32.mrf.mxu3  ;;  %v4958_v43 = vadd.f32 %v4873_v53, %v8277_v22  ;;  %6637 = vmatmul.msk.bf16.gmra.mxu1 %vm339_vm1, %v5584_v50  ;;  %v5042_v22 = vpack.c.bf16 %v5016_v51, %v5015_v36  ;;  %v5017_v51 = vld [vmem:[#allocation3 + $0x125] sm:$0xff] }
 0x5df   : > { %v5552_v36 = vld [vmem:[#allocation3 + $0x9f] sm:$0xff] }
 0x5e0   : > { %v5234_v33 = vadd.f32 %v5149_v37, %v4958_v43 }
 0x5e1   : > { %6625 = vmatmul.msk.bf16.gmra.mxu0 %vm339_vm1, %v5318_v40 }
 0x5e2   : > { %v8459_v58 = vadd.f32 %v5425_v7, %v5234_v33 }
 0x5e3   : > { %v4659_v3 = vpop.f32.mrf.mxu1 }
 0x5e4   : > { %v8462_v24 = vadd.f32 %v4659_v3, %v8336_v48 }
 0x5e5   : > { %v4875_v29 = vpop.f32.mrf.mxu2 }
 0x5e6   : > { %v5432_v23 = vpop.f32.mrf.mxu0  ;;  %v5151_v19 = vpop.f32.mrf.mxu3  ;;  %v4959_v8 = vadd.f32 %v4875_v29, %v8285_v21  ;;  %v5319_v21 = vpack.c.bf16 %v5294_v16, %v5293_v0  ;;  %v5018_v29 = vld [vmem:[#allocation3 + $0x12d] sm:$0xff]  ;;  %v5551_v16 = vld [vmem:[#allocation3 + $0x97] sm:$0xff] }
 0x5e7   : > { %v5586_v0 = vpack.c.bf16 %v5552_v36, %v5551_v16  ;;  %v5553_v36 = vld [vmem:[#allocation3 + $0xa7] sm:$0xff] }
 0x5e8   : > { %v5235_v60 = vadd.f32 %v5151_v19, %v4959_v8 }
 0x5ea   : > { %v8465_v12 = vadd.f32 %v5427_v44, %v5235_v60  ;;  %6581 = vmatmul.msk.bf16.gmra.mxu2 %vm339_vm1, %v5041_v39  ;;  %v5296_v60 = vld [vmem:[#allocation3 + $0x13e] sm:$0xff] }
 0x5eb   : > { %6603 = vmatmul.msk.bf16.gmra.mxu3 %vm339_vm1, %v5042_v22  ;;  %v4662_v7 = vpop.f32.mrf.mxu1 }
 0x5ec   : > { %v8470_v34 = vadd.f32 %v4662_v7, %v8346_v47  ;;  %v5295_v7 = vld [vmem:[#allocation3 + $0x136] sm:$0xff] }
 0x5ed   : > { %v4878_v50 = vpop.f32.mrf.mxu2 }
 0x5ee   : > { %v5435_v48 = vpop.f32.mrf.mxu0  ;;  %v5154_v40 = vpop.f32.mrf.mxu3  ;;  %v4960_v53 = vadd.f32 %v4878_v50, %v8293_v55  ;;  %6638 = vmatmul.msk.bf16.gmra.mxu1 %vm339_vm1, %v5585_v62  ;;  %v5043_v55 = vpack.c.bf16 %v5018_v29, %v5017_v51  ;;  %v5554_v51 = vld [vmem:[#allocation3 + $0xaf] sm:$0xff] }
 0x5ef   : > { %v5587_v16 = vpack.c.bf16 %v5554_v51, %v5553_v36  ;;  %v5299_v51 = vld [vmem:[#allocation3 + $0x156] sm:$0xff] }
 0x5f0   : > { %v5236_v44 = vadd.f32 %v5154_v40, %v4960_v53 }
 0x5f1   : > { %6626 = vmatmul.msk.bf16.gmra.mxu0 %vm339_vm1, %v5319_v21 }
 0x5f2   : > { %v8475_v39 = vadd.f32 %v5430_v49, %v5236_v44 }
 0x5f3   : > { %v4664_v37 = vpop.f32.mrf.mxu1 }
 0x5f4   : > { %v8478_v33 = vadd.f32 %v4664_v37, %v8352_v25 }
 0x5f5   : > { %v4880_v47 = vpop.f32.mrf.mxu2 }
 0x5f6   : > { %v5437_v43 = vpop.f32.mrf.mxu0  ;;  %v5156_v3 = vpop.f32.mrf.mxu3  ;;  %v4961_v19 = vadd.f32 %v4880_v47, %v8301_v28  ;;  %v5320_v28 = vpack.c.bf16 %v5296_v60, %v5295_v7 }
 0x5f8   : > { %v5237_v8 = vadd.f32 %v5156_v3, %v4961_v19  ;;  %v5019_v3 = vld [vmem:[#allocation3 + $0x135] sm:$0xff] }
 0x5fa   : > { %v8481_v13 = vadd.f32 %v5432_v23, %v5237_v8  ;;  %6582 = vmatmul.msk.bf16.gmra.mxu2 %vm339_vm1, %v5042_v22 }
 0x5fb   : > { %6604 = vmatmul.msk.bf16.gmra.mxu3 %vm339_vm1, %v5043_v55  ;;  %v4667_v49 = vpop.f32.mrf.mxu1 }
 0x5fc   : > { %v8486_v56 = vadd.f32 %v4667_v49, %v8362_v6  ;;  %v5020_v6 = vld [vmem:[#allocation3 + $0x13d] sm:$0xff]  ;;  %v5297_v49 = vld [vmem:[#allocation3 + $0x146] sm:$0xff] }
 0x5fd   : > { %v4883_v62 = vpop.f32.mrf.mxu2  ;;  %v5044_v19 = vpack.c.bf16 %v5020_v6, %v5019_v3 }
 0x5fe   : > { %v5440_v25 = vpop.f32.mrf.mxu0  ;;  %v5159_v21 = vpop.f32.mrf.mxu3  ;;  %v4962_v50 = vadd.f32 %v4883_v62, %v8309_v20  ;;  %6639 = vmatmul.msk.bf16.gmra.mxu1 %vm339_vm1, %v5586_v0  ;;  %v5298_v20 = vld [vmem:[#allocation3 + $0x14e] sm:$0xff] }
 0x5ff   : > { %v5321_v7 = vpack.c.bf16 %v5298_v20, %v5297_v49 }
 0x600   : > { %v5238_v23 = vadd.f32 %v5159_v21, %v4962_v50 }
 0x601   : > { %6627 = vmatmul.msk.bf16.gmra.mxu0 %vm339_vm1, %v5320_v28 }
 0x602   : > { %v8491_v22 = vadd.f32 %v5435_v48, %v5238_v23 }
 0x603   : > { %v4669_v40 = vpop.f32.mrf.mxu1 }
 0x604   : > { %v5022_v40 = vld [vmem:[#allocation3 + $0x14d] sm:$0xff] }
 0x605   : > { %v4885_v44 = vpop.f32.mrf.mxu2 }
 0x606   : > { %v8493_v53 = vpop.f32.mrf.mxu0  ;;  %v5161_v37 = vpop.f32.mrf.mxu3  ;;  %v4963_v47 = vadd.f32 %v4885_v44, %v8317_v2 }
 0x608   : > { %v5239_v29 = vadd.f32 %v5161_v37, %v4963_v47  ;;  %v5021_v37 = vld [vmem:[#allocation3 + $0x145] sm:$0xff] }
 0x609   : > { %v5045_v6 = vpack.c.bf16 %v5022_v40, %v5021_v37  ;;  %v5556_v47 = vld [vmem:[#allocation3 + $0xbf] sm:$0xff] }
 0x60a   : > { %v8496_v8 = vadd.f32 %v5437_v43, %v5239_v29  ;;  %6583 = vmatmul.msk.bf16.gmra.mxu2 %vm339_vm1, %v5043_v55 }
 0x60b   : > { %6605 = vmatmul.msk.bf16.gmra.mxu3 %vm339_vm1, %v5044_v19  ;;  %v4671_v48 = vpop.f32.mrf.mxu1 }
 0x60d   : > { %v4888_v0 = vpop.f32.mrf.mxu2 }
 0x60e   : > { %v5445_v60 = vpop.f32.mrf.mxu0  ;;  %v5164_v28 = vpop.f32.mrf.mxu3  ;;  %v4964_v2 = vadd.f32 %v4888_v0, %v8325_v46  ;;  %6640 = vmatmul.msk.bf16.gmra.mxu1 %vm339_vm1, %v5587_v16  ;;  %v5300_v46 = vld [vmem:[#allocation3 + $0x15e] sm:$0xff] }
 0x60f   : > { %v5322_v48 = vpack.c.bf16 %v5300_v46, %v5299_v51  ;;  %v5301_v46 = vld [vmem:[#allocation3 + $0x166] sm:$0xff] }
 0x610   : > { %v5240_v43 = vadd.f32 %v5164_v28, %v4964_v2  ;;  %v5557_v51 = vld [vmem:[#allocation3 + $0xc7] sm:$0xff] }
 0x611   : > { %6628 = vmatmul.msk.bf16.gmra.mxu0 %vm339_vm1, %v5321_v7 }
 0x612   : > { %v8503_v62 = vadd.f32 %v5440_v25, %v5240_v43  ;;  %v5555_v25 = vld [vmem:[#allocation3 + $0xb7] sm:$0xff] }
 0x613   : > { %v4672_v55 = vpop.f32.mrf.mxu1  ;;  %v5588_v20 = vpack.c.bf16 %v5556_v47, %v5555_v25  ;;  %v5024_v43 = vld [vmem:[#allocation3 + $0x15d] sm:$0xff]  ;;  %v5558_v47 = vld [vmem:[#allocation3 + $0xcf] sm:$0xff] }
 0x615   : > { %v4890_v50 = vpop.f32.mrf.mxu2 }
 0x616   : > { %v5447_v21 = vpop.f32.mrf.mxu0  ;;  %v8505_v23 = vpop.f32.mrf.mxu3  ;;  %v8508_v44 = vadd.f32 %v4890_v50, %v8333_v4  ;;  %v5023_v50 = vld [vmem:[#allocation3 + $0x155] sm:$0xff] }
 0x617   : > { %v5046_v37 = vpack.c.bf16 %v5024_v43, %v5023_v50 }
 0x61a   : > { %6584 = vmatmul.msk.bf16.gmra.mxu2 %vm339_vm1, %v5044_v19 }
 0x61b   : > { %6606 = vmatmul.msk.bf16.gmra.mxu3 %vm339_vm1, %v5045_v6  ;;  %v5678_v3 = vpop.f32.mrf.mxu1 }
 0x61d   : > { %v4893_v36 = vpop.f32.mrf.mxu2 }
 0x61e   : > { %v5450_v29 = vpop.f32.mrf.mxu0  ;;  %v5169_v49 = vpop.f32.mrf.mxu3  ;;  %v4966_v16 = vadd.f32 %v4893_v36, %v8341_v54  ;;  %6641 = vmatmul.msk.bf16.gmra.mxu1 %vm339_vm1, %v5588_v20  ;;  %v5302_v54 = vld [vmem:[#allocation3 + $0x16e] sm:$0xff] }
 0x620   : > { %v5242_v4 = vadd.f32 %v5169_v49, %v4966_v16 }
 0x621   : > { %6629 = vmatmul.msk.bf16.gmra.mxu0 %vm339_vm1, %v5322_v48  ;;  %v5589_v48 = vpack.c.bf16 %v5558_v47, %v5557_v51 }
 0x622   : > { %v8515_v7 = vadd.f32 %v5445_v60, %v5242_v4  ;;  %v8525_v60 = vld [vmem:[%s8879_s5] ss:$0 sm:$0xff]  ;;  %v8979_v4 = vld [vmem:[#allocation9_spill] sm:$0xff] }
 0x623   : > { %v5679_v19 = vpop.f32.mrf.mxu1 }
 0x624   : > { %v5900_v19 = vrot.slane %v8979_v4, 5 }
 0x625   : > { %v4895_v28 = vpop.f32.mrf.mxu2 }
 0x626   : > { %v5452_v0 = vpop.f32.mrf.mxu0  ;;  %v5171_v2 = vpop.f32.mrf.mxu3  ;;  %v4967_v55 = vadd.f32 %v4895_v28, %v8349_v18 }
 0x628   : > { %v5243_v40 = vadd.f32 %v5171_v2, %v4967_v55 }
 0x62a   : > { %v8518_v3 = vadd.f32 %v5447_v21, %v5243_v40  ;;  %6585 = vmatmul.msk.bf16.gmra.mxu2 %vm339_vm1, %v5045_v6  ;;  %v8531_v21 = vld [vmem:[%s8880_s6] ss:$0 sm:$0xff]  ;;  %v5323_v6 = vpack.c.bf16 %v5302_v54, %v5301_v46 }
 0x62b   : > { %6607 = vmatmul.msk.bf16.gmra.mxu3 %vm339_vm1, %v5046_v37  ;;  %v5681_v25 = vpop.f32.mrf.mxu1 }
 0x62c   : > { %v5778_v20 = vadd.f32 %v5681_v25, %v8395_v31 }
 0x62d   : > { %v4898_v36 = vpop.f32.mrf.mxu2 }
 0x62e   : > { %v5455_v18 = vpop.f32.mrf.mxu0  ;;  %v5174_v49 = vpop.f32.mrf.mxu3  ;;  %v5819_v16 = vmul.f32 %v8525_v60, %v5778_v20  ;;  %v4968_v28 = vadd.f32 %v4898_v36, %v8357_v38  ;;  %6642 = vmatmul.msk.bf16.gmra.mxu1 %vm339_vm1, %v5589_v48  ;;  %v8980_v38 = vld [vmem:[#allocation10_spill] sm:$0xff]  ;;  %v5026_v20 = vld [vmem:[#allocation3 + $0x16d] sm:$0xff] }
 0x62f   : > { %v5901_v40 = vrot.slane %v8980_v38, 5 }
 0x630   : > { %v5860_v31 = vadd.f32 %v8531_v21, %v5819_v16  ;;  %v5244_v2 = vadd.f32 %v5174_v49, %v4968_v28  ;;  %v5560_v28 = vld [vmem:[#allocation3 + $0xdf] sm:$0xff] }
 0x631   : > { %6630 = vmatmul.msk.bf16.gmra.mxu0 %vm339_vm1, %v5323_v6  ;;  %v5902_v36 = vsel %vm5899_vm4, %v5900_v19, %v5901_v40 }
 0x632   : > { %v5906_v43 = vadd.f32 %v5900_v19, %v5860_v31  ;;  %v8539_v55 = vadd.f32 %v5450_v29, %v5244_v2  ;;  %v5025_v29 = vld [vmem:[#allocation3 + $0x165] sm:$0xff] }
 0x633   : > { %v5683_v50 = vpop.f32.mrf.mxu1  ;;  %v5047_v4 = vpack.c.bf16 %v5026_v20, %v5025_v29 }
 0x634   : > { %v5909_v46 = vmax.f32 %v5906_v43, 0.0  ;;  %v5779_v54 = vadd.f32 %v5683_v50, %v8401_v57  ;;  %v5559_v43 = vld [vmem:[#allocation3 + $0xd7] sm:$0xff] }
 0x635   : > { %v4900_v25 = vpop.f32.mrf.mxu2  ;;  %v5590_v19 = vpack.c.bf16 %v5560_v28, %v5559_v43 }
 0x636   : > { %v5457_v47 = vpop.f32.mrf.mxu0  ;;  %v5176_v51 = vpop.f32.mrf.mxu3  ;;  %5913 = vst.msk [vmem:[%s8546_s9 - $0x3] sm:$0xf8] %vm5912_vm3, %v5909_v46  ;;  %v5820_v48 = vmul.f32 %v8525_v60, %v5779_v54  ;;  %v4969_v6 = vadd.f32 %v4900_v25, %v8365_v14 }
 0x638   : > { %v5861_v49 = vadd.f32 %v8531_v21, %v5820_v48  ;;  %v5245_v16 = vadd.f32 %v5176_v51, %v4969_v6  ;;  %v8981_v51 = vld [vmem:[#allocation12_spill] sm:$0xff] }
 0x63a   : > { %v5907_v57 = vadd.f32 %v5902_v36, %v5861_v49  ;;  %v8556_v31 = vadd.f32 %v5452_v0, %v5245_v16  ;;  %6586 = vmatmul.msk.bf16.gmra.mxu2 %vm339_vm1, %v5046_v37  ;;  %v5920_v0 = vrot.slane %v8981_v51, 3  ;;  %v8982_v49 = vld [vmem:[#allocation13_spill] sm:$0xff] }
 0x63b   : > { %6608 = vmatmul.msk.bf16.gmra.mxu3 %vm339_vm1, %v5047_v4  ;;  %v5686_v2 = vpop.f32.mrf.mxu1  ;;  %v5921_v16 = vrot.slane %v8982_v49, 3 }
 0x63c   : > { %v5910_v38 = vmax.f32 %v5907_v57, 0.0  ;;  %v5780_v14 = vadd.f32 %v5686_v2, %v8411_v35 }
 0x63d   : > { %v4903_v46 = vpop.f32.mrf.mxu2 }
 0x63e   : > { %v5460_v50 = vpop.f32.mrf.mxu0  ;;  %v5179_v54 = vpop.f32.mrf.mxu3  ;;  %5914 = vst.msk [vmem:[%s8546_s9 + $0x5] sm:$0xff] %vm339_vm1, %v5910_v38  ;;  %v5821_v25 = vmul.f32 %v8525_v60, %v5780_v14  ;;  %v4970_v29 = vadd.f32 %v4903_v46, %v8370_v1  ;;  %6643 = vmatmul.msk.bf16.gmra.mxu1 %vm339_vm1, %v5590_v19  ;;  %v4751_v38 = vld [vmem:[#allocation3 + $0x165] sm:$0xf]  ;;  %v5922_v14 = vsel %vm5919_vm7, %v5920_v0, %v5921_v16 }
 0x640   : > { %v5862_v37 = vadd.f32 %v8531_v21, %v5821_v25  ;;  %v5246_v20 = vadd.f32 %v5179_v54, %v4970_v29  ;;  %v4772_v54 = vpack.c.bf16 %v4751_v38, %v4751_v38 }
 0x642   : > { %v5908_v48 = vadd.f32 %v5901_v40, %v5862_v37  ;;  %v5926_v6 = vadd.f32 %v5920_v0, %v5862_v37  ;;  %v8568_v35 = vadd.f32 %v5455_v18, %v5246_v20  ;;  %v5561_v37 = vld [vmem:[#allocation3 + $0xe7] sm:$0xff] }
 0x643   : > { %v5688_v36 = vpop.f32.mrf.mxu1 }
 0x644   : > { %v5911_v28 = vmax.f32 %v5908_v48, 0.0  ;;  %v5929_v57 = vmax.f32 %v5926_v6, 0.0  ;;  %v5781_v1 = vadd.f32 %v5688_v36, %v8417_v52  ;;  %v5562_v52 = vld [vmem:[#allocation3 + $0xef] sm:$0xff] }
 0x645   : > { %v4905_v2 = vpop.f32.mrf.mxu2  ;;  %v5591_v6 = vpack.c.bf16 %v5562_v52, %v5561_v37 }
 0x646   : > { %v5462_v4 = vpop.f32.mrf.mxu0  ;;  %v5181_v43 = vpop.f32.mrf.mxu3  ;;  %5916 = vst.msk [vmem:[%s8546_s9 + $0xd] sm:$0x7] %vm5915_vm5, %v5911_v28  ;;  %v5822_v18 = vmul.f32 %v8525_v60, %v5781_v1  ;;  %v4971_v40 = vadd.f32 %v4905_v2, %v8375_v45  ;;  %v8983_v28 = vld [vmem:[#allocation16_spill] sm:$0xff] }
 0x647   : > { %6654 = vst.msk [vmem:[%s8546_s9 + $0xb] sm:$0xe0] %vm5933_vm6, %v5929_v57  ;;  %v5941_v57 = vrot.slane %v8983_v28, 1 }
 0x648   : > { %v5863_v19 = vadd.f32 %v8531_v21, %v5822_v18  ;;  %v5247_v46 = vadd.f32 %v5181_v43, %v4971_v40  ;;  %v8984_v40 = vld [vmem:[#allocation19_spill] sm:$0xff] }
 0x64a   : > { %v5927_v25 = vadd.f32 %v5922_v14, %v5863_v19  ;;  %v8580_v51 = vadd.f32 %v5457_v47, %v5247_v46  ;;  %6587 = vmatmul.msk.bf16.gmra.mxu2 %vm339_vm1, %v4772_v54  ;;  %v5942_v14 = vrot.slane %v8984_v40, 1 }
 0x64b   : > { %v5691_v29 = vpop.f32.mrf.mxu1 }
 0x64c   : > { %v5930_v48 = vmax.f32 %v5927_v25, 0.0  ;;  %v5782_v45 = vadd.f32 %v5691_v29, %v8427_v27  ;;  %v5943_v29 = vsel %vm5940_vm10, %v5941_v57, %v5942_v14 }
 0x64d   : > { %v4908_v36 = vpop.f32.mrf.mxu2 }
 0x64e   : > { %v5465_v20 = vpop.f32.mrf.mxu0  ;;  %v5184_v0 = vpop.f32.mrf.mxu3  ;;  %6655 = vst.msk [vmem:[%s8546_s9 + $0x13] sm:$0xff] %vm339_vm1, %v5930_v48  ;;  %v5823_v49 = vmul.f32 %v8525_v60, %v5782_v45  ;;  %v4972_v47 = vadd.f32 %v4908_v36, %v8380_v26  ;;  %6644 = vmatmul.msk.bf16.gmra.mxu1 %vm339_vm1, %v5591_v6  ;;  %v5564_v45 = vld [vmem:[#allocation3 + $0xff] sm:$0xff] }
 0x650   : > { %v5864_v1 = vadd.f32 %v8531_v21, %v5823_v49  ;;  %v5248_v2 = vadd.f32 %v5184_v0, %v4972_v47  ;;  %v5563_v0 = vld [vmem:[#allocation3 + $0xf7] sm:$0xff] }
 0x652   : > { %v5928_v43 = vadd.f32 %v5921_v16, %v5864_v1  ;;  %v5947_v38 = vadd.f32 %v5941_v57, %v5864_v1  ;;  %v8591_v27 = vadd.f32 %v5460_v50, %v5248_v2  ;;  %v5592_v1 = vpack.c.bf16 %v5564_v45, %v5563_v0  ;;  %v5565_v0 = vld [vmem:[#allocation3 + $0x107] sm:$0xff] }
 0x653   : > { %v5693_v18 = vpop.f32.mrf.mxu1 }
 0x654   : > { %v5931_v46 = vmax.f32 %v5928_v43, 0.0  ;;  %v5950_v54 = vmax.f32 %v5947_v38, 0.0  ;;  %v5783_v26 = vadd.f32 %v5693_v18, %v8433_v59 }
 0x655   : > { %v4910_v52 = vpop.f32.mrf.mxu2 }
 0x656   : > { %v5467_v19 = vpop.f32.mrf.mxu0  ;;  %v5186_v25 = vpop.f32.mrf.mxu3  ;;  %6656 = vst.msk [vmem:[%s8546_s9 + $0x1b] sm:$0x1f] %vm5936_vm8, %v5931_v46  ;;  %v5824_v16 = vmul.f32 %v8525_v60, %v5783_v26  ;;  %v4973_v50 = vadd.f32 %v4910_v52, %v8385_v17 }
 0x657   : > { %6657 = vst.msk [vmem:[%s8546_s9 + $0x19] sm:$0x80] %vm5954_vm9, %v5950_v54 }
 0x658   : > { %v5865_v37 = vadd.f32 %v8531_v21, %v5824_v16  ;;  %v5249_v48 = vadd.f32 %v5186_v25, %v4973_v50  ;;  %v8985_v16 = vld [vmem:[#allocation20_spill] sm:$0xff] }
 0x659   : > { %v5962_v50 = vrot.slane %v8985_v16, 7  ;;  %v8987_v16 = vld [vmem:[#allocation24_spill] sm:$0xff] }
 0x65a   : > { %v5948_v6 = vadd.f32 %v5943_v29, %v5865_v37  ;;  %v8603_v59 = vadd.f32 %v5462_v4, %v5249_v48  ;;  %v5566_v37 = vld [vmem:[#allocation3 + $0x10f] sm:$0xff] }
 0x65b   : > { %v5696_v36 = vpop.f32.mrf.mxu1 }
 0x65c   : > { %v5951_v28 = vmax.f32 %v5948_v6, 0.0  ;;  %v5784_v47 = vadd.f32 %v5696_v36, %v8443_v63  ;;  %v8986_v6 = vld [vmem:[#allocation23_spill] sm:$0xff] }
 0x65d   : > { %v4913_v17 = vpop.f32.mrf.mxu2  ;;  %v5963_v36 = vrot.slane %v8986_v6, 7  ;;  %v8988_v6 = vld [vmem:[#allocation26_spill] sm:$0xff] }
 0x65e   : > { %v5470_v49 = vpop.f32.mrf.mxu0  ;;  %v5189_v2 = vpop.f32.mrf.mxu3  ;;  %6658 = vst.msk [vmem:[%s8546_s9 + $0x21] sm:$0xff] %vm339_vm1, %v5951_v28  ;;  %v5825_v57 = vmul.f32 %v8525_v60, %v5784_v47  ;;  %v4974_v43 = vadd.f32 %v4913_v17, %v8390_v61  ;;  %6645 = vmatmul.msk.bf16.gmra.mxu1 %vm339_vm1, %v5592_v1  ;;  %v5593_v17 = vpack.c.bf16 %v5566_v37, %v5565_v0  ;;  %v5983_v0 = vrot.slane %v8988_v6, 5 }
 0x660   : > { %v5866_v4 = vadd.f32 %v8531_v21, %v5825_v57  ;;  %v5250_v38 = vadd.f32 %v5189_v2, %v4974_v43  ;;  %v5964_v43 = vsel %vm5961_vm13, %v5962_v50, %v5963_v36 }
 0x662   : > { %v5949_v18 = vadd.f32 %v5942_v14, %v5866_v4  ;;  %v8612_v40 = vadd.f32 %v5465_v20, %v5250_v38 }
 0x663   : > { %v5698_v63 = vpop.f32.mrf.mxu1 }
 0x664   : > { %v5952_v54 = vmax.f32 %v5949_v18, 0.0  ;;  %v5785_v26 = vadd.f32 %v5698_v63, %v8449_v9 }
 0x665   : > { %v4915_v52 = vpop.f32.mrf.mxu2 }
 0x666   : > { %v5472_v46 = vpop.f32.mrf.mxu0  ;;  %v5191_v25 = vpop.f32.mrf.mxu3  ;;  %6659 = vst.msk [vmem:[%s8546_s9 + $0x29] sm:$0x7f] %vm5957_vm11, %v5952_v54  ;;  %v5826_v61 = vmul.f32 %v8525_v60, %v5785_v26  ;;  %v4975_v29 = vadd.f32 %v4915_v52, %v8398_v30 }
 0x668   : > { %v5867_v14 = vadd.f32 %v8531_v21, %v5826_v61  ;;  %v5251_v20 = vadd.f32 %v5191_v25, %v4975_v29  ;;  %v5982_v29 = vrot.slane %v8987_v16, 5  ;;  %v8989_v16 = vld [vmem:[#allocation27_spill] sm:$0xff] }
 0x66a   : > { %v5968_v48 = vadd.f32 %v5962_v50, %v5867_v14  ;;  %v8621_v45 = vadd.f32 %v5467_v19, %v5251_v20 }
 0x66b   : > { %v5701_v9 = vpop.f32.mrf.mxu1 }
 0x66c   : > { %v5971_v47 = vmax.f32 %v5968_v48, 0.0  ;;  %v5786_v1 = vadd.f32 %v5701_v9, %v8459_v58 }
 0x66d   : > { %v4918_v30 = vpop.f32.mrf.mxu2 }
 0x66e   : > { %v5475_v28 = vpop.f32.mrf.mxu0  ;;  %v5194_v2 = vpop.f32.mrf.mxu3  ;;  %6660 = vst.msk [vmem:[%s8546_s9 + $0x2f] sm:$0xfe] %vm5975_vm12, %v5971_v47  ;;  %v5827_v57 = vmul.f32 %v8525_v60, %v5786_v1  ;;  %v4976_v19 = vadd.f32 %v4918_v30, %v8406_v42  ;;  %6646 = vmatmul.msk.bf16.gmra.mxu1 %vm339_vm1, %v5593_v17  ;;  %v5567_v47 = vld [vmem:[#allocation3 + $0x117] sm:$0xff] }
 0x670   : > { %v5868_v4 = vadd.f32 %v8531_v21, %v5827_v57  ;;  %v5252_v38 = vadd.f32 %v5194_v2, %v4976_v19 }
 0x672   : > { %v5969_v18 = vadd.f32 %v5964_v43, %v5868_v4  ;;  %v8632_v58 = vadd.f32 %v5470_v49, %v5252_v38  ;;  %v5568_v49 = vld [vmem:[#allocation3 + $0x11f] sm:$0xff]  ;;  %v5984_v43 = vsel %vm5899_vm4, %v5982_v29, %v5983_v0 }
 0x673   : > { %v5703_v63 = vpop.f32.mrf.mxu1  ;;  %v5594_v2 = vpack.c.bf16 %v5568_v49, %v5567_v47  ;;  %v5569_v47 = vld [vmem:[#allocation3 + $0x127] sm:$0xff] }
 0x674   : > { %v5972_v26 = vmax.f32 %v5969_v18, 0.0  ;;  %v5787_v52 = vadd.f32 %v5703_v63, %v8465_v12 }
 0x675   : > { %v4920_v25 = vpop.f32.mrf.mxu2 }
 0x676   : > { %v5477_v54 = vpop.f32.mrf.mxu0  ;;  %v5196_v61 = vpop.f32.mrf.mxu3  ;;  %6661 = vst.msk [vmem:[%s8546_s9 + $0x37] sm:$0xff] %vm339_vm1, %v5972_v26  ;;  %v5828_v42 = vmul.f32 %v8525_v60, %v5787_v52  ;;  %v4977_v50 = vadd.f32 %v4920_v25, %v8414_v41 }
 0x678   : > { %v5869_v14 = vadd.f32 %v8531_v21, %v5828_v42  ;;  %v5253_v20 = vadd.f32 %v5196_v61, %v4977_v50  ;;  %v6000_v50 = vrot.slane %v8989_v16, 3 }
 0x67a   : > { %v5970_v37 = vadd.f32 %v5963_v36, %v5869_v14  ;;  %v5988_v48 = vadd.f32 %v5982_v29, %v5869_v14  ;;  %v8641_v9 = vadd.f32 %v5472_v46, %v5253_v20  ;;  %v5570_v20 = vld [vmem:[#allocation3 + $0x12f] sm:$0xff] }
 0x67b   : > { %v5706_v12 = vpop.f32.mrf.mxu1 }
 0x67c   : > { %v5973_v17 = vmax.f32 %v5970_v37, 0.0  ;;  %v5991_v30 = vmax.f32 %v5988_v48, 0.0  ;;  %v5788_v41 = vadd.f32 %v5706_v12, %v8475_v39  ;;  %v8990_v12 = vld [vmem:[#allocation30_spill] sm:$0xff] }
 0x67d   : > { %v4923_v57 = vpop.f32.mrf.mxu2  ;;  %v6001_v6 = vrot.slane %v8990_v12, 3 }
 0x67e   : > { %v5480_v1 = vpop.f32.mrf.mxu0  ;;  %v5199_v19 = vpop.f32.mrf.mxu3  ;;  %6662 = vst.msk [vmem:[%s8546_s9 + $0x3f] sm:$0x1] %vm5978_vm14, %v5973_v17  ;;  %v5829_v46 = vmul.f32 %v8525_v60, %v5788_v41  ;;  %v4978_v36 = vadd.f32 %v4923_v57, %v8422_v5  ;;  %6647 = vmatmul.msk.bf16.gmra.mxu1 %vm339_vm1, %v5594_v2 }
 0x67f   : > { %6663 = vst.msk [vmem:[%s8546_s9 + $0x3d] sm:$0xf8] %vm5912_vm3, %v5991_v30 }
 0x680   : > { %v5870_v4 = vadd.f32 %v8531_v21, %v5829_v46  ;;  %v5254_v38 = vadd.f32 %v5199_v19, %v4978_v36  ;;  %v6002_v46 = vsel %vm5919_vm7, %v6000_v50, %v6001_v6 }
 0x682   : > { %v5989_v39 = vadd.f32 %v5984_v43, %v5870_v4  ;;  %v8654_v18 = vadd.f32 %v5475_v28, %v5254_v38 }
 0x683   : > { %v5708_v63 = vpop.f32.mrf.mxu1 }
 0x684   : > { %v5992_v52 = vmax.f32 %v5989_v39, 0.0  ;;  %v5789_v25 = vadd.f32 %v5708_v63, %v8481_v13 }
 0x685   : > { %v4925_v61 = vpop.f32.mrf.mxu2 }
 0x686   : > { %v5482_v26 = vpop.f32.mrf.mxu0  ;;  %v5201_v42 = vpop.f32.mrf.mxu3  ;;  %6664 = vst.msk [vmem:[%s8546_s9 + $0x45] sm:$0xff] %vm339_vm1, %v5992_v52  ;;  %v5830_v5 = vmul.f32 %v8525_v60, %v5789_v25  ;;  %v4979_v29 = vadd.f32 %v4925_v61, %v8430_v11  ;;  %v5595_v11 = vpack.c.bf16 %v5570_v20, %v5569_v47 }
 0x688   : > { %v5871_v14 = vadd.f32 %v8531_v21, %v5830_v5  ;;  %v5255_v28 = vadd.f32 %v5201_v42, %v4979_v29  ;;  %v8991_v42 = vld [vmem:[#allocation33_spill] sm:$0xff] }
 0x689   : > { %v6018_v5 = vrot.slane %v8991_v42, 1 }
 0x68a   : > { %v5990_v49 = vadd.f32 %v5983_v0, %v5871_v14  ;;  %v6006_v37 = vadd.f32 %v6000_v50, %v5871_v14  ;;  %v8663_v48 = vadd.f32 %v5477_v54, %v5255_v28 }
 0x68b   : > { %v5711_v13 = vpop.f32.mrf.mxu1 }
 0x68c   : > { %v5993_v30 = vmax.f32 %v5990_v49, 0.0  ;;  %v6009_v41 = vmax.f32 %v6006_v37, 0.0  ;;  %v5790_v2 = vadd.f32 %v5711_v13, %v8491_v22  ;;  %v8992_v49 = vld [vmem:[#allocation34_spill] sm:$0xff]  ;;  %v5571_v13 = vld [vmem:[#allocation3 + $0x137] sm:$0xff] }
 0x68d   : > { %v4928_v57 = vpop.f32.mrf.mxu2  ;;  %v6019_v37 = vrot.slane %v8992_v49, 1 }
 0x68e   : > { %v5485_v17 = vpop.f32.mrf.mxu0  ;;  %v5204_v19 = vpop.f32.mrf.mxu3  ;;  %6665 = vst.msk [vmem:[%s8546_s9 + $0x4d] sm:$0x7] %vm5915_vm5, %v5993_v30  ;;  %v5831_v0 = vmul.f32 %v8525_v60, %v5790_v2  ;;  %v4980_v54 = vadd.f32 %v4928_v57, %v8438_v10  ;;  %6648 = vmatmul.msk.bf16.gmra.mxu1 %vm339_vm1, %v5595_v11  ;;  %v5241_v57 = vadd.f32 %v8505_v23, %v8508_v44 }
 0x68f   : > { %6666 = vst.msk [vmem:[%s8546_s9 + $0x4b] sm:$0xe0] %vm5933_vm6, %v6009_v41 }
 0x690   : > { %v5872_v36 = vadd.f32 %v8531_v21, %v5831_v0  ;;  %v5256_v43 = vadd.f32 %v5204_v19, %v4980_v54  ;;  %v6020_v19 = vsel %vm5940_vm10, %v6018_v5, %v6019_v37  ;;  %v5517_v54 = vadd.f32 %v8493_v53, %v5241_v57  ;;  %v5574_v53 = vld [vmem:[#allocation3 + $0x14f] sm:$0xff] }
 0x692   : > { %v6007_v22 = vadd.f32 %v6002_v46, %v5872_v36  ;;  %v8676_v4 = vadd.f32 %v5480_v1, %v5256_v43  ;;  %v5572_v1 = vld [vmem:[#allocation3 + $0x13f] sm:$0xff] }
 0x693   : > { %v5713_v38 = vpop.f32.mrf.mxu1 }
 0x694   : > { %v6010_v63 = vmax.f32 %v6007_v22, 0.0  ;;  %v5791_v52 = vadd.f32 %v5713_v38, %v8496_v8 }
 0x695   : > { %v4930_v25 = vpop.f32.mrf.mxu2 }
 0x696   : > { %v5487_v39 = vpop.f32.mrf.mxu0  ;;  %v5206_v61 = vpop.f32.mrf.mxu3  ;;  %6667 = vst.msk [vmem:[%s8546_s9 + $0x53] sm:$0xff] %vm339_vm1, %v6010_v63  ;;  %v5832_v10 = vmul.f32 %v8525_v60, %v5791_v52  ;;  %v4981_v16 = vadd.f32 %v4930_v25, %v8446_v15  ;;  %v5596_v15 = vpack.c.bf16 %v5572_v1, %v5571_v13 }
 0x698   : > { %v5873_v50 = vadd.f32 %v8531_v21, %v5832_v10  ;;  %v5257_v29 = vadd.f32 %v5206_v61, %v4981_v16 }
 0x69a   : > { %v6008_v14 = vadd.f32 %v6001_v6, %v5873_v50  ;;  %v6024_v28 = vadd.f32 %v6018_v5, %v5873_v50  ;;  %v8685_v20 = vadd.f32 %v5482_v26, %v5257_v29  ;;  %v5573_v5 = vld [vmem:[#allocation3 + $0x147] sm:$0xff] }
 0x69b   : > { %v5716_v8 = vpop.f32.mrf.mxu1  ;;  %v5597_v1 = vpack.c.bf16 %v5574_v53, %v5573_v5 }
 0x69c   : > { %v6011_v47 = vmax.f32 %v6008_v14, 0.0  ;;  %v6027_v30 = vmax.f32 %v6024_v28, 0.0  ;;  %v5792_v41 = vadd.f32 %v5716_v8, %v8503_v62  ;;  %v8993_v8 = vld [vmem:[#allocation35_spill] sm:$0xff] }
 0x69d   : > { %v4933_v2 = vpop.f32.mrf.mxu2  ;;  %v6036_v49 = vrot.slane %v8993_v8, 7 }
 0x69e   : > { %v5490_v12 = vpop.f32.mrf.mxu0  ;;  %v5209_v11 = vpop.f32.mrf.mxu3  ;;  %6668 = vst.msk [vmem:[%s8546_s9 + $0x5b] sm:$0x1f] %vm5936_vm8, %v6011_v47  ;;  %v5833_v26 = vmul.f32 %v8525_v60, %v5792_v41  ;;  %v4982_v6 = vadd.f32 %v4933_v2, %v8454_v32  ;;  %6649 = vmatmul.msk.bf16.gmra.mxu1 %vm339_vm1, %v5596_v15  ;;  %v5027_v47 = vld [vmem:[#allocation3 + $0x175] sm:$0xf] }
 0x69f   : > { %6669 = vst.msk [vmem:[%s8546_s9 + $0x59] sm:$0x80] %vm5954_vm9, %v6027_v30  ;;  %v5048_v30 = vpack.c.bf16 %v5027_v47, %v5027_v47  ;;  %v8994_v2 = vld [vmem:[#allocation4_spill] sm:$0xff] }
 0x6a0   : > { %v5874_v62 = vadd.f32 %v8531_v21, %v5833_v26  ;;  %v5258_v0 = vadd.f32 %v5209_v11, %v4982_v6  ;;  %v6037_v11 = vrot.slane %v8994_v2, 7 }
 0x6a1   : > { %6609 = vmatmul.msk.bf16.gmra.mxu3 %vm339_vm1, %v5048_v30 }
 0x6a2   : > { %v6025_v46 = vadd.f32 %v6020_v19, %v5874_v62  ;;  %v8701_v23 = vadd.f32 %v5485_v17, %v5258_v0 }
 0x6a3   : > { %v5718_v44 = vpop.f32.mrf.mxu1 }
 0x6a4   : > { %v6028_v43 = vmax.f32 %v6025_v46, 0.0  ;;  %v5793_v22 = vadd.f32 %v5718_v44, %v5517_v54  ;;  %v5303_v54 = vld [vmem:[#allocation3 + $0x176] sm:$0xf] }
 0x6a5   : > { %v4935_v38 = vpop.f32.mrf.mxu2  ;;  %v5324_v46 = vpack.c.bf16 %v5303_v54, %v5303_v54 }
 0x6a6   : > { %v5492_v36 = vpop.f32.mrf.mxu0  ;;  %v5211_v32 = vpop.f32.mrf.mxu3  ;;  %6670 = vst.msk [vmem:[%s8546_s9 + $0x61] sm:$0xff] %vm339_vm1, %v6028_v43  ;;  %v5834_v63 = vmul.f32 %v8525_v60, %v5793_v22  ;;  %v4983_v52 = vadd.f32 %v4935_v38, %v8462_v24  ;;  %v5576_v22 = vld [vmem:[#allocation3 + $0x15f] sm:$0xff] }
 0x6a7   : > { %6631 = vmatmul.msk.bf16.gmra.mxu0 %vm339_vm1, %v5324_v46 }
 0x6a8   : > { %v5875_v25 = vadd.f32 %v8531_v21, %v5834_v63  ;;  %v5259_v61 = vadd.f32 %v5211_v32, %v4983_v52  ;;  %v5575_v63 = vld [vmem:[#allocation3 + $0x157] sm:$0xff] }
 0x6aa   : > { %v6026_v10 = vadd.f32 %v6019_v37, %v5875_v25  ;;  %v8708_v17 = vadd.f32 %v5487_v39, %v5259_v61 }
 0x6ab   : > { %v5721_v42 = vpop.f32.mrf.mxu1 }
 0x6ac   : > { %v6029_v50 = vmax.f32 %v6026_v10, 0.0  ;;  %v5794_v29 = vadd.f32 %v5721_v42, %v8515_v7  ;;  %v8995_v42 = vld [vmem:[#allocation5_spill] sm:$0xff] }
 0x6ad   : > { %v4938_v14 = vpop.f32.mrf.mxu2  ;;  %v6054_v5 = vrot.slane %v8995_v42, 5 }
 0x6ae   : > { %v5495_v16 = vpop.f32.mrf.mxu0  ;;  %v5214_v28 = vpop.f32.mrf.mxu3  ;;  %6671 = vst.msk [vmem:[%s8546_s9 + $0x69] sm:$0x7f] %vm5957_vm11, %v6029_v50  ;;  %v5835_v24 = vmul.f32 %v8525_v60, %v5794_v29  ;;  %v4984_v13 = vadd.f32 %v4938_v14, %v8470_v34  ;;  %6650 = vmatmul.msk.bf16.gmra.mxu1 %vm339_vm1, %v5597_v1 }
 0x6b0   : > { %v5876_v39 = vadd.f32 %v8531_v21, %v5835_v24  ;;  %v5260_v37 = vadd.f32 %v5214_v28, %v4984_v13  ;;  %v8996_v24 = vld [vmem:[#allocation6_spill] sm:$0xff] }
 0x6b1   : > { %v6055_v8 = vrot.slane %v8996_v24, 5  ;;  %v9000_v24 = vld [vmem:[#allocation14_spill] sm:$0xff] }
 0x6b2   : > { %v6042_v7 = vadd.f32 %v6036_v49, %v5876_v39  ;;  %v8718_v41 = vadd.f32 %v5490_v12, %v5260_v37  ;;  %v6038_v12 = vsel %vm5961_vm13, %v6036_v49, %v6037_v11 }
 0x6b3   : > { %v5723_v15 = vpop.f32.mrf.mxu1  ;;  %v6056_v30 = vsel %vm5899_vm4, %v6054_v5, %v6055_v8 }
 0x6b4   : > { %v6045_v26 = vmax.f32 %v6042_v7, 0.0  ;;  %v5795_v34 = vadd.f32 %v5723_v15, %v8518_v3  ;;  %v5577_v7 = vld [vmem:[#allocation3 + $0x167] sm:$0xff]  ;;  %v5578_v15 = vld [vmem:[#allocation3 + $0x16f] sm:$0xff] }
 0x6b5   : > { %v4940_v6 = vpop.f32.mrf.mxu2 }
 0x6b6   : > { %v5497_v57 = vpop.f32.mrf.mxu0  ;;  %v5216_v19 = vpop.f32.mrf.mxu3  ;;  %6672 = vst.msk [vmem:[%s8546_s9 + $0x6f] sm:$0xfe] %vm5975_vm12, %v6045_v26  ;;  %v5836_v62 = vmul.f32 %v8525_v60, %v5795_v34  ;;  %v4985_v0 = vadd.f32 %v4940_v6, %v8478_v33  ;;  %v5598_v33 = vpack.c.bf16 %v5576_v22, %v5575_v63  ;;  %v5599_v26 = vpack.c.bf16 %v5578_v15, %v5577_v7 }
 0x6b8   : > { %v5877_v44 = vadd.f32 %v8531_v21, %v5836_v62  ;;  %v5261_v43 = vadd.f32 %v5216_v19, %v4985_v0  ;;  %v8997_v19 = vld [vmem:[#allocation7_spill] sm:$0xff] }
 0x6b9   : > { %v6072_v62 = vrot.slane %v8997_v19, 3 }
 0x6ba   : > { %v6043_v3 = vadd.f32 %v6038_v12, %v5877_v44  ;;  %v8730_v38 = vadd.f32 %v5492_v36, %v5261_v43  ;;  %v8998_v44 = vld [vmem:[#allocation8_spill] sm:$0xff] }
 0x6bb   : > { %v5726_v32 = vpop.f32.mrf.mxu1  ;;  %v6073_v43 = vrot.slane %v8998_v44, 3 }
 0x6bc   : > { %v6046_v52 = vmax.f32 %v6043_v3, 0.0  ;;  %v5796_v25 = vadd.f32 %v5726_v32, %v8539_v55 }
 0x6bd   : > { %v4943_v61 = vpop.f32.mrf.mxu2 }
 0x6be   : > { %v5219_v53 = vpop.f32.mrf.mxu3  ;;  %6673 = vst.msk [vmem:[%s8546_s9 + $0x77] sm:$0xff] %vm339_vm1, %v6046_v52  ;;  %v5837_v10 = vmul.f32 %v8525_v60, %v5796_v25  ;;  %v4986_v50 = vadd.f32 %v4943_v61, %v8486_v56  ;;  %6651 = vmatmul.msk.bf16.gmra.mxu1 %vm339_vm1, %v5598_v33  ;;  %v6074_v52 = vsel %vm5919_vm7, %v6072_v62, %v6073_v43  ;;  %v5579_v25 = vld [vmem:[#allocation3 + $0x177] sm:$0xf] }
 0x6c0   : > { %v5878_v36 = vadd.f32 %v8531_v21, %v5837_v10  ;;  %v5262_v29 = vadd.f32 %v5219_v53, %v4986_v50  ;;  %v5600_v53 = vpack.c.bf16 %v5579_v25, %v5579_v25  ;;  %v8999_v50 = vld [vmem:[#allocation11_spill] sm:$0xff] }
 0x6c2   : > { %v6044_v1 = vadd.f32 %v6037_v11, %v5878_v36  ;;  %v6060_v55 = vadd.f32 %v6054_v5, %v5878_v36  ;;  %v8740_v14 = vadd.f32 %v5495_v16, %v5262_v29  ;;  %v6090_v36 = vrot.slane %v8999_v50, 1 }
 0x6c3   : > { %v5728_v28 = vpop.f32.mrf.mxu1 }
 0x6c4   : > { %v6047_v49 = vmax.f32 %v6044_v1, 0.0  ;;  %v6063_v13 = vmax.f32 %v6060_v55, 0.0  ;;  %v5797_v39 = vadd.f32 %v5728_v28, %v8556_v31 }
 0x6c5   : > { %v4945_v37 = vpop.f32.mrf.mxu2 }
 0x6c6   : > { %v5221_v56 = vpop.f32.mrf.mxu3  ;;  %6674 = vst.msk [vmem:[%s8546_s9 + $0x7f] sm:$0x1] %vm5978_vm14, %v6047_v49  ;;  %v5838_v47 = vmul.f32 %v8525_v60, %v5797_v39 }
 0x6c7   : > { %6675 = vst.msk [vmem:[%s8546_s9 + $0x7d] sm:$0xf8] %vm5912_vm3, %v6063_v13 }
 0x6c8   : > { %v5879_v16 = vadd.f32 %v8531_v21, %v5838_v47 }
 0x6ca   : > { %v6061_v2 = vadd.f32 %v6056_v30, %v5879_v16 }
 0x6cb   : > { %v5731_v11 = vpop.f32.mrf.mxu1 }
 0x6cc   : > { %v6064_v57 = vmax.f32 %v6061_v2, 0.0  ;;  %v5798_v31 = vadd.f32 %v5731_v11, %v8568_v35 }
 0x6cd   : > { %v4947_v34 = vpop.f32.mrf.mxu2 }
 0x6ce   : > { %6676 = vst.msk [vmem:[%s8546_s9 + $0x85] sm:$0xff] %vm339_vm1, %v6064_v57  ;;  %v5839_v6 = vmul.f32 %v8525_v60, %v5798_v31  ;;  %6652 = vmatmul.msk.bf16.gmra.mxu1 %vm339_vm1, %v5599_v26  ;;  %v9001_v34 = vld [vmem:[#allocation15_spill] sm:$0xff] }
 0x6d0   : > { %v5880_v0 = vadd.f32 %v8531_v21, %v5839_v6  ;;  %v6108_v6 = vrot.slane %v9001_v34, 7 }
 0x6d2   : > { %v6062_v54 = vadd.f32 %v6055_v8, %v5880_v0  ;;  %v6078_v12 = vadd.f32 %v6072_v62, %v5880_v0  ;;  %v6091_v8 = vrot.slane %v9000_v24, 1  ;;  %v9002_v0 = vld [vmem:[#allocation17_spill] sm:$0xff] }
 0x6d3   : > { %v5733_v46 = vpop.f32.mrf.mxu1 }
 0x6d4   : > { %v6065_v35 = vmax.f32 %v6062_v54, 0.0  ;;  %v6081_v22 = vmax.f32 %v6078_v12, 0.0  ;;  %v5799_v3 = vadd.f32 %v5733_v46, %v8580_v51  ;;  %v6092_v37 = vsel %vm5940_vm10, %v6090_v36, %v6091_v8 }
 0x6d5   : > { %v4948_v32 = vpop.f32.mrf.mxu2  ;;  %v6109_v54 = vrot.slane %v9002_v0, 7  ;;  %v9008_v0 = vld [vmem:[#allocation29_spill] sm:$0xff] }
 0x6d6   : > { %6677 = vst.msk [vmem:[%s8546_s9 + $0x8d] sm:$0x7] %vm5915_vm5, %v6065_v35  ;;  %v5840_v63 = vmul.f32 %v8525_v60, %v5799_v3 }
 0x6d7   : > { %6678 = vst.msk [vmem:[%s8546_s9 + $0x8b] sm:$0xe0] %vm5933_vm6, %v6081_v22  ;;  %v6110_v44 = vsel %vm5961_vm13, %v6108_v6, %v6109_v54 }
 0x6d8   : > { %v5881_v33 = vadd.f32 %v8531_v21, %v5840_v63 }
 0x6da   : > { %v6079_v61 = vadd.f32 %v6074_v52, %v5881_v33 }
 0x6db   : > { %v5736_v10 = vpop.f32.mrf.mxu1 }
 0x6dc   : > { %v6082_v42 = vmax.f32 %v6079_v61, 0.0  ;;  %v5800_v51 = vadd.f32 %v5736_v10, %v8591_v27  ;;  %v9004_v10 = vld [vmem:[#allocation21_spill] sm:$0xff] }
 0x6de   : > { %6679 = vst.msk [vmem:[%s8546_s9 + $0x93] sm:$0xff] %vm339_vm1, %v6082_v42  ;;  %v5841_v5 = vmul.f32 %v8525_v60, %v5800_v51  ;;  %6653 = vmatmul.msk.bf16.gmra.mxu1 %vm339_vm1, %v5600_v53  ;;  %v6127_v42 = vrot.slane %v9004_v10, 5 }
 0x6e0   : > { %v5882_v29 = vadd.f32 %v8531_v21, %v5841_v5 }
 0x6e2   : > { %v6080_v1 = vadd.f32 %v6073_v43, %v5882_v29  ;;  %v6096_v55 = vadd.f32 %v6090_v36, %v5882_v29 }
 0x6e3   : > { %v5738_v28 = vpop.f32.mrf.mxu1 }
 0x6e4   : > { %v6083_v49 = vmax.f32 %v6080_v1, 0.0  ;;  %v6099_v13 = vmax.f32 %v6096_v55, 0.0  ;;  %v5801_v27 = vadd.f32 %v5738_v28, %v8603_v59 }
 0x6e6   : > { %6680 = vst.msk [vmem:[%s8546_s9 + $0x9b] sm:$0x1f] %vm5936_vm8, %v6083_v49  ;;  %v5842_v39 = vmul.f32 %v8525_v60, %v5801_v27 }
 0x6e7   : > { %6681 = vst.msk [vmem:[%s8546_s9 + $0x99] sm:$0x80] %vm5954_vm9, %v6099_v13 }
 0x6e8   : > { %v5883_v56 = vadd.f32 %v8531_v21, %v5842_v39 }
 0x6ea   : > { %v6097_v47 = vadd.f32 %v6092_v37, %v5883_v56  ;;  %v9006_v56 = vld [vmem:[#allocation25_spill] sm:$0xff] }
 0x6eb   : > { %v5741_v30 = vpop.f32.mrf.mxu1 }
 0x6ec   : > { %v6100_v16 = vmax.f32 %v6097_v47, 0.0  ;;  %v5802_v7 = vadd.f32 %v5741_v30, %v8612_v40  ;;  %v6145_v47 = vrot.slane %v9006_v56, 3 }
 0x6ee   : > { %6682 = vst.msk [vmem:[%s8546_s9 + $0xa1] sm:$0xff] %vm339_vm1, %v6100_v16  ;;  %v5843_v59 = vmul.f32 %v8525_v60, %v5802_v7 }
 0x6f0   : > { %v5884_v15 = vadd.f32 %v8531_v21, %v5843_v59 }
 0x6f2   : > { %v6098_v2 = vadd.f32 %v6091_v8, %v5884_v15  ;;  %v9005_v8 = vld [vmem:[#allocation22_spill] sm:$0xff] }
 0x6f3   : > { %v5743_v11 = vpop.f32.mrf.mxu1  ;;  %v6144_v49 = vrot.slane %v9005_v8, 3 }
 0x6f4   : > { %v6101_v57 = vmax.f32 %v6098_v2, 0.0  ;;  %v5803_v31 = vadd.f32 %v5743_v11, %v8621_v45 }
 0x6f5   : > { %v6146_v59 = vsel %vm5919_vm7, %v6144_v49, %v6145_v47 }
 0x6f6   : > { %6683 = vst.msk [vmem:[%s8546_s9 + $0xa9] sm:$0x7f] %vm5957_vm11, %v6101_v57  ;;  %v5844_v26 = vmul.f32 %v8525_v60, %v5803_v31 }
 0x6f8   : > { %v5885_v40 = vadd.f32 %v8531_v21, %v5844_v26  ;;  %v9007_v26 = vld [vmem:[#allocation28_spill] sm:$0xff] }
 0x6f9   : > { %v6162_v34 = vrot.slane %v9007_v26, 1 }
 0x6fa   : > { %v6114_v19 = vadd.f32 %v6108_v6, %v5885_v40 }
 0x6fb   : > { %v5746_v62 = vpop.f32.mrf.mxu1 }
 0x6fc   : > { %v6117_v12 = vmax.f32 %v6114_v19, 0.0  ;;  %v5804_v46 = vadd.f32 %v5746_v62, %v8632_v58  ;;  %v9003_v58 = vld [vmem:[#allocation18_spill] sm:$0xff] }
 0x6fd   : > { %v6126_v52 = vrot.slane %v9003_v58, 5 }
 0x6fe   : > { %6684 = vst.msk [vmem:[%s8546_s9 + $0xaf] sm:$0xfe] %vm5975_vm12, %v6117_v12  ;;  %v5845_v45 = vmul.f32 %v8525_v60, %v5804_v46 }
 0x6ff   : > { %v6128_v36 = vsel %vm5899_vm4, %v6126_v52, %v6127_v42 }
 0x700   : > { %v5886_v43 = vadd.f32 %v8531_v21, %v5845_v45 }
 0x702   : > { %v6115_v35 = vadd.f32 %v6110_v44, %v5886_v43 }
 0x703   : > { %v5748_v22 = vpop.f32.mrf.mxu1 }
 0x704   : > { %v6118_v3 = vmax.f32 %v6115_v35, 0.0  ;;  %v5805_v32 = vadd.f32 %v5748_v22, %v8641_v9 }
 0x706   : > { %6685 = vst.msk [vmem:[%s8546_s9 + $0xb7] sm:$0xff] %vm339_vm1, %v6118_v3  ;;  %v5846_v63 = vmul.f32 %v8525_v60, %v5805_v32 }
 0x708   : > { %v5887_v25 = vadd.f32 %v8531_v21, %v5846_v63 }
 0x70a   : > { %v6116_v33 = vadd.f32 %v6109_v54, %v5887_v25  ;;  %v6132_v61 = vadd.f32 %v6126_v52, %v5887_v25  ;;  %v6163_v54 = vrot.slane %v9008_v0, 1 }
 0x70b   : > { %v5751_v53 = vpop.f32.mrf.mxu1 }
 0x70c   : > { %v6119_v51 = vmax.f32 %v6116_v33, 0.0  ;;  %v6135_v5 = vmax.f32 %v6132_v61, 0.0  ;;  %v5806_v50 = vadd.f32 %v5751_v53, %v8654_v18  ;;  %v6164_v44 = vsel %vm5940_vm10, %v6162_v34, %v6163_v54 }
 0x70e   : > { %6686 = vst.msk [vmem:[%s8546_s9 + $0xbf] sm:$0x1] %vm5978_vm14, %v6119_v51  ;;  %v5847_v9 = vmul.f32 %v8525_v60, %v5806_v50 }
 0x70f   : > { %6687 = vst.msk [vmem:[%s8546_s9 + $0xbd] sm:$0xf8] %vm5912_vm3, %v6135_v5 }
 0x710   : > { %v5888_v29 = vadd.f32 %v8531_v21, %v5847_v9 }
 0x712   : > { %v6133_v1 = vadd.f32 %v6128_v36, %v5888_v29 }
 0x713   : > { %v5753_v55 = vpop.f32.mrf.mxu1 }
 0x714   : > { %v6136_v28 = vmax.f32 %v6133_v1, 0.0  ;;  %v5807_v24 = vadd.f32 %v5753_v55, %v8663_v48 }
 0x716   : > { %6688 = vst.msk [vmem:[%s8546_s9 + $0xc5] sm:$0xff] %vm339_vm1, %v6136_v28  ;;  %v5848_v18 = vmul.f32 %v8525_v60, %v5807_v24 }
 0x718   : > { %v5889_v13 = vadd.f32 %v8531_v21, %v5848_v18 }
 0x71a   : > { %v6134_v27 = vadd.f32 %v6127_v42, %v5889_v13  ;;  %v6150_v39 = vadd.f32 %v6144_v49, %v5889_v13  ;;  %v9009_v42 = vld [vmem:[#allocation31_spill] sm:$0xff] }
 0x71b   : > { %v5756_v37 = vpop.f32.mrf.mxu1  ;;  %v6180_v51 = vrot.slane %v9009_v42, 7 }
 0x71c   : > { %v6137_v30 = vmax.f32 %v6134_v27, 0.0  ;;  %v6153_v16 = vmax.f32 %v6150_v39, 0.0  ;;  %v5808_v7 = vadd.f32 %v5756_v37, %v8676_v4 }
 0x71e   : > { %6689 = vst.msk [vmem:[%s8546_s9 + $0xcd] sm:$0x7] %vm5915_vm5, %v6137_v30  ;;  %v5849_v48 = vmul.f32 %v8525_v60, %v5808_v7 }
 0x71f   : > { %6690 = vst.msk [vmem:[%s8546_s9 + $0xcb] sm:$0xe0] %vm5933_vm6, %v6153_v16 }
 0x720   : > { %v5890_v15 = vadd.f32 %v8531_v21, %v5849_v48 }
 0x722   : > { %v6151_v2 = vadd.f32 %v6146_v59, %v5890_v15 }
 0x723   : > { %v5758_v11 = vpop.f32.mrf.mxu1 }
 0x724   : > { %v6154_v57 = vmax.f32 %v6151_v2, 0.0  ;;  %v5809_v31 = vadd.f32 %v5758_v11, %v8685_v20  ;;  %v5223_v63 = vpop.f32.mrf.mxu3  ;;  %v5499_v58 = vpop.f32.mrf.mxu0 }
 0x726   : > { %6691 = vst.msk [vmem:[%s8546_s9 + $0xd3] sm:$0xff] %vm339_vm1, %v6154_v57  ;;  %v5850_v4 = vmul.f32 %v8525_v60, %v5809_v31 }
 0x728   : > { %v5891_v6 = vadd.f32 %v8531_v21, %v5850_v4 }
 0x72a   : > { %v6152_v40 = vadd.f32 %v6145_v47, %v5891_v6  ;;  %v6168_v19 = vadd.f32 %v6162_v34, %v5891_v6 }
 0x72b   : > { %v5761_v62 = vpop.f32.mrf.mxu1 }
 0x72c   : > { %v6155_v12 = vmax.f32 %v6152_v40, 0.0  ;;  %v6171_v46 = vmax.f32 %v6168_v19, 0.0  ;;  %v5810_v45 = vadd.f32 %v5761_v62, %v8701_v23  ;;  %v5500_v5 = vpop.f32.mrf.mxu0 }
 0x72e   : > { %6692 = vst.msk [vmem:[%s8546_s9 + $0xdb] sm:$0x1f] %vm5936_vm8, %v6155_v12  ;;  %v5851_v20 = vmul.f32 %v8525_v60, %v5810_v45 }
 0x72f   : > { %6693 = vst.msk [vmem:[%s8546_s9 + $0xd9] sm:$0x80] %vm5954_vm9, %v6171_v46 }
 0x730   : > { %v5892_v43 = vadd.f32 %v8531_v21, %v5851_v20 }
 0x732   : > { %v6169_v35 = vadd.f32 %v6164_v44, %v5892_v43 }
 0x733   : > { %v5763_v22 = vpop.f32.mrf.mxu1 }
 0x734   : > { %v6172_v3 = vmax.f32 %v6169_v35, 0.0  ;;  %v5811_v32 = vadd.f32 %v5763_v22, %v8708_v17  ;;  %v6724_v17 = vld [vmem:[%s8879_s5] ss:$0 sm:$0xff] }
 0x736   : > { %6694 = vst.msk [vmem:[%s8546_s9 + $0xe1] sm:$0xff] %vm339_vm1, %v6172_v3  ;;  %v5852_v23 = vmul.f32 %v8525_v60, %v5811_v32  ;;  %v5224_v60 = vpop.f32.mrf.mxu3 }
 0x738   : > { %v5893_v52 = vadd.f32 %v8531_v21, %v5852_v23  ;;  %v6725_v21 = vld [vmem:[%s8880_s6] ss:$0 sm:$0xff] }
 0x73a   : > { %v6170_v25 = vadd.f32 %v6163_v54, %v5893_v52 }
 0x73b   : > { %v5766_v33 = vpop.f32.mrf.mxu1 }
 0x73c   : > { %v6173_v61 = vmax.f32 %v6170_v25, 0.0  ;;  %v5812_v53 = vadd.f32 %v5766_v33, %v8718_v41  ;;  %v9010_v41 = vld [vmem:[#allocation32_spill] sm:$0xff] }
 0x73d   : > { %v6181_v29 = vrot.slane %v9010_v41, 7 }
 0x73e   : > { %6695 = vst.msk [vmem:[%s8546_s9 + $0xe9] sm:$0x7f] %vm5957_vm11, %v6173_v61  ;;  %v5853_v10 = vmul.f32 %v6724_v17, %v5812_v53 }
 0x73f   : > { %v6182_v24 = vsel %vm5961_vm13, %v6180_v51, %v6181_v29 }
 0x740   : > { %v5894_v50 = vadd.f32 %v6725_v21, %v5853_v10 }
 0x742   : > { %v6186_v9 = vadd.f32 %v6180_v51, %v5894_v50 }
 0x743   : > { %v5768_v36 = vpop.f32.mrf.mxu1 }
 0x744   : > { %v6189_v1 = vmax.f32 %v6186_v9, 0.0  ;;  %v5813_v55 = vadd.f32 %v5768_v36, %v8730_v38 }
 0x746   : > { %6696 = vst.msk [vmem:[%s8546_s9 + $0xef] sm:$0xfe] %vm5975_vm12, %v6189_v1  ;;  %v5854_v28 = vmul.f32 %v6724_v17, %v5813_v55 }
 0x748   : > { %v5895_v18 = vadd.f32 %v6725_v21, %v5854_v28 }
 0x74a   : > { %v6187_v8 = vadd.f32 %v6182_v24, %v5895_v18 }
 0x74b   : > { %v5771_v49 = vpop.f32.mrf.mxu1 }
 0x74c   : > { %v6190_v13 = vmax.f32 %v6187_v8, 0.0  ;;  %v5814_v27 = vadd.f32 %v5771_v49, %v8740_v14 }
 0x74e   : > { %6697 = vst.msk [vmem:[%s8546_s9 + $0xf7] sm:$0xff] %vm339_vm1, %v6190_v13  ;;  %v5855_v39 = vmul.f32 %v6724_v17, %v5814_v27 }
 0x750   : > { %v5896_v37 = vadd.f32 %v6725_v21, %v5855_v39 }
 0x752   : > { %v6188_v56 = vadd.f32 %v6181_v29, %v5896_v37 }
 0x753   : > { %v5773_v47 = vpop.f32.mrf.mxu1 }
 0x754   : > { %v6191_v30 = vmax.f32 %v6188_v56, 0.0 }
 0x756   : > { %6698 = vst.msk [vmem:[%s8546_s9 + $0xff] sm:$0x1] %vm5978_vm14, %v6191_v30 }
 0x75b   : > { %v5775_v38 = vpop.f32.mrf.mxu1 }
 0x763   : > { %v5776_v16 = vpop.f32.mrf.mxu1 }
 0x764 PF: > { %s18_s27 = sadd.s32 1, %s6732_s27  }
 0x765   : > { %p15_p4 = scmp.ge.s32.totalorder %s18_s27, 4  }
 0x767   :  { %17 = sbr.rel (!%p15_p4) target bundleno = 1 (0x1), region = 113 }

</bundles_post_ra>
